<compile_context>
chip_gen: v7x
topology: tpu7x:2x2x1
jax: 0.10.0
libtpu: 0.0.40
codegen_flags: <defaults>
</compile_context>

<pallas_src>
import functools

import jax
import jax.numpy as jnp
from jax.experimental import pallas as pl
from jax.experimental.pallas import tpu as pltpu


# ---------------------------------------------------------------------------
# Pallas kernel: single-K-step matmul + fused BN affine (+ residual add, ReLU)
# ---------------------------------------------------------------------------
def _mm_fused_kernel(a_ref, w_ref, scale_ref, shift_ref, *rest,
                     apply_relu, has_add):
    if has_add:
        add_ref, o_ref = rest
    else:
        (o_ref,) = rest
    # MXU matmul in bf16, f32 accumulation; epilogue entirely in f32.
    y = jnp.dot(a_ref[...], w_ref[...], preferred_element_type=jnp.float32)
    y = y * scale_ref[...] + shift_ref[...]
    if has_add:
        y = y + add_ref[...].astype(jnp.float32)
    if apply_relu:
        y = jnp.maximum(y, 0.0)
    o_ref[...] = y.astype(o_ref.dtype)


def _round_up(x, m):
    return (x + m - 1) // m * m


def _pick_tm(M):
    """Largest 8-aligned tile (<=512) dividing M; ensure >=2 blocks for v7x."""
    tm = None
    for cand in range(512, 63, -8):
        if M % cand == 0:
            tm = cand
            break
    if tm is None:
        tm = M if M <= 512 else 512          # full-dim block or padded fallback
    Mp = _round_up(M, tm)
    # Give v7x's second TensorCore some work: split the single parallel block.
    if Mp // tm < 2 and tm % 16 == 0:
        tm //= 2
    return tm, Mp


def matmul_affine(a, w, scale, shift, relu, add=None, out_dtype=jnp.bfloat16):
    """out[m,n] = act((sum_k a[m,k] w[k,n]) * scale[n] + shift[n] + add[m,n])."""
    M, K = a.shape
    K2, N = w.shape
    assert K == K2
    tm, Mp = _pick_tm(M)

    a = a.astype(jnp.bfloat16)
    has_add = add is not None
    if has_add:
        add = add.astype(jnp.bfloat16)       # residual read in bf16
    if Mp != M:                              # rare fallback (not hit here)
        a = jnp.pad(a, ((0, Mp - M), (0, 0)))
        if has_add:
            add = jnp.pad(add, ((0, Mp - M), (0, 0)))

    scale2 = scale.reshape(1, N).astype(jnp.float32)
    shift2 = shift.reshape(1, N).astype(jnp.float32)

    gm = Mp // tm
    # K is taken as one full block (max K here is 2304 -> ~2.3 MiB bf16 per A
    # tile), so there is no K grid axis and no accumulator scratch.
    if gm >= 2:
        a_spec = pl.BlockSpec((tm, K), lambda i: (i, 0),
                              pipeline_mode=pl.Buffered(min(3, gm)))
    else:
        a_spec = pl.BlockSpec((tm, K), lambda i: (i, 0))
    in_specs = [
        a_spec,
        pl.BlockSpec((K, N), lambda i: (0, 0)),   # weight: constant block
        pl.BlockSpec((1, N), lambda i: (0, 0)),
        pl.BlockSpec((1, N), lambda i: (0, 0)),
    ]
    inputs = [a, w.astype(jnp.bfloat16), scale2, shift2]
    if has_add:
        in_specs.append(pl.BlockSpec((tm, N), lambda i: (i, 0)))
        inputs.append(add)

    out_bytes = Mp * N * jnp.dtype(out_dtype).itemsize
    bytes_accessed = (Mp * K * 2 + K * N * 2 + out_bytes
                      + (Mp * N * 2 if has_add else 0))
    out = pl.pallas_call(
        functools.partial(_mm_fused_kernel, apply_relu=relu, has_add=has_add),
        out_shape=jax.ShapeDtypeStruct((Mp, N), out_dtype),
        grid_spec=pltpu.PrefetchScalarGridSpec(
            num_scalar_prefetch=0,
            grid=(gm,),
            in_specs=in_specs,
            out_specs=pl.BlockSpec((tm, N), lambda i: (i, 0)),
        ),
        compiler_params=pltpu.CompilerParams(
            dimension_semantics=("parallel",),
            vmem_limit_bytes=32 * 1024 * 1024),
        cost_estimate=pl.CostEstimate(flops=2 * Mp * K * N,
                                      transcendentals=0,
                                      bytes_accessed=bytes_accessed),
    )(*inputs)
    return out[:M] if Mp != M else out


# ---------------------------------------------------------------------------
# Conv glue (bf16 im2col + fused Pallas matmul)
# ---------------------------------------------------------------------------
def _im2col(x, kh, kw, stride, pad):
    """NHWC -> patches [N, OH, OW, KH*KW*C], features in (ky, kx, c) order."""
    if pad > 0:
        x = jnp.pad(x, ((0, 0), (pad, pad), (pad, pad), (0, 0)))
    n, hp, wp, c = x.shape
    oh = (hp - kh) // stride + 1
    ow = (wp - kw) // stride + 1
    cols = []
    for ky in range(kh):
        for kx in range(kw):
            cols.append(x[:, ky:ky + oh * stride:stride,
                          kx:kx + ow * stride:stride, :])
    if kh == 1 and kw == 1:
        return cols[0], oh, ow
    return jnp.concatenate(cols, axis=-1), oh, ow


def conv_block(x, p, kh, kw, stride, pad, relu, add=None,
               out_dtype=jnp.bfloat16):
    """Conv (prepared weight (K, Cout) bf16) + affine (+add) (+ReLU), NHWC."""
    n, h, w, cin = x.shape
    kdim, cout = p["w"].shape
    assert kdim == kh * kw * cin
    patches, oh, ow = _im2col(x, kh, kw, stride, pad)
    a = patches.reshape(n * oh * ow, kh * kw * cin)
    add_m = None if add is None else add.reshape(n * oh * ow, cout)
    out = matmul_affine(a, p["w"], p["scale"], p["shift"], relu, add_m,
                        out_dtype)
    return out.reshape(n, oh, ow, cout)


# ---------------------------------------------------------------------------
# Bilinear x2 upsample (align_corners=True), gather-free, bf16 intermediates
# ---------------------------------------------------------------------------
def _interp_matrix(out_size, in_size):
    if out_size == 1:
        return jnp.zeros((1, in_size), jnp.float32).at[0, 0].set(1.0)
    c = jnp.arange(out_size, dtype=jnp.float32) * ((in_size - 1) / (out_size - 1))
    i0 = jnp.floor(c).astype(jnp.int32)
    i1 = jnp.minimum(i0 + 1, in_size - 1)
    w1 = c - i0.astype(jnp.float32)
    cols = jnp.arange(in_size, dtype=jnp.int32)[None, :]
    return ((cols == i0[:, None]).astype(jnp.float32) * (1.0 - w1)[:, None]
            + (cols == i1[:, None]).astype(jnp.float32) * w1[:, None])


def upsample_bilinear_x2(x):
    n, h, w, c = x.shape
    by = _interp_matrix(2 * h, h)
    bx = _interp_matrix(2 * w, w)
    y = jnp.einsum('oh,nhwc->nowc', by, x.astype(jnp.float32)).astype(x.dtype)
    return jnp.einsum('pw,nowc->nopc', bx,
                      y.astype(jnp.float32)).astype(x.dtype)


# ---------------------------------------------------------------------------
# Parameter preparation (done once, outside the jitted forward)
# ---------------------------------------------------------------------------
def _fold_bn(bn, eps=1e-5):
    scale = bn["gamma"] / jnp.sqrt(bn["var"] + eps)
    shift = bn["beta"] - bn["mean"] * scale
    return scale.astype(jnp.float32), shift.astype(jnp.float32)


def _prep_conv(w_oihw, scale, shift):
    cout, cin, kh, kw = w_oihw.shape
    wm = jnp.transpose(w_oihw, (2, 3, 1, 0)).reshape(kh * kw * cin, cout)
    return dict(w=wm.astype(jnp.bfloat16),
                scale=scale.astype(jnp.float32),
                shift=shift.astype(jnp.float32))


def _prep_conv_bn(w_oihw, bn):
    s, b = _fold_bn(bn)
    return _prep_conv(w_oihw, s, b)


def _prep_block(p):
    d = dict(conv1=_prep_conv_bn(p["conv1_w"], p["bn1"]),
             conv2=_prep_conv_bn(p["conv2_w"], p["bn2"]))
    if "down_w" in p:
        d["down"] = _prep_conv_bn(p["down_w"], p["down_bn"])
    return d


def prepare_params(params):
    # up1 conv1 acts on concat([skip(64ch), upsampled(128ch)]); split its
    # weight by input channel so the concat never has to be materialised.
    w_cat = params["up1"]["conv1_w"]                   # (256, 192, 3, 3)
    s1, b1 = _fold_bn(params["up1"]["bn1"])
    c_skip = 64
    up1 = dict(
        # skip partial: pre-scaled by BN scale; shift applied once (in c1_up)
        c1_skip=_prep_conv(w_cat[:, :c_skip], s1, jnp.zeros_like(b1)),
        c1_up=_prep_conv(w_cat[:, c_skip:], s1, b1),
        c2=_prep_conv_bn(params["up1"]["conv2_w"], params["up1"]["bn2"]),
    )
    out_c = params["up2"]["conv2_w"].shape[0]
    up2 = dict(
        c1=_prep_conv_bn(params["up2"]["conv1_w"], params["up2"]["bn1"]),
        c2=_prep_conv(params["up2"]["conv2_w"],
                      jnp.ones((out_c,), jnp.float32),
                      params["up2"]["conv2_b"]),
    )
    return dict(
        stem=_prep_conv_bn(params["conv1_w"], params["bn1"]),
        layer1=[_prep_block(p) for p in params["layer1"]],
        layer2=[_prep_block(p) for p in params["layer2"]],
        up1=up1,
        up2=up2,
    )


# ---------------------------------------------------------------------------
# BevEncode model
# ---------------------------------------------------------------------------
def _basic_block(x, p, stride):
    identity = x
    out = conv_block(x, p["conv1"], 3, 3, stride=stride, pad=1, relu=True)
    if "down" in p:
        identity = conv_block(x, p["down"], 1, 1, stride=stride, pad=0,
                              relu=False)
    # residual add + ReLU fused into conv2's matmul epilogue (bf16 add read)
    return conv_block(out, p["conv2"], 3, 3, stride=1, pad=1, relu=True,
                      add=identity)


def bevencode_forward(x_nchw, pp):
    # NHWC + bf16 activations throughout (f32 epilogue math in the kernel).
    x = jnp.transpose(x_nchw, (0, 2, 3, 1)).astype(jnp.bfloat16)

    # stem: conv7x7 s2 + BN + ReLU
    x = conv_block(x, pp["stem"], 7, 7, stride=2, pad=3, relu=True)

    # layer1 (2 BasicBlocks, 64 -> 64)
    x = _basic_block(x, pp["layer1"][0], stride=1)
    x1 = _basic_block(x, pp["layer1"][1], stride=1)

    # layer2 (2 BasicBlocks, 64 -> 128, stride 2 with downsample)
    x = _basic_block(x1, pp["layer2"][0], stride=2)
    x = _basic_block(x, pp["layer2"][1], stride=1)

    # up1: upsample x2, conv on concat([skip, up]) done as split-K matmuls
    xu = upsample_bilinear_x2(x)
    part = conv_block(x1, pp["up1"]["c1_skip"], 3, 3, stride=1, pad=1,
                      relu=False)                         # scale*conv_skip
    x = conv_block(xu, pp["up1"]["c1_up"], 3, 3, stride=1, pad=1, relu=True,
                   add=part)                              # + scale*conv_up + shift
    x = conv_block(x, pp["up1"]["c2"], 3, 3, stride=1, pad=1, relu=True)

    # up2: upsample x2, conv3x3-bn-relu, conv1x1(+bias) -> f32 output
    x = upsample_bilinear_x2(x)
    x = conv_block(x, pp["up2"]["c1"], 3, 3, stride=1, pad=1, relu=True)
    x = conv_block(x, pp["up2"]["c2"], 1, 1, stride=1, pad=0, relu=False,
                   out_dtype=jnp.float32)

    return jnp.transpose(x, (0, 3, 1, 2))  # -> NCHW


# ---------------------------------------------------------------------------
# Deterministic synthetic parameter init (PyTorch layout)
# ---------------------------------------------------------------------------
def init_params(key, in_c, out_c):
    keys = iter(jax.random.split(key, 64))

    def conv_w(cout, cin, kh, kw):
        return jax.random.normal(next(keys), (cout, cin, kh, kw),
                                 jnp.float32) * 0.05

    def bn(c):
        return dict(gamma=jnp.ones((c,), jnp.float32),
                    beta=jnp.zeros((c,), jnp.float32),
                    mean=jnp.zeros((c,), jnp.float32),
                    var=jnp.ones((c,), jnp.float32))

    def block(cin, cout, downsample):
        p = dict(conv1_w=conv_w(cout, cin, 3, 3), bn1=bn(cout),
                 conv2_w=conv_w(cout, cout, 3, 3), bn2=bn(cout))
        if downsample:
            p["down_w"] = conv_w(cout, cin, 1, 1)
            p["down_bn"] = bn(cout)
        return p

    return dict(
        conv1_w=conv_w(64, in_c, 7, 7),
        bn1=bn(64),
        layer1=[block(64, 64, False), block(64, 64, False)],
        layer2=[block(64, 128, True), block(128, 128, False)],
        up1=dict(conv1_w=conv_w(256, 64 + 128, 3, 3), bn1=bn(256),
                 conv2_w=conv_w(256, 256, 3, 3), bn2=bn(256)),
        up2=dict(conv1_w=conv_w(128, 256, 3, 3), bn1=bn(128),
                 conv2_w=conv_w(out_c, 128, 1, 1),
                 conv2_b=jnp.zeros((out_c,), jnp.float32)),
    )


# ---------------------------------------------------------------------------
if __name__ == "__main__":
    in_c, out_c = 4, 4
    key = jax.random.PRNGKey(0)
    k_x, k_p = jax.random.split(key)

    x = jax.random.normal(k_x, (2, in_c, 16, 16), jnp.float32)  # NCHW input
    params = init_params(k_p, in_c, out_c)
    pp = prepare_params(params)   # fold BN, transpose to (K, Cout), cast bf16

    fwd = jax.jit(bevencode_forward)
    out = jax.block_until_ready(fwd(x, pp))

    assert out.shape == (2, out_c, 16, 16), out.shape
    assert bool(jnp.all(jnp.isfinite(out)))
    print("KERNEL_OK")
</pallas_src>

<mosaic_0001>
module attributes {stable_mosaic.version = 11 : i64} {
  func.func @_mm_fused_kernel(%arg0: i32, %arg1: memref<64x196xbf16, #tpu.memory_space<vmem>>, %arg2: memref<196x64xbf16, #tpu.memory_space<vmem>>, %arg3: memref<1x64xf32, #tpu.memory_space<vmem>>, %arg4: memref<1x64xf32, #tpu.memory_space<vmem>>, %arg5: memref<64x64xbf16, #tpu.memory_space<vmem>>) attributes {dimension_semantics = [#tpu.dimension_semantics<parallel>], iteration_bounds = array<i64: 2>, scalar_prefetch = 0 : i64, scratch_operands = 0 : i64, tpu.core_type = #tpu.core_type<tc>, window_params = [{pipeline_mode = #tpu.pipeline_mode<double_buffered>, transform_indices = @transform_0, window_bounds = array<i64: 64, 196>}, {pipeline_mode = #tpu.pipeline_mode<synchronous>, transform_indices = @transform_1, window_bounds = array<i64: 196, 64>}, {pipeline_mode = #tpu.pipeline_mode<synchronous>, transform_indices = @transform_2, window_bounds = array<i64: 1, 64>}, {pipeline_mode = #tpu.pipeline_mode<synchronous>, transform_indices = @transform_3, window_bounds = array<i64: 1, 64>}, {transform_indices = @transform_4, window_bounds = array<i64: 64, 64>}]} {
    %c0 = arith.constant 0 : index
    %c0_0 = arith.constant 0 : index
    %0 = vector.load %arg1[%c0, %c0_0] : memref<64x196xbf16, #tpu.memory_space<vmem>>, vector<64x196xbf16>
    %c0_1 = arith.constant 0 : index
    %c0_2 = arith.constant 0 : index
    %1 = vector.load %arg2[%c0_1, %c0_2] : memref<196x64xbf16, #tpu.memory_space<vmem>>, vector<196x64xbf16>
    %cst = arith.constant dense<0.000000e+00> : vector<64x64xf32>
    %2 = tpu.matmul %0, %1, %cst {dimension_numbers = #tpu.dot_dimension_numbers<[1], [0], [0], [1], [0, 0, 1, 1], [], []>} : vector<64x196xbf16>, vector<196x64xbf16>, vector<64x64xf32> -> vector<64x64xf32>
    %c0_3 = arith.constant 0 : index
    %c0_4 = arith.constant 0 : index
    %3 = vector.load %arg3[%c0_3, %c0_4] : memref<1x64xf32, #tpu.memory_space<vmem>>, vector<1x64xf32>
    %4 = vector.broadcast %3 : vector<1x64xf32> to vector<64x64xf32>
    %5 = arith.mulf %2, %4 : vector<64x64xf32>
    %c0_5 = arith.constant 0 : index
    %c0_6 = arith.constant 0 : index
    %6 = vector.load %arg4[%c0_5, %c0_6] : memref<1x64xf32, #tpu.memory_space<vmem>>, vector<1x64xf32>
    %7 = vector.broadcast %6 : vector<1x64xf32> to vector<64x64xf32>
    %8 = arith.addf %5, %7 : vector<64x64xf32>
    %cst_7 = arith.constant 0.000000e+00 : f32
    %9 = vector.broadcast %cst_7 : f32 to vector<64x64xf32>
    %10 = arith.maximumf %8, %9 : vector<64x64xf32>
    %11 = arith.truncf %10 : vector<64x64xf32> to vector<64x64xbf16>
    %c0_8 = arith.constant 0 : index
    %c0_9 = arith.constant 0 : index
    %12 = vector.load %arg5[%c0_8, %c0_9] : memref<64x64xbf16, #tpu.memory_space<vmem>>, vector<64x64xbf16>
    tpu.vector_store %arg5[%c0_8, %c0_9], %11 {strides = array<i32>} : memref<64x64xbf16, #tpu.memory_space<vmem>>, vector<64x64xbf16>,
    return
  }
  func.func @transform_0(%arg0: i32) -> (i32, i32) {
    %c0_i32 = arith.constant 0 : i32
    %c0_i32_0 = arith.constant 0 : i32
    return %arg0, %c0_i32 : i32, i32
  }
  func.func @transform_1(%arg0: i32) -> (i32, i32) {
    %c0_i32 = arith.constant 0 : i32
    %c0_i32_0 = arith.constant 0 : i32
    %c0_i32_1 = arith.constant 0 : i32
    return %c0_i32, %c0_i32_0 : i32, i32
  }
  func.func @transform_2(%arg0: i32) -> (i32, i32) {
    %c0_i32 = arith.constant 0 : i32
    %c0_i32_0 = arith.constant 0 : i32
    %c0_i32_1 = arith.constant 0 : i32
    return %c0_i32, %c0_i32_0 : i32, i32
  }
  func.func @transform_3(%arg0: i32) -> (i32, i32) {
    %c0_i32 = arith.constant 0 : i32
    %c0_i32_0 = arith.constant 0 : i32
    %c0_i32_1 = arith.constant 0 : i32
    return %c0_i32, %c0_i32_0 : i32, i32
  }
  func.func @transform_4(%arg0: i32) -> (i32, i32) {
    %c0_i32 = arith.constant 0 : i32
    %c0_i32_0 = arith.constant 0 : i32
    return %arg0, %c0_i32 : i32, i32
  }
}

module attributes {stable_mosaic.version = 11 : i64} {
  func.func @_mm_fused_kernel(%arg0: i32, %arg1: memref<64x576xbf16, #tpu.memory_space<vmem>>, %arg2: memref<576x64xbf16, #tpu.memory_space<vmem>>, %arg3: memref<1x64xf32, #tpu.memory_space<vmem>>, %arg4: memref<1x64xf32, #tpu.memory_space<vmem>>, %arg5: memref<64x64xbf16, #tpu.memory_space<vmem>>, %arg6: memref<64x64xbf16, #tpu.memory_space<vmem>>) attributes {dimension_semantics = [#tpu.dimension_semantics<parallel>], iteration_bounds = array<i64: 2>, scalar_prefetch = 0 : i64, scratch_operands = 0 : i64, tpu.core_type = #tpu.core_type<tc>, window_params = [{pipeline_mode = #tpu.pipeline_mode<double_buffered>, transform_indices = @transform_0, window_bounds = array<i64: 64, 576>}, {pipeline_mode = #tpu.pipeline_mode<synchronous>, transform_indices = @transform_1, window_bounds = array<i64: 576, 64>}, {pipeline_mode = #tpu.pipeline_mode<synchronous>, transform_indices = @transform_2, window_bounds = array<i64: 1, 64>}, {pipeline_mode = #tpu.pipeline_mode<synchronous>, transform_indices = @transform_3, window_bounds = array<i64: 1, 64>}, {transform_indices = @transform_4, window_bounds = array<i64: 64, 64>}, {transform_indices = @transform_5, window_bounds = array<i64: 64, 64>}]} {
    %c0 = arith.constant 0 : index
    %c0_0 = arith.constant 0 : index
    %0 = vector.load %arg1[%c0, %c0_0] : memref<64x576xbf16, #tpu.memory_space<vmem>>, vector<64x576xbf16>
    %c0_1 = arith.constant 0 : index
    %c0_2 = arith.constant 0 : index
    %1 = vector.load %arg2[%c0_1, %c0_2] : memref<576x64xbf16, #tpu.memory_space<vmem>>, vector<576x64xbf16>
    %cst = arith.constant dense<0.000000e+00> : vector<64x64xf32>
    %2 = tpu.matmul %0, %1, %cst {dimension_numbers = #tpu.dot_dimension_numbers<[1], [0], [0], [1], [0, 0, 1, 1], [], []>} : vector<64x576xbf16>, vector<576x64xbf16>, vector<64x64xf32> -> vector<64x64xf32>
    %c0_3 = arith.constant 0 : index
    %c0_4 = arith.constant 0 : index
    %3 = vector.load %arg3[%c0_3, %c0_4] : memref<1x64xf32, #tpu.memory_space<vmem>>, vector<1x64xf32>
    %4 = vector.broadcast %3 : vector<1x64xf32> to vector<64x64xf32>
    %5 = arith.mulf %2, %4 : vector<64x64xf32>
    %c0_5 = arith.constant 0 : index
    %c0_6 = arith.constant 0 : index
    %6 = vector.load %arg4[%c0_5, %c0_6] : memref<1x64xf32, #tpu.memory_space<vmem>>, vector<1x64xf32>
    %7 = vector.broadcast %6 : vector<1x64xf32> to vector<64x64xf32>
    %8 = arith.addf %5, %7 : vector<64x64xf32>
    %c0_7 = arith.constant 0 : index
    %c0_8 = arith.constant 0 : index
    %9 = vector.load %arg5[%c0_7, %c0_8] : memref<64x64xbf16, #tpu.memory_space<vmem>>, vector<64x64xbf16>
    %10 = arith.extf %9 : vector<64x64xbf16> to vector<64x64xf32>
    %11 = arith.addf %8, %10 : vector<64x64xf32>
    %cst_9 = arith.constant 0.000000e+00 : f32
    %12 = vector.broadcast %cst_9 : f32 to vector<64x64xf32>
    %13 = arith.maximumf %11, %12 : vector<64x64xf32>
    %14 = arith.truncf %13 : vector<64x64xf32> to vector<64x64xbf16>
    %c0_10 = arith.constant 0 : index
    %c0_11 = arith.constant 0 : index
    %15 = vector.load %arg6[%c0_10, %c0_11] : memref<64x64xbf16, #tpu.memory_space<vmem>>, vector<64x64xbf16>
    tpu.vector_store %arg6[%c0_10, %c0_11], %14 {strides = array<i32>} : memref<64x64xbf16, #tpu.memory_space<vmem>>, vector<64x64xbf16>,
    return
  }
  func.func @transform_0(%arg0: i32) -> (i32, i32) {
    %c0_i32 = arith.constant 0 : i32
    %c0_i32_0 = arith.constant 0 : i32
    return %arg0, %c0_i32 : i32, i32
  }
  func.func @transform_1(%arg0: i32) -> (i32, i32) {
    %c0_i32 = arith.constant 0 : i32
    %c0_i32_0 = arith.constant 0 : i32
    %c0_i32_1 = arith.constant 0 : i32
    return %c0_i32, %c0_i32_0 : i32, i32
  }
  func.func @transform_2(%arg0: i32) -> (i32, i32) {
    %c0_i32 = arith.constant 0 : i32
    %c0_i32_0 = arith.constant 0 : i32
    %c0_i32_1 = arith.constant 0 : i32
    return %c0_i32, %c0_i32_0 : i32, i32
  }
  func.func @transform_3(%arg0: i32) -> (i32, i32) {
    %c0_i32 = arith.constant 0 : i32
    %c0_i32_0 = arith.constant 0 : i32
    %c0_i32_1 = arith.constant 0 : i32
    return %c0_i32, %c0_i32_0 : i32, i32
  }
  func.func @transform_4(%arg0: i32) -> (i32, i32) {
    %c0_i32 = arith.constant 0 : i32
    %c0_i32_0 = arith.constant 0 : i32
    return %arg0, %c0_i32 : i32, i32
  }
  func.func @transform_5(%arg0: i32) -> (i32, i32) {
    %c0_i32 = arith.constant 0 : i32
    %c0_i32_0 = arith.constant 0 : i32
    return %arg0, %c0_i32 : i32, i32
  }
}

module attributes {stable_mosaic.version = 11 : i64} {
  func.func @_mm_fused_kernel(%arg0: i32, %arg1: memref<64x576xbf16, #tpu.memory_space<vmem>>, %arg2: memref<576x64xbf16, #tpu.memory_space<vmem>>, %arg3: memref<1x64xf32, #tpu.memory_space<vmem>>, %arg4: memref<1x64xf32, #tpu.memory_space<vmem>>, %arg5: memref<64x64xbf16, #tpu.memory_space<vmem>>) attributes {dimension_semantics = [#tpu.dimension_semantics<parallel>], iteration_bounds = array<i64: 2>, scalar_prefetch = 0 : i64, scratch_operands = 0 : i64, tpu.core_type = #tpu.core_type<tc>, window_params = [{pipeline_mode = #tpu.pipeline_mode<double_buffered>, transform_indices = @transform_0, window_bounds = array<i64: 64, 576>}, {pipeline_mode = #tpu.pipeline_mode<synchronous>, transform_indices = @transform_1, window_bounds = array<i64: 576, 64>}, {pipeline_mode = #tpu.pipeline_mode<synchronous>, transform_indices = @transform_2, window_bounds = array<i64: 1, 64>}, {pipeline_mode = #tpu.pipeline_mode<synchronous>, transform_indices = @transform_3, window_bounds = array<i64: 1, 64>}, {transform_indices = @transform_4, window_bounds = array<i64: 64, 64>}]} {
    %c0 = arith.constant 0 : index
    %c0_0 = arith.constant 0 : index
    %0 = vector.load %arg1[%c0, %c0_0] : memref<64x576xbf16, #tpu.memory_space<vmem>>, vector<64x576xbf16>
    %c0_1 = arith.constant 0 : index
    %c0_2 = arith.constant 0 : index
    %1 = vector.load %arg2[%c0_1, %c0_2] : memref<576x64xbf16, #tpu.memory_space<vmem>>, vector<576x64xbf16>
    %cst = arith.constant dense<0.000000e+00> : vector<64x64xf32>
    %2 = tpu.matmul %0, %1, %cst {dimension_numbers = #tpu.dot_dimension_numbers<[1], [0], [0], [1], [0, 0, 1, 1], [], []>} : vector<64x576xbf16>, vector<576x64xbf16>, vector<64x64xf32> -> vector<64x64xf32>
    %c0_3 = arith.constant 0 : index
    %c0_4 = arith.constant 0 : index
    %3 = vector.load %arg3[%c0_3, %c0_4] : memref<1x64xf32, #tpu.memory_space<vmem>>, vector<1x64xf32>
    %4 = vector.broadcast %3 : vector<1x64xf32> to vector<64x64xf32>
    %5 = arith.mulf %2, %4 : vector<64x64xf32>
    %c0_5 = arith.constant 0 : index
    %c0_6 = arith.constant 0 : index
    %6 = vector.load %arg4[%c0_5, %c0_6] : memref<1x64xf32, #tpu.memory_space<vmem>>, vector<1x64xf32>
    %7 = vector.broadcast %6 : vector<1x64xf32> to vector<64x64xf32>
    %8 = arith.addf %5, %7 : vector<64x64xf32>
    %cst_7 = arith.constant 0.000000e+00 : f32
    %9 = vector.broadcast %cst_7 : f32 to vector<64x64xf32>
    %10 = arith.maximumf %8, %9 : vector<64x64xf32>
    %11 = arith.truncf %10 : vector<64x64xf32> to vector<64x64xbf16>
    %c0_8 = arith.constant 0 : index
    %c0_9 = arith.constant 0 : index
    %12 = vector.load %arg5[%c0_8, %c0_9] : memref<64x64xbf16, #tpu.memory_space<vmem>>, vector<64x64xbf16>
    tpu.vector_store %arg5[%c0_8, %c0_9], %11 {strides = array<i32>} : memref<64x64xbf16, #tpu.memory_space<vmem>>, vector<64x64xbf16>,
    return
  }
  func.func @transform_0(%arg0: i32) -> (i32, i32) {
    %c0_i32 = arith.constant 0 : i32
    %c0_i32_0 = arith.constant 0 : i32
    return %arg0, %c0_i32 : i32, i32
  }
  func.func @transform_1(%arg0: i32) -> (i32, i32) {
    %c0_i32 = arith.constant 0 : i32
    %c0_i32_0 = arith.constant 0 : i32
    %c0_i32_1 = arith.constant 0 : i32
    return %c0_i32, %c0_i32_0 : i32, i32
  }
  func.func @transform_2(%arg0: i32) -> (i32, i32) {
    %c0_i32 = arith.constant 0 : i32
    %c0_i32_0 = arith.constant 0 : i32
    %c0_i32_1 = arith.constant 0 : i32
    return %c0_i32, %c0_i32_0 : i32, i32
  }
  func.func @transform_3(%arg0: i32) -> (i32, i32) {
    %c0_i32 = arith.constant 0 : i32
    %c0_i32_0 = arith.constant 0 : i32
    %c0_i32_1 = arith.constant 0 : i32
    return %c0_i32, %c0_i32_0 : i32, i32
  }
  func.func @transform_4(%arg0: i32) -> (i32, i32) {
    %c0_i32 = arith.constant 0 : i32
    %c0_i32_0 = arith.constant 0 : i32
    return %arg0, %c0_i32 : i32, i32
  }
}

module attributes {stable_mosaic.version = 11 : i64} {
  func.func @_mm_fused_kernel(%arg0: i32, %arg1: memref<64x576xbf16, #tpu.memory_space<vmem>>, %arg2: memref<576x256xbf16, #tpu.memory_space<vmem>>, %arg3: memref<1x256xf32, #tpu.memory_space<vmem>>, %arg4: memref<1x256xf32, #tpu.memory_space<vmem>>, %arg5: memref<64x256xbf16, #tpu.memory_space<vmem>>) attributes {dimension_semantics = [#tpu.dimension_semantics<parallel>], iteration_bounds = array<i64: 2>, scalar_prefetch = 0 : i64, scratch_operands = 0 : i64, tpu.core_type = #tpu.core_type<tc>, window_params = [{pipeline_mode = #tpu.pipeline_mode<double_buffered>, transform_indices = @transform_0, window_bounds = array<i64: 64, 576>}, {pipeline_mode = #tpu.pipeline_mode<synchronous>, transform_indices = @transform_1, window_bounds = array<i64: 576, 256>}, {pipeline_mode = #tpu.pipeline_mode<synchronous>, transform_indices = @transform_2, window_bounds = array<i64: 1, 256>}, {pipeline_mode = #tpu.pipeline_mode<synchronous>, transform_indices = @transform_3, window_bounds = array<i64: 1, 256>}, {transform_indices = @transform_4, window_bounds = array<i64: 64, 256>}]} {
    %c0 = arith.constant 0 : index
    %c0_0 = arith.constant 0 : index
    %0 = vector.load %arg1[%c0, %c0_0] : memref<64x576xbf16, #tpu.memory_space<vmem>>, vector<64x576xbf16>
    %c0_1 = arith.constant 0 : index
    %c0_2 = arith.constant 0 : index
    %1 = vector.load %arg2[%c0_1, %c0_2] : memref<576x256xbf16, #tpu.memory_space<vmem>>, vector<576x256xbf16>
    %cst = arith.constant dense<0.000000e+00> : vector<64x256xf32>
    %2 = tpu.matmul %0, %1, %cst {dimension_numbers = #tpu.dot_dimension_numbers<[1], [0], [0], [1], [0, 0, 1, 1], [], []>} : vector<64x576xbf16>, vector<576x256xbf16>, vector<64x256xf32> -> vector<64x256xf32>
    %c0_3 = arith.constant 0 : index
    %c0_4 = arith.constant 0 : index
    %3 = vector.load %arg3[%c0_3, %c0_4] : memref<1x256xf32, #tpu.memory_space<vmem>>, vector<1x256xf32>
    %4 = vector.broadcast %3 : vector<1x256xf32> to vector<64x256xf32>
    %5 = arith.mulf %2, %4 : vector<64x256xf32>
    %c0_5 = arith.constant 0 : index
    %c0_6 = arith.constant 0 : index
    %6 = vector.load %arg4[%c0_5, %c0_6] : memref<1x256xf32, #tpu.memory_space<vmem>>, vector<1x256xf32>
    %7 = vector.broadcast %6 : vector<1x256xf32> to vector<64x256xf32>
    %8 = arith.addf %5, %7 : vector<64x256xf32>
    %9 = arith.truncf %8 : vector<64x256xf32> to vector<64x256xbf16>
    %c0_7 = arith.constant 0 : index
    %c0_8 = arith.constant 0 : index
    %10 = vector.load %arg5[%c0_7, %c0_8] : memref<64x256xbf16, #tpu.memory_space<vmem>>, vector<64x256xbf16>
    tpu.vector_store %arg5[%c0_7, %c0_8], %9 {strides = array<i32>} : memref<64x256xbf16, #tpu.memory_space<vmem>>, vector<64x256xbf16>,
    return
  }
  func.func @transform_0(%arg0: i32) -> (i32, i32) {
    %c0_i32 = arith.constant 0 : i32
    %c0_i32_0 = arith.constant 0 : i32
    return %arg0, %c0_i32 : i32, i32
  }
  func.func @transform_1(%arg0: i32) -> (i32, i32) {
    %c0_i32 = arith.constant 0 : i32
    %c0_i32_0 = arith.constant 0 : i32
    %c0_i32_1 = arith.constant 0 : i32
    return %c0_i32, %c0_i32_0 : i32, i32
  }
  func.func @transform_2(%arg0: i32) -> (i32, i32) {
    %c0_i32 = arith.constant 0 : i32
    %c0_i32_0 = arith.constant 0 : i32
    %c0_i32_1 = arith.constant 0 : i32
    return %c0_i32, %c0_i32_0 : i32, i32
  }
  func.func @transform_3(%arg0: i32) -> (i32, i32) {
    %c0_i32 = arith.constant 0 : i32
    %c0_i32_0 = arith.constant 0 : i32
    %c0_i32_1 = arith.constant 0 : i32
    return %c0_i32, %c0_i32_0 : i32, i32
  }
  func.func @transform_4(%arg0: i32) -> (i32, i32) {
    %c0_i32 = arith.constant 0 : i32
    %c0_i32_0 = arith.constant 0 : i32
    return %arg0, %c0_i32 : i32, i32
  }
}

module attributes {stable_mosaic.version = 11 : i64} {
  func.func @_mm_fused_kernel(%arg0: i32, %arg1: memref<16x576xbf16, #tpu.memory_space<vmem>>, %arg2: memref<576x128xbf16, #tpu.memory_space<vmem>>, %arg3: memref<1x128xf32, #tpu.memory_space<vmem>>, %arg4: memref<1x128xf32, #tpu.memory_space<vmem>>, %arg5: memref<16x128xbf16, #tpu.memory_space<vmem>>) attributes {dimension_semantics = [#tpu.dimension_semantics<parallel>], iteration_bounds = array<i64: 2>, scalar_prefetch = 0 : i64, scratch_operands = 0 : i64, tpu.core_type = #tpu.core_type<tc>, window_params = [{pipeline_mode = #tpu.pipeline_mode<double_buffered>, transform_indices = @transform_0, window_bounds = array<i64: 16, 576>}, {pipeline_mode = #tpu.pipeline_mode<synchronous>, transform_indices = @transform_1, window_bounds = array<i64: 576, 128>}, {pipeline_mode = #tpu.pipeline_mode<synchronous>, transform_indices = @transform_2, window_bounds = array<i64: 1, 128>}, {pipeline_mode = #tpu.pipeline_mode<synchronous>, transform_indices = @transform_3, window_bounds = array<i64: 1, 128>}, {transform_indices = @transform_4, window_bounds = array<i64: 16, 128>}]} {
    %c0 = arith.constant 0 : index
    %c0_0 = arith.constant 0 : index
    %0 = vector.load %arg1[%c0, %c0_0] : memref<16x576xbf16, #tpu.memory_space<vmem>>, vector<16x576xbf16>
    %c0_1 = arith.constant 0 : index
    %c0_2 = arith.constant 0 : index
    %1 = vector.load %arg2[%c0_1, %c0_2] : memref<576x128xbf16, #tpu.memory_space<vmem>>, vector<576x128xbf16>
    %cst = arith.constant dense<0.000000e+00> : vector<16x128xf32>
    %2 = tpu.matmul %0, %1, %cst {dimension_numbers = #tpu.dot_dimension_numbers<[1], [0], [0], [1], [0, 0, 1, 1], [], []>} : vector<16x576xbf16>, vector<576x128xbf16>, vector<16x128xf32> -> vector<16x128xf32>
    %c0_3 = arith.constant 0 : index
    %c0_4 = arith.constant 0 : index
    %3 = vector.load %arg3[%c0_3, %c0_4] : memref<1x128xf32, #tpu.memory_space<vmem>>, vector<1x128xf32>
    %4 = vector.broadcast %3 : vector<1x128xf32> to vector<16x128xf32>
    %5 = arith.mulf %2, %4 : vector<16x128xf32>
    %c0_5 = arith.constant 0 : index
    %c0_6 = arith.constant 0 : index
    %6 = vector.load %arg4[%c0_5, %c0_6] : memref<1x128xf32, #tpu.memory_space<vmem>>, vector<1x128xf32>
    %7 = vector.broadcast %6 : vector<1x128xf32> to vector<16x128xf32>
    %8 = arith.addf %5, %7 : vector<16x128xf32>
    %cst_7 = arith.constant 0.000000e+00 : f32
    %9 = vector.broadcast %cst_7 : f32 to vector<16x128xf32>
    %10 = arith.maximumf %8, %9 : vector<16x128xf32>
    %11 = arith.truncf %10 : vector<16x128xf32> to vector<16x128xbf16>
    %c0_8 = arith.constant 0 : index
    %c0_9 = arith.constant 0 : index
    %12 = vector.load %arg5[%c0_8, %c0_9] : memref<16x128xbf16, #tpu.memory_space<vmem>>, vector<16x128xbf16>
    tpu.vector_store %arg5[%c0_8, %c0_9], %11 {strides = array<i32>} : memref<16x128xbf16, #tpu.memory_space<vmem>>, vector<16x128xbf16>,
    return
  }
  func.func @transform_0(%arg0: i32) -> (i32, i32) {
    %c0_i32 = arith.constant 0 : i32
    %c0_i32_0 = arith.constant 0 : i32
    return %arg0, %c0_i32 : i32, i32
  }
  func.func @transform_1(%arg0: i32) -> (i32, i32) {
    %c0_i32 = arith.constant 0 : i32
    %c0_i32_0 = arith.constant 0 : i32
    %c0_i32_1 = arith.constant 0 : i32
    return %c0_i32, %c0_i32_0 : i32, i32
  }
  func.func @transform_2(%arg0: i32) -> (i32, i32) {
    %c0_i32 = arith.constant 0 : i32
    %c0_i32_0 = arith.constant 0 : i32
    %c0_i32_1 = arith.constant 0 : i32
    return %c0_i32, %c0_i32_0 : i32, i32
  }
  func.func @transform_3(%arg0: i32) -> (i32, i32) {
    %c0_i32 = arith.constant 0 : i32
    %c0_i32_0 = arith.constant 0 : i32
    %c0_i32_1 = arith.constant 0 : i32
    return %c0_i32, %c0_i32_0 : i32, i32
  }
  func.func @transform_4(%arg0: i32) -> (i32, i32) {
    %c0_i32 = arith.constant 0 : i32
    %c0_i32_0 = arith.constant 0 : i32
    return %arg0, %c0_i32 : i32, i32
  }
}

module attributes {stable_mosaic.version = 11 : i64} {
  func.func @_mm_fused_kernel(%arg0: i32, %arg1: memref<16x1152xbf16, #tpu.memory_space<vmem>>, %arg2: memref<1152x128xbf16, #tpu.memory_space<vmem>>, %arg3: memref<1x128xf32, #tpu.memory_space<vmem>>, %arg4: memref<1x128xf32, #tpu.memory_space<vmem>>, %arg5: memref<16x128xbf16, #tpu.memory_space<vmem>>, %arg6: memref<16x128xbf16, #tpu.memory_space<vmem>>) attributes {dimension_semantics = [#tpu.dimension_semantics<parallel>], iteration_bounds = array<i64: 2>, scalar_prefetch = 0 : i64, scratch_operands = 0 : i64, tpu.core_type = #tpu.core_type<tc>, window_params = [{pipeline_mode = #tpu.pipeline_mode<double_buffered>, transform_indices = @transform_0, window_bounds = array<i64: 16, 1152>}, {pipeline_mode = #tpu.pipeline_mode<synchronous>, transform_indices = @transform_1, window_bounds = array<i64: 1152, 128>}, {pipeline_mode = #tpu.pipeline_mode<synchronous>, transform_indices = @transform_2, window_bounds = array<i64: 1, 128>}, {pipeline_mode = #tpu.pipeline_mode<synchronous>, transform_indices = @transform_3, window_bounds = array<i64: 1, 128>}, {transform_indices = @transform_4, window_bounds = array<i64: 16, 128>}, {transform_indices = @transform_5, window_bounds = array<i64: 16, 128>}]} {
    %c0 = arith.constant 0 : index
    %c0_0 = arith.constant 0 : index
    %0 = vector.load %arg1[%c0, %c0_0] : memref<16x1152xbf16, #tpu.memory_space<vmem>>, vector<16x1152xbf16>
    %c0_1 = arith.constant 0 : index
    %c0_2 = arith.constant 0 : index
    %1 = vector.load %arg2[%c0_1, %c0_2] : memref<1152x128xbf16, #tpu.memory_space<vmem>>, vector<1152x128xbf16>
    %cst = arith.constant dense<0.000000e+00> : vector<16x128xf32>
    %2 = tpu.matmul %0, %1, %cst {dimension_numbers = #tpu.dot_dimension_numbers<[1], [0], [0], [1], [0, 0, 1, 1], [], []>} : vector<16x1152xbf16>, vector<1152x128xbf16>, vector<16x128xf32> -> vector<16x128xf32>
    %c0_3 = arith.constant 0 : index
    %c0_4 = arith.constant 0 : index
    %3 = vector.load %arg3[%c0_3, %c0_4] : memref<1x128xf32, #tpu.memory_space<vmem>>, vector<1x128xf32>
    %4 = vector.broadcast %3 : vector<1x128xf32> to vector<16x128xf32>
    %5 = arith.mulf %2, %4 : vector<16x128xf32>
    %c0_5 = arith.constant 0 : index
    %c0_6 = arith.constant 0 : index
    %6 = vector.load %arg4[%c0_5, %c0_6] : memref<1x128xf32, #tpu.memory_space<vmem>>, vector<1x128xf32>
    %7 = vector.broadcast %6 : vector<1x128xf32> to vector<16x128xf32>
    %8 = arith.addf %5, %7 : vector<16x128xf32>
    %c0_7 = arith.constant 0 : index
    %c0_8 = arith.constant 0 : index
    %9 = vector.load %arg5[%c0_7, %c0_8] : memref<16x128xbf16, #tpu.memory_space<vmem>>, vector<16x128xbf16>
    %10 = arith.extf %9 : vector<16x128xbf16> to vector<16x128xf32>
    %11 = arith.addf %8, %10 : vector<16x128xf32>
    %cst_9 = arith.constant 0.000000e+00 : f32
    %12 = vector.broadcast %cst_9 : f32 to vector<16x128xf32>
    %13 = arith.maximumf %11, %12 : vector<16x128xf32>
    %14 = arith.truncf %13 : vector<16x128xf32> to vector<16x128xbf16>
    %c0_10 = arith.constant 0 : index
    %c0_11 = arith.constant 0 : index
    %15 = vector.load %arg6[%c0_10, %c0_11] : memref<16x128xbf16, #tpu.memory_space<vmem>>, vector<16x128xbf16>
    tpu.vector_store %arg6[%c0_10, %c0_11], %14 {strides = array<i32>} : memref<16x128xbf16, #tpu.memory_space<vmem>>, vector<16x128xbf16>,
    return
  }
  func.func @transform_0(%arg0: i32) -> (i32, i32) {
    %c0_i32 = arith.constant 0 : i32
    %c0_i32_0 = arith.constant 0 : i32
    return %arg0, %c0_i32 : i32, i32
  }
  func.func @transform_1(%arg0: i32) -> (i32, i32) {
    %c0_i32 = arith.constant 0 : i32
    %c0_i32_0 = arith.constant 0 : i32
    %c0_i32_1 = arith.constant 0 : i32
    return %c0_i32, %c0_i32_0 : i32, i32
  }
  func.func @transform_2(%arg0: i32) -> (i32, i32) {
    %c0_i32 = arith.constant 0 : i32
    %c0_i32_0 = arith.constant 0 : i32
    %c0_i32_1 = arith.constant 0 : i32
    return %c0_i32, %c0_i32_0 : i32, i32
  }
  func.func @transform_3(%arg0: i32) -> (i32, i32) {
    %c0_i32 = arith.constant 0 : i32
    %c0_i32_0 = arith.constant 0 : i32
    %c0_i32_1 = arith.constant 0 : i32
    return %c0_i32, %c0_i32_0 : i32, i32
  }
  func.func @transform_4(%arg0: i32) -> (i32, i32) {
    %c0_i32 = arith.constant 0 : i32
    %c0_i32_0 = arith.constant 0 : i32
    return %arg0, %c0_i32 : i32, i32
  }
  func.func @transform_5(%arg0: i32) -> (i32, i32) {
    %c0_i32 = arith.constant 0 : i32
    %c0_i32_0 = arith.constant 0 : i32
    return %arg0, %c0_i32 : i32, i32
  }
}

module attributes {stable_mosaic.version = 11 : i64} {
  func.func @_mm_fused_kernel(%arg0: i32, %arg1: memref<16x64xbf16, #tpu.memory_space<vmem>>, %arg2: memref<64x128xbf16, #tpu.memory_space<vmem>>, %arg3: memref<1x128xf32, #tpu.memory_space<vmem>>, %arg4: memref<1x128xf32, #tpu.memory_space<vmem>>, %arg5: memref<16x128xbf16, #tpu.memory_space<vmem>>) attributes {dimension_semantics = [#tpu.dimension_semantics<parallel>], iteration_bounds = array<i64: 2>, scalar_prefetch = 0 : i64, scratch_operands = 0 : i64, tpu.core_type = #tpu.core_type<tc>, window_params = [{pipeline_mode = #tpu.pipeline_mode<double_buffered>, transform_indices = @transform_0, window_bounds = array<i64: 16, 64>}, {pipeline_mode = #tpu.pipeline_mode<synchronous>, transform_indices = @transform_1, window_bounds = array<i64: 64, 128>}, {pipeline_mode = #tpu.pipeline_mode<synchronous>, transform_indices = @transform_2, window_bounds = array<i64: 1, 128>}, {pipeline_mode = #tpu.pipeline_mode<synchronous>, transform_indices = @transform_3, window_bounds = array<i64: 1, 128>}, {transform_indices = @transform_4, window_bounds = array<i64: 16, 128>}]} {
    %c0 = arith.constant 0 : index
    %c0_0 = arith.constant 0 : index
    %0 = vector.load %arg1[%c0, %c0_0] : memref<16x64xbf16, #tpu.memory_space<vmem>>, vector<16x64xbf16>
    %c0_1 = arith.constant 0 : index
    %c0_2 = arith.constant 0 : index
    %1 = vector.load %arg2[%c0_1, %c0_2] : memref<64x128xbf16, #tpu.memory_space<vmem>>, vector<64x128xbf16>
    %cst = arith.constant dense<0.000000e+00> : vector<16x128xf32>
    %2 = tpu.matmul %0, %1, %cst {dimension_numbers = #tpu.dot_dimension_numbers<[1], [0], [0], [1], [0, 0, 1, 1], [], []>} : vector<16x64xbf16>, vector<64x128xbf16>, vector<16x128xf32> -> vector<16x128xf32>
    %c0_3 = arith.constant 0 : index
    %c0_4 = arith.constant 0 : index
    %3 = vector.load %arg3[%c0_3, %c0_4] : memref<1x128xf32, #tpu.memory_space<vmem>>, vector<1x128xf32>
    %4 = vector.broadcast %3 : vector<1x128xf32> to vector<16x128xf32>
    %5 = arith.mulf %2, %4 : vector<16x128xf32>
    %c0_5 = arith.constant 0 : index
    %c0_6 = arith.constant 0 : index
    %6 = vector.load %arg4[%c0_5, %c0_6] : memref<1x128xf32, #tpu.memory_space<vmem>>, vector<1x128xf32>
    %7 = vector.broadcast %6 : vector<1x128xf32> to vector<16x128xf32>
    %8 = arith.addf %5, %7 : vector<16x128xf32>
    %9 = arith.truncf %8 : vector<16x128xf32> to vector<16x128xbf16>
    %c0_7 = arith.constant 0 : index
    %c0_8 = arith.constant 0 : index
    %10 = vector.load %arg5[%c0_7, %c0_8] : memref<16x128xbf16, #tpu.memory_space<vmem>>, vector<16x128xbf16>
    tpu.vector_store %arg5[%c0_7, %c0_8], %9 {strides = array<i32>} : memref<16x128xbf16, #tpu.memory_space<vmem>>, vector<16x128xbf16>,
    return
  }
  func.func @transform_0(%arg0: i32) -> (i32, i32) {
    %c0_i32 = arith.constant 0 : i32
    %c0_i32_0 = arith.constant 0 : i32
    return %arg0, %c0_i32 : i32, i32
  }
  func.func @transform_1(%arg0: i32) -> (i32, i32) {
    %c0_i32 = arith.constant 0 : i32
    %c0_i32_0 = arith.constant 0 : i32
    %c0_i32_1 = arith.constant 0 : i32
    return %c0_i32, %c0_i32_0 : i32, i32
  }
  func.func @transform_2(%arg0: i32) -> (i32, i32) {
    %c0_i32 = arith.constant 0 : i32
    %c0_i32_0 = arith.constant 0 : i32
    %c0_i32_1 = arith.constant 0 : i32
    return %c0_i32, %c0_i32_0 : i32, i32
  }
  func.func @transform_3(%arg0: i32) -> (i32, i32) {
    %c0_i32 = arith.constant 0 : i32
    %c0_i32_0 = arith.constant 0 : i32
    %c0_i32_1 = arith.constant 0 : i32
    return %c0_i32, %c0_i32_0 : i32, i32
  }
  func.func @transform_4(%arg0: i32) -> (i32, i32) {
    %c0_i32 = arith.constant 0 : i32
    %c0_i32_0 = arith.constant 0 : i32
    return %arg0, %c0_i32 : i32, i32
  }
}

module attributes {stable_mosaic.version = 11 : i64} {
  func.func @_mm_fused_kernel(%arg0: i32, %arg1: memref<16x1152xbf16, #tpu.memory_space<vmem>>, %arg2: memref<1152x128xbf16, #tpu.memory_space<vmem>>, %arg3: memref<1x128xf32, #tpu.memory_space<vmem>>, %arg4: memref<1x128xf32, #tpu.memory_space<vmem>>, %arg5: memref<16x128xbf16, #tpu.memory_space<vmem>>) attributes {dimension_semantics = [#tpu.dimension_semantics<parallel>], iteration_bounds = array<i64: 2>, scalar_prefetch = 0 : i64, scratch_operands = 0 : i64, tpu.core_type = #tpu.core_type<tc>, window_params = [{pipeline_mode = #tpu.pipeline_mode<double_buffered>, transform_indices = @transform_0, window_bounds = array<i64: 16, 1152>}, {pipeline_mode = #tpu.pipeline_mode<synchronous>, transform_indices = @transform_1, window_bounds = array<i64: 1152, 128>}, {pipeline_mode = #tpu.pipeline_mode<synchronous>, transform_indices = @transform_2, window_bounds = array<i64: 1, 128>}, {pipeline_mode = #tpu.pipeline_mode<synchronous>, transform_indices = @transform_3, window_bounds = array<i64: 1, 128>}, {transform_indices = @transform_4, window_bounds = array<i64: 16, 128>}]} {
    %c0 = arith.constant 0 : index
    %c0_0 = arith.constant 0 : index
    %0 = vector.load %arg1[%c0, %c0_0] : memref<16x1152xbf16, #tpu.memory_space<vmem>>, vector<16x1152xbf16>
    %c0_1 = arith.constant 0 : index
    %c0_2 = arith.constant 0 : index
    %1 = vector.load %arg2[%c0_1, %c0_2] : memref<1152x128xbf16, #tpu.memory_space<vmem>>, vector<1152x128xbf16>
    %cst = arith.constant dense<0.000000e+00> : vector<16x128xf32>
    %2 = tpu.matmul %0, %1, %cst {dimension_numbers = #tpu.dot_dimension_numbers<[1], [0], [0], [1], [0, 0, 1, 1], [], []>} : vector<16x1152xbf16>, vector<1152x128xbf16>, vector<16x128xf32> -> vector<16x128xf32>
    %c0_3 = arith.constant 0 : index
    %c0_4 = arith.constant 0 : index
    %3 = vector.load %arg3[%c0_3, %c0_4] : memref<1x128xf32, #tpu.memory_space<vmem>>, vector<1x128xf32>
    %4 = vector.broadcast %3 : vector<1x128xf32> to vector<16x128xf32>
    %5 = arith.mulf %2, %4 : vector<16x128xf32>
    %c0_5 = arith.constant 0 : index
    %c0_6 = arith.constant 0 : index
    %6 = vector.load %arg4[%c0_5, %c0_6] : memref<1x128xf32, #tpu.memory_space<vmem>>, vector<1x128xf32>
    %7 = vector.broadcast %6 : vector<1x128xf32> to vector<16x128xf32>
    %8 = arith.addf %5, %7 : vector<16x128xf32>
    %cst_7 = arith.constant 0.000000e+00 : f32
    %9 = vector.broadcast %cst_7 : f32 to vector<16x128xf32>
    %10 = arith.maximumf %8, %9 : vector<16x128xf32>
    %11 = arith.truncf %10 : vector<16x128xf32> to vector<16x128xbf16>
    %c0_8 = arith.constant 0 : index
    %c0_9 = arith.constant 0 : index
    %12 = vector.load %arg5[%c0_8, %c0_9] : memref<16x128xbf16, #tpu.memory_space<vmem>>, vector<16x128xbf16>
    tpu.vector_store %arg5[%c0_8, %c0_9], %11 {strides = array<i32>} : memref<16x128xbf16, #tpu.memory_space<vmem>>, vector<16x128xbf16>,
    return
  }
  func.func @transform_0(%arg0: i32) -> (i32, i32) {
    %c0_i32 = arith.constant 0 : i32
    %c0_i32_0 = arith.constant 0 : i32
    return %arg0, %c0_i32 : i32, i32
  }
  func.func @transform_1(%arg0: i32) -> (i32, i32) {
    %c0_i32 = arith.constant 0 : i32
    %c0_i32_0 = arith.constant 0 : i32
    %c0_i32_1 = arith.constant 0 : i32
    return %c0_i32, %c0_i32_0 : i32, i32
  }
  func.func @transform_2(%arg0: i32) -> (i32, i32) {
    %c0_i32 = arith.constant 0 : i32
    %c0_i32_0 = arith.constant 0 : i32
    %c0_i32_1 = arith.constant 0 : i32
    return %c0_i32, %c0_i32_0 : i32, i32
  }
  func.func @transform_3(%arg0: i32) -> (i32, i32) {
    %c0_i32 = arith.constant 0 : i32
    %c0_i32_0 = arith.constant 0 : i32
    %c0_i32_1 = arith.constant 0 : i32
    return %c0_i32, %c0_i32_0 : i32, i32
  }
  func.func @transform_4(%arg0: i32) -> (i32, i32) {
    %c0_i32 = arith.constant 0 : i32
    %c0_i32_0 = arith.constant 0 : i32
    return %arg0, %c0_i32 : i32, i32
  }
}

module attributes {stable_mosaic.version = 11 : i64} {
  func.func @_mm_fused_kernel(%arg0: i32, %arg1: memref<64x1152xbf16, #tpu.memory_space<vmem>>, %arg2: memref<1152x256xbf16, #tpu.memory_space<vmem>>, %arg3: memref<1x256xf32, #tpu.memory_space<vmem>>, %arg4: memref<1x256xf32, #tpu.memory_space<vmem>>, %arg5: memref<64x256xbf16, #tpu.memory_space<vmem>>, %arg6: memref<64x256xbf16, #tpu.memory_space<vmem>>) attributes {dimension_semantics = [#tpu.dimension_semantics<parallel>], iteration_bounds = array<i64: 2>, scalar_prefetch = 0 : i64, scratch_operands = 0 : i64, tpu.core_type = #tpu.core_type<tc>, window_params = [{pipeline_mode = #tpu.pipeline_mode<double_buffered>, transform_indices = @transform_0, window_bounds = array<i64: 64, 1152>}, {pipeline_mode = #tpu.pipeline_mode<synchronous>, transform_indices = @transform_1, window_bounds = array<i64: 1152, 256>}, {pipeline_mode = #tpu.pipeline_mode<synchronous>, transform_indices = @transform_2, window_bounds = array<i64: 1, 256>}, {pipeline_mode = #tpu.pipeline_mode<synchronous>, transform_indices = @transform_3, window_bounds = array<i64: 1, 256>}, {transform_indices = @transform_4, window_bounds = array<i64: 64, 256>}, {transform_indices = @transform_5, window_bounds = array<i64: 64, 256>}]} {
    %c0 = arith.constant 0 : index
    %c0_0 = arith.constant 0 : index
    %0 = vector.load %arg1[%c0, %c0_0] : memref<64x1152xbf16, #tpu.memory_space<vmem>>, vector<64x1152xbf16>
    %c0_1 = arith.constant 0 : index
    %c0_2 = arith.constant 0 : index
    %1 = vector.load %arg2[%c0_1, %c0_2] : memref<1152x256xbf16, #tpu.memory_space<vmem>>, vector<1152x256xbf16>
    %cst = arith.constant dense<0.000000e+00> : vector<64x256xf32>
    %2 = tpu.matmul %0, %1, %cst {dimension_numbers = #tpu.dot_dimension_numbers<[1], [0], [0], [1], [0, 0, 1, 1], [], []>} : vector<64x1152xbf16>, vector<1152x256xbf16>, vector<64x256xf32> -> vector<64x256xf32>
    %c0_3 = arith.constant 0 : index
    %c0_4 = arith.constant 0 : index
    %3 = vector.load %arg3[%c0_3, %c0_4] : memref<1x256xf32, #tpu.memory_space<vmem>>, vector<1x256xf32>
    %4 = vector.broadcast %3 : vector<1x256xf32> to vector<64x256xf32>
    %5 = arith.mulf %2, %4 : vector<64x256xf32>
    %c0_5 = arith.constant 0 : index
    %c0_6 = arith.constant 0 : index
    %6 = vector.load %arg4[%c0_5, %c0_6] : memref<1x256xf32, #tpu.memory_space<vmem>>, vector<1x256xf32>
    %7 = vector.broadcast %6 : vector<1x256xf32> to vector<64x256xf32>
    %8 = arith.addf %5, %7 : vector<64x256xf32>
    %c0_7 = arith.constant 0 : index
    %c0_8 = arith.constant 0 : index
    %9 = vector.load %arg5[%c0_7, %c0_8] : memref<64x256xbf16, #tpu.memory_space<vmem>>, vector<64x256xbf16>
    %10 = arith.extf %9 : vector<64x256xbf16> to vector<64x256xf32>
    %11 = arith.addf %8, %10 : vector<64x256xf32>
    %cst_9 = arith.constant 0.000000e+00 : f32
    %12 = vector.broadcast %cst_9 : f32 to vector<64x256xf32>
    %13 = arith.maximumf %11, %12 : vector<64x256xf32>
    %14 = arith.truncf %13 : vector<64x256xf32> to vector<64x256xbf16>
    %c0_10 = arith.constant 0 : index
    %c0_11 = arith.constant 0 : index
    %15 = vector.load %arg6[%c0_10, %c0_11] : memref<64x256xbf16, #tpu.memory_space<vmem>>, vector<64x256xbf16>
    tpu.vector_store %arg6[%c0_10, %c0_11], %14 {strides = array<i32>} : memref<64x256xbf16, #tpu.memory_space<vmem>>, vector<64x256xbf16>,
    return
  }
  func.func @transform_0(%arg0: i32) -> (i32, i32) {
    %c0_i32 = arith.constant 0 : i32
    %c0_i32_0 = arith.constant 0 : i32
    return %arg0, %c0_i32 : i32, i32
  }
  func.func @transform_1(%arg0: i32) -> (i32, i32) {
    %c0_i32 = arith.constant 0 : i32
    %c0_i32_0 = arith.constant 0 : i32
    %c0_i32_1 = arith.constant 0 : i32
    return %c0_i32, %c0_i32_0 : i32, i32
  }
  func.func @transform_2(%arg0: i32) -> (i32, i32) {
    %c0_i32 = arith.constant 0 : i32
    %c0_i32_0 = arith.constant 0 : i32
    %c0_i32_1 = arith.constant 0 : i32
    return %c0_i32, %c0_i32_0 : i32, i32
  }
  func.func @transform_3(%arg0: i32) -> (i32, i32) {
    %c0_i32 = arith.constant 0 : i32
    %c0_i32_0 = arith.constant 0 : i32
    %c0_i32_1 = arith.constant 0 : i32
    return %c0_i32, %c0_i32_0 : i32, i32
  }
  func.func @transform_4(%arg0: i32) -> (i32, i32) {
    %c0_i32 = arith.constant 0 : i32
    %c0_i32_0 = arith.constant 0 : i32
    return %arg0, %c0_i32 : i32, i32
  }
  func.func @transform_5(%arg0: i32) -> (i32, i32) {
    %c0_i32 = arith.constant 0 : i32
    %c0_i32_0 = arith.constant 0 : i32
    return %arg0, %c0_i32 : i32, i32
  }
}

module attributes {stable_mosaic.version = 11 : i64} {
  func.func @_mm_fused_kernel(%arg0: i32, %arg1: memref<64x2304xbf16, #tpu.memory_space<vmem>>, %arg2: memref<2304x256xbf16, #tpu.memory_space<vmem>>, %arg3: memref<1x256xf32, #tpu.memory_space<vmem>>, %arg4: memref<1x256xf32, #tpu.memory_space<vmem>>, %arg5: memref<64x256xbf16, #tpu.memory_space<vmem>>) attributes {dimension_semantics = [#tpu.dimension_semantics<parallel>], iteration_bounds = array<i64: 2>, scalar_prefetch = 0 : i64, scratch_operands = 0 : i64, tpu.core_type = #tpu.core_type<tc>, window_params = [{pipeline_mode = #tpu.pipeline_mode<double_buffered>, transform_indices = @transform_0, window_bounds = array<i64: 64, 2304>}, {pipeline_mode = #tpu.pipeline_mode<synchronous>, transform_indices = @transform_1, window_bounds = array<i64: 2304, 256>}, {pipeline_mode = #tpu.pipeline_mode<synchronous>, transform_indices = @transform_2, window_bounds = array<i64: 1, 256>}, {pipeline_mode = #tpu.pipeline_mode<synchronous>, transform_indices = @transform_3, window_bounds = array<i64: 1, 256>}, {transform_indices = @transform_4, window_bounds = array<i64: 64, 256>}]} {
    %c0 = arith.constant 0 : index
    %c0_0 = arith.constant 0 : index
    %0 = vector.load %arg1[%c0, %c0_0] : memref<64x2304xbf16, #tpu.memory_space<vmem>>, vector<64x2304xbf16>
    %c0_1 = arith.constant 0 : index
    %c0_2 = arith.constant 0 : index
    %1 = vector.load %arg2[%c0_1, %c0_2] : memref<2304x256xbf16, #tpu.memory_space<vmem>>, vector<2304x256xbf16>
    %cst = arith.constant dense<0.000000e+00> : vector<64x256xf32>
    %2 = tpu.matmul %0, %1, %cst {dimension_numbers = #tpu.dot_dimension_numbers<[1], [0], [0], [1], [0, 0, 1, 1], [], []>} : vector<64x2304xbf16>, vector<2304x256xbf16>, vector<64x256xf32> -> vector<64x256xf32>
    %c0_3 = arith.constant 0 : index
    %c0_4 = arith.constant 0 : index
    %3 = vector.load %arg3[%c0_3, %c0_4] : memref<1x256xf32, #tpu.memory_space<vmem>>, vector<1x256xf32>
    %4 = vector.broadcast %3 : vector<1x256xf32> to vector<64x256xf32>
    %5 = arith.mulf %2, %4 : vector<64x256xf32>
    %c0_5 = arith.constant 0 : index
    %c0_6 = arith.constant 0 : index
    %6 = vector.load %arg4[%c0_5, %c0_6] : memref<1x256xf32, #tpu.memory_space<vmem>>, vector<1x256xf32>
    %7 = vector.broadcast %6 : vector<1x256xf32> to vector<64x256xf32>
    %8 = arith.addf %5, %7 : vector<64x256xf32>
    %cst_7 = arith.constant 0.000000e+00 : f32
    %9 = vector.broadcast %cst_7 : f32 to vector<64x256xf32>
    %10 = arith.maximumf %8, %9 : vector<64x256xf32>
    %11 = arith.truncf %10 : vector<64x256xf32> to vector<64x256xbf16>
    %c0_8 = arith.constant 0 : index
    %c0_9 = arith.constant 0 : index
    %12 = vector.load %arg5[%c0_8, %c0_9] : memref<64x256xbf16, #tpu.memory_space<vmem>>, vector<64x256xbf16>
    tpu.vector_store %arg5[%c0_8, %c0_9], %11 {strides = array<i32>} : memref<64x256xbf16, #tpu.memory_space<vmem>>, vector<64x256xbf16>,
    return
  }
  func.func @transform_0(%arg0: i32) -> (i32, i32) {
    %c0_i32 = arith.constant 0 : i32
    %c0_i32_0 = arith.constant 0 : i32
    return %arg0, %c0_i32 : i32, i32
  }
  func.func @transform_1(%arg0: i32) -> (i32, i32) {
    %c0_i32 = arith.constant 0 : i32
    %c0_i32_0 = arith.constant 0 : i32
    %c0_i32_1 = arith.constant 0 : i32
    return %c0_i32, %c0_i32_0 : i32, i32
  }
  func.func @transform_2(%arg0: i32) -> (i32, i32) {
    %c0_i32 = arith.constant 0 : i32
    %c0_i32_0 = arith.constant 0 : i32
    %c0_i32_1 = arith.constant 0 : i32
    return %c0_i32, %c0_i32_0 : i32, i32
  }
  func.func @transform_3(%arg0: i32) -> (i32, i32) {
    %c0_i32 = arith.constant 0 : i32
    %c0_i32_0 = arith.constant 0 : i32
    %c0_i32_1 = arith.constant 0 : i32
    return %c0_i32, %c0_i32_0 : i32, i32
  }
  func.func @transform_4(%arg0: i32) -> (i32, i32) {
    %c0_i32 = arith.constant 0 : i32
    %c0_i32_0 = arith.constant 0 : i32
    return %arg0, %c0_i32 : i32, i32
  }
}

module attributes {stable_mosaic.version = 11 : i64} {
  func.func @_mm_fused_kernel(%arg0: i32, %arg1: memref<256x2304xbf16, #tpu.memory_space<vmem>>, %arg2: memref<2304x128xbf16, #tpu.memory_space<vmem>>, %arg3: memref<1x128xf32, #tpu.memory_space<vmem>>, %arg4: memref<1x128xf32, #tpu.memory_space<vmem>>, %arg5: memref<256x128xbf16, #tpu.memory_space<vmem>>) attributes {dimension_semantics = [#tpu.dimension_semantics<parallel>], iteration_bounds = array<i64: 2>, scalar_prefetch = 0 : i64, scratch_operands = 0 : i64, tpu.core_type = #tpu.core_type<tc>, window_params = [{pipeline_mode = #tpu.pipeline_mode<double_buffered>, transform_indices = @transform_0, window_bounds = array<i64: 256, 2304>}, {pipeline_mode = #tpu.pipeline_mode<synchronous>, transform_indices = @transform_1, window_bounds = array<i64: 2304, 128>}, {pipeline_mode = #tpu.pipeline_mode<synchronous>, transform_indices = @transform_2, window_bounds = array<i64: 1, 128>}, {pipeline_mode = #tpu.pipeline_mode<synchronous>, transform_indices = @transform_3, window_bounds = array<i64: 1, 128>}, {transform_indices = @transform_4, window_bounds = array<i64: 256, 128>}]} {
    %c0 = arith.constant 0 : index
    %c0_0 = arith.constant 0 : index
    %0 = vector.load %arg1[%c0, %c0_0] : memref<256x2304xbf16, #tpu.memory_space<vmem>>, vector<256x2304xbf16>
    %c0_1 = arith.constant 0 : index
    %c0_2 = arith.constant 0 : index
    %1 = vector.load %arg2[%c0_1, %c0_2] : memref<2304x128xbf16, #tpu.memory_space<vmem>>, vector<2304x128xbf16>
    %cst = arith.constant dense<0.000000e+00> : vector<256x128xf32>
    %2 = tpu.matmul %0, %1, %cst {dimension_numbers = #tpu.dot_dimension_numbers<[1], [0], [0], [1], [0, 0, 1, 1], [], []>} : vector<256x2304xbf16>, vector<2304x128xbf16>, vector<256x128xf32> -> vector<256x128xf32>
    %c0_3 = arith.constant 0 : index
    %c0_4 = arith.constant 0 : index
    %3 = vector.load %arg3[%c0_3, %c0_4] : memref<1x128xf32, #tpu.memory_space<vmem>>, vector<1x128xf32>
    %4 = vector.broadcast %3 : vector<1x128xf32> to vector<256x128xf32>
    %5 = arith.mulf %2, %4 : vector<256x128xf32>
    %c0_5 = arith.constant 0 : index
    %c0_6 = arith.constant 0 : index
    %6 = vector.load %arg4[%c0_5, %c0_6] : memref<1x128xf32, #tpu.memory_space<vmem>>, vector<1x128xf32>
    %7 = vector.broadcast %6 : vector<1x128xf32> to vector<256x128xf32>
    %8 = arith.addf %5, %7 : vector<256x128xf32>
    %cst_7 = arith.constant 0.000000e+00 : f32
    %9 = vector.broadcast %cst_7 : f32 to vector<256x128xf32>
    %10 = arith.maximumf %8, %9 : vector<256x128xf32>
    %11 = arith.truncf %10 : vector<256x128xf32> to vector<256x128xbf16>
    %c0_8 = arith.constant 0 : index
    %c0_9 = arith.constant 0 : index
    %12 = vector.load %arg5[%c0_8, %c0_9] : memref<256x128xbf16, #tpu.memory_space<vmem>>, vector<256x128xbf16>
    tpu.vector_store %arg5[%c0_8, %c0_9], %11 {strides = array<i32>} : memref<256x128xbf16, #tpu.memory_space<vmem>>, vector<256x128xbf16>,
    return
  }
  func.func @transform_0(%arg0: i32) -> (i32, i32) {
    %c0_i32 = arith.constant 0 : i32
    %c0_i32_0 = arith.constant 0 : i32
    return %arg0, %c0_i32 : i32, i32
  }
  func.func @transform_1(%arg0: i32) -> (i32, i32) {
    %c0_i32 = arith.constant 0 : i32
    %c0_i32_0 = arith.constant 0 : i32
    %c0_i32_1 = arith.constant 0 : i32
    return %c0_i32, %c0_i32_0 : i32, i32
  }
  func.func @transform_2(%arg0: i32) -> (i32, i32) {
    %c0_i32 = arith.constant 0 : i32
    %c0_i32_0 = arith.constant 0 : i32
    %c0_i32_1 = arith.constant 0 : i32
    return %c0_i32, %c0_i32_0 : i32, i32
  }
  func.func @transform_3(%arg0: i32) -> (i32, i32) {
    %c0_i32 = arith.constant 0 : i32
    %c0_i32_0 = arith.constant 0 : i32
    %c0_i32_1 = arith.constant 0 : i32
    return %c0_i32, %c0_i32_0 : i32, i32
  }
  func.func @transform_4(%arg0: i32) -> (i32, i32) {
    %c0_i32 = arith.constant 0 : i32
    %c0_i32_0 = arith.constant 0 : i32
    return %arg0, %c0_i32 : i32, i32
  }
}

module attributes {stable_mosaic.version = 11 : i64} {
  func.func @_mm_fused_kernel(%arg0: i32, %arg1: memref<256x128xbf16, #tpu.memory_space<vmem>>, %arg2: memref<128x4xbf16, #tpu.memory_space<vmem>>, %arg3: memref<1x4xf32, #tpu.memory_space<vmem>>, %arg4: memref<1x4xf32, #tpu.memory_space<vmem>>, %arg5: memref<256x4xf32, #tpu.memory_space<vmem>>) attributes {dimension_semantics = [#tpu.dimension_semantics<parallel>], iteration_bounds = array<i64: 2>, scalar_prefetch = 0 : i64, scratch_operands = 0 : i64, tpu.core_type = #tpu.core_type<tc>, window_params = [{pipeline_mode = #tpu.pipeline_mode<double_buffered>, transform_indices = @transform_0, window_bounds = array<i64: 256, 128>}, {pipeline_mode = #tpu.pipeline_mode<synchronous>, transform_indices = @transform_1, window_bounds = array<i64: 128, 4>}, {pipeline_mode = #tpu.pipeline_mode<synchronous>, transform_indices = @transform_2, window_bounds = array<i64: 1, 4>}, {pipeline_mode = #tpu.pipeline_mode<synchronous>, transform_indices = @transform_3, window_bounds = array<i64: 1, 4>}, {transform_indices = @transform_4, window_bounds = array<i64: 256, 4>}]} {
    %c0 = arith.constant 0 : index
    %c0_0 = arith.constant 0 : index
    %0 = vector.load %arg1[%c0, %c0_0] : memref<256x128xbf16, #tpu.memory_space<vmem>>, vector<256x128xbf16>
    %c0_1 = arith.constant 0 : index
    %c0_2 = arith.constant 0 : index
    %1 = vector.load %arg2[%c0_1, %c0_2] : memref<128x4xbf16, #tpu.memory_space<vmem>>, vector<128x4xbf16>
    %cst = arith.constant dense<0.000000e+00> : vector<256x4xf32>
    %2 = tpu.matmul %0, %1, %cst {dimension_numbers = #tpu.dot_dimension_numbers<[1], [0], [0], [1], [0, 0, 1, 1], [], []>} : vector<256x128xbf16>, vector<128x4xbf16>, vector<256x4xf32> -> vector<256x4xf32>
    %c0_3 = arith.constant 0 : index
    %c0_4 = arith.constant 0 : index
    %3 = vector.load %arg3[%c0_3, %c0_4] : memref<1x4xf32, #tpu.memory_space<vmem>>, vector<1x4xf32>
    %4 = vector.broadcast %3 : vector<1x4xf32> to vector<256x4xf32>
    %5 = arith.mulf %2, %4 : vector<256x4xf32>
    %c0_5 = arith.constant 0 : index
    %c0_6 = arith.constant 0 : index
    %6 = vector.load %arg4[%c0_5, %c0_6] : memref<1x4xf32, #tpu.memory_space<vmem>>, vector<1x4xf32>
    %7 = vector.broadcast %6 : vector<1x4xf32> to vector<256x4xf32>
    %8 = arith.addf %5, %7 : vector<256x4xf32>
    %c0_7 = arith.constant 0 : index
    %c0_8 = arith.constant 0 : index
    %9 = vector.load %arg5[%c0_7, %c0_8] : memref<256x4xf32, #tpu.memory_space<vmem>>, vector<256x4xf32>
    tpu.vector_store %arg5[%c0_7, %c0_8], %8 {strides = array<i32>} : memref<256x4xf32, #tpu.memory_space<vmem>>, vector<256x4xf32>,
    return
  }
  func.func @transform_0(%arg0: i32) -> (i32, i32) {
    %c0_i32 = arith.constant 0 : i32
    %c0_i32_0 = arith.constant 0 : i32
    return %arg0, %c0_i32 : i32, i32
  }
  func.func @transform_1(%arg0: i32) -> (i32, i32) {
    %c0_i32 = arith.constant 0 : i32
    %c0_i32_0 = arith.constant 0 : i32
    %c0_i32_1 = arith.constant 0 : i32
    return %c0_i32, %c0_i32_0 : i32, i32
  }
  func.func @transform_2(%arg0: i32) -> (i32, i32) {
    %c0_i32 = arith.constant 0 : i32
    %c0_i32_0 = arith.constant 0 : i32
    %c0_i32_1 = arith.constant 0 : i32
    return %c0_i32, %c0_i32_0 : i32, i32
  }
  func.func @transform_3(%arg0: i32) -> (i32, i32) {
    %c0_i32 = arith.constant 0 : i32
    %c0_i32_0 = arith.constant 0 : i32
    %c0_i32_1 = arith.constant 0 : i32
    return %c0_i32, %c0_i32_0 : i32, i32
  }
  func.func @transform_4(%arg0: i32) -> (i32, i32) {
    %c0_i32 = arith.constant 0 : i32
    %c0_i32_0 = arith.constant 0 : i32
    return %arg0, %c0_i32 : i32, i32
  }
}

</mosaic_0001>

<bundles_post_ra>
// kernel: bevencode_forward.15
= control target key start
LH: loop header
LB: loop body
LE: loop exit
PB: predicated region body
PF: predicated region fallthrough
CT: control target
= control target key end

     0   :  { %s716_s15 = smov 0   ;;  %s840_s0 = inlined_call_operand.vmem [shape: bf16[128,196], index: 0, kind: input, shape index: {}]   ;;  %s841_s1 = inlined_call_operand.vmem [shape: bf16[196,64], index: 1, kind: input, shape index: {}]   ;;  %s842_s2 = inlined_call_operand.vmem [shape: f32[1,64], index: 2, kind: input, shape index: {}]   ;;  %s843_s3 = inlined_call_operand.vmem [shape: f32[1,64], index: 3, kind: input, shape index: {}]   ;;  %s844_s4 = inlined_call_operand.vmem [shape: bf16[128,64], index: 4, kind: output, shape index: {}]  }
   0x1 LB: > { %s566_s16 = sadd.s32 4294967295, %s688_s15   ;;  %p570_p0 = scmp.ge.s32.totalorder %s688_s15, 1  ;;  %s688_s15 = sphi %s716_s15, %s14_s15  }
   0x2   : > { %p164_p1 = scmp.lt.s32.totalorder %s688_s15, 3 }
   0x4   : > { %p165_p2 = pnand %p570_p0, %p164_p1 }
   0x5   : > { %v657_v0 = vld [vmem:[%s841_s1] sm:$0xff] (!%p165_p2)   ;;  %v690_v1 = vmov (!%p165_p2), 0   ;;  %v658_v2 = vld [vmem:[%s841_s1 + $0x8] sm:$0xff] (!%p165_p2)   ;;  %s571_s21 = sshll.u32 (!%p165_p2), %s566_s16, 3  ;;  %v659_v3 = vld [vmem:[%s841_s1 + $0x10] sm:$0xff] (!%p165_p2)   ;;  %vm349_vm0 = vcmask (!%p165_p2), 556032  }
   0x6   : > { %168 = sbr.rel (%p165_p2) target bundleno = 289 (0x121), region = 36  ;;  %366 = vmatprep.subr.bf16.mxu0 (!%p165_p2), %v690_v1  ;;  %622 = vmatprep.subr.bf16.mxu1 (!%p165_p2), %v690_v1  ;;  %p192_p3 = scmp.lt.s32.totalorder (!%p165_p2), %s571_s21, 15  ;;  %v660_v4 = vld [vmem:[%s841_s1 + $0x18] sm:$0xff] (!%p165_p2)   ;;  %v661_v6 = vld [vmem:[%s841_s1 + $0x20] sm:$0xff] (!%p165_p2)   ;;  %v662_v8 = vld [vmem:[%s841_s1 + $0x28] sm:$0xff] (!%p165_p2)   ;;  %vm362_vm1 = vcmask (!%p165_p2), 1041408  }
   0x7   : > { %367 = vmatpush1.bf16.msra.mxu0 (!%p165_p2), %v657_v0  ;;  %635 = vmatpush1.bf16.msra.mxu1 (!%p165_p2), %v657_v0  ;;  %v663_v9 = vld [vmem:[%s841_s1 + $0x30] sm:$0xff] (!%p165_p2)   ;;  %v664_v10 = vld [vmem:[%s841_s1 + $0x38] sm:$0xff] (!%p165_p2)   ;;  %v665_v11 = vld [vmem:[%s841_s1 + $0x40] sm:$0xff] (!%p165_p2)   ;;  %vm501_vm2 = vcmask (!%p165_p2), 519168  }
   0x8   : > { %368 = vmatprep.subr.bf16.mxu0 (!%p165_p2), %v690_v1  ;;  %623 = vmatprep.subr.bf16.mxu1 (!%p165_p2), %v690_v1  ;;  %v666_v12 = vld [vmem:[%s841_s1 + $0x48] sm:$0xff] (!%p165_p2)   ;;  %v667_v13 = vld [vmem:[%s841_s1 + $0x50] sm:$0xff] (!%p165_p2)   ;;  %v668_v14 = vld [vmem:[%s841_s1 + $0x58] sm:$0xff] (!%p165_p2)  }
   0x9   : > { %v669_v15 = vld [vmem:[%s841_s1 + $0x60] ss:$0 sps:$4 sm:$0x33] (!%p165_p2)  }
   0xa   : > { %v364_v16 = vsel (!%p165_p2), %vm362_vm1, %v669_v15, 0  ;;  %v601_v23 = vld [vmem:[%s842_s2] ss:$0 sm:$0xff] (!%p165_p2) }
   0xb   : > { %369 = vmatpush1.bf16.msra.mxu0 (!%p165_p2), %v658_v2  ;;  %636 = vmatpush1.bf16.msra.mxu1 (!%p165_p2), %v658_v2  ;;  %v602_v25 = vld [vmem:[%s843_s3] ss:$0 sm:$0xff] (!%p165_p2) }
   0xc   : > { %370 = vmatprep.subr.bf16.mxu0 (!%p165_p2), %v690_v1  ;;  %624 = vmatprep.subr.bf16.mxu1 (!%p165_p2), %v690_v1 }
   0xd   : > { %s846_s21 = smov (!%p192_p3, %s571_s21), 15 }
   0xe   : > { %s613_s24 = sshll.u32 %s846_s21, 3  ;;  %s575_s28 = sshll.u32 %s846_s21, 2 }
   0xf   : > { %371 = vmatpush1.bf16.msra.mxu0 %v659_v3  ;;  %637 = vmatpush1.bf16.msra.mxu1 %v659_v3  ;;  %s748_s29 = scalar_lea.vmem %s840_s0, %s613_s24  ;;  %s819_s5 = scalar_lea.vmem %s844_s4, %s575_s28 }
  0x10   : > { %372 = vmatprep.subr.bf16.mxu0 %v690_v1  ;;  %625 = vmatprep.subr.bf16.mxu1 %v690_v1  ;;  %v672_v5 = vld [vmem:[%s748_s29 + $0x4] ss:$8 sps:$4 sm:$0xff]   ;;  %v670_v17 = vld [vmem:[%s748_s29] ss:$8 sps:$4 sm:$0xff]   ;;  %v676_v19 = vld [vmem:[%s748_s29 + $0x14] ss:$8 sps:$4 sm:$0xff]  }
  0x11   : > { %v675_v7 = vld [vmem:[%s748_s29 + $0x24] ss:$8 sps:$4 sm:$0xff]   ;;  %597 = vmatprep.mubr.msk.bf16.mxu0 %vm349_vm0, %v672_v5  ;;  %v673_v18 = vld [vmem:[%s748_s29 + $0x20] ss:$8 sps:$4 sm:$0xff]   ;;  %v678_v20 = vld [vmem:[%s748_s29 + $0x34] ss:$8 sps:$4 sm:$0xff]  }
  0x12   : > { %599 = vmatprep.mubr.msk.bf16.mxu1 %vm349_vm0, %v675_v7  ;;  %v680_v21 = vld [vmem:[%s748_s29 + $0x10] ss:$8 sps:$4 sm:$0xff]  }
  0x13   : > { %373 = vmatpush1.bf16.msra.mxu0 %v660_v4  ;;  %638 = vmatpush1.bf16.msra.mxu1 %v660_v4  ;;  %v681_v22 = vld [vmem:[%s748_s29 + $0x30] ss:$8 sps:$4 sm:$0xff]  }
  0x14   : > { %374 = vmatprep.subr.bf16.mxu0 %v690_v1  ;;  %626 = vmatprep.subr.bf16.mxu1 %v690_v1 }
  0x17   : > { %375 = vmatpush1.bf16.msra.mxu0 %v661_v6  ;;  %639 = vmatpush1.bf16.msra.mxu1 %v661_v6 }
  0x18   : > { %376 = vmatprep.subr.bf16.mxu0 %v690_v1  ;;  %627 = vmatprep.subr.bf16.mxu1 %v690_v1 }
  0x1b   : > { %377 = vmatpush1.bf16.msra.mxu0 %v662_v8  ;;  %640 = vmatpush1.bf16.msra.mxu1 %v662_v8 }
  0x1c   : > { %378 = vmatprep.subr.bf16.mxu0 %v690_v1  ;;  %628 = vmatprep.subr.bf16.mxu1 %v690_v1 }
  0x1f   : > { %379 = vmatpush1.bf16.msra.mxu0 %v663_v9  ;;  %641 = vmatpush1.bf16.msra.mxu1 %v663_v9 }
  0x20   : > { %380 = vmatprep.subr.bf16.mxu0 %v690_v1  ;;  %629 = vmatprep.subr.bf16.mxu1 %v690_v1 }
  0x23   : > { %381 = vmatpush1.bf16.msra.mxu0 %v664_v10  ;;  %642 = vmatpush1.bf16.msra.mxu1 %v664_v10 }
  0x24   : > { %382 = vmatprep.subr.bf16.mxu0 %v690_v1  ;;  %630 = vmatprep.subr.bf16.mxu1 %v690_v1 }
  0x27   : > { %383 = vmatpush1.bf16.msra.mxu0 %v665_v11  ;;  %643 = vmatpush1.bf16.msra.mxu1 %v665_v11 }
  0x28   : > { %384 = vmatprep.subr.bf16.mxu0 %v690_v1  ;;  %631 = vmatprep.subr.bf16.mxu1 %v690_v1 }
  0x2b   : > { %385 = vmatpush1.bf16.msra.mxu0 %v666_v12  ;;  %644 = vmatpush1.bf16.msra.mxu1 %v666_v12 }
  0x2c   : > { %386 = vmatprep.subr.bf16.mxu0 %v690_v1  ;;  %632 = vmatprep.subr.bf16.mxu1 %v690_v1 }
  0x2f   : > { %387 = vmatpush1.bf16.msra.mxu0 %v667_v13  ;;  %645 = vmatpush1.bf16.msra.mxu1 %v667_v13 }
  0x30   : > { %388 = vmatprep.subr.bf16.mxu0 %v690_v1  ;;  %633 = vmatprep.subr.bf16.mxu1 %v690_v1 }
  0x33   : > { %389 = vmatpush1.bf16.msra.mxu0 %v668_v14  ;;  %646 = vmatpush1.bf16.msra.mxu1 %v668_v14 }
  0x34   : > { %390 = vmatprep.subr.bf16.mxu0 %v690_v1  ;;  %634 = vmatprep.subr.bf16.mxu1 %v690_v1 }
  0x37   : > { %391 = vmatpush1.bf16.msra.mxu0 %v364_v16  ;;  %647 = vmatpush1.bf16.msra.mxu1 %v364_v16 }
  0x3a   : > { %399 = vmatmul.mubr.bf16.vlgmr.msra.gmra.mrb[0].mxu0 %v670_v17  ;;  %415 = vmatmul.mubr.bf16.vlgmr.msra.gmra.mrb[0].mxu1 %v673_v18 }
  0x3b   : > { %598 = vmatprep.mubr.msk.bf16.mxu0 %vm349_vm0, %v676_v19  ;;  %600 = vmatprep.mubr.msk.bf16.mxu1 %vm349_vm0, %v678_v20 }
  0x42   : > { %407 = vmatmul.mubr.bf16.gmra.mrb[4].mxu0 %v680_v21  ;;  %423 = vmatmul.mubr.bf16.gmra.mrb[4].mxu1 %v681_v22 }
 0x10d   : > { %v400_v24 = vpop.f32.mrb[0].mxu0  ;;  %v416_v26 = vpop.f32.mrb[0].mxu1 }
 0x10e   : > { %v438_v27 = vmul.f32 %v601_v23, %v400_v24  ;;  %v442_v28 = vmul.f32 %v601_v23, %v416_v26  ;;  %v402_v29 = vpop.f32.mrb[1].mxu0  ;;  %v418_v30 = vpop.f32.mrb[1].mxu1 }
 0x10f   : > { %v403_v31 = vpop.f32.mrb[2].mxu0  ;;  %v419_v32 = vpop.f32.mrb[2].mxu1 }
 0x110   : > { %v453_v33 = vadd.f32 %v602_v25, %v438_v27  ;;  %v457_v34 = vadd.f32 %v602_v25, %v442_v28  ;;  %v439_v35 = vmul.f32 %v601_v23, %v403_v31  ;;  %v443_v36 = vmul.f32 %v601_v23, %v419_v32  ;;  %v405_v37 = vpop.f32.mrb[3].mxu0  ;;  %v421_v38 = vpop.f32.mrb[3].mxu1 }
 0x112   : > { %v461_v39 = vmax.f32 %v453_v33, 0.0  ;;  %v465_v40 = vmax.f32 %v457_v34, 0.0  ;;  %v454_v41 = vadd.f32 %v602_v25, %v439_v35  ;;  %v458_v42 = vadd.f32 %v602_v25, %v443_v36 }
 0x114   : > { %v614_v43 = vpack.c.bf16 %v461_v39, %v461_v39  ;;  %v618_v44 = vpack.c.bf16 %v465_v40, %v465_v40  ;;  %v462_v45 = vmax.f32 %v454_v41, 0.0  ;;  %v466_v46 = vmax.f32 %v458_v42, 0.0 }
 0x115   : > { %v408_v47 = vpop.f32.mrb[4].mxu0  ;;  %v424_v48 = vpop.f32.mrb[4].mxu1 }
 0x116   : > { %502 = vst.msk [vmem:[%s819_s5] sm:$0xf] %vm501_vm2, %v614_v43  ;;  %506 = vst.msk [vmem:[%s819_s5 + $0x10] sm:$0xf] %vm501_vm2, %v618_v44  ;;  %v615_v49 = vpack.c.bf16 %v462_v45, %v462_v45  ;;  %v619_v50 = vpack.c.bf16 %v466_v46, %v466_v46  ;;  %v440_v51 = vmul.f32 %v601_v23, %v408_v47  ;;  %v410_v53 = vpop.f32.mrb[5].mxu0  ;;  %v426_v54 = vpop.f32.mrb[5].mxu1 }
 0x117   : > { %v444_v52 = vmul.f32 %v601_v23, %v424_v48  ;;  %v411_v55 = vpop.f32.mrb[6].mxu0  ;;  %v427_v56 = vpop.f32.mrb[6].mxu1 }
 0x118   : > { %503 = vst.msk [vmem:[%s819_s5 + $0x4] sm:$0xf] %vm501_vm2, %v615_v49  ;;  %507 = vst.msk [vmem:[%s819_s5 + $0x14] sm:$0xf] %vm501_vm2, %v619_v50  ;;  %v455_v57 = vadd.f32 %v602_v25, %v440_v51  ;;  %v441_v59 = vmul.f32 %v601_v23, %v411_v55  ;;  %v445_v60 = vmul.f32 %v601_v23, %v427_v56  ;;  %v413_v61 = vpop.f32.mrb[7].mxu0  ;;  %v429_v62 = vpop.f32.mrb[7].mxu1 }
 0x119   : > { %v459_v58 = vadd.f32 %v602_v25, %v444_v52 }
 0x11a   : > { %v463_v63 = vmax.f32 %v455_v57, 0.0  ;;  %v456_v1 = vadd.f32 %v602_v25, %v441_v59  ;;  %v460_v2 = vadd.f32 %v602_v25, %v445_v60 }
 0x11b   : > { %v467_v0 = vmax.f32 %v459_v58, 0.0 }
 0x11c   : > { %v616_v3 = vpack.c.bf16 %v463_v63, %v463_v63  ;;  %v464_v5 = vmax.f32 %v456_v1, 0.0  ;;  %v468_v6 = vmax.f32 %v460_v2, 0.0 }
 0x11d   : > { %v620_v4 = vpack.c.bf16 %v467_v0, %v467_v0 }
 0x11e   : > { %504 = vst.msk [vmem:[%s819_s5 + $0x8] sm:$0xf] %vm501_vm2, %v616_v3  ;;  %v617_v7 = vpack.c.bf16 %v464_v5, %v464_v5  ;;  %v621_v8 = vpack.c.bf16 %v468_v6, %v468_v6 }
 0x11f   : > { %508 = vst.msk [vmem:[%s819_s5 + $0x18] sm:$0xf] %vm501_vm2, %v620_v4 }
 0x120   : > { %505 = vst.msk [vmem:[%s819_s5 + $0xc] sm:$0xf] %vm501_vm2, %v617_v7  ;;  %509 = vst.msk [vmem:[%s819_s5 + $0x1c] sm:$0xf] %vm501_vm2, %v621_v8 }
 0x121 PF: > { %s14_s15 = sadd.s32 1, %s688_s15  }
 0x122   : > { %p11_p4 = scmp.ge.s32.totalorder %s14_s15, 4  }
 0x124   :  { %13 = sbr.rel (!%p11_p4) target bundleno = 1 (0x1), region = 66 }

// kernel: bevencode_forward.16
= control target key start
LH: loop header
LB: loop body
LE: loop exit
PB: predicated region body
PF: predicated region fallthrough
CT: control target
= control target key end

     0   :  { %s1267_s15 = smov 0   ;;  %s1434_s0 = inlined_call_operand.vmem [shape: bf16[128,576], index: 0, kind: input, shape index: {}]   ;;  %s1435_s1 = inlined_call_operand.vmem [shape: bf16[576,64], index: 1, kind: input, shape index: {}]   ;;  %s1436_s2 = inlined_call_operand.vmem [shape: f32[1,64], index: 2, kind: input, shape index: {}]   ;;  %s1437_s3 = inlined_call_operand.vmem [shape: f32[1,64], index: 3, kind: input, shape index: {}]   ;;  %s1438_s4 = inlined_call_operand.vmem [shape: bf16[128,64], index: 4, kind: output, shape index: {}]  }
   0x1 LB: > { %s960_s16 = sadd.s32 4294967295, %s1240_s15   ;;  %p964_p0 = scmp.ge.s32.totalorder %s1240_s15, 1  ;;  %s1240_s15 = sphi %s1267_s15, %s14_s15  }
   0x2   : > { %p164_p1 = scmp.lt.s32.totalorder %s1240_s15, 3 }
   0x4   : > { %p165_p2 = pnand %p964_p0, %p164_p1 }
   0x5   : > { %v1170_v0 = vld [vmem:[%s1435_s1 + $0x40] sm:$0xff] (!%p165_p2)   ;;  %v1174_v4 = vld [vmem:[%s1435_s1 + $0x48] sm:$0xff] (!%p165_p2)   ;;  %v1178_v8 = vld [vmem:[%s1435_s1 + $0x50] sm:$0xff] (!%p165_p2)   ;;  %s965_s23 = sshll.u32 (!%p165_p2), %s960_s16, 3  ;;  %vm617_vm0 = vcmask (!%p165_p2), 523264   ;;  %vm895_vm1 = vcmask (!%p165_p2), 519168  }
   0x6   : > { %168 = sbr.rel (%p165_p2) target bundleno = 298 (0x12a), region = 36  ;;  %v1171_v1 = vld [vmem:[%s1435_s1 + $0xc0] sm:$0xff] (!%p165_p2)   ;;  %1049 = vmatprep.subr.bf16.mxu0 (!%p165_p2), %v1170_v0  ;;  %v1175_v5 = vld [vmem:[%s1435_s1 + $0xc8] sm:$0xff] (!%p165_p2)   ;;  %v1179_v9 = vld [vmem:[%s1435_s1 + $0xd0] sm:$0xff] (!%p165_p2)   ;;  %p192_p3 = scmp.lt.s32.totalorder (!%p165_p2), %s965_s23, 15 }
   0x7   : > { %v1172_v2 = vld [vmem:[%s1435_s1] sm:$0xff] (!%p165_p2)   ;;  %1089 = vmatprep.subr.bf16.mxu1 (!%p165_p2), %v1171_v1  ;;  %v1176_v6 = vld [vmem:[%s1435_s1 + $0x8] sm:$0xff] (!%p165_p2)   ;;  %v1180_v10 = vld [vmem:[%s1435_s1 + $0x10] sm:$0xff] (!%p165_p2)  }
   0x8   : > { %v1173_v3 = vld [vmem:[%s1435_s1 + $0x80] sm:$0xff] (!%p165_p2)   ;;  %1050 = vmatpush3.bf16.msra.mxu0 (!%p165_p2), %v1172_v2  ;;  %v1177_v7 = vld [vmem:[%s1435_s1 + $0x88] sm:$0xff] (!%p165_p2)   ;;  %v1181_v11 = vld [vmem:[%s1435_s1 + $0x90] sm:$0xff] (!%p165_p2)  }
   0x9   : > { %1090 = vmatpush3.bf16.msra.mxu1 (!%p165_p2), %v1173_v3  ;;  %1051 = vmatprep.subr.bf16.mxu0 (!%p165_p2), %v1174_v4  ;;  %v1182_v12 = vld [vmem:[%s1435_s1 + $0x58] sm:$0xff] (!%p165_p2)   ;;  %v1186_v16 = vld [vmem:[%s1435_s1 + $0x60] sm:$0xff] (!%p165_p2)   ;;  %v1190_v20 = vld [vmem:[%s1435_s1 + $0x68] sm:$0xff] (!%p165_p2)  }
   0xa   : > { %1091 = vmatprep.subr.bf16.mxu1 (!%p165_p2), %v1175_v5  ;;  %v1183_v13 = vld [vmem:[%s1435_s1 + $0xd8] sm:$0xff] (!%p165_p2)   ;;  %v1187_v17 = vld [vmem:[%s1435_s1 + $0xe0] sm:$0xff] (!%p165_p2)   ;;  %v1191_v21 = vld [vmem:[%s1435_s1 + $0xe8] sm:$0xff] (!%p165_p2)  }
   0xb   : > { %v1184_v14 = vld [vmem:[%s1435_s1 + $0x18] sm:$0xff] (!%p165_p2)   ;;  %v1188_v18 = vld [vmem:[%s1435_s1 + $0x20] sm:$0xff] (!%p165_p2)   ;;  %v1192_v22 = vld [vmem:[%s1435_s1 + $0x28] sm:$0xff] (!%p165_p2)  }
   0xc   : > { %1052 = vmatpush3.bf16.msra.mxu0 (!%p165_p2), %v1176_v6  ;;  %v1185_v15 = vld [vmem:[%s1435_s1 + $0x98] sm:$0xff] (!%p165_p2)   ;;  %v1189_v19 = vld [vmem:[%s1435_s1 + $0xa0] sm:$0xff] (!%p165_p2)   ;;  %v1193_v23 = vld [vmem:[%s1435_s1 + $0xa8] sm:$0xff] (!%p165_p2)  }
   0xd   : > { %1092 = vmatpush3.bf16.msra.mxu1 %v1177_v7  ;;  %1053 = vmatprep.subr.bf16.mxu0 %v1178_v8  ;;  %s1440_s23 = smov (!%p192_p3, %s965_s23), 15  ;;  %v1194_v24 = vld [vmem:[%s1435_s1 + $0x70] sm:$0xff]   ;;  %v1198_v28 = vld [vmem:[%s1435_s1 + $0x78] sm:$0xff]   ;;  %v1208_v36 = vld [vmem:[%s1435_s1 + $0x100] sm:$0xff]  }
   0xe   : > { %1093 = vmatprep.subr.bf16.mxu1 %v1179_v9  ;;  %v1195_v25 = vld [vmem:[%s1435_s1 + $0xf0] sm:$0xff]   ;;  %s1161_s21 = smul.u32 20, %s1440_s23  ;;  %v1199_v29 = vld [vmem:[%s1435_s1 + $0xf8] sm:$0xff]   ;;  %v1215_v39 = vld [vmem:[%s1435_s1 + $0x108] sm:$0xff]   ;;  %s968_s26 = sshll.u32 %s1440_s23, 2 }
   0xf   : > { %v1196_v26 = vld [vmem:[%s1435_s1 + $0x30] sm:$0xff]   ;;  %v1200_v30 = vld [vmem:[%s1435_s1 + $0x38] sm:$0xff]   ;;  %s202_s29 = scalar_lea.vmem %s1438_s4, %s968_s26 }
  0x10   : > { %1054 = vmatpush3.bf16.msra.mxu0 %v1180_v10  ;;  %v1197_v27 = vld [vmem:[%s1435_s1 + $0xb0] sm:$0xff]   ;;  %s1373_s6 = scalar_lea.vmem %s1434_s0, %s1161_s21  ;;  %v1201_v31 = vld [vmem:[%s1435_s1 + $0xb8] sm:$0xff]  }
  0x11   : > { %1094 = vmatpush3.bf16.msra.mxu1 %v1181_v11  ;;  %1055 = vmatprep.subr.bf16.mxu0 %v1182_v12  ;;  %v1202_v32 = vld [vmem:[%s1373_s6] ss:$20 sps:$4 sm:$0xff]   ;;  %v1204_v33 = vld [vmem:[%s1373_s6 + $0x4] ss:$20 sps:$4 sm:$0xff]   ;;  %v1205_v34 = vld [vmem:[%s1373_s6 + $0x8] ss:$20 sps:$4 sm:$0xff]  }
  0x12   : > { %1095 = vmatprep.subr.bf16.mxu1 %v1183_v13  ;;  %v1207_v35 = vld [vmem:[%s1373_s6 + $0xc] ss:$20 sps:$4 sm:$0xff]   ;;  %662 = vmatprep.mubr.bf16.mxu0 %v1204_v33  ;;  %v1211_v38 = vld [vmem:[%s1373_s6 + $0x34] ss:$20 sps:$4 sm:$0xff]   ;;  %v1214_v41 = vld [vmem:[%s1373_s6 + $0x30] ss:$20 sps:$4 sm:$0xff]  }
  0x13   : > { %727 = vmatprep.mubr.bf16.mxu1 %v1207_v35  ;;  %v1209_v37 = vld [vmem:[%s1373_s6 + $0x2c] ss:$20 sps:$4 sm:$0xff]   ;;  %v1213_v40 = vld [vmem:[%s1373_s6 + $0x28] ss:$20 sps:$4 sm:$0xff]   ;;  %v1222_v44 = vld [vmem:[%s1435_s1 + $0x110] sm:$0xff]  }
  0x14   : > { %1056 = vmatpush3.bf16.msra.mxu0 %v1184_v14  ;;  %v1216_v42 = vld [vmem:[%s1373_s6 + $0x54] ss:$20 sps:$4 sm:$0xff]   ;;  %v1218_v43 = vld [vmem:[%s1373_s6 + $0x5c] ss:$20 sps:$4 sm:$0xff]   ;;  %v1221_v47 = vld [vmem:[%s1373_s6 + $0x58] ss:$20 sps:$4 sm:$0xff]  }
  0x15   : > { %1096 = vmatpush3.bf16.msra.mxu1 %v1185_v15  ;;  %1057 = vmatprep.subr.bf16.mxu0 %v1186_v16  ;;  %v1229_v45 = vld [vmem:[%s1435_s1 + $0x118] sm:$0xff]   ;;  %v1220_v46 = vld [vmem:[%s1373_s6 + $0x50] ss:$20 sps:$4 sm:$0xff]   ;;  %v1228_v51 = vld [vmem:[%s1373_s6 + $0x80] ss:$20 sps:$4 sm:$0xff]  }
  0x16   : > { %1097 = vmatprep.subr.bf16.mxu1 %v1187_v17  ;;  %v1223_v48 = vld [vmem:[%s1373_s6 + $0x7c] ss:$20 sps:$4 sm:$0xff]   ;;  %v1225_v49 = vld [vmem:[%s1373_s6 + $0x84] ss:$20 sps:$4 sm:$0xff]   ;;  %v1231_v53 = vld [vmem:[%s1373_s6 + $0x60] ss:$20 sps:$4 sm:$0xff]  }
  0x17   : > { %v1227_v50 = vld [vmem:[%s1373_s6 + $0x78] ss:$20 sps:$4 sm:$0xff]   ;;  %v1230_v52 = vld [vmem:[%s1373_s6 + $0x10] ss:$20 sps:$4 sm:$0xff]   ;;  %v1233_v55 = vld [vmem:[%s1373_s6 + $0x88] ss:$20 sps:$4 sm:$0xff]  }
  0x18   : > { %1058 = vmatpush3.bf16.msra.mxu0 %v1188_v18  ;;  %v1232_v54 = vld [vmem:[%s1373_s6 + $0x38] ss:$20 sps:$4 sm:$0xff]  }
  0x19   : > { %1098 = vmatpush3.bf16.msra.mxu1 %v1189_v19  ;;  %1059 = vmatprep.subr.bf16.mxu0 %v1190_v20 }
  0x1a   : > { %1099 = vmatprep.subr.bf16.mxu1 %v1191_v21 }
  0x1c   : > { %1060 = vmatpush3.bf16.msra.mxu0 %v1192_v22 }
  0x1d   : > { %1100 = vmatpush3.bf16.msra.mxu1 %v1193_v23  ;;  %1061 = vmatprep.subr.bf16.mxu0 %v1194_v24 }
  0x1e   : > { %1101 = vmatprep.subr.bf16.mxu1 %v1195_v25 }
  0x20   : > { %1062 = vmatpush3.bf16.msra.mxu0 %v1196_v26 }
  0x21   : > { %1102 = vmatpush3.bf16.msra.mxu1 %v1197_v27  ;;  %1063 = vmatprep.subr.bf16.mxu0 %v1198_v28 }
  0x22   : > { %1103 = vmatprep.subr.bf16.mxu1 %v1199_v29 }
  0x24   : > { %1064 = vmatpush3.bf16.msra.mxu0 %v1200_v30 }
  0x25   : > { %1104 = vmatpush3.bf16.msra.mxu1 %v1201_v31  ;;  %1137 = vmatprep.subr.bf16.mxu0 %v1208_v36 }
  0x26   : > { %1153 = vmatprep.subr.bf16.mxu1 %v1208_v36 }
  0x27   : > { %663 = vmatmul.mubr.bf16.vlgmr.msra.gmra.mrb[0].mxu0 %v1202_v32 }
  0x28   : > { %728 = vmatmul.mubr.bf16.vlgmr.msra.gmra.mrb[0].mxu1 %v1205_v34  ;;  %1138 = vmatpush3.bf16.msra.mxu0 %v1208_v36 }
  0x29   : > { %1157 = vmatpush3.bf16.msra.mxu1 %v1208_v36  ;;  %670 = vmatprep.mubr.bf16.mxu0 %v1209_v37 }
  0x2a   : > { %735 = vmatprep.mubr.bf16.mxu1 %v1211_v38  ;;  %1139 = vmatprep.subr.bf16.mxu0 %v1215_v39 }
  0x2b   : > { %1154 = vmatprep.subr.bf16.mxu1 %v1215_v39 }
  0x2c   : > { %1140 = vmatpush3.bf16.msra.mxu0 %v1215_v39 }
  0x2d   : > { %1158 = vmatpush3.bf16.msra.mxu1 %v1215_v39  ;;  %1141 = vmatprep.subr.bf16.mxu0 %v1222_v44 }
  0x2e   : > { %1155 = vmatprep.subr.bf16.mxu1 %v1222_v44 }
  0x2f   : > { %671 = vmatmul.mubr.bf16.gmra.mrb[4].mxu0 %v1213_v40 }
  0x30   : > { %736 = vmatmul.mubr.bf16.gmra.mrb[4].mxu1 %v1214_v41  ;;  %678 = vmatprep.mubr.bf16.mxu0 %v1216_v42 }
  0x31   : > { %743 = vmatprep.mubr.bf16.mxu1 %v1218_v43  ;;  %1142 = vmatpush3.bf16.msra.mxu0 %v1222_v44 }
  0x32   : > { %1159 = vmatpush3.bf16.msra.mxu1 %v1222_v44  ;;  %1143 = vmatprep.subr.bf16.mxu0 %v1229_v45 }
  0x33   : > { %1156 = vmatprep.subr.bf16.mxu1 %v1229_v45 }
  0x35   : > { %1144 = vmatpush3.bf16.msra.mxu0 %v1229_v45 }
  0x36   : > { %1160 = vmatpush3.bf16.msra.mxu1 %v1229_v45 }
  0x37   : > { %679 = vmatmul.mubr.bf16.gmra.mrb[8].mxu0 %v1220_v46 }
  0x38   : > { %744 = vmatmul.mubr.bf16.gmra.mrb[8].mxu1 %v1221_v47  ;;  %686 = vmatprep.mubr.bf16.mxu0 %v1223_v48 }
  0x39   : > { %751 = vmatprep.mubr.bf16.mxu1 %v1225_v49  ;;  %v1029_v49 = vld [vmem:[%s1436_s2] ss:$0 sm:$0xff] }
  0x3f   : > { %687 = vmatmul.mubr.bf16.gmra.mrb[12].mxu0 %v1227_v50 }
  0x40   : > { %752 = vmatmul.mubr.bf16.gmra.mrb[12].mxu1 %v1228_v51  ;;  %1145 = vmatprep.mubr.msk.bf16.mxu0 %vm617_vm0, %v1230_v52 }
  0x41   : > { %1149 = vmatprep.mubr.msk.bf16.mxu1 %vm617_vm0, %v1231_v53  ;;  %v1030_v53 = vld [vmem:[%s1437_s3] ss:$0 sm:$0xff] }
  0x47   : > { %1146 = vmatmul.mubr.msk.bf16.vlgmr.msra.gmra.mrb[16].mxu0 %vm617_vm0, %v1232_v54 }
  0x48   : > { %1150 = vmatmul.mubr.msk.bf16.vlgmr.msra.gmra.mrb[16].mxu1 %vm617_vm0, %v1233_v55 }
  0xfa   : > { %v1065_v56 = vpop.f32.mrb[0].mxu0 }
  0xfb   : > { %v1105_v57 = vpop.f32.mrb[0].mxu1  ;;  %v1066_v58 = vpop.f32.mrb[1].mxu0 }
  0xfc   : > { %v1067_v59 = vadd.f32 %v1066_v58, %v1065_v56  ;;  %v1106_v60 = vpop.f32.mrb[1].mxu1  ;;  %v1068_v61 = vpop.f32.mrb[2].mxu0 }
  0xfd   : > { %v1107_v62 = vadd.f32 %v1106_v60, %v1105_v57  ;;  %v1108_v63 = vpop.f32.mrb[2].mxu1  ;;  %v1069_v0 = vpop.f32.mrb[3].mxu0 }
  0xfe   : > { %v1070_v1 = vadd.f32 %v1069_v0, %v1068_v61  ;;  %v1109_v2 = vpop.f32.mrb[3].mxu1 }
  0xff   : > { %v1110_v3 = vadd.f32 %v1109_v2, %v1108_v63  ;;  %v730_v4 = vadd.f32 %v1107_v62, %v1067_v59 }
 0x101   : > { %v733_v5 = vadd.f32 %v1110_v3, %v1070_v1 }
 0x102   : > { %v1071_v6 = vpop.f32.mrb[4].mxu0 }
 0x103   : > { %v1111_v7 = vpop.f32.mrb[4].mxu1  ;;  %v1072_v8 = vpop.f32.mrb[5].mxu0 }
 0x104   : > { %v1073_v9 = vadd.f32 %v1072_v8, %v1071_v6  ;;  %v1112_v10 = vpop.f32.mrb[5].mxu1  ;;  %v1074_v11 = vpop.f32.mrb[6].mxu0 }
 0x105   : > { %v1113_v12 = vadd.f32 %v1112_v10, %v1111_v7  ;;  %v1114_v13 = vpop.f32.mrb[6].mxu1  ;;  %v1075_v14 = vpop.f32.mrb[7].mxu0 }
 0x106   : > { %v1076_v15 = vadd.f32 %v1075_v14, %v1074_v11  ;;  %v1115_v16 = vpop.f32.mrb[7].mxu1 }
 0x107   : > { %v1116_v17 = vadd.f32 %v1115_v16, %v1114_v13  ;;  %v738_v18 = vadd.f32 %v1113_v12, %v1073_v9 }
 0x109   : > { %v741_v19 = vadd.f32 %v1116_v17, %v1076_v15 }
 0x10a   : > { %v1077_v20 = vpop.f32.mrb[8].mxu0 }
 0x10b   : > { %v1117_v21 = vpop.f32.mrb[8].mxu1  ;;  %v1078_v22 = vpop.f32.mrb[9].mxu0 }
 0x10c   : > { %v1079_v23 = vadd.f32 %v1078_v22, %v1077_v20  ;;  %v1118_v24 = vpop.f32.mrb[9].mxu1  ;;  %v1080_v25 = vpop.f32.mrb[10].mxu0 }
 0x10d   : > { %v1119_v26 = vadd.f32 %v1118_v24, %v1117_v21  ;;  %v1120_v27 = vpop.f32.mrb[10].mxu1  ;;  %v1081_v28 = vpop.f32.mrb[11].mxu0 }
 0x10e   : > { %v1082_v29 = vadd.f32 %v1081_v28, %v1080_v25  ;;  %v1121_v30 = vpop.f32.mrb[11].mxu1 }
 0x10f   : > { %v1122_v31 = vadd.f32 %v1121_v30, %v1120_v27  ;;  %v746_v32 = vadd.f32 %v1119_v26, %v1079_v23 }
 0x111   : > { %v749_v33 = vadd.f32 %v1122_v31, %v1082_v29 }
 0x112   : > { %v1083_v34 = vpop.f32.mrb[12].mxu0 }
 0x113   : > { %v1123_v35 = vpop.f32.mrb[12].mxu1  ;;  %v1084_v36 = vpop.f32.mrb[13].mxu0 }
 0x114   : > { %v1085_v37 = vadd.f32 %v1084_v36, %v1083_v34  ;;  %v1124_v38 = vpop.f32.mrb[13].mxu1  ;;  %v1086_v39 = vpop.f32.mrb[14].mxu0 }
 0x115   : > { %v1125_v40 = vadd.f32 %v1124_v38, %v1123_v35  ;;  %v1126_v41 = vpop.f32.mrb[14].mxu1  ;;  %v1087_v42 = vpop.f32.mrb[15].mxu0 }
 0x116   : > { %v1088_v43 = vadd.f32 %v1087_v42, %v1086_v39  ;;  %v1127_v44 = vpop.f32.mrb[15].mxu1 }
 0x117   : > { %v1128_v45 = vadd.f32 %v1127_v44, %v1126_v41  ;;  %v754_v46 = vadd.f32 %v1125_v40, %v1085_v37 }
 0x119   : > { %v757_v47 = vadd.f32 %v1128_v45, %v1088_v43 }
 0x11a   : > { %v1147_v48 = vpop.f32.mrb[16].mxu0 }
 0x11b   : > { %v803_v50 = vadd.f32 %v1147_v48, %v738_v18  ;;  %v1151_v51 = vpop.f32.mrb[16].mxu1  ;;  %v794_v52 = vpop.f32.mrb[17].mxu0 }
 0x11c   : > { %v819_v54 = vadd.f32 %v1151_v51, %v754_v46  ;;  %v795_v55 = vadd.f32 %v794_v52, %v730_v4  ;;  %v810_v56 = vpop.f32.mrb[17].mxu1  ;;  %v1148_v57 = vpop.f32.mrb[18].mxu0 }
 0x11d   : > { %v834_v58 = vmul.f32 %v1029_v49, %v803_v50  ;;  %v811_v59 = vadd.f32 %v810_v56, %v746_v32  ;;  %v806_v60 = vadd.f32 %v1148_v57, %v741_v19  ;;  %v1152_v61 = vpop.f32.mrb[18].mxu1  ;;  %v797_v62 = vpop.f32.mrb[19].mxu0 }
 0x11e   : > { %v838_v63 = vmul.f32 %v1029_v49, %v819_v54  ;;  %v832_v0 = vmul.f32 %v1029_v49, %v795_v55  ;;  %v822_v1 = vadd.f32 %v1152_v61, %v757_v47  ;;  %v798_v2 = vadd.f32 %v797_v62, %v733_v5  ;;  %v813_v3 = vpop.f32.mrb[19].mxu1 }
 0x11f   : > { %v849_v6 = vadd.f32 %v1030_v53, %v834_v58  ;;  %v836_v7 = vmul.f32 %v1029_v49, %v811_v59  ;;  %v835_v8 = vmul.f32 %v1029_v49, %v806_v60  ;;  %v814_v9 = vadd.f32 %v813_v3, %v749_v33 }
 0x120   : > { %v853_v10 = vadd.f32 %v1030_v53, %v838_v63  ;;  %v847_v4 = vadd.f32 %v1030_v53, %v832_v0  ;;  %v839_v11 = vmul.f32 %v1029_v49, %v822_v1  ;;  %v833_v12 = vmul.f32 %v1029_v49, %v798_v2 }
 0x121   : > { %v857_v13 = vmax.f32 %v849_v6, 0.0  ;;  %v851_v14 = vadd.f32 %v1030_v53, %v836_v7  ;;  %v850_v15 = vadd.f32 %v1030_v53, %v835_v8  ;;  %v837_v16 = vmul.f32 %v1029_v49, %v814_v9 }
 0x122   : > { %v861_v17 = vmax.f32 %v853_v10, 0.0  ;;  %v855_v5 = vmax.f32 %v847_v4, 0.0  ;;  %v854_v18 = vadd.f32 %v1030_v53, %v839_v11  ;;  %v848_v19 = vadd.f32 %v1030_v53, %v833_v12 }
 0x123   : > { %v1043_v20 = vpack.c.bf16 %v857_v13, %v857_v13  ;;  %v859_v21 = vmax.f32 %v851_v14, 0.0  ;;  %v858_v22 = vmax.f32 %v850_v15, 0.0  ;;  %v852_v23 = vadd.f32 %v1030_v53, %v837_v16 }
 0x124   : > { %v1047_v24 = vpack.c.bf16 %v861_v17, %v861_v17  ;;  %v1041_v25 = vpack.c.bf16 %v855_v5, %v855_v5  ;;  %v862_v26 = vmax.f32 %v854_v18, 0.0  ;;  %v856_v27 = vmax.f32 %v848_v19, 0.0 }
 0x125   : > { %898 = vst.msk [vmem:[%s202_s29 + $0x8] sm:$0xf] %vm895_vm1, %v1043_v20  ;;  %v1045_v28 = vpack.c.bf16 %v859_v21, %v859_v21  ;;  %v1044_v29 = vpack.c.bf16 %v858_v22, %v858_v22  ;;  %v860_v30 = vmax.f32 %v852_v23, 0.0 }
 0x126   : > { %902 = vst.msk [vmem:[%s202_s29 + $0x18] sm:$0xf] %vm895_vm1, %v1047_v24  ;;  %896 = vst.msk [vmem:[%s202_s29] sm:$0xf] %vm895_vm1, %v1041_v25  ;;  %v1048_v31 = vpack.c.bf16 %v862_v26, %v862_v26  ;;  %v1042_v32 = vpack.c.bf16 %v856_v27, %v856_v27 }
 0x127   : > { %900 = vst.msk [vmem:[%s202_s29 + $0x10] sm:$0xf] %vm895_vm1, %v1045_v28  ;;  %899 = vst.msk [vmem:[%s202_s29 + $0xc] sm:$0xf] %vm895_vm1, %v1044_v29  ;;  %v1046_v33 = vpack.c.bf16 %v860_v30, %v860_v30 }
 0x128   : > { %903 = vst.msk [vmem:[%s202_s29 + $0x1c] sm:$0xf] %vm895_vm1, %v1048_v31  ;;  %897 = vst.msk [vmem:[%s202_s29 + $0x4] sm:$0xf] %vm895_vm1, %v1042_v32 }
 0x129   : > { %901 = vst.msk [vmem:[%s202_s29 + $0x14] sm:$0xf] %vm895_vm1, %v1046_v33 }
 0x12a PF: > { %s14_s15 = sadd.s32 1, %s1240_s15  }
 0x12b   : > { %p11_p4 = scmp.ge.s32.totalorder %s14_s15, 4  }
 0x12d   :  { %13 = sbr.rel (!%p11_p4) target bundleno = 1 (0x1), region = 66 }

// kernel: bevencode_forward.17
= control target key start
LH: loop header
LB: loop body
LE: loop exit
PB: predicated region body
PF: predicated region fallthrough
CT: control target
= control target key end

     0   :  { %s1378_s18 = smov 0   ;;  %s1558_s0 = inlined_call_operand.vmem [shape: bf16[128,576], index: 0, kind: input, shape index: {}]   ;;  %s1559_s1 = inlined_call_operand.vmem [shape: bf16[576,64], index: 1, kind: input, shape index: {}]   ;;  %s1560_s2 = inlined_call_operand.vmem [shape: f32[1,64], index: 2, kind: input, shape index: {}]   ;;  %s1561_s3 = inlined_call_operand.vmem [shape: f32[1,64], index: 3, kind: input, shape index: {}]   ;;  %s1562_s4 = inlined_call_operand.vmem [shape: bf16[128,64], index: 4, kind: input, shape index: {}]   ;;  %s1563_s5 = inlined_call_operand.vmem [shape: bf16[128,64], index: 5, kind: output, shape index: {}]  }
   0x1 LB: > { %s1045_s19 = sadd.s32 4294967295, %s1346_s18   ;;  %p1049_p0 = scmp.ge.s32.totalorder %s1346_s18, 1  ;;  %s1346_s18 = sphi %s1378_s18, %s15_s18  }
   0x2   : > { %p200_p1 = scmp.lt.s32.totalorder %s1346_s18, 3 }
   0x4   : > { %p201_p2 = pnand %p1049_p0, %p200_p1 }
   0x5   : > { %v1276_v0 = vld [vmem:[%s1559_s1 + $0x40] sm:$0xff] (!%p201_p2)   ;;  %v1280_v4 = vld [vmem:[%s1559_s1 + $0x48] sm:$0xff] (!%p201_p2)   ;;  %v1284_v8 = vld [vmem:[%s1559_s1 + $0x50] sm:$0xff] (!%p201_p2)   ;;  %s1050_s27 = sshll.u32 (!%p201_p2), %s1045_s19, 3  ;;  %vm666_vm0 = vcmask (!%p201_p2), 523264   ;;  %vm968_vm1 = vcmask (!%p201_p2), 519168  }
   0x6   : > { %204 = sbr.rel (%p201_p2) target bundleno = 300 (0x12c), region = 40  ;;  %v1277_v1 = vld [vmem:[%s1559_s1 + $0xc0] sm:$0xff] (!%p201_p2)   ;;  %1155 = vmatprep.subr.bf16.mxu0 (!%p201_p2), %v1276_v0  ;;  %v1281_v5 = vld [vmem:[%s1559_s1 + $0xc8] sm:$0xff] (!%p201_p2)   ;;  %v1285_v9 = vld [vmem:[%s1559_s1 + $0xd0] sm:$0xff] (!%p201_p2)   ;;  %p235_p3 = scmp.lt.s32.totalorder (!%p201_p2), %s1050_s27, 15 }
   0x7   : > { %v1278_v2 = vld [vmem:[%s1559_s1] sm:$0xff] (!%p201_p2)   ;;  %1195 = vmatprep.subr.bf16.mxu1 (!%p201_p2), %v1277_v1  ;;  %v1282_v6 = vld [vmem:[%s1559_s1 + $0x8] sm:$0xff] (!%p201_p2)   ;;  %v1286_v10 = vld [vmem:[%s1559_s1 + $0x10] sm:$0xff] (!%p201_p2)  }
   0x8   : > { %v1279_v3 = vld [vmem:[%s1559_s1 + $0x80] sm:$0xff] (!%p201_p2)   ;;  %1156 = vmatpush3.bf16.msra.mxu0 (!%p201_p2), %v1278_v2  ;;  %v1283_v7 = vld [vmem:[%s1559_s1 + $0x88] sm:$0xff] (!%p201_p2)   ;;  %v1287_v11 = vld [vmem:[%s1559_s1 + $0x90] sm:$0xff] (!%p201_p2)  }
   0x9   : > { %1196 = vmatpush3.bf16.msra.mxu1 (!%p201_p2), %v1279_v3  ;;  %1157 = vmatprep.subr.bf16.mxu0 (!%p201_p2), %v1280_v4  ;;  %v1288_v12 = vld [vmem:[%s1559_s1 + $0x58] sm:$0xff] (!%p201_p2)   ;;  %v1292_v16 = vld [vmem:[%s1559_s1 + $0x60] sm:$0xff] (!%p201_p2)   ;;  %v1296_v20 = vld [vmem:[%s1559_s1 + $0x68] sm:$0xff] (!%p201_p2)  }
   0xa   : > { %1197 = vmatprep.subr.bf16.mxu1 (!%p201_p2), %v1281_v5  ;;  %v1289_v13 = vld [vmem:[%s1559_s1 + $0xd8] sm:$0xff] (!%p201_p2)   ;;  %v1293_v17 = vld [vmem:[%s1559_s1 + $0xe0] sm:$0xff] (!%p201_p2)   ;;  %v1297_v21 = vld [vmem:[%s1559_s1 + $0xe8] sm:$0xff] (!%p201_p2)  }
   0xb   : > { %v1290_v14 = vld [vmem:[%s1559_s1 + $0x18] sm:$0xff] (!%p201_p2)   ;;  %v1294_v18 = vld [vmem:[%s1559_s1 + $0x20] sm:$0xff] (!%p201_p2)   ;;  %v1298_v22 = vld [vmem:[%s1559_s1 + $0x28] sm:$0xff] (!%p201_p2)  }
   0xc   : > { %1158 = vmatpush3.bf16.msra.mxu0 (!%p201_p2), %v1282_v6  ;;  %v1291_v15 = vld [vmem:[%s1559_s1 + $0x98] sm:$0xff] (!%p201_p2)   ;;  %v1295_v19 = vld [vmem:[%s1559_s1 + $0xa0] sm:$0xff] (!%p201_p2)   ;;  %v1299_v23 = vld [vmem:[%s1559_s1 + $0xa8] sm:$0xff] (!%p201_p2)  }
   0xd   : > { %1198 = vmatpush3.bf16.msra.mxu1 %v1283_v7  ;;  %1159 = vmatprep.subr.bf16.mxu0 %v1284_v8  ;;  %s1565_s27 = smov (!%p235_p3, %s1050_s27), 15  ;;  %v1300_v24 = vld [vmem:[%s1559_s1 + $0x70] sm:$0xff]   ;;  %v1304_v28 = vld [vmem:[%s1559_s1 + $0x78] sm:$0xff]   ;;  %v1314_v36 = vld [vmem:[%s1559_s1 + $0x100] sm:$0xff]  }
   0xe   : > { %1199 = vmatprep.subr.bf16.mxu1 %v1285_v9  ;;  %v1301_v25 = vld [vmem:[%s1559_s1 + $0xf0] sm:$0xff]   ;;  %s1267_s26 = smul.u32 20, %s1565_s27  ;;  %v1305_v29 = vld [vmem:[%s1559_s1 + $0xf8] sm:$0xff]   ;;  %v1321_v39 = vld [vmem:[%s1559_s1 + $0x108] sm:$0xff]   ;;  %s1053_s28 = sshll.u32 %s1565_s27, 2 }
   0xf   : > { %v1302_v26 = vld [vmem:[%s1559_s1 + $0x30] sm:$0xff]   ;;  %v1306_v30 = vld [vmem:[%s1559_s1 + $0x38] sm:$0xff]   ;;  %s245_s6 = scalar_lea.vmem %s1562_s4, %s1053_s28 }
  0x10   : > { %1160 = vmatpush3.bf16.msra.mxu0 %v1286_v10  ;;  %v1303_v27 = vld [vmem:[%s1559_s1 + $0xb0] sm:$0xff]   ;;  %s1484_s12 = scalar_lea.vmem %s1558_s0, %s1267_s26  ;;  %v1307_v31 = vld [vmem:[%s1559_s1 + $0xb8] sm:$0xff]  }
  0x11   : > { %1200 = vmatpush3.bf16.msra.mxu1 %v1287_v11  ;;  %1161 = vmatprep.subr.bf16.mxu0 %v1288_v12  ;;  %v1308_v32 = vld [vmem:[%s1484_s12] ss:$20 sps:$4 sm:$0xff]   ;;  %v1310_v33 = vld [vmem:[%s1484_s12 + $0x4] ss:$20 sps:$4 sm:$0xff]   ;;  %v1311_v34 = vld [vmem:[%s1484_s12 + $0x8] ss:$20 sps:$4 sm:$0xff]  }
  0x12   : > { %1201 = vmatprep.subr.bf16.mxu1 %v1289_v13  ;;  %v1313_v35 = vld [vmem:[%s1484_s12 + $0xc] ss:$20 sps:$4 sm:$0xff]   ;;  %711 = vmatprep.mubr.bf16.mxu0 %v1310_v33  ;;  %v1317_v38 = vld [vmem:[%s1484_s12 + $0x34] ss:$20 sps:$4 sm:$0xff]   ;;  %v1320_v41 = vld [vmem:[%s1484_s12 + $0x30] ss:$20 sps:$4 sm:$0xff]  }
  0x13   : > { %776 = vmatprep.mubr.bf16.mxu1 %v1313_v35  ;;  %v1315_v37 = vld [vmem:[%s1484_s12 + $0x2c] ss:$20 sps:$4 sm:$0xff]   ;;  %v1319_v40 = vld [vmem:[%s1484_s12 + $0x28] ss:$20 sps:$4 sm:$0xff]   ;;  %v1328_v44 = vld [vmem:[%s1559_s1 + $0x110] sm:$0xff]  }
  0x14   : > { %1162 = vmatpush3.bf16.msra.mxu0 %v1290_v14  ;;  %v1322_v42 = vld [vmem:[%s1484_s12 + $0x54] ss:$20 sps:$4 sm:$0xff]   ;;  %v1324_v43 = vld [vmem:[%s1484_s12 + $0x5c] ss:$20 sps:$4 sm:$0xff]   ;;  %v1327_v47 = vld [vmem:[%s1484_s12 + $0x58] ss:$20 sps:$4 sm:$0xff]  }
  0x15   : > { %1202 = vmatpush3.bf16.msra.mxu1 %v1291_v15  ;;  %1163 = vmatprep.subr.bf16.mxu0 %v1292_v16  ;;  %v1335_v45 = vld [vmem:[%s1559_s1 + $0x118] sm:$0xff]   ;;  %v1326_v46 = vld [vmem:[%s1484_s12 + $0x50] ss:$20 sps:$4 sm:$0xff]   ;;  %v1334_v51 = vld [vmem:[%s1484_s12 + $0x80] ss:$20 sps:$4 sm:$0xff]  }
  0x16   : > { %1203 = vmatprep.subr.bf16.mxu1 %v1293_v17  ;;  %v1329_v48 = vld [vmem:[%s1484_s12 + $0x7c] ss:$20 sps:$4 sm:$0xff]   ;;  %v1331_v49 = vld [vmem:[%s1484_s12 + $0x84] ss:$20 sps:$4 sm:$0xff]   ;;  %v1337_v53 = vld [vmem:[%s1484_s12 + $0x60] ss:$20 sps:$4 sm:$0xff]  }
  0x17   : > { %v1333_v50 = vld [vmem:[%s1484_s12 + $0x78] ss:$20 sps:$4 sm:$0xff]   ;;  %v1336_v52 = vld [vmem:[%s1484_s12 + $0x10] ss:$20 sps:$4 sm:$0xff]   ;;  %v1339_v55 = vld [vmem:[%s1484_s12 + $0x88] ss:$20 sps:$4 sm:$0xff]  }
  0x18   : > { %1164 = vmatpush3.bf16.msra.mxu0 %v1294_v18  ;;  %v1338_v54 = vld [vmem:[%s1484_s12 + $0x38] ss:$20 sps:$4 sm:$0xff]   ;;  %s251_s12 = scalar_lea.vmem %s1563_s5, %s1053_s28 }
  0x19   : > { %1204 = vmatpush3.bf16.msra.mxu1 %v1295_v19  ;;  %1165 = vmatprep.subr.bf16.mxu0 %v1296_v20 }
  0x1a   : > { %1205 = vmatprep.subr.bf16.mxu1 %v1297_v21 }
  0x1c   : > { %1166 = vmatpush3.bf16.msra.mxu0 %v1298_v22 }
  0x1d   : > { %1206 = vmatpush3.bf16.msra.mxu1 %v1299_v23  ;;  %1167 = vmatprep.subr.bf16.mxu0 %v1300_v24 }
  0x1e   : > { %1207 = vmatprep.subr.bf16.mxu1 %v1301_v25 }
  0x20   : > { %1168 = vmatpush3.bf16.msra.mxu0 %v1302_v26 }
  0x21   : > { %1208 = vmatpush3.bf16.msra.mxu1 %v1303_v27  ;;  %1169 = vmatprep.subr.bf16.mxu0 %v1304_v28 }
  0x22   : > { %1209 = vmatprep.subr.bf16.mxu1 %v1305_v29 }
  0x24   : > { %1170 = vmatpush3.bf16.msra.mxu0 %v1306_v30 }
  0x25   : > { %1210 = vmatpush3.bf16.msra.mxu1 %v1307_v31  ;;  %1243 = vmatprep.subr.bf16.mxu0 %v1314_v36 }
  0x26   : > { %1259 = vmatprep.subr.bf16.mxu1 %v1314_v36 }
  0x27   : > { %712 = vmatmul.mubr.bf16.vlgmr.msra.gmra.mrb[0].mxu0 %v1308_v32 }
  0x28   : > { %777 = vmatmul.mubr.bf16.vlgmr.msra.gmra.mrb[0].mxu1 %v1311_v34  ;;  %1244 = vmatpush3.bf16.msra.mxu0 %v1314_v36 }
  0x29   : > { %1263 = vmatpush3.bf16.msra.mxu1 %v1314_v36  ;;  %719 = vmatprep.mubr.bf16.mxu0 %v1315_v37 }
  0x2a   : > { %784 = vmatprep.mubr.bf16.mxu1 %v1317_v38  ;;  %1245 = vmatprep.subr.bf16.mxu0 %v1321_v39 }
  0x2b   : > { %1260 = vmatprep.subr.bf16.mxu1 %v1321_v39 }
  0x2c   : > { %1246 = vmatpush3.bf16.msra.mxu0 %v1321_v39 }
  0x2d   : > { %1264 = vmatpush3.bf16.msra.mxu1 %v1321_v39  ;;  %1247 = vmatprep.subr.bf16.mxu0 %v1328_v44 }
  0x2e   : > { %1261 = vmatprep.subr.bf16.mxu1 %v1328_v44 }
  0x2f   : > { %720 = vmatmul.mubr.bf16.gmra.mrb[4].mxu0 %v1319_v40 }
  0x30   : > { %785 = vmatmul.mubr.bf16.gmra.mrb[4].mxu1 %v1320_v41  ;;  %727 = vmatprep.mubr.bf16.mxu0 %v1322_v42 }
  0x31   : > { %792 = vmatprep.mubr.bf16.mxu1 %v1324_v43  ;;  %1248 = vmatpush3.bf16.msra.mxu0 %v1328_v44 }
  0x32   : > { %1265 = vmatpush3.bf16.msra.mxu1 %v1328_v44  ;;  %1249 = vmatprep.subr.bf16.mxu0 %v1335_v45 }
  0x33   : > { %1262 = vmatprep.subr.bf16.mxu1 %v1335_v45 }
  0x35   : > { %1250 = vmatpush3.bf16.msra.mxu0 %v1335_v45 }
  0x36   : > { %1266 = vmatpush3.bf16.msra.mxu1 %v1335_v45 }
  0x37   : > { %728 = vmatmul.mubr.bf16.gmra.mrb[8].mxu0 %v1326_v46  ;;  %v1152_v46 = vld [vmem:[%s245_s6 + $0x8] sm:$0xff]  }
  0x38   : > { %793 = vmatmul.mubr.bf16.gmra.mrb[8].mxu1 %v1327_v47  ;;  %735 = vmatprep.mubr.bf16.mxu0 %v1329_v48  ;;  %v1154_v48 = vld [vmem:[%s245_s6 + $0x18] sm:$0xff]  }
  0x39   : > { %800 = vmatprep.mubr.bf16.mxu1 %v1331_v49  ;;  %v1137_v49 = vld [vmem:[%s245_s6] sm:$0xff]  }
  0x3f   : > { %736 = vmatmul.mubr.bf16.gmra.mrb[12].mxu0 %v1333_v50  ;;  %v1153_v50 = vld [vmem:[%s245_s6 + $0x10] sm:$0xff]  }
  0x40   : > { %801 = vmatmul.mubr.bf16.gmra.mrb[12].mxu1 %v1334_v51  ;;  %1251 = vmatprep.mubr.msk.bf16.mxu0 %vm666_vm0, %v1336_v52 }
  0x41   : > { %1255 = vmatprep.mubr.msk.bf16.mxu1 %vm666_vm0, %v1337_v53  ;;  %v1116_v53 = vld [vmem:[%s1560_s2] ss:$0 sm:$0xff] }
  0x47   : > { %1252 = vmatmul.mubr.msk.bf16.vlgmr.msra.gmra.mrb[16].mxu0 %vm666_vm0, %v1338_v54  ;;  %v1142_v54 = vunpack.c.l.bf16 %v1152_v46 }
  0x48   : > { %1256 = vmatmul.mubr.msk.bf16.vlgmr.msra.gmra.mrb[16].mxu1 %vm666_vm0, %v1339_v55  ;;  %v1150_v55 = vunpack.c.l.bf16 %v1154_v48 }
  0xfa   : > { %v1171_v56 = vpop.f32.mrb[0].mxu0 }
  0xfb   : > { %v1211_v57 = vpop.f32.mrb[0].mxu1  ;;  %v1172_v58 = vpop.f32.mrb[1].mxu0 }
  0xfc   : > { %v1173_v59 = vadd.f32 %v1172_v58, %v1171_v56  ;;  %v1212_v60 = vpop.f32.mrb[1].mxu1  ;;  %v1174_v61 = vpop.f32.mrb[2].mxu0  ;;  %v1138_v56 = vunpack.c.l.bf16 %v1137_v49 }
  0xfd   : > { %v1213_v62 = vadd.f32 %v1212_v60, %v1211_v57  ;;  %v1214_v63 = vpop.f32.mrb[2].mxu1  ;;  %v1175_v0 = vpop.f32.mrb[3].mxu0  ;;  %v1146_v60 = vunpack.c.l.bf16 %v1153_v50 }
  0xfe   : > { %v1176_v1 = vadd.f32 %v1175_v0, %v1174_v61  ;;  %v1215_v2 = vpop.f32.mrb[3].mxu1  ;;  %v1143_v61 = vunpack.c.h.bf16 %v1152_v46 }
  0xff   : > { %v1216_v3 = vadd.f32 %v1215_v2, %v1214_v63  ;;  %v1524_v4 = vadd.f32 %v1213_v62, %v1173_v59  ;;  %v1151_v62 = vunpack.c.h.bf16 %v1154_v48  ;;  %v1117_v63 = vld [vmem:[%s1561_s3] ss:$0 sm:$0xff] }
 0x101   : > { %v1526_v5 = vadd.f32 %v1216_v3, %v1176_v1 }
 0x102   : > { %v1177_v6 = vpop.f32.mrb[4].mxu0 }
 0x103   : > { %v1217_v7 = vpop.f32.mrb[4].mxu1  ;;  %v1178_v8 = vpop.f32.mrb[5].mxu0 }
 0x104   : > { %v1179_v9 = vadd.f32 %v1178_v8, %v1177_v6  ;;  %v1218_v10 = vpop.f32.mrb[5].mxu1  ;;  %v1180_v11 = vpop.f32.mrb[6].mxu0  ;;  %v1139_v6 = vunpack.c.h.bf16 %v1137_v49 }
 0x105   : > { %v1219_v12 = vadd.f32 %v1218_v10, %v1217_v7  ;;  %v1220_v13 = vpop.f32.mrb[6].mxu1  ;;  %v1181_v14 = vpop.f32.mrb[7].mxu0  ;;  %v1147_v7 = vunpack.c.h.bf16 %v1153_v50 }
 0x106   : > { %v1182_v15 = vadd.f32 %v1181_v14, %v1180_v11  ;;  %v1221_v16 = vpop.f32.mrb[7].mxu1 }
 0x107   : > { %v1222_v17 = vadd.f32 %v1221_v16, %v1220_v13  ;;  %v787_v18 = vadd.f32 %v1219_v12, %v1179_v9 }
 0x109   : > { %v790_v19 = vadd.f32 %v1222_v17, %v1182_v15 }
 0x10a   : > { %v1183_v20 = vpop.f32.mrb[8].mxu0 }
 0x10b   : > { %v1223_v21 = vpop.f32.mrb[8].mxu1  ;;  %v1184_v22 = vpop.f32.mrb[9].mxu0 }
 0x10c   : > { %v1185_v23 = vadd.f32 %v1184_v22, %v1183_v20  ;;  %v1224_v24 = vpop.f32.mrb[9].mxu1  ;;  %v1186_v25 = vpop.f32.mrb[10].mxu0 }
 0x10d   : > { %v1225_v26 = vadd.f32 %v1224_v24, %v1223_v21  ;;  %v1226_v27 = vpop.f32.mrb[10].mxu1  ;;  %v1187_v28 = vpop.f32.mrb[11].mxu0 }
 0x10e   : > { %v1188_v29 = vadd.f32 %v1187_v28, %v1186_v25  ;;  %v1227_v30 = vpop.f32.mrb[11].mxu1 }
 0x10f   : > { %v1228_v31 = vadd.f32 %v1227_v30, %v1226_v27  ;;  %v795_v32 = vadd.f32 %v1225_v26, %v1185_v23 }
 0x111   : > { %v798_v33 = vadd.f32 %v1228_v31, %v1188_v29 }
 0x112   : > { %v1189_v34 = vpop.f32.mrb[12].mxu0 }
 0x113   : > { %v1229_v35 = vpop.f32.mrb[12].mxu1  ;;  %v1190_v36 = vpop.f32.mrb[13].mxu0 }
 0x114   : > { %v1191_v37 = vadd.f32 %v1190_v36, %v1189_v34  ;;  %v1230_v38 = vpop.f32.mrb[13].mxu1  ;;  %v1192_v39 = vpop.f32.mrb[14].mxu0 }
 0x115   : > { %v1231_v40 = vadd.f32 %v1230_v38, %v1229_v35  ;;  %v1232_v41 = vpop.f32.mrb[14].mxu1  ;;  %v1193_v42 = vpop.f32.mrb[15].mxu0 }
 0x116   : > { %v1194_v43 = vadd.f32 %v1193_v42, %v1192_v39  ;;  %v1233_v44 = vpop.f32.mrb[15].mxu1 }
 0x117   : > { %v1234_v45 = vadd.f32 %v1233_v44, %v1232_v41  ;;  %v803_v47 = vadd.f32 %v1231_v40, %v1191_v37 }
 0x119   : > { %v806_v51 = vadd.f32 %v1234_v45, %v1194_v43 }
 0x11a   : > { %v1253_v52 = vpop.f32.mrb[16].mxu0 }
 0x11b   : > { %v852_v57 = vadd.f32 %v1253_v52, %v787_v18  ;;  %v1257_v58 = vpop.f32.mrb[16].mxu1  ;;  %v843_v59 = vpop.f32.mrb[17].mxu0 }
 0x11c   : > { %v868_v0 = vadd.f32 %v1257_v58, %v803_v47  ;;  %v844_v1 = vadd.f32 %v843_v59, %v1524_v4  ;;  %v859_v2 = vpop.f32.mrb[17].mxu1  ;;  %v1254_v3 = vpop.f32.mrb[18].mxu0 }
 0x11d   : > { %v883_v8 = vmul.f32 %v1116_v53, %v852_v57  ;;  %v860_v9 = vadd.f32 %v859_v2, %v795_v32  ;;  %v855_v10 = vadd.f32 %v1254_v3, %v790_v19  ;;  %v1258_v11 = vpop.f32.mrb[18].mxu1  ;;  %v846_v12 = vpop.f32.mrb[19].mxu0 }
 0x11e   : > { %v887_v13 = vmul.f32 %v1116_v53, %v868_v0  ;;  %v881_v14 = vmul.f32 %v1116_v53, %v844_v1  ;;  %v871_v15 = vadd.f32 %v1258_v11, %v806_v51  ;;  %v847_v16 = vadd.f32 %v846_v12, %v1526_v5  ;;  %v862_v17 = vpop.f32.mrb[19].mxu1 }
 0x11f   : > { %v898_v18 = vadd.f32 %v1117_v63, %v883_v8  ;;  %v885_v20 = vmul.f32 %v1116_v53, %v860_v9  ;;  %v884_v21 = vmul.f32 %v1116_v53, %v855_v10  ;;  %v863_v4 = vadd.f32 %v862_v17, %v798_v33 }
 0x120   : > { %v902_v22 = vadd.f32 %v1117_v63, %v887_v13  ;;  %v896_v23 = vadd.f32 %v1117_v63, %v881_v14  ;;  %v888_v24 = vmul.f32 %v1116_v53, %v871_v15  ;;  %v882_v25 = vmul.f32 %v1116_v53, %v847_v16 }
 0x121   : > { %v922_v26 = vadd.f32 %v1142_v54, %v898_v18  ;;  %v900_v27 = vadd.f32 %v1117_v63, %v885_v20  ;;  %v899_v19 = vadd.f32 %v1117_v63, %v884_v21  ;;  %v886_v28 = vmul.f32 %v1116_v53, %v863_v4 }
 0x122   : > { %v926_v29 = vadd.f32 %v1150_v55, %v902_v22  ;;  %v920_v30 = vadd.f32 %v1138_v56, %v896_v23  ;;  %v903_v31 = vadd.f32 %v1117_v63, %v888_v24  ;;  %v897_v32 = vadd.f32 %v1117_v63, %v882_v25 }
 0x123   : > { %v930_v34 = vmax.f32 %v922_v26, 0.0  ;;  %v924_v5 = vadd.f32 %v1146_v60, %v900_v27  ;;  %v923_v35 = vadd.f32 %v1143_v61, %v899_v19  ;;  %v901_v36 = vadd.f32 %v1117_v63, %v886_v28 }
 0x124   : > { %v934_v33 = vmax.f32 %v926_v29, 0.0  ;;  %v928_v37 = vmax.f32 %v920_v30, 0.0  ;;  %v927_v38 = vadd.f32 %v1151_v62, %v903_v31  ;;  %v921_v39 = vadd.f32 %v1139_v6, %v897_v32 }
 0x125   : > { %v1130_v40 = vpack.c.bf16 %v930_v34, %v930_v34  ;;  %v932_v41 = vmax.f32 %v924_v5, 0.0  ;;  %v931_v42 = vmax.f32 %v923_v35, 0.0  ;;  %v925_v43 = vadd.f32 %v1147_v7, %v901_v36 }
 0x126   : > { %v1134_v44 = vpack.c.bf16 %v934_v33, %v934_v33  ;;  %v1128_v45 = vpack.c.bf16 %v928_v37, %v928_v37  ;;  %v935_v46 = vmax.f32 %v927_v38, 0.0  ;;  %v929_v47 = vmax.f32 %v921_v39, 0.0 }
 0x127   : > { %971 = vst.msk [vmem:[%s251_s12 + $0x8] sm:$0xf] %vm968_vm1, %v1130_v40  ;;  %v1132_v48 = vpack.c.bf16 %v932_v41, %v932_v41  ;;  %v1131_v49 = vpack.c.bf16 %v931_v42, %v931_v42  ;;  %v933_v50 = vmax.f32 %v925_v43, 0.0 }
 0x128   : > { %975 = vst.msk [vmem:[%s251_s12 + $0x18] sm:$0xf] %vm968_vm1, %v1134_v44  ;;  %969 = vst.msk [vmem:[%s251_s12] sm:$0xf] %vm968_vm1, %v1128_v45  ;;  %v1135_v51 = vpack.c.bf16 %v935_v46, %v935_v46  ;;  %v1129_v52 = vpack.c.bf16 %v929_v47, %v929_v47 }
 0x129   : > { %973 = vst.msk [vmem:[%s251_s12 + $0x10] sm:$0xf] %vm968_vm1, %v1132_v48  ;;  %972 = vst.msk [vmem:[%s251_s12 + $0xc] sm:$0xf] %vm968_vm1, %v1131_v49  ;;  %v1133_v53 = vpack.c.bf16 %v933_v50, %v933_v50 }
 0x12a   : > { %976 = vst.msk [vmem:[%s251_s12 + $0x1c] sm:$0xf] %vm968_vm1, %v1135_v51  ;;  %970 = vst.msk [vmem:[%s251_s12 + $0x4] sm:$0xf] %vm968_vm1, %v1129_v52 }
 0x12b   : > { %974 = vst.msk [vmem:[%s251_s12 + $0x14] sm:$0xf] %vm968_vm1, %v1133_v53 }
 0x12c PF: > { %s15_s18 = sadd.s32 1, %s1346_s18  }
 0x12d   : > { %p12_p4 = scmp.ge.s32.totalorder %s15_s18, 4  }
 0x12f   :  { %14 = sbr.rel (!%p12_p4) target bundleno = 1 (0x1), region = 73 }

// kernel: bevencode_forward.25
= control target key start
LH: loop header
LB: loop body
LE: loop exit
PB: predicated region body
PF: predicated region fallthrough
CT: control target
= control target key end

     0   :  { %s1510_s15 = smov 0   ;;  %s1845_s0 = inlined_call_operand.vmem [shape: bf16[128,576], index: 0, kind: input, shape index: {}]   ;;  %s1846_s1 = inlined_call_operand.vmem [shape: bf16[576,256], index: 1, kind: input, shape index: {}]   ;;  %s1847_s2 = inlined_call_operand.vmem [shape: f32[1,256], index: 2, kind: input, shape index: {}]   ;;  %s1848_s3 = inlined_call_operand.vmem [shape: f32[1,256], index: 3, kind: input, shape index: {}]   ;;  %s1849_s4 = inlined_call_operand.vmem [shape: bf16[128,256], index: 4, kind: output, shape index: {}]  }
   0x1 LB: > { %s1165_s16 = sadd.s32 4294967295, %s1482_s15   ;;  %p1169_p0 = scmp.ge.s32.totalorder %s1482_s15, 1  ;;  %s1482_s15 = sphi %s1510_s15, %s14_s15  }
   0x2   : > { %p164_p1 = scmp.lt.s32.totalorder %s1482_s15, 3 }
   0x4   : > { %p165_p2 = pnand %p1169_p0, %p164_p1 }
   0x5   : > { %v1340_v0 = vld [vmem:[%s1846_s1 + $0x4] ss:$8 sps:$4 sm:$0xff] (!%p165_p2)   ;;  %v1344_v2 = vld [vmem:[%s1846_s1] ss:$8 sps:$4 sm:$0xff] (!%p165_p2)   ;;  %v1346_v4 = vld [vmem:[%s1846_s1 + $0x14] ss:$8 sps:$4 sm:$0xff] (!%p165_p2)  }
   0x6   : > { %168 = sbr.rel (%p165_p2) target bundleno = 335 (0x14f), region = 36  ;;  %v1342_v1 = vld [vmem:[%s1846_s1 + $0x104] ss:$8 sps:$4 sm:$0xff] (!%p165_p2)   ;;  %776 = vmatprep.subr.bf16.mxu1 (!%p165_p2), %v1340_v0  ;;  %v1345_v3 = vld [vmem:[%s1846_s1 + $0x100] ss:$8 sps:$4 sm:$0xff] (!%p165_p2)   ;;  %s1170_s29 = sshll.u32 (!%p165_p2), %s1165_s16, 3 }
   0x7   : > { %849 = vmatprep.subr.bf16.mxu0 (!%p165_p2), %v1342_v1  ;;  %777 = vmatpush1.bf16.msra.mxu1 (!%p165_p2), %v1344_v2  ;;  %v1348_v5 = vld [vmem:[%s1846_s1 + $0x114] ss:$8 sps:$4 sm:$0xff] (!%p165_p2)   ;;  %v1350_v6 = vld [vmem:[%s1846_s1 + $0x10] ss:$8 sps:$4 sm:$0xff] (!%p165_p2)   ;;  %v1352_v8 = vld [vmem:[%s1846_s1 + $0x24] ss:$8 sps:$4 sm:$0xff] (!%p165_p2)  }
   0x8   : > { %850 = vmatpush1.bf16.msra.mxu0 (!%p165_p2), %v1345_v3  ;;  %778 = vmatprep.subr.bf16.mxu1 (!%p165_p2), %v1346_v4  ;;  %v1351_v7 = vld [vmem:[%s1846_s1 + $0x110] ss:$8 sps:$4 sm:$0xff] (!%p165_p2)   ;;  %v1354_v9 = vld [vmem:[%s1846_s1 + $0x124] ss:$8 sps:$4 sm:$0xff] (!%p165_p2)   ;;  %v1356_v10 = vld [vmem:[%s1846_s1 + $0x20] ss:$8 sps:$4 sm:$0xff] (!%p165_p2)  }
   0x9   : > { %851 = vmatprep.subr.bf16.mxu0 (!%p165_p2), %v1348_v5  ;;  %v1357_v11 = vld [vmem:[%s1846_s1 + $0x120] ss:$8 sps:$4 sm:$0xff] (!%p165_p2)   ;;  %v1358_v12 = vld [vmem:[%s1846_s1 + $0x34] ss:$8 sps:$4 sm:$0xff] (!%p165_p2)   ;;  %v1362_v14 = vld [vmem:[%s1846_s1 + $0x30] ss:$8 sps:$4 sm:$0xff] (!%p165_p2)  }
   0xa   : > { %v1360_v13 = vld [vmem:[%s1846_s1 + $0x134] ss:$8 sps:$4 sm:$0xff] (!%p165_p2)   ;;  %v1363_v15 = vld [vmem:[%s1846_s1 + $0x130] ss:$8 sps:$4 sm:$0xff] (!%p165_p2)   ;;  %v1364_v16 = vld [vmem:[%s1846_s1 + $0x44] ss:$8 sps:$4 sm:$0xff] (!%p165_p2)  }
   0xb   : > { %779 = vmatpush1.bf16.msra.mxu1 (!%p165_p2), %v1350_v6  ;;  %v1366_v17 = vld [vmem:[%s1846_s1 + $0x144] ss:$8 sps:$4 sm:$0xff] (!%p165_p2)   ;;  %v1368_v18 = vld [vmem:[%s1846_s1 + $0x40] ss:$8 sps:$4 sm:$0xff] (!%p165_p2)   ;;  %v1370_v20 = vld [vmem:[%s1846_s1 + $0x54] ss:$8 sps:$4 sm:$0xff] (!%p165_p2)  }
   0xc   : > { %852 = vmatpush1.bf16.msra.mxu0 (!%p165_p2), %v1351_v7  ;;  %780 = vmatprep.subr.bf16.mxu1 (!%p165_p2), %v1352_v8  ;;  %v1369_v19 = vld [vmem:[%s1846_s1 + $0x140] ss:$8 sps:$4 sm:$0xff] (!%p165_p2)   ;;  %v1372_v21 = vld [vmem:[%s1846_s1 + $0x154] ss:$8 sps:$4 sm:$0xff] (!%p165_p2)   ;;  %v1374_v22 = vld [vmem:[%s1846_s1 + $0x50] ss:$8 sps:$4 sm:$0xff] (!%p165_p2)  }
   0xd   : > { %853 = vmatprep.subr.bf16.mxu0 %v1354_v9  ;;  %v1375_v23 = vld [vmem:[%s1846_s1 + $0x150] ss:$8 sps:$4 sm:$0xff]   ;;  %v1376_v24 = vld [vmem:[%s1846_s1 + $0x64] ss:$8 sps:$4 sm:$0xff]   ;;  %v1380_v26 = vld [vmem:[%s1846_s1 + $0x60] ss:$8 sps:$4 sm:$0xff]  }
   0xe   : > { %v1378_v25 = vld [vmem:[%s1846_s1 + $0x164] ss:$8 sps:$4 sm:$0xff]   ;;  %v1381_v27 = vld [vmem:[%s1846_s1 + $0x160] ss:$8 sps:$4 sm:$0xff]   ;;  %v1382_v28 = vld [vmem:[%s1846_s1 + $0x74] ss:$8 sps:$4 sm:$0xff]  }
   0xf   : > { %781 = vmatpush1.bf16.msra.mxu1 %v1356_v10  ;;  %v1384_v29 = vld [vmem:[%s1846_s1 + $0x174] ss:$8 sps:$4 sm:$0xff]   ;;  %v1386_v30 = vld [vmem:[%s1846_s1 + $0x70] ss:$8 sps:$4 sm:$0xff]   ;;  %v1388_v32 = vld [vmem:[%s1846_s1 + $0x84] ss:$8 sps:$4 sm:$0xff]  }
  0x10   : > { %854 = vmatpush1.bf16.msra.mxu0 %v1357_v11  ;;  %782 = vmatprep.subr.bf16.mxu1 %v1358_v12  ;;  %v1387_v31 = vld [vmem:[%s1846_s1 + $0x170] ss:$8 sps:$4 sm:$0xff]   ;;  %p193_p3 = scmp.lt.s32.totalorder %s1170_s29, 15  ;;  %v1390_v33 = vld [vmem:[%s1846_s1 + $0x184] ss:$8 sps:$4 sm:$0xff]   ;;  %vm763_vm0 = vcmask 523264  }
  0x11   : > { %855 = vmatprep.subr.bf16.mxu0 %v1360_v13  ;;  %v1392_v34 = vld [vmem:[%s1846_s1 + $0x80] ss:$8 sps:$4 sm:$0xff]   ;;  %v1394_v36 = vld [vmem:[%s1846_s1 + $0x94] ss:$8 sps:$4 sm:$0xff]   ;;  %v1398_v38 = vld [vmem:[%s1846_s1 + $0x90] ss:$8 sps:$4 sm:$0xff]  }
  0x12   : > { %v1393_v35 = vld [vmem:[%s1846_s1 + $0x180] ss:$8 sps:$4 sm:$0xff]   ;;  %s1851_s29 = smov (!%p193_p3, %s1170_s29), 15  ;;  %v1396_v37 = vld [vmem:[%s1846_s1 + $0x194] ss:$8 sps:$4 sm:$0xff]  }
  0x13   : > { %783 = vmatpush1.bf16.msra.mxu1 %v1362_v14  ;;  %v1399_v39 = vld [vmem:[%s1846_s1 + $0x190] ss:$8 sps:$4 sm:$0xff]   ;;  %v1400_v40 = vld [vmem:[%s1846_s1 + $0xa4] ss:$8 sps:$4 sm:$0xff]   ;;  %s1330_s27 = smul.u32 20, %s1851_s29  ;;  %s1281_s26 = sshll.u32 %s1851_s29, 3 }
  0x14   : > { %856 = vmatpush1.bf16.msra.mxu0 %v1363_v15  ;;  %784 = vmatprep.subr.bf16.mxu1 %v1364_v16  ;;  %v1402_v41 = vld [vmem:[%s1846_s1 + $0x1a4] ss:$8 sps:$4 sm:$0xff]   ;;  %v1404_v42 = vld [vmem:[%s1846_s1 + $0xa0] ss:$8 sps:$4 sm:$0xff]   ;;  %v1406_v44 = vld [vmem:[%s1846_s1 + $0xb4] ss:$8 sps:$4 sm:$0xff]   ;;  %s1806_s28 = scalar_lea.vmem %s1849_s4, %s1281_s26 }
  0x15   : > { %857 = vmatprep.subr.bf16.mxu0 %v1366_v17  ;;  %v1405_v43 = vld [vmem:[%s1846_s1 + $0x1a0] ss:$8 sps:$4 sm:$0xff]   ;;  %s1661_s12 = scalar_lea.vmem %s1845_s0, %s1330_s27  ;;  %v1408_v45 = vld [vmem:[%s1846_s1 + $0x1b4] ss:$8 sps:$4 sm:$0xff]   ;;  %v1410_v46 = vld [vmem:[%s1846_s1 + $0xb0] ss:$8 sps:$4 sm:$0xff]  }
  0x16   : > { %v1411_v47 = vld [vmem:[%s1846_s1 + $0x1b0] ss:$8 sps:$4 sm:$0xff]   ;;  %v1412_v48 = vld [vmem:[%s1846_s1 + $0xc4] ss:$8 sps:$4 sm:$0xff]   ;;  %v1416_v52 = vld [vmem:[%s1846_s1 + $0xc0] ss:$8 sps:$4 sm:$0xff]  }
  0x17   : > { %785 = vmatpush1.bf16.msra.mxu1 %v1368_v18  ;;  %v1438_v49 = vld [vmem:[%s1661_s12 + $0x4] ss:$20 sps:$4 sm:$0xff]   ;;  %v1441_v51 = vld [vmem:[%s1661_s12 + $0xc] ss:$20 sps:$4 sm:$0xff]   ;;  %v1418_v54 = vld [vmem:[%s1846_s1 + $0xd4] ss:$8 sps:$4 sm:$0xff]  }
  0x18   : > { %858 = vmatpush1.bf16.msra.mxu0 %v1369_v19  ;;  %786 = vmatprep.subr.bf16.mxu1 %v1370_v20  ;;  %v1414_v50 = vld [vmem:[%s1846_s1 + $0x1c4] ss:$8 sps:$4 sm:$0xff]   ;;  %v1417_v53 = vld [vmem:[%s1846_s1 + $0x1c0] ss:$8 sps:$4 sm:$0xff]   ;;  %v1420_v55 = vld [vmem:[%s1846_s1 + $0x1d4] ss:$8 sps:$4 sm:$0xff]  }
  0x19   : > { %859 = vmatprep.subr.bf16.mxu0 %v1372_v21  ;;  %808 = vmatprep.mubr.bf16.mxu1 %v1438_v49  ;;  %v1422_v56 = vld [vmem:[%s1846_s1 + $0xd0] ss:$8 sps:$4 sm:$0xff]   ;;  %v1424_v58 = vld [vmem:[%s1846_s1 + $0xe4] ss:$8 sps:$4 sm:$0xff]   ;;  %v1428_v60 = vld [vmem:[%s1846_s1 + $0xe0] ss:$8 sps:$4 sm:$0xff]  }
  0x1a   : > { %881 = vmatprep.mubr.bf16.mxu0 %v1441_v51  ;;  %v1423_v57 = vld [vmem:[%s1846_s1 + $0x1d0] ss:$8 sps:$4 sm:$0xff]   ;;  %v1426_v59 = vld [vmem:[%s1846_s1 + $0x1e4] ss:$8 sps:$4 sm:$0xff]   ;;  %v1429_v61 = vld [vmem:[%s1846_s1 + $0x1e0] ss:$8 sps:$4 sm:$0xff]  }
  0x1b   : > { %787 = vmatpush1.bf16.msra.mxu1 %v1374_v22  ;;  %v1430_v62 = vld [vmem:[%s1846_s1 + $0xf4] ss:$8 sps:$4 sm:$0xff]   ;;  %v1434_v0 = vld [vmem:[%s1846_s1 + $0xf0] ss:$8 sps:$4 sm:$0xff]   ;;  %v1444_v2 = vld [vmem:[%s1846_s1 + $0x204] ss:$8 sps:$4 sm:$0xff]  }
  0x1c   : > { %860 = vmatpush1.bf16.msra.mxu0 %v1375_v23  ;;  %788 = vmatprep.subr.bf16.mxu1 %v1376_v24  ;;  %v1432_v63 = vld [vmem:[%s1846_s1 + $0x1f4] ss:$8 sps:$4 sm:$0xff]   ;;  %v1435_v1 = vld [vmem:[%s1846_s1 + $0x1f0] ss:$8 sps:$4 sm:$0xff]   ;;  %v1442_v5 = vld [vmem:[%s1846_s1 + $0x200] ss:$8 sps:$4 sm:$0xff]  }
  0x1d   : > { %861 = vmatprep.subr.bf16.mxu0 %v1378_v25  ;;  %v1436_v3 = vld [vmem:[%s1661_s12] ss:$20 sps:$4 sm:$0xff]   ;;  %v1439_v4 = vld [vmem:[%s1661_s12 + $0x8] ss:$20 sps:$4 sm:$0xff]   ;;  %v1451_v9 = vld [vmem:[%s1846_s1 + $0x210] ss:$8 sps:$4 sm:$0xff]  }
  0x1e   : > { %v1445_v6 = vld [vmem:[%s1661_s12 + $0x2c] ss:$20 sps:$4 sm:$0xff]   ;;  %v1447_v7 = vld [vmem:[%s1661_s12 + $0x34] ss:$20 sps:$4 sm:$0xff]   ;;  %v1450_v12 = vld [vmem:[%s1661_s12 + $0x30] ss:$20 sps:$4 sm:$0xff]  }
  0x1f   : > { %789 = vmatpush1.bf16.msra.mxu1 %v1380_v26  ;;  %v1453_v8 = vld [vmem:[%s1846_s1 + $0x214] ss:$8 sps:$4 sm:$0xff]   ;;  %v1462_v10 = vld [vmem:[%s1846_s1 + $0x224] ss:$8 sps:$4 sm:$0xff]   ;;  %v1460_v15 = vld [vmem:[%s1846_s1 + $0x220] ss:$8 sps:$4 sm:$0xff]  }
  0x20   : > { %862 = vmatpush1.bf16.msra.mxu0 %v1381_v27  ;;  %790 = vmatprep.subr.bf16.mxu1 %v1382_v28  ;;  %v1449_v11 = vld [vmem:[%s1661_s12 + $0x28] ss:$20 sps:$4 sm:$0xff]   ;;  %v1469_v17 = vld [vmem:[%s1846_s1 + $0x230] ss:$8 sps:$4 sm:$0xff]   ;;  %v1468_v23 = vld [vmem:[%s1661_s12 + $0x80] ss:$20 sps:$4 sm:$0xff]  }
  0x21   : > { %863 = vmatprep.subr.bf16.mxu0 %v1384_v29  ;;  %v1454_v13 = vld [vmem:[%s1661_s12 + $0x54] ss:$20 sps:$4 sm:$0xff]   ;;  %v1456_v14 = vld [vmem:[%s1661_s12 + $0x5c] ss:$20 sps:$4 sm:$0xff]   ;;  %v1459_v19 = vld [vmem:[%s1661_s12 + $0x58] ss:$20 sps:$4 sm:$0xff]  }
  0x22   : > { %v1471_v16 = vld [vmem:[%s1846_s1 + $0x234] ss:$8 sps:$4 sm:$0xff]   ;;  %v1458_v18 = vld [vmem:[%s1661_s12 + $0x50] ss:$20 sps:$4 sm:$0xff]   ;;  %v1467_v22 = vld [vmem:[%s1661_s12 + $0x78] ss:$20 sps:$4 sm:$0xff]  }
  0x23   : > { %791 = vmatpush1.bf16.msra.mxu1 %v1386_v30  ;;  %v1463_v20 = vld [vmem:[%s1661_s12 + $0x7c] ss:$20 sps:$4 sm:$0xff]   ;;  %v1465_v21 = vld [vmem:[%s1661_s12 + $0x84] ss:$20 sps:$4 sm:$0xff]   ;;  %v1484_v24 = vmov 0  }
  0x24   : > { %864 = vmatpush1.bf16.msra.mxu0 %v1387_v31  ;;  %792 = vmatprep.subr.bf16.mxu1 %v1388_v32  ;;  %v1472_v25 = vld [vmem:[%s1661_s12 + $0x10] ss:$20 sps:$4 sm:$0xff]   ;;  %v1473_v26 = vld [vmem:[%s1661_s12 + $0x60] ss:$20 sps:$4 sm:$0xff]   ;;  %v1474_v27 = vld [vmem:[%s1661_s12 + $0x38] ss:$20 sps:$4 sm:$0xff]  }
  0x25   : > { %865 = vmatprep.subr.bf16.mxu0 %v1390_v33  ;;  %v1475_v28 = vld [vmem:[%s1661_s12 + $0x88] ss:$20 sps:$4 sm:$0xff]  }
  0x27   : > { %793 = vmatpush1.bf16.msra.mxu1 %v1392_v34 }
  0x28   : > { %866 = vmatpush1.bf16.msra.mxu0 %v1393_v35  ;;  %794 = vmatprep.subr.bf16.mxu1 %v1394_v36 }
  0x29   : > { %867 = vmatprep.subr.bf16.mxu0 %v1396_v37 }
  0x2b   : > { %795 = vmatpush1.bf16.msra.mxu1 %v1398_v38 }
  0x2c   : > { %868 = vmatpush1.bf16.msra.mxu0 %v1399_v39  ;;  %796 = vmatprep.subr.bf16.mxu1 %v1400_v40 }
  0x2d   : > { %869 = vmatprep.subr.bf16.mxu0 %v1402_v41 }
  0x2f   : > { %797 = vmatpush1.bf16.msra.mxu1 %v1404_v42 }
  0x30   : > { %870 = vmatpush1.bf16.msra.mxu0 %v1405_v43  ;;  %798 = vmatprep.subr.bf16.mxu1 %v1406_v44 }
  0x31   : > { %871 = vmatprep.subr.bf16.mxu0 %v1408_v45 }
  0x33   : > { %799 = vmatpush1.bf16.msra.mxu1 %v1410_v46 }
  0x34   : > { %872 = vmatpush1.bf16.msra.mxu0 %v1411_v47  ;;  %800 = vmatprep.subr.bf16.mxu1 %v1412_v48  ;;  %v997_v48 = vlaneseq }
  0x35   : > { %873 = vmatprep.subr.bf16.mxu0 %v1414_v50 }
  0x36   : > { %v998_v50 = vshrl.u32 %v997_v48, 7 }
  0x37   : > { %801 = vmatpush1.bf16.msra.mxu1 %v1416_v52 }
  0x38   : > { %874 = vmatpush1.bf16.msra.mxu0 %v1417_v53  ;;  %802 = vmatprep.subr.bf16.mxu1 %v1418_v54 }
  0x39   : > { %875 = vmatprep.subr.bf16.mxu0 %v1420_v55 }
  0x3b   : > { %803 = vmatpush1.bf16.msra.mxu1 %v1422_v56 }
  0x3c   : > { %876 = vmatpush1.bf16.msra.mxu0 %v1423_v57  ;;  %804 = vmatprep.subr.bf16.mxu1 %v1424_v58 }
  0x3d   : > { %877 = vmatprep.subr.bf16.mxu0 %v1426_v59 }
  0x3f   : > { %805 = vmatpush1.bf16.msra.mxu1 %v1428_v60 }
  0x40   : > { %878 = vmatpush1.bf16.msra.mxu0 %v1429_v61  ;;  %806 = vmatprep.subr.bf16.mxu1 %v1430_v62  ;;  %v999_v62 = vsub.s32 0, %v998_v50 }
  0x41   : > { %879 = vmatprep.subr.bf16.mxu0 %v1432_v63 }
  0x43   : > { %807 = vmatpush1.bf16.msra.mxu1 %v1434_v0  ;;  %v995_v0 = vld [vmem:[%s1847_s2] sm:$0x3] }
  0x44   : > { %880 = vmatpush1.bf16.msra.mxu0 %v1435_v1  ;;  %1290 = vmatprep.subr.bf16.mxu1 %v1444_v2  ;;  %v1003_v1 = vsub.s32 1, %v998_v50 }
  0x45   : > { %922 = vmatprep.subr.bf16.mxu0 %v1444_v2  ;;  %v1023_v2 = vld [vmem:[%s1848_s3] sm:$0x3] }
  0x46   : > { %809 = vmatmul.mubr.bf16.vlgmr.msra.gmra.mrb[0].mxu1 %v1436_v3  ;;  %v1782_v3 = vrot.slane %v995_v0, %v999_v62 }
  0x47   : > { %882 = vmatmul.mubr.bf16.vlgmr.msra.gmra.mrb[0].mxu0 %v1439_v4  ;;  %1294 = vmatpush1.bf16.msra.mxu1 %v1442_v5 }
  0x48   : > { %923 = vmatpush1.bf16.msra.mxu0 %v1442_v5  ;;  %818 = vmatprep.mubr.bf16.mxu1 %v1445_v6  ;;  %v1784_v6 = vrot.slane %v995_v0, %v1003_v1 }
  0x49   : > { %891 = vmatprep.mubr.bf16.mxu0 %v1447_v7  ;;  %924 = vmatprep.subr.bf16.mxu0 %v1453_v8 }
  0x4a   : > { %1291 = vmatprep.subr.bf16.mxu1 %v1453_v8  ;;  %v1786_v8 = vrot.slane %v1023_v2, %v999_v62 }
  0x4b   : > { %1295 = vmatpush1.bf16.msra.mxu1 %v1451_v9 }
  0x4c   : > { %925 = vmatpush1.bf16.msra.mxu0 %v1451_v9  ;;  %1292 = vmatprep.subr.bf16.mxu1 %v1462_v10 }
  0x4d   : > { %926 = vmatprep.subr.bf16.mxu0 %v1462_v10 }
  0x4e   : > { %819 = vmatmul.mubr.bf16.gmra.mrb[4].mxu1 %v1449_v11 }
  0x4f   : > { %892 = vmatmul.mubr.bf16.gmra.mrb[4].mxu0 %v1450_v12  ;;  %828 = vmatprep.mubr.bf16.mxu1 %v1454_v13  ;;  %v1788_v13 = vrot.slane %v1023_v2, %v1003_v1 }
  0x50   : > { %901 = vmatprep.mubr.bf16.mxu0 %v1456_v14  ;;  %927 = vmatpush1.bf16.msra.mxu0 %v1460_v15 }
  0x51   : > { %1296 = vmatpush1.bf16.msra.mxu1 %v1460_v15  ;;  %928 = vmatprep.subr.bf16.mxu0 %v1471_v16 }
  0x52   : > { %1293 = vmatprep.subr.bf16.mxu1 %v1471_v16 }
  0x54   : > { %929 = vmatpush1.bf16.msra.mxu0 %v1469_v17 }
  0x55   : > { %1297 = vmatpush1.bf16.msra.mxu1 %v1469_v17 }
  0x56   : > { %829 = vmatmul.mubr.bf16.gmra.mrb[8].mxu1 %v1458_v18 }
  0x57   : > { %902 = vmatmul.mubr.bf16.gmra.mrb[8].mxu0 %v1459_v19  ;;  %838 = vmatprep.mubr.bf16.mxu1 %v1463_v20 }
  0x58   : > { %911 = vmatprep.mubr.bf16.mxu0 %v1465_v21 }
  0x5e   : > { %839 = vmatmul.mubr.bf16.gmra.mrb[12].mxu1 %v1467_v22 }
  0x5f   : > { %912 = vmatmul.mubr.bf16.gmra.mrb[12].mxu0 %v1468_v23  ;;  %974 = vmatprep.mubr.bf16.mxu1 %v1484_v24 }
  0x60   : > { %954 = vmatprep.mubr.bf16.mxu0 %v1484_v24 }
  0x66   : > { %1269 = vmatmul.mubr.msk.bf16.vlgmr.msra.gmra.mrb[16].mxu1 %vm763_vm0, %v1473_v26 }
  0x67   : > { %1267 = vmatmul.mubr.msk.bf16.vlgmr.msra.gmra.mrb[0].mxu0 %vm763_vm0, %v1472_v25  ;;  %984 = vmatprep.mubr.bf16.mxu1 %v1484_v24 }
  0x68   : > { %964 = vmatprep.mubr.bf16.mxu0 %v1484_v24 }
  0x6e   : > { %1270 = vmatmul.mubr.msk.bf16.gmra.mrb[20].mxu1 %vm763_vm0, %v1475_v28 }
  0x6f   : > { %1268 = vmatmul.mubr.msk.bf16.gmra.mrb[4].mxu0 %vm763_vm0, %v1474_v27 }
 0x119   : > { %v810_v29 = vpop.f32.mrb[0].mxu1 }
 0x11a   : > { %v812_v30 = vpop.f32.mrb[1].mxu1 }
 0x11b   : > { %v814_v31 = vpop.f32.mrb[2].mxu1 }
 0x11c   : > { %v816_v32 = vpop.f32.mrb[3].mxu1 }
 0x121   : > { %v1764_v33 = vpop.f32.mrb[4].mxu1 }
 0x122   : > { %v1766_v34 = vpop.f32.mrb[5].mxu1 }
 0x123   : > { %v1768_v35 = vpop.f32.mrb[6].mxu1 }
 0x124   : > { %v1770_v36 = vpop.f32.mrb[7].mxu1 }
 0x129   : > { %v830_v37 = vpop.f32.mrb[8].mxu1 }
 0x12a   : > { %v903_v38 = vpop.f32.mrb[8].mxu0  ;;  %v832_v40 = vpop.f32.mrb[9].mxu1 }
 0x12b   : > { %v904_v39 = vadd.f32 %v903_v38, %v830_v37  ;;  %v905_v41 = vpop.f32.mrb[9].mxu0  ;;  %v834_v43 = vpop.f32.mrb[10].mxu1 }
 0x12c   : > { %v906_v42 = vadd.f32 %v905_v41, %v832_v40  ;;  %v907_v44 = vpop.f32.mrb[10].mxu0  ;;  %v836_v46 = vpop.f32.mrb[11].mxu1 }
 0x12d   : > { %v908_v45 = vadd.f32 %v907_v44, %v834_v43  ;;  %v909_v47 = vpop.f32.mrb[11].mxu0 }
 0x12e   : > { %v910_v49 = vadd.f32 %v909_v47, %v836_v46 }
 0x131   : > { %v840_v51 = vpop.f32.mrb[12].mxu1 }
 0x132   : > { %v913_v52 = vpop.f32.mrb[12].mxu0  ;;  %v842_v54 = vpop.f32.mrb[13].mxu1 }
 0x133   : > { %v914_v53 = vadd.f32 %v913_v52, %v840_v51  ;;  %v915_v55 = vpop.f32.mrb[13].mxu0  ;;  %v844_v57 = vpop.f32.mrb[14].mxu1 }
 0x134   : > { %v916_v56 = vadd.f32 %v915_v55, %v842_v54  ;;  %v917_v58 = vpop.f32.mrb[14].mxu0  ;;  %v846_v60 = vpop.f32.mrb[15].mxu1 }
 0x135   : > { %v1772_v59 = vadd.f32 %v917_v58, %v844_v57  ;;  %v919_v61 = vpop.f32.mrb[15].mxu0 }
 0x136   : > { %v1774_v63 = vadd.f32 %v919_v61, %v846_v60 }
 0x139   : > { %v976_v5 = vpop.f32.mrb[16].mxu1 }
 0x13a   : > { %v956_v4 = vpop.f32.mrb[0].mxu0  ;;  %v977_v9 = vadd.f32 %v976_v5, %v904_v39  ;;  %v978_v11 = vpop.f32.mrb[17].mxu1 }
 0x13b   : > { %v1298_v7 = vadd.f32 %v956_v4, %v810_v29  ;;  %v958_v10 = vpop.f32.mrb[1].mxu0  ;;  %v979_v14 = vadd.f32 %v978_v11, %v906_v42  ;;  %v980_v16 = vpop.f32.mrb[18].mxu1 }
 0x13c   : > { %v1299_v12 = vadd.f32 %v958_v10, %v812_v30  ;;  %v960_v15 = vpop.f32.mrb[2].mxu0  ;;  %v1015_v18 = vmul.f32 %v1782_v3, %v977_v9  ;;  %v981_v20 = vadd.f32 %v980_v16, %v908_v45  ;;  %v982_v22 = vpop.f32.mrb[19].mxu1 }
 0x13d   : > { %v1007_v17 = vmul.f32 %v1298_v7, %v1782_v3  ;;  %v1300_v19 = vadd.f32 %v960_v15, %v814_v31  ;;  %v962_v21 = vpop.f32.mrb[3].mxu0  ;;  %v1016_v24 = vmul.f32 %v1784_v6, %v979_v14  ;;  %v983_v26 = vadd.f32 %v982_v22, %v910_v49 }
 0x13e   : > { %v1008_v23 = vmul.f32 %v1299_v12, %v1784_v6  ;;  %v1301_v25 = vadd.f32 %v962_v21, %v816_v32  ;;  %v1043_v28 = vadd.f32 %v1786_v8, %v1015_v18  ;;  %v1017_v30 = vmul.f32 %v1782_v3, %v981_v20 }
 0x13f   : > { %v1035_v27 = vadd.f32 %v1786_v8, %v1007_v17  ;;  %v1009_v29 = vmul.f32 %v1300_v19, %v1782_v3  ;;  %v1044_v37 = vadd.f32 %v1788_v13, %v1016_v24  ;;  %v1018_v39 = vmul.f32 %v1784_v6, %v983_v26 }
 0x140   : > { %v1036_v31 = vadd.f32 %v1788_v13, %v1008_v23  ;;  %v1010_v38 = vmul.f32 %v1301_v25, %v1784_v6  ;;  %v1045_v40 = vadd.f32 %v1786_v8, %v1017_v30 }
 0x141   : > { %v1037_v32 = vadd.f32 %v1786_v8, %v1009_v29  ;;  %v1286_v42 = vpack.c.bf16 %v1044_v37, %v1043_v28  ;;  %v1046_v44 = vadd.f32 %v1788_v13, %v1018_v39  ;;  %v986_v46 = vpop.f32.mrb[20].mxu1 }
 0x142   : > { %v1282_v41 = vpack.c.bf16 %v1036_v31, %v1035_v27  ;;  %v1038_v43 = vadd.f32 %v1788_v13, %v1010_v38  ;;  %v966_v45 = vpop.f32.mrb[4].mxu0  ;;  %v987_v48 = vadd.f32 %v986_v46, %v914_v53  ;;  %v988_v50 = vpop.f32.mrb[21].mxu1 }
 0x143   : > { %v1302_v47 = vadd.f32 %v966_v45, %v1764_v33  ;;  %v968_v49 = vpop.f32.mrb[5].mxu0  ;;  %1103 = vst [vmem:[%s1806_s28 + $0x20] sm:$0xff] %v1286_v42  ;;  %v1287_v52 = vpack.c.bf16 %v1046_v44, %v1045_v40  ;;  %v989_v55 = vadd.f32 %v988_v50, %v916_v56  ;;  %v990_v58 = vpop.f32.mrb[22].mxu1 }
 0x144   : > { %1099 = vst [vmem:[%s1806_s28] sm:$0xff] %v1282_v41  ;;  %v1283_v51 = vpack.c.bf16 %v1038_v43, %v1037_v32  ;;  %v1303_v54 = vadd.f32 %v968_v49, %v1766_v34  ;;  %v970_v57 = vpop.f32.mrb[6].mxu0  ;;  %v1019_v61 = vmul.f32 %v1782_v3, %v987_v48  ;;  %v991_v53 = vadd.f32 %v990_v58, %v1772_v59  ;;  %v992_v0 = vpop.f32.mrb[23].mxu1 }
 0x145   : > { %v1011_v60 = vmul.f32 %v1302_v47, %v1782_v3  ;;  %v1304_v33 = vadd.f32 %v970_v57, %v1768_v35  ;;  %v972_v62 = vpop.f32.mrb[7].mxu0  ;;  %1104 = vst [vmem:[%s1806_s28 + $0x28] sm:$0xff] %v1287_v52  ;;  %v1020_v2 = vmul.f32 %v1784_v6, %v989_v55  ;;  %v993_v56 = vadd.f32 %v992_v0, %v1774_v63 }
 0x146   : > { %1100 = vst [vmem:[%s1806_s28 + $0x8] sm:$0xff] %v1283_v51  ;;  %v1012_v1 = vmul.f32 %v1303_v54, %v1784_v6  ;;  %v1305_v34 = vadd.f32 %v972_v62, %v1770_v36  ;;  %v1047_v35 = vadd.f32 %v1786_v8, %v1019_v61  ;;  %v1021_v5 = vmul.f32 %v1782_v3, %v991_v53 }
 0x147   : > { %v1039_v4 = vadd.f32 %v1786_v8, %v1011_v60  ;;  %v1013_v59 = vmul.f32 %v1304_v33, %v1782_v3  ;;  %v1048_v9 = vadd.f32 %v1788_v13, %v1020_v2  ;;  %v1022_v10 = vmul.f32 %v1784_v6, %v993_v56 }
 0x148   : > { %v1040_v7 = vadd.f32 %v1788_v13, %v1012_v1  ;;  %v1014_v36 = vmul.f32 %v1305_v34, %v1784_v6  ;;  %v1049_v11 = vadd.f32 %v1786_v8, %v1021_v5 }
 0x149   : > { %v1041_v63 = vadd.f32 %v1786_v8, %v1013_v59  ;;  %v1288_v14 = vpack.c.bf16 %v1048_v9, %v1047_v35  ;;  %v1050_v16 = vadd.f32 %v1788_v13, %v1022_v10 }
 0x14a   : > { %v1284_v12 = vpack.c.bf16 %v1040_v7, %v1039_v4  ;;  %v1042_v15 = vadd.f32 %v1788_v13, %v1014_v36 }
 0x14b   : > { %1105 = vst [vmem:[%s1806_s28 + $0x30] sm:$0xff] %v1288_v14  ;;  %v1289_v17 = vpack.c.bf16 %v1050_v16, %v1049_v11 }
 0x14c   : > { %1101 = vst [vmem:[%s1806_s28 + $0x10] sm:$0xff] %v1284_v12  ;;  %v1285_v3 = vpack.c.bf16 %v1042_v15, %v1041_v63 }
 0x14d   : > { %1106 = vst [vmem:[%s1806_s28 + $0x38] sm:$0xff] %v1289_v17 }
 0x14e   : > { %1102 = vst [vmem:[%s1806_s28 + $0x18] sm:$0xff] %v1285_v3 }
 0x14f PF: > { %s14_s15 = sadd.s32 1, %s1482_s15  }
 0x150   : > { %p11_p4 = scmp.ge.s32.totalorder %s14_s15, 4  }
 0x152   :  { %13 = sbr.rel (!%p11_p4) target bundleno = 1 (0x1), region = 66 }

// kernel: bevencode_forward.20
= control target key start
LH: loop header
LB: loop body
LE: loop exit
PB: predicated region body
PF: predicated region fallthrough
CT: control target
= control target key end

     0   :  { %s951_s15 = smov 0   ;;  %s1088_s0 = inlined_call_operand.vmem [shape: bf16[32,576], index: 0, kind: input, shape index: {}]   ;;  %s1089_s1 = inlined_call_operand.vmem [shape: bf16[576,128], index: 1, kind: input, shape index: {}]   ;;  %s1090_s2 = inlined_call_operand.vmem [shape: f32[1,128], index: 2, kind: input, shape index: {}]   ;;  %s1091_s3 = inlined_call_operand.vmem [shape: f32[1,128], index: 3, kind: input, shape index: {}]   ;;  %s1092_s4 = inlined_call_operand.vmem [shape: bf16[32,128], index: 4, kind: output, shape index: {}]  }
   0x1 LB: > { %s737_s16 = sadd.s32 4294967295, %s922_s15   ;;  %p741_p0 = scmp.ge.s32.totalorder %s922_s15, 1  ;;  %s922_s15 = sphi %s951_s15, %s14_s15  }
   0x2   : > { %p164_p1 = scmp.lt.s32.totalorder %s922_s15, 3 }
   0x4   : > { %p165_p2 = pnand %p741_p0, %p164_p1 }
   0x5   : > { %v873_v0 = vld [vmem:[%s1089_s1 + $0x40] sm:$0xff] (!%p165_p2)   ;;  %v877_v4 = vld [vmem:[%s1089_s1 + $0x48] sm:$0xff] (!%p165_p2)   ;;  %v881_v8 = vld [vmem:[%s1089_s1 + $0x50] sm:$0xff] (!%p165_p2)   ;;  %s742_s23 = sshll.u32 (!%p165_p2), %s737_s16, 1  ;;  %v924_v34 = vmov (!%p165_p2), 0.0   ;;  %vm925_vm0 = vmmov (!%p165_p2), 0  }
   0x6   : > { %168 = sbr.rel (%p165_p2) target bundleno = 280 (0x118), region = 36  ;;  %v874_v1 = vld [vmem:[%s1089_s1 + $0xc0] sm:$0xff] (!%p165_p2)   ;;  %801 = vmatprep.subr.bf16.mxu0 (!%p165_p2), %v873_v0  ;;  %v878_v5 = vld [vmem:[%s1089_s1 + $0xc8] sm:$0xff] (!%p165_p2)   ;;  %v882_v9 = vld [vmem:[%s1089_s1 + $0xd0] sm:$0xff] (!%p165_p2)   ;;  %p192_p3 = scmp.lt.s32.totalorder (!%p165_p2), %s742_s23, 3  ;;  %vm524_vm1 = vcmask (!%p165_p2), 523264  }
   0x7   : > { %v875_v2 = vld [vmem:[%s1089_s1] sm:$0xff] (!%p165_p2)   ;;  %823 = vmatprep.subr.bf16.mxu1 (!%p165_p2), %v874_v1  ;;  %v879_v6 = vld [vmem:[%s1089_s1 + $0x8] sm:$0xff] (!%p165_p2)   ;;  %v883_v10 = vld [vmem:[%s1089_s1 + $0x10] sm:$0xff] (!%p165_p2)  }
   0x8   : > { %v876_v3 = vld [vmem:[%s1089_s1 + $0x80] sm:$0xff] (!%p165_p2)   ;;  %802 = vmatpush3.bf16.msra.mxu0 (!%p165_p2), %v875_v2  ;;  %v880_v7 = vld [vmem:[%s1089_s1 + $0x88] sm:$0xff] (!%p165_p2)   ;;  %v884_v11 = vld [vmem:[%s1089_s1 + $0x90] sm:$0xff] (!%p165_p2)  }
   0x9   : > { %824 = vmatpush3.bf16.msra.mxu1 (!%p165_p2), %v876_v3  ;;  %803 = vmatprep.subr.bf16.mxu0 (!%p165_p2), %v877_v4  ;;  %v885_v12 = vld [vmem:[%s1089_s1 + $0x58] sm:$0xff] (!%p165_p2)   ;;  %v889_v16 = vld [vmem:[%s1089_s1 + $0x60] sm:$0xff] (!%p165_p2)   ;;  %v893_v20 = vld [vmem:[%s1089_s1 + $0x68] sm:$0xff] (!%p165_p2)  }
   0xa   : > { %825 = vmatprep.subr.bf16.mxu1 (!%p165_p2), %v878_v5  ;;  %v886_v13 = vld [vmem:[%s1089_s1 + $0xd8] sm:$0xff] (!%p165_p2)   ;;  %v890_v17 = vld [vmem:[%s1089_s1 + $0xe0] sm:$0xff] (!%p165_p2)   ;;  %v894_v21 = vld [vmem:[%s1089_s1 + $0xe8] sm:$0xff] (!%p165_p2)  }
   0xb   : > { %v887_v14 = vld [vmem:[%s1089_s1 + $0x18] sm:$0xff] (!%p165_p2)   ;;  %v891_v18 = vld [vmem:[%s1089_s1 + $0x20] sm:$0xff] (!%p165_p2)   ;;  %v895_v22 = vld [vmem:[%s1089_s1 + $0x28] sm:$0xff] (!%p165_p2)  }
   0xc   : > { %804 = vmatpush3.bf16.msra.mxu0 (!%p165_p2), %v879_v6  ;;  %v888_v15 = vld [vmem:[%s1089_s1 + $0x98] sm:$0xff] (!%p165_p2)   ;;  %v892_v19 = vld [vmem:[%s1089_s1 + $0xa0] sm:$0xff] (!%p165_p2)   ;;  %v896_v23 = vld [vmem:[%s1089_s1 + $0xa8] sm:$0xff] (!%p165_p2)  }
   0xd   : > { %826 = vmatpush3.bf16.msra.mxu1 %v880_v7  ;;  %805 = vmatprep.subr.bf16.mxu0 %v881_v8  ;;  %s1094_s23 = smov (!%p192_p3, %s742_s23), 3  ;;  %v897_v24 = vld [vmem:[%s1089_s1 + $0x70] sm:$0xff]   ;;  %v901_v28 = vld [vmem:[%s1089_s1 + $0x78] sm:$0xff]   ;;  %v911_v37 = vld [vmem:[%s1089_s1 + $0x100] sm:$0xff]  }
   0xe   : > { %827 = vmatprep.subr.bf16.mxu1 %v882_v9  ;;  %v898_v25 = vld [vmem:[%s1089_s1 + $0xf0] sm:$0xff]   ;;  %s862_s21 = smul.u32 20, %s1094_s23  ;;  %v902_v29 = vld [vmem:[%s1089_s1 + $0xf8] sm:$0xff]   ;;  %v912_v38 = vld [vmem:[%s1089_s1 + $0x108] sm:$0xff]   ;;  %s745_s26 = sshll.u32 %s1094_s23, 2 }
   0xf   : > { %v899_v26 = vld [vmem:[%s1089_s1 + $0x30] sm:$0xff]   ;;  %v903_v30 = vld [vmem:[%s1089_s1 + $0x38] sm:$0xff]   ;;  %v788_v57 = vld [vmem:[%s1090_s2] ss:$0 sm:$0xff]  ;;  %s202_s29 = scalar_lea.vmem %s1092_s4, %s745_s26 }
  0x10   : > { %806 = vmatpush3.bf16.msra.mxu0 %v883_v10  ;;  %v900_v27 = vld [vmem:[%s1089_s1 + $0xb0] sm:$0xff]   ;;  %s196_s6 = scalar_lea.vmem %s1088_s0, %s862_s21  ;;  %v904_v31 = vld [vmem:[%s1089_s1 + $0xb8] sm:$0xff]   ;;  %v789_v60 = vld [vmem:[%s1091_s3] ss:$0 sm:$0xff] }
  0x11   : > { %828 = vmatpush3.bf16.msra.mxu1 %v884_v11  ;;  %807 = vmatprep.subr.bf16.mxu0 %v885_v12  ;;  %v905_v32 = vld [vmem:[%s196_s6] ss:$20 sps:$4 sm:$0xff]   ;;  %v907_v33 = vld [vmem:[%s196_s6 + $0x4] ss:$20 sps:$4 sm:$0xff]   ;;  %v908_v35 = vld [vmem:[%s196_s6 + $0x8] ss:$20 sps:$4 sm:$0xff]  }
  0x12   : > { %829 = vmatprep.subr.bf16.mxu1 %v886_v13  ;;  %v910_v36 = vld [vmem:[%s196_s6 + $0xc] ss:$20 sps:$4 sm:$0xff]   ;;  %560 = vmatprep.mubr.bf16.mxu0 %v907_v33  ;;  %v913_v39 = vld [vmem:[%s1089_s1 + $0x110] sm:$0xff]   ;;  %v914_v40 = vld [vmem:[%s1089_s1 + $0x118] sm:$0xff]  }
  0x13   : > { %601 = vmatprep.mubr.bf16.mxu1 %v910_v36  ;;  %v915_v41 = vld [vmem:[%s196_s6 + $0x10] ss:$20 sps:$4 sm:$0xff]  }
  0x14   : > { %808 = vmatpush3.bf16.msra.mxu0 %v887_v14 }
  0x15   : > { %830 = vmatpush3.bf16.msra.mxu1 %v888_v15  ;;  %809 = vmatprep.subr.bf16.mxu0 %v889_v16 }
  0x16   : > { %831 = vmatprep.subr.bf16.mxu1 %v890_v17 }
  0x18   : > { %810 = vmatpush3.bf16.msra.mxu0 %v891_v18 }
  0x19   : > { %832 = vmatpush3.bf16.msra.mxu1 %v892_v19  ;;  %811 = vmatprep.subr.bf16.mxu0 %v893_v20 }
  0x1a   : > { %833 = vmatprep.subr.bf16.mxu1 %v894_v21 }
  0x1c   : > { %812 = vmatpush3.bf16.msra.mxu0 %v895_v22 }
  0x1d   : > { %834 = vmatpush3.bf16.msra.mxu1 %v896_v23  ;;  %813 = vmatprep.subr.bf16.mxu0 %v897_v24 }
  0x1e   : > { %835 = vmatprep.subr.bf16.mxu1 %v898_v25 }
  0x20   : > { %814 = vmatpush3.bf16.msra.mxu0 %v899_v26 }
  0x21   : > { %836 = vmatpush3.bf16.msra.mxu1 %v900_v27  ;;  %815 = vmatprep.subr.bf16.mxu0 %v901_v28 }
  0x22   : > { %837 = vmatprep.subr.bf16.mxu1 %v902_v29 }
  0x24   : > { %816 = vmatpush3.bf16.msra.mxu0 %v903_v30 }
  0x25   : > { %838 = vmatpush3.bf16.msra.mxu1 %v904_v31  ;;  %850 = vmatprep.subr.bf16.mxu0 %v924_v34 }
  0x27   : > { %561 = vmatmul.mubr.bf16.vlgmr.msra.gmra.mrb[0].mxu0 %v905_v32 }
  0x28   : > { %602 = vmatmul.mubr.bf16.vlgmr.msra.gmra.mrb[0].mxu1 %v908_v35  ;;  %851 = vmatpush3.bf16.msra.mxu0 %v911_v37 }
  0x29   : > { %852 = vmatprep.subr.bf16.mxu0 %v924_v34  ;;  %858 = vmatprep.mubr.msk.bf16.mxu0 %vm925_vm0, %v924_v34 }
  0x2c   : > { %853 = vmatpush3.bf16.msra.mxu0 %v912_v38 }
  0x2d   : > { %854 = vmatprep.subr.bf16.mxu0 %v924_v34 }
  0x30   : > { %855 = vmatpush3.bf16.msra.mxu0 %v913_v39 }
  0x31   : > { %856 = vmatprep.subr.bf16.mxu0 %v924_v34 }
  0x34   : > { %857 = vmatpush3.bf16.msra.mxu0 %v914_v40 }
  0x37   : > { %859 = vmatmul.mubr.msk.bf16.vlgmr.msra.gmra.mrb[4].mxu0 %vm524_vm1, %v915_v41 }
  0xfa   : > { %v817_v42 = vpop.f32.mrb[0].mxu0 }
  0xfb   : > { %v839_v43 = vpop.f32.mrb[0].mxu1  ;;  %v818_v44 = vpop.f32.mrb[1].mxu0 }
  0xfc   : > { %v819_v45 = vadd.f32 %v818_v44, %v817_v42  ;;  %v840_v46 = vpop.f32.mrb[1].mxu1  ;;  %v820_v47 = vpop.f32.mrb[2].mxu0 }
  0xfd   : > { %v841_v48 = vadd.f32 %v840_v46, %v839_v43  ;;  %v842_v49 = vpop.f32.mrb[2].mxu1  ;;  %v821_v50 = vpop.f32.mrb[3].mxu0 }
  0xfe   : > { %v822_v51 = vadd.f32 %v821_v50, %v820_v47  ;;  %v843_v52 = vpop.f32.mrb[3].mxu1 }
  0xff   : > { %v844_v53 = vadd.f32 %v843_v52, %v842_v49  ;;  %v604_v54 = vadd.f32 %v841_v48, %v819_v45 }
 0x101   : > { %v607_v55 = vadd.f32 %v844_v53, %v822_v51 }
 0x10a   : > { %v644_v56 = vpop.f32.mrb[4].mxu0 }
 0x10b   : > { %v645_v58 = vadd.f32 %v644_v56, %v604_v54  ;;  %v860_v59 = vpop.f32.mrb[5].mxu0 }
 0x10c   : > { %v647_v61 = vpop.f32.mrb[6].mxu0 }
 0x10d   : > { %v658_v62 = vmul.f32 %v788_v57, %v645_v58  ;;  %v648_v63 = vadd.f32 %v647_v61, %v607_v55  ;;  %v861_v0 = vpop.f32.mrb[7].mxu0 }
 0x10f   : > { %v667_v1 = vadd.f32 %v789_v60, %v658_v62  ;;  %v659_v2 = vmul.f32 %v788_v57, %v648_v63 }
 0x111   : > { %v668_v3 = vadd.f32 %v789_v60, %v659_v2  ;;  %v669_v4 = vmax.f32 %v667_v1, 0.0 }
 0x113   : > { %v670_v5 = vmax.f32 %v668_v3, 0.0 }
 0x115   : > { %v799_v6 = vpack.c.bf16 %v670_v5, %v669_v4 }
 0x117   : > { %800 = vst [vmem:[%s202_s29] sm:$0xff] %v799_v6  }
 0x118 PF: > { %s14_s15 = sadd.s32 1, %s922_s15  }
 0x119   : > { %p11_p4 = scmp.ge.s32.totalorder %s14_s15, 4  }
 0x11b   :  { %13 = sbr.rel (!%p11_p4) target bundleno = 1 (0x1), region = 66 }

// kernel: bevencode_forward.21
= control target key start
LH: loop header
LB: loop body
LE: loop exit
PB: predicated region body
PF: predicated region fallthrough
CT: control target
= control target key end

     0   :  { %s465_s15 = smov 0   ;;  %s500_s0 = inlined_call_operand.vmem [shape: bf16[32,64], index: 0, kind: input, shape index: {}]   ;;  %s501_s1 = inlined_call_operand.vmem [shape: bf16[64,128], index: 1, kind: input, shape index: {}]   ;;  %s502_s2 = inlined_call_operand.vmem [shape: f32[1,128], index: 2, kind: input, shape index: {}]   ;;  %s503_s3 = inlined_call_operand.vmem [shape: f32[1,128], index: 3, kind: input, shape index: {}]   ;;  %s504_s4 = inlined_call_operand.vmem [shape: bf16[32,128], index: 4, kind: output, shape index: {}]  }
   0x1 LB: > { %s370_s16 = sadd.s32 4294967295, %s436_s15   ;;  %p374_p0 = scmp.ge.s32.totalorder %s436_s15, 1  ;;  %s436_s15 = sphi %s465_s15, %s14_s15  }
   0x2   : > { %p163_p1 = scmp.lt.s32.totalorder %s436_s15, 3 }
   0x4   : > { %p164_p2 = pnand %p374_p0, %p163_p1 }
   0x5   : > { %v425_v0 = vld [vmem:[%s501_s1] sm:$0xff] (!%p164_p2)   ;;  %v438_v1 = vmov (!%p164_p2), 0.0   ;;  %v426_v2 = vld [vmem:[%s501_s1 + $0x8] sm:$0xff] (!%p164_p2)   ;;  %vm439_vm0 = vmmov (!%p164_p2), 0   ;;  %s375_s21 = sshll.u32 (!%p164_p2), %s370_s16, 1  ;;  %v427_v3 = vld [vmem:[%s501_s1 + $0x10] sm:$0xff] (!%p164_p2)  }
   0x6   : > { %167 = sbr.rel (%p164_p2) target bundleno = 243 (0xf3), region = 36  ;;  %403 = vmatprep.subr.bf16.mxu0 (!%p164_p2), %v438_v1  ;;  %411 = vmatprep.mubr.msk.bf16.mxu0 (!%p164_p2), %vm439_vm0, %v438_v1  ;;  %p190_p3 = scmp.lt.s32.totalorder (!%p164_p2), %s375_s21, 3  ;;  %v428_v4 = vld [vmem:[%s501_s1 + $0x18] sm:$0xff] (!%p164_p2)   ;;  %vm241_vm1 = vcmask (!%p164_p2), 523264   ;;  %v385_v6 = vld [vmem:[%s502_s2] ss:$0 sm:$0xff] (!%p164_p2) }
   0x7   : > { %404 = vmatpush3.bf16.msra.mxu0 (!%p164_p2), %v425_v0  ;;  %v386_v10 = vld [vmem:[%s503_s3] ss:$0 sm:$0xff] (!%p164_p2) }
   0x8   : > { %405 = vmatprep.subr.bf16.mxu0 (!%p164_p2), %v438_v1 }
   0xb   : > { %406 = vmatpush3.bf16.msra.mxu0 (!%p164_p2), %v426_v2 }
   0xc   : > { %407 = vmatprep.subr.bf16.mxu0 (!%p164_p2), %v438_v1 }
   0xd   : > { %s506_s21 = smov (!%p190_p3, %s375_s21), 3 }
   0xe   : > { %s376_s24 = sshll.u32 %s506_s21, 2 }
   0xf   : > { %s193_s27 = scalar_lea.vmem %s500_s0, %s376_s24  ;;  %408 = vmatpush3.bf16.msra.mxu0 %v427_v3  ;;  %s199_s10 = scalar_lea.vmem %s504_s4, %s376_s24 }
  0x10   : > { %409 = vmatprep.subr.bf16.mxu0 %v438_v1  ;;  %v429_v5 = vld [vmem:[%s193_s27] sm:$0xff]  }
  0x13   : > { %410 = vmatpush3.bf16.msra.mxu0 %v428_v4 }
  0x16   : > { %412 = vmatmul.mubr.msk.bf16.vlgmr.msra.gmra.mrb[0].mxu0 %vm241_vm1, %v429_v5 }
  0xe9   : > { %v279_v7 = vpop.f32.mrb[0].mxu0 }
  0xea   : > { %v293_v8 = vmul.f32 %v385_v6, %v279_v7  ;;  %v413_v9 = vpop.f32.mrb[1].mxu0 }
  0xeb   : > { %v282_v11 = vpop.f32.mrb[2].mxu0 }
  0xec   : > { %v294_v12 = vmul.f32 %v385_v6, %v282_v11  ;;  %v414_v13 = vpop.f32.mrb[3].mxu0  ;;  %v302_v14 = vadd.f32 %v386_v10, %v293_v8 }
  0xee   : > { %v303_v15 = vadd.f32 %v386_v10, %v294_v12 }
  0xf0   : > { %v396_v16 = vpack.c.bf16 %v303_v15, %v302_v14 }
  0xf2   : > { %397 = vst [vmem:[%s199_s10] sm:$0xff] %v396_v16  }
  0xf3 PF: > { %s14_s15 = sadd.s32 1, %s436_s15  }
  0xf4   : > { %p11_p4 = scmp.ge.s32.totalorder %s14_s15, 4  }
  0xf6   :  { %13 = sbr.rel (!%p11_p4) target bundleno = 1 (0x1), region = 66 }

// kernel: bevencode_forward.22
= control target key start
LH: loop header
LB: loop body
LE: loop exit
PB: predicated region body
PF: predicated region fallthrough
CT: control target
= control target key end

     0   :  { %s1557_s18 = smov 0   ;;  %s1816_s0 = inlined_call_operand.vmem [shape: bf16[32,1152], index: 0, kind: input, shape index: {}]   ;;  %s1817_s1 = inlined_call_operand.vmem [shape: bf16[1152,128], index: 1, kind: input, shape index: {}]   ;;  %s1818_s2 = inlined_call_operand.vmem [shape: f32[1,128], index: 2, kind: input, shape index: {}]   ;;  %s1819_s3 = inlined_call_operand.vmem [shape: f32[1,128], index: 3, kind: input, shape index: {}]   ;;  %s1820_s4 = inlined_call_operand.vmem [shape: bf16[32,128], index: 4, kind: input, shape index: {}]   ;;  %s1821_s5 = inlined_call_operand.vmem [shape: bf16[32,128], index: 5, kind: output, shape index: {}]  }
   0x1 LB: > { %s1195_s19 = sadd.s32 4294967295, %s1523_s18   ;;  %p1199_p0 = scmp.ge.s32.totalorder %s1523_s18, 1  ;;  %s1523_s18 = sphi %s1557_s18, %s15_s18  }
   0x2   : > { %p200_p1 = scmp.lt.s32.totalorder %s1523_s18, 3 }
   0x4   : > { %p201_p2 = pnand %p1199_p0, %p200_p1 }
   0x5   : > { %v1432_v0 = vld [vmem:[%s1817_s1 + $0x40] sm:$0xff] (!%p201_p2)   ;;  %v1436_v4 = vld [vmem:[%s1817_s1 + $0x48] sm:$0xff] (!%p201_p2)   ;;  %v1440_v8 = vld [vmem:[%s1817_s1 + $0x50] sm:$0xff] (!%p201_p2)   ;;  %s1200_s27 = sshll.u32 (!%p201_p2), %s1195_s19, 1  ;;  %vm1526_vm0 = vmmov (!%p201_p2), 0  }
   0x6   : > { %204 = sbr.rel (%p201_p2) target bundleno = 330 (0x14a), region = 40  ;;  %v1433_v1 = vld [vmem:[%s1817_s1 + $0xc0] sm:$0xff] (!%p201_p2)   ;;  %1304 = vmatprep.subr.bf16.mxu0 (!%p201_p2), %v1432_v0  ;;  %v1437_v5 = vld [vmem:[%s1817_s1 + $0xc8] sm:$0xff] (!%p201_p2)   ;;  %v1441_v9 = vld [vmem:[%s1817_s1 + $0xd0] sm:$0xff] (!%p201_p2)   ;;  %p235_p3 = scmp.lt.s32.totalorder (!%p201_p2), %s1200_s27, 3 }
   0x7   : > { %v1434_v2 = vld [vmem:[%s1817_s1] sm:$0xff] (!%p201_p2)   ;;  %1326 = vmatprep.subr.bf16.mxu1 (!%p201_p2), %v1433_v1  ;;  %v1438_v6 = vld [vmem:[%s1817_s1 + $0x8] sm:$0xff] (!%p201_p2)   ;;  %v1442_v10 = vld [vmem:[%s1817_s1 + $0x10] sm:$0xff] (!%p201_p2)  }
   0x8   : > { %v1435_v3 = vld [vmem:[%s1817_s1 + $0x80] sm:$0xff] (!%p201_p2)   ;;  %1305 = vmatpush3.bf16.msra.mxu0 (!%p201_p2), %v1434_v2  ;;  %v1439_v7 = vld [vmem:[%s1817_s1 + $0x88] sm:$0xff] (!%p201_p2)   ;;  %v1443_v11 = vld [vmem:[%s1817_s1 + $0x90] sm:$0xff] (!%p201_p2)  }
   0x9   : > { %1327 = vmatpush3.bf16.msra.mxu1 (!%p201_p2), %v1435_v3  ;;  %1306 = vmatprep.subr.bf16.mxu0 (!%p201_p2), %v1436_v4  ;;  %v1444_v12 = vld [vmem:[%s1817_s1 + $0x58] sm:$0xff] (!%p201_p2)   ;;  %v1448_v16 = vld [vmem:[%s1817_s1 + $0x60] sm:$0xff] (!%p201_p2)   ;;  %v1452_v20 = vld [vmem:[%s1817_s1 + $0x68] sm:$0xff] (!%p201_p2)  }
   0xa   : > { %1328 = vmatprep.subr.bf16.mxu1 (!%p201_p2), %v1437_v5  ;;  %v1445_v13 = vld [vmem:[%s1817_s1 + $0xd8] sm:$0xff] (!%p201_p2)   ;;  %v1449_v17 = vld [vmem:[%s1817_s1 + $0xe0] sm:$0xff] (!%p201_p2)   ;;  %v1453_v21 = vld [vmem:[%s1817_s1 + $0xe8] sm:$0xff] (!%p201_p2)  }
   0xb   : > { %v1446_v14 = vld [vmem:[%s1817_s1 + $0x18] sm:$0xff] (!%p201_p2)   ;;  %v1450_v18 = vld [vmem:[%s1817_s1 + $0x20] sm:$0xff] (!%p201_p2)   ;;  %v1454_v22 = vld [vmem:[%s1817_s1 + $0x28] sm:$0xff] (!%p201_p2)  }
   0xc   : > { %1307 = vmatpush3.bf16.msra.mxu0 (!%p201_p2), %v1438_v6  ;;  %v1447_v15 = vld [vmem:[%s1817_s1 + $0x98] sm:$0xff] (!%p201_p2)   ;;  %v1451_v19 = vld [vmem:[%s1817_s1 + $0xa0] sm:$0xff] (!%p201_p2)   ;;  %v1455_v23 = vld [vmem:[%s1817_s1 + $0xa8] sm:$0xff] (!%p201_p2)   ;;  %v1525_v6 = vmov (!%p201_p2), 0.0  }
   0xd   : > { %1329 = vmatpush3.bf16.msra.mxu1 %v1439_v7  ;;  %1308 = vmatprep.subr.bf16.mxu0 %v1440_v8  ;;  %s1823_s27 = smov (!%p235_p3, %s1200_s27), 3  ;;  %v1456_v24 = vld [vmem:[%s1817_s1 + $0x70] sm:$0xff]   ;;  %v1460_v28 = vld [vmem:[%s1817_s1 + $0x78] sm:$0xff]   ;;  %v1470_v36 = vld [vmem:[%s1817_s1 + $0x140] sm:$0xff]  }
   0xe   : > { %1330 = vmatprep.subr.bf16.mxu1 %v1441_v9  ;;  %v1457_v25 = vld [vmem:[%s1817_s1 + $0xf0] sm:$0xff]   ;;  %s1421_s26 = smul.u32 36, %s1823_s27  ;;  %v1461_v29 = vld [vmem:[%s1817_s1 + $0xf8] sm:$0xff]   ;;  %v1471_v37 = vld [vmem:[%s1817_s1 + $0x100] sm:$0xff]  }
   0xf   : > { %v1458_v26 = vld [vmem:[%s1817_s1 + $0x30] sm:$0xff]   ;;  %v1462_v30 = vld [vmem:[%s1817_s1 + $0x38] sm:$0xff]   ;;  %v1472_v38 = vld [vmem:[%s1817_s1 + $0x1c0] sm:$0xff]  }
  0x10   : > { %1309 = vmatpush3.bf16.msra.mxu0 %v1442_v10  ;;  %v1459_v27 = vld [vmem:[%s1817_s1 + $0xb0] sm:$0xff]   ;;  %s1663_s12 = scalar_lea.vmem %s1816_s0, %s1421_s26  ;;  %v1463_v31 = vld [vmem:[%s1817_s1 + $0xb8] sm:$0xff]   ;;  %v1473_v39 = vld [vmem:[%s1817_s1 + $0x180] sm:$0xff]  }
  0x11   : > { %1331 = vmatpush3.bf16.msra.mxu1 %v1443_v11  ;;  %1310 = vmatprep.subr.bf16.mxu0 %v1444_v12  ;;  %v1464_v32 = vld [vmem:[%s1663_s12] ss:$36 sps:$4 sm:$0xff]   ;;  %v1467_v34 = vld [vmem:[%s1663_s12 + $0x8] ss:$36 sps:$4 sm:$0xff]   ;;  %v1478_v44 = vld [vmem:[%s1817_s1 + $0x150] sm:$0xff]  }
  0x12   : > { %1332 = vmatprep.subr.bf16.mxu1 %v1445_v13  ;;  %v1466_v33 = vld [vmem:[%s1663_s12 + $0x4] ss:$36 sps:$4 sm:$0xff]   ;;  %v1469_v35 = vld [vmem:[%s1663_s12 + $0xc] ss:$36 sps:$4 sm:$0xff]   ;;  %v1482_v48 = vld [vmem:[%s1817_s1 + $0x158] sm:$0xff]  }
  0x13   : > { %918 = vmatprep.mubr.bf16.mxu0 %v1466_v33  ;;  %959 = vmatprep.mubr.bf16.mxu1 %v1469_v35  ;;  %v1474_v40 = vld [vmem:[%s1817_s1 + $0x148] sm:$0xff]   ;;  %v1479_v45 = vld [vmem:[%s1817_s1 + $0x110] sm:$0xff]   ;;  %v1483_v49 = vld [vmem:[%s1817_s1 + $0x118] sm:$0xff]  }
  0x14   : > { %1311 = vmatpush3.bf16.msra.mxu0 %v1446_v14  ;;  %v1475_v41 = vld [vmem:[%s1817_s1 + $0x108] sm:$0xff]   ;;  %v1480_v46 = vld [vmem:[%s1817_s1 + $0x1d0] sm:$0xff]   ;;  %v1484_v50 = vld [vmem:[%s1817_s1 + $0x1d8] sm:$0xff]  }
  0x15   : > { %1333 = vmatpush3.bf16.msra.mxu1 %v1447_v15  ;;  %1312 = vmatprep.subr.bf16.mxu0 %v1448_v16  ;;  %v1476_v42 = vld [vmem:[%s1817_s1 + $0x1c8] sm:$0xff]   ;;  %v1481_v47 = vld [vmem:[%s1817_s1 + $0x190] sm:$0xff]   ;;  %v1485_v51 = vld [vmem:[%s1817_s1 + $0x198] sm:$0xff]  }
  0x16   : > { %1334 = vmatprep.subr.bf16.mxu1 %v1449_v17  ;;  %v1477_v43 = vld [vmem:[%s1817_s1 + $0x188] sm:$0xff]   ;;  %v1486_v52 = vld [vmem:[%s1817_s1 + $0x160] sm:$0xff]   ;;  %v1494_v60 = vld [vmem:[%s1817_s1 + $0x170] sm:$0xff]  }
  0x17   : > { %v1487_v53 = vld [vmem:[%s1817_s1 + $0x120] sm:$0xff]   ;;  %v1490_v56 = vld [vmem:[%s1817_s1 + $0x168] sm:$0xff]   ;;  %v1495_v61 = vld [vmem:[%s1817_s1 + $0x130] sm:$0xff]  }
  0x18   : > { %1313 = vmatpush3.bf16.msra.mxu0 %v1450_v18  ;;  %v1488_v54 = vld [vmem:[%s1817_s1 + $0x1e0] sm:$0xff]   ;;  %v1491_v57 = vld [vmem:[%s1817_s1 + $0x128] sm:$0xff]   ;;  %v1496_v62 = vld [vmem:[%s1817_s1 + $0x1f0] sm:$0xff]  }
  0x19   : > { %1335 = vmatpush3.bf16.msra.mxu1 %v1451_v19  ;;  %1314 = vmatprep.subr.bf16.mxu0 %v1452_v20  ;;  %v1489_v55 = vld [vmem:[%s1817_s1 + $0x1a0] sm:$0xff]   ;;  %v1492_v58 = vld [vmem:[%s1817_s1 + $0x1e8] sm:$0xff]   ;;  %v1497_v63 = vld [vmem:[%s1817_s1 + $0x1b0] sm:$0xff]  }
  0x1a   : > { %1336 = vmatprep.subr.bf16.mxu1 %v1453_v21  ;;  %v1493_v59 = vld [vmem:[%s1817_s1 + $0x1a8] sm:$0xff]   ;;  %v1498_v0 = vld [vmem:[%s1817_s1 + $0x178] sm:$0xff]   ;;  %v1501_v3 = vld [vmem:[%s1663_s12 + $0x10] ss:$36 sps:$4 sm:$0xff]  }
  0x1b   : > { %v1499_v1 = vld [vmem:[%s1817_s1 + $0x138] sm:$0xff]   ;;  %v1508_v9 = vld [vmem:[%s1817_s1 + $0x200] sm:$0xff]   ;;  %v1509_v10 = vld [vmem:[%s1817_s1 + $0x208] sm:$0xff]  }
  0x1c   : > { %1315 = vmatpush3.bf16.msra.mxu0 %v1454_v22  ;;  %v1500_v2 = vld [vmem:[%s1817_s1 + $0x1f8] sm:$0xff]   ;;  %v1510_v11 = vld [vmem:[%s1817_s1 + $0x210] sm:$0xff]   ;;  %v1512_v13 = vld [vmem:[%s1817_s1 + $0x220] sm:$0xff]  }
  0x1d   : > { %1337 = vmatpush3.bf16.msra.mxu1 %v1455_v23  ;;  %1316 = vmatprep.subr.bf16.mxu0 %v1456_v24  ;;  %v1503_v4 = vld [vmem:[%s1663_s12 + $0x14] ss:$36 sps:$4 sm:$0xff]   ;;  %v1507_v8 = vld [vmem:[%s1663_s12 + $0x1c] ss:$36 sps:$4 sm:$0xff]   ;;  %v1513_v14 = vld [vmem:[%s1817_s1 + $0x228] sm:$0xff]  }
  0x1e   : > { %1338 = vmatprep.subr.bf16.mxu1 %v1457_v25  ;;  %v1504_v5 = vld [vmem:[%s1817_s1 + $0x1b8] sm:$0xff]   ;;  %v1514_v15 = vld [vmem:[%s1817_s1 + $0x230] sm:$0xff]   ;;  %v1516_v17 = vld [vmem:[%s1663_s12 + $0x20] ss:$36 sps:$4 sm:$0xff]  }
  0x1f   : > { %v1505_v7 = vld [vmem:[%s1663_s12 + $0x18] ss:$36 sps:$4 sm:$0xff]   ;;  %s1203_s12 = sshll.u32 %s1823_s27, 2 }
  0x20   : > { %1317 = vmatpush3.bf16.msra.mxu0 %v1458_v26  ;;  %v1511_v12 = vld [vmem:[%s1817_s1 + $0x218] sm:$0xff]   ;;  %s245_s19 = scalar_lea.vmem %s1820_s4, %s1203_s12  ;;  %s251_s17 = scalar_lea.vmem %s1821_s5, %s1203_s12 }
  0x21   : > { %1339 = vmatpush3.bf16.msra.mxu1 %v1459_v27  ;;  %1318 = vmatprep.subr.bf16.mxu0 %v1460_v28  ;;  %v1515_v16 = vld [vmem:[%s1817_s1 + $0x238] sm:$0xff]  }
  0x22   : > { %1340 = vmatprep.subr.bf16.mxu1 %v1461_v29 }
  0x24   : > { %1319 = vmatpush3.bf16.msra.mxu0 %v1462_v30 }
  0x25   : > { %1341 = vmatpush3.bf16.msra.mxu1 %v1463_v31  ;;  %1348 = vmatprep.subr.bf16.mxu0 %v1470_v36 }
  0x26   : > { %1370 = vmatprep.subr.bf16.mxu1 %v1472_v38 }
  0x27   : > { %919 = vmatmul.mubr.bf16.vlgmr.msra.gmra.mrb[0].mxu0 %v1464_v32 }
  0x28   : > { %960 = vmatmul.mubr.bf16.vlgmr.msra.gmra.mrb[0].mxu1 %v1467_v34  ;;  %1349 = vmatpush3.bf16.msra.mxu0 %v1471_v37 }
  0x29   : > { %1371 = vmatpush3.bf16.msra.mxu1 %v1473_v39  ;;  %1350 = vmatprep.subr.bf16.mxu0 %v1474_v40 }
  0x2a   : > { %1372 = vmatprep.subr.bf16.mxu1 %v1476_v42  ;;  %1000 = vmatprep.mubr.bf16.mxu0 %v1503_v4 }
  0x2b   : > { %1041 = vmatprep.mubr.bf16.mxu1 %v1507_v8 }
  0x2c   : > { %1351 = vmatpush3.bf16.msra.mxu0 %v1475_v41 }
  0x2d   : > { %1373 = vmatpush3.bf16.msra.mxu1 %v1477_v43  ;;  %1352 = vmatprep.subr.bf16.mxu0 %v1478_v44 }
  0x2e   : > { %1374 = vmatprep.subr.bf16.mxu1 %v1480_v46 }
  0x30   : > { %1353 = vmatpush3.bf16.msra.mxu0 %v1479_v45 }
  0x31   : > { %1375 = vmatpush3.bf16.msra.mxu1 %v1481_v47  ;;  %1354 = vmatprep.subr.bf16.mxu0 %v1482_v48 }
  0x32   : > { %1376 = vmatprep.subr.bf16.mxu1 %v1484_v50  ;;  %v1296_v50 = vld [vmem:[%s245_s19] sm:$0xff]  }
  0x34   : > { %1355 = vmatpush3.bf16.msra.mxu0 %v1483_v49  ;;  %v1287_v49 = vld [vmem:[%s1818_s2] ss:$0 sm:$0xff] }
  0x35   : > { %1377 = vmatpush3.bf16.msra.mxu1 %v1485_v51  ;;  %1356 = vmatprep.subr.bf16.mxu0 %v1486_v52 }
  0x36   : > { %1378 = vmatprep.subr.bf16.mxu1 %v1488_v54 }
  0x38   : > { %1357 = vmatpush3.bf16.msra.mxu0 %v1487_v53  ;;  %v1288_v53 = vld [vmem:[%s1819_s3] ss:$0 sm:$0xff] }
  0x39   : > { %1379 = vmatpush3.bf16.msra.mxu1 %v1489_v55  ;;  %1358 = vmatprep.subr.bf16.mxu0 %v1490_v56  ;;  %v1297_v56 = vunpack.c.l.bf16 %v1296_v50 }
  0x3a   : > { %1380 = vmatprep.subr.bf16.mxu1 %v1492_v58 }
  0x3c   : > { %1359 = vmatpush3.bf16.msra.mxu0 %v1491_v57 }
  0x3d   : > { %1381 = vmatpush3.bf16.msra.mxu1 %v1493_v59  ;;  %1360 = vmatprep.subr.bf16.mxu0 %v1494_v60 }
  0x3e   : > { %1382 = vmatprep.subr.bf16.mxu1 %v1496_v62 }
  0x40   : > { %1361 = vmatpush3.bf16.msra.mxu0 %v1495_v61  ;;  %v1298_v61 = vunpack.c.h.bf16 %v1296_v50 }
  0x41   : > { %1383 = vmatpush3.bf16.msra.mxu1 %v1497_v63  ;;  %1362 = vmatprep.subr.bf16.mxu0 %v1498_v0 }
  0x42   : > { %1384 = vmatprep.subr.bf16.mxu1 %v1500_v2 }
  0x44   : > { %1363 = vmatpush3.bf16.msra.mxu0 %v1499_v1 }
  0x45   : > { %1401 = vmatprep.subr.bf16.mxu0 %v1525_v6  ;;  %1385 = vmatpush3.bf16.msra.mxu1 %v1504_v5 }
  0x47   : > { %1001 = vmatmul.mubr.bf16.vlgmr.msra.gmra.mrb[4].mxu0 %v1501_v3 }
  0x48   : > { %1417 = vmatprep.mubr.msk.bf16.mxu0 %vm1526_vm0, %v1525_v6  ;;  %1402 = vmatpush3.bf16.msra.mxu0 %v1508_v9 }
  0x49   : > { %1042 = vmatmul.mubr.bf16.vlgmr.msra.gmra.mrb[4].mxu1 %v1505_v7  ;;  %1403 = vmatprep.subr.bf16.mxu0 %v1525_v6 }
  0x4c   : > { %1404 = vmatpush3.bf16.msra.mxu0 %v1509_v10 }
  0x4d   : > { %1405 = vmatprep.subr.bf16.mxu0 %v1525_v6 }
  0x50   : > { %1406 = vmatpush3.bf16.msra.mxu0 %v1510_v11 }
  0x51   : > { %1407 = vmatprep.subr.bf16.mxu0 %v1525_v6 }
  0x54   : > { %1408 = vmatpush3.bf16.msra.mxu0 %v1511_v12 }
  0x55   : > { %1409 = vmatprep.subr.bf16.mxu0 %v1525_v6 }
  0x58   : > { %1410 = vmatpush3.bf16.msra.mxu0 %v1512_v13 }
  0x59   : > { %1411 = vmatprep.subr.bf16.mxu0 %v1525_v6 }
  0x5c   : > { %1412 = vmatpush3.bf16.msra.mxu0 %v1513_v14 }
  0x5d   : > { %1413 = vmatprep.subr.bf16.mxu0 %v1525_v6 }
  0x60   : > { %1414 = vmatpush3.bf16.msra.mxu0 %v1514_v15 }
  0x61   : > { %1415 = vmatprep.subr.bf16.mxu0 %v1525_v6 }
  0x64   : > { %1416 = vmatpush3.bf16.msra.mxu0 %v1515_v16 }
  0x67   : > { %1418 = vmatmul.mubr.bf16.vlgmr.msra.gmra.mrb[8].mxu0 %v1516_v17 }
  0xfa   : > { %v1320_v18 = vpop.f32.mrb[0].mxu0 }
  0xfb   : > { %v1342_v19 = vpop.f32.mrb[0].mxu1  ;;  %v1321_v20 = vpop.f32.mrb[1].mxu0 }
  0xfc   : > { %v1322_v21 = vadd.f32 %v1321_v20, %v1320_v18  ;;  %v1343_v22 = vpop.f32.mrb[1].mxu1  ;;  %v1323_v23 = vpop.f32.mrb[2].mxu0 }
  0xfd   : > { %v1344_v24 = vadd.f32 %v1343_v22, %v1342_v19  ;;  %v1345_v25 = vpop.f32.mrb[2].mxu1  ;;  %v1324_v26 = vpop.f32.mrb[3].mxu0 }
  0xfe   : > { %v1325_v27 = vadd.f32 %v1324_v26, %v1323_v23  ;;  %v1346_v28 = vpop.f32.mrb[3].mxu1 }
  0xff   : > { %v962_v29 = vadd.f32 %v1344_v24, %v1322_v21  ;;  %v1347_v30 = vadd.f32 %v1346_v28, %v1345_v25 }
 0x101   : > { %v965_v31 = vadd.f32 %v1347_v30, %v1325_v27 }
 0x11a   : > { %v1364_v32 = vpop.f32.mrb[4].mxu0 }
 0x11b   : > { %v1365_v33 = vpop.f32.mrb[5].mxu0 }
 0x11c   : > { %v1366_v34 = vadd.f32 %v1365_v33, %v1364_v32  ;;  %v1367_v35 = vpop.f32.mrb[6].mxu0  ;;  %v1386_v36 = vpop.f32.mrb[4].mxu1 }
 0x11d   : > { %v1368_v37 = vpop.f32.mrb[7].mxu0  ;;  %v1387_v40 = vpop.f32.mrb[5].mxu1 }
 0x11e   : > { %v1003_v38 = vadd.f32 %v1366_v34, %v962_v29  ;;  %v1369_v39 = vadd.f32 %v1368_v37, %v1367_v35  ;;  %v1388_v41 = vadd.f32 %v1387_v40, %v1386_v36  ;;  %v1389_v42 = vpop.f32.mrb[6].mxu1 }
 0x11f   : > { %v1390_v44 = vpop.f32.mrb[7].mxu1 }
 0x120   : > { %v1006_v43 = vadd.f32 %v1369_v39, %v965_v31  ;;  %v1391_v45 = vadd.f32 %v1390_v44, %v1389_v42  ;;  %v1044_v46 = vadd.f32 %v1388_v41, %v1003_v38 }
 0x122   : > { %v1047_v47 = vadd.f32 %v1391_v45, %v1006_v43 }
 0x13a   : > { %v1084_v48 = vpop.f32.mrb[8].mxu0 }
 0x13b   : > { %v1085_v51 = vadd.f32 %v1084_v48, %v1044_v46  ;;  %v1419_v52 = vpop.f32.mrb[9].mxu0 }
 0x13c   : > { %v1087_v54 = vpop.f32.mrb[10].mxu0 }
 0x13d   : > { %v1098_v55 = vmul.f32 %v1287_v49, %v1085_v51  ;;  %v1088_v57 = vadd.f32 %v1087_v54, %v1047_v47  ;;  %v1420_v58 = vpop.f32.mrb[11].mxu0 }
 0x13f   : > { %v1107_v59 = vadd.f32 %v1288_v53, %v1098_v55  ;;  %v1099_v60 = vmul.f32 %v1287_v49, %v1088_v57 }
 0x141   : > { %v1113_v62 = vadd.f32 %v1297_v56, %v1107_v59  ;;  %v1108_v63 = vadd.f32 %v1288_v53, %v1099_v60 }
 0x143   : > { %v1114_v0 = vadd.f32 %v1298_v61, %v1108_v63  ;;  %v1115_v1 = vmax.f32 %v1113_v62, 0.0 }
 0x145   : > { %v1116_v2 = vmax.f32 %v1114_v0, 0.0 }
 0x147   : > { %v1302_v3 = vpack.c.bf16 %v1116_v2, %v1115_v1 }
 0x149   : > { %1303 = vst [vmem:[%s251_s17] sm:$0xff] %v1302_v3  }
 0x14a PF: > { %s15_s18 = sadd.s32 1, %s1523_s18  }
 0x14b   : > { %p12_p4 = scmp.ge.s32.totalorder %s15_s18, 4  }
 0x14d   :  { %14 = sbr.rel (!%p12_p4) target bundleno = 1 (0x1), region = 73 }

// kernel: bevencode_forward.23
= control target key start
LH: loop header
LB: loop body
LE: loop exit
PB: predicated region body
PF: predicated region fallthrough
CT: control target
= control target key end

     0   :  { %s1479_s15 = smov 0   ;;  %s1735_s0 = inlined_call_operand.vmem [shape: bf16[32,1152], index: 0, kind: input, shape index: {}]   ;;  %s1736_s1 = inlined_call_operand.vmem [shape: bf16[1152,128], index: 1, kind: input, shape index: {}]   ;;  %s1737_s2 = inlined_call_operand.vmem [shape: f32[1,128], index: 2, kind: input, shape index: {}]   ;;  %s1738_s3 = inlined_call_operand.vmem [shape: f32[1,128], index: 3, kind: input, shape index: {}]   ;;  %s1739_s4 = inlined_call_operand.vmem [shape: bf16[32,128], index: 4, kind: output, shape index: {}]  }
   0x1 LB: > { %s1128_s16 = sadd.s32 4294967295, %s1450_s15   ;;  %p1132_p0 = scmp.ge.s32.totalorder %s1450_s15, 1  ;;  %s1450_s15 = sphi %s1479_s15, %s14_s15  }
   0x2   : > { %p164_p1 = scmp.lt.s32.totalorder %s1450_s15, 3 }
   0x4   : > { %p165_p2 = pnand %p1132_p0, %p164_p1 }
   0x5   : > { %v1359_v0 = vld [vmem:[%s1736_s1 + $0x40] sm:$0xff] (!%p165_p2)   ;;  %v1363_v4 = vld [vmem:[%s1736_s1 + $0x48] sm:$0xff] (!%p165_p2)   ;;  %v1367_v8 = vld [vmem:[%s1736_s1 + $0x50] sm:$0xff] (!%p165_p2)   ;;  %s1133_s23 = sshll.u32 (!%p165_p2), %s1128_s16, 1  ;;  %vm1453_vm0 = vmmov (!%p165_p2), 0  }
   0x6   : > { %168 = sbr.rel (%p165_p2) target bundleno = 328 (0x148), region = 36  ;;  %v1360_v1 = vld [vmem:[%s1736_s1 + $0xc0] sm:$0xff] (!%p165_p2)   ;;  %1231 = vmatprep.subr.bf16.mxu0 (!%p165_p2), %v1359_v0  ;;  %v1364_v5 = vld [vmem:[%s1736_s1 + $0xc8] sm:$0xff] (!%p165_p2)   ;;  %v1368_v9 = vld [vmem:[%s1736_s1 + $0xd0] sm:$0xff] (!%p165_p2)   ;;  %p192_p3 = scmp.lt.s32.totalorder (!%p165_p2), %s1133_s23, 3 }
   0x7   : > { %v1361_v2 = vld [vmem:[%s1736_s1] sm:$0xff] (!%p165_p2)   ;;  %1253 = vmatprep.subr.bf16.mxu1 (!%p165_p2), %v1360_v1  ;;  %v1365_v6 = vld [vmem:[%s1736_s1 + $0x8] sm:$0xff] (!%p165_p2)   ;;  %v1369_v10 = vld [vmem:[%s1736_s1 + $0x10] sm:$0xff] (!%p165_p2)  }
   0x8   : > { %v1362_v3 = vld [vmem:[%s1736_s1 + $0x80] sm:$0xff] (!%p165_p2)   ;;  %1232 = vmatpush3.bf16.msra.mxu0 (!%p165_p2), %v1361_v2  ;;  %v1366_v7 = vld [vmem:[%s1736_s1 + $0x88] sm:$0xff] (!%p165_p2)   ;;  %v1370_v11 = vld [vmem:[%s1736_s1 + $0x90] sm:$0xff] (!%p165_p2)  }
   0x9   : > { %1254 = vmatpush3.bf16.msra.mxu1 (!%p165_p2), %v1362_v3  ;;  %1233 = vmatprep.subr.bf16.mxu0 (!%p165_p2), %v1363_v4  ;;  %v1371_v12 = vld [vmem:[%s1736_s1 + $0x58] sm:$0xff] (!%p165_p2)   ;;  %v1375_v16 = vld [vmem:[%s1736_s1 + $0x60] sm:$0xff] (!%p165_p2)   ;;  %v1379_v20 = vld [vmem:[%s1736_s1 + $0x68] sm:$0xff] (!%p165_p2)  }
   0xa   : > { %1255 = vmatprep.subr.bf16.mxu1 (!%p165_p2), %v1364_v5  ;;  %v1372_v13 = vld [vmem:[%s1736_s1 + $0xd8] sm:$0xff] (!%p165_p2)   ;;  %v1376_v17 = vld [vmem:[%s1736_s1 + $0xe0] sm:$0xff] (!%p165_p2)   ;;  %v1380_v21 = vld [vmem:[%s1736_s1 + $0xe8] sm:$0xff] (!%p165_p2)  }
   0xb   : > { %v1373_v14 = vld [vmem:[%s1736_s1 + $0x18] sm:$0xff] (!%p165_p2)   ;;  %v1377_v18 = vld [vmem:[%s1736_s1 + $0x20] sm:$0xff] (!%p165_p2)   ;;  %v1381_v22 = vld [vmem:[%s1736_s1 + $0x28] sm:$0xff] (!%p165_p2)  }
   0xc   : > { %1234 = vmatpush3.bf16.msra.mxu0 (!%p165_p2), %v1365_v6  ;;  %v1374_v15 = vld [vmem:[%s1736_s1 + $0x98] sm:$0xff] (!%p165_p2)   ;;  %v1378_v19 = vld [vmem:[%s1736_s1 + $0xa0] sm:$0xff] (!%p165_p2)   ;;  %v1382_v23 = vld [vmem:[%s1736_s1 + $0xa8] sm:$0xff] (!%p165_p2)   ;;  %v1452_v6 = vmov (!%p165_p2), 0.0  }
   0xd   : > { %1256 = vmatpush3.bf16.msra.mxu1 %v1366_v7  ;;  %1235 = vmatprep.subr.bf16.mxu0 %v1367_v8  ;;  %s1741_s23 = smov (!%p192_p3, %s1133_s23), 3  ;;  %v1383_v24 = vld [vmem:[%s1736_s1 + $0x70] sm:$0xff]   ;;  %v1387_v28 = vld [vmem:[%s1736_s1 + $0x78] sm:$0xff]   ;;  %v1397_v36 = vld [vmem:[%s1736_s1 + $0x140] sm:$0xff]  }
   0xe   : > { %1257 = vmatprep.subr.bf16.mxu1 %v1368_v9  ;;  %v1384_v25 = vld [vmem:[%s1736_s1 + $0xf0] sm:$0xff]   ;;  %s1348_s21 = smul.u32 36, %s1741_s23  ;;  %v1388_v29 = vld [vmem:[%s1736_s1 + $0xf8] sm:$0xff]   ;;  %v1398_v37 = vld [vmem:[%s1736_s1 + $0x100] sm:$0xff]   ;;  %s1136_s28 = sshll.u32 %s1741_s23, 2 }
   0xf   : > { %v1385_v26 = vld [vmem:[%s1736_s1 + $0x30] sm:$0xff]   ;;  %v1389_v30 = vld [vmem:[%s1736_s1 + $0x38] sm:$0xff]   ;;  %v1399_v38 = vld [vmem:[%s1736_s1 + $0x1c0] sm:$0xff]   ;;  %s202_s5 = scalar_lea.vmem %s1739_s4, %s1136_s28 }
  0x10   : > { %1236 = vmatpush3.bf16.msra.mxu0 %v1369_v10  ;;  %v1386_v27 = vld [vmem:[%s1736_s1 + $0xb0] sm:$0xff]   ;;  %s1585_s6 = scalar_lea.vmem %s1735_s0, %s1348_s21  ;;  %v1390_v31 = vld [vmem:[%s1736_s1 + $0xb8] sm:$0xff]   ;;  %v1400_v39 = vld [vmem:[%s1736_s1 + $0x180] sm:$0xff]  }
  0x11   : > { %1258 = vmatpush3.bf16.msra.mxu1 %v1370_v11  ;;  %1237 = vmatprep.subr.bf16.mxu0 %v1371_v12  ;;  %v1391_v32 = vld [vmem:[%s1585_s6] ss:$36 sps:$4 sm:$0xff]   ;;  %v1394_v34 = vld [vmem:[%s1585_s6 + $0x8] ss:$36 sps:$4 sm:$0xff]   ;;  %v1405_v44 = vld [vmem:[%s1736_s1 + $0x150] sm:$0xff]  }
  0x12   : > { %1259 = vmatprep.subr.bf16.mxu1 %v1372_v13  ;;  %v1393_v33 = vld [vmem:[%s1585_s6 + $0x4] ss:$36 sps:$4 sm:$0xff]   ;;  %v1396_v35 = vld [vmem:[%s1585_s6 + $0xc] ss:$36 sps:$4 sm:$0xff]   ;;  %v1409_v48 = vld [vmem:[%s1736_s1 + $0x158] sm:$0xff]  }
  0x13   : > { %869 = vmatprep.mubr.bf16.mxu0 %v1393_v33  ;;  %910 = vmatprep.mubr.bf16.mxu1 %v1396_v35  ;;  %v1401_v40 = vld [vmem:[%s1736_s1 + $0x148] sm:$0xff]   ;;  %v1406_v45 = vld [vmem:[%s1736_s1 + $0x110] sm:$0xff]   ;;  %v1410_v49 = vld [vmem:[%s1736_s1 + $0x118] sm:$0xff]  }
  0x14   : > { %1238 = vmatpush3.bf16.msra.mxu0 %v1373_v14  ;;  %v1402_v41 = vld [vmem:[%s1736_s1 + $0x108] sm:$0xff]   ;;  %v1407_v46 = vld [vmem:[%s1736_s1 + $0x1d0] sm:$0xff]   ;;  %v1411_v50 = vld [vmem:[%s1736_s1 + $0x1d8] sm:$0xff]  }
  0x15   : > { %1260 = vmatpush3.bf16.msra.mxu1 %v1374_v15  ;;  %1239 = vmatprep.subr.bf16.mxu0 %v1375_v16  ;;  %v1403_v42 = vld [vmem:[%s1736_s1 + $0x1c8] sm:$0xff]   ;;  %v1408_v47 = vld [vmem:[%s1736_s1 + $0x190] sm:$0xff]   ;;  %v1412_v51 = vld [vmem:[%s1736_s1 + $0x198] sm:$0xff]  }
  0x16   : > { %1261 = vmatprep.subr.bf16.mxu1 %v1376_v17  ;;  %v1404_v43 = vld [vmem:[%s1736_s1 + $0x188] sm:$0xff]   ;;  %v1413_v52 = vld [vmem:[%s1736_s1 + $0x160] sm:$0xff]   ;;  %v1421_v60 = vld [vmem:[%s1736_s1 + $0x170] sm:$0xff]  }
  0x17   : > { %v1414_v53 = vld [vmem:[%s1736_s1 + $0x120] sm:$0xff]   ;;  %v1417_v56 = vld [vmem:[%s1736_s1 + $0x168] sm:$0xff]   ;;  %v1422_v61 = vld [vmem:[%s1736_s1 + $0x130] sm:$0xff]  }
  0x18   : > { %1240 = vmatpush3.bf16.msra.mxu0 %v1377_v18  ;;  %v1415_v54 = vld [vmem:[%s1736_s1 + $0x1e0] sm:$0xff]   ;;  %v1418_v57 = vld [vmem:[%s1736_s1 + $0x128] sm:$0xff]   ;;  %v1423_v62 = vld [vmem:[%s1736_s1 + $0x1f0] sm:$0xff]  }
  0x19   : > { %1262 = vmatpush3.bf16.msra.mxu1 %v1378_v19  ;;  %1241 = vmatprep.subr.bf16.mxu0 %v1379_v20  ;;  %v1416_v55 = vld [vmem:[%s1736_s1 + $0x1a0] sm:$0xff]   ;;  %v1419_v58 = vld [vmem:[%s1736_s1 + $0x1e8] sm:$0xff]   ;;  %v1424_v63 = vld [vmem:[%s1736_s1 + $0x1b0] sm:$0xff]  }
  0x1a   : > { %1263 = vmatprep.subr.bf16.mxu1 %v1380_v21  ;;  %v1420_v59 = vld [vmem:[%s1736_s1 + $0x1a8] sm:$0xff]   ;;  %v1425_v0 = vld [vmem:[%s1736_s1 + $0x178] sm:$0xff]   ;;  %v1428_v3 = vld [vmem:[%s1585_s6 + $0x10] ss:$36 sps:$4 sm:$0xff]  }
  0x1b   : > { %v1426_v1 = vld [vmem:[%s1736_s1 + $0x138] sm:$0xff]   ;;  %v1435_v9 = vld [vmem:[%s1736_s1 + $0x200] sm:$0xff]   ;;  %v1436_v10 = vld [vmem:[%s1736_s1 + $0x208] sm:$0xff]  }
  0x1c   : > { %1242 = vmatpush3.bf16.msra.mxu0 %v1381_v22  ;;  %v1427_v2 = vld [vmem:[%s1736_s1 + $0x1f8] sm:$0xff]   ;;  %v1437_v11 = vld [vmem:[%s1736_s1 + $0x210] sm:$0xff]   ;;  %v1439_v13 = vld [vmem:[%s1736_s1 + $0x220] sm:$0xff]  }
  0x1d   : > { %1264 = vmatpush3.bf16.msra.mxu1 %v1382_v23  ;;  %1243 = vmatprep.subr.bf16.mxu0 %v1383_v24  ;;  %v1430_v4 = vld [vmem:[%s1585_s6 + $0x14] ss:$36 sps:$4 sm:$0xff]   ;;  %v1434_v8 = vld [vmem:[%s1585_s6 + $0x1c] ss:$36 sps:$4 sm:$0xff]   ;;  %v1440_v14 = vld [vmem:[%s1736_s1 + $0x228] sm:$0xff]  }
  0x1e   : > { %1265 = vmatprep.subr.bf16.mxu1 %v1384_v25  ;;  %v1431_v5 = vld [vmem:[%s1736_s1 + $0x1b8] sm:$0xff]   ;;  %v1441_v15 = vld [vmem:[%s1736_s1 + $0x230] sm:$0xff]   ;;  %v1443_v17 = vld [vmem:[%s1585_s6 + $0x20] ss:$36 sps:$4 sm:$0xff]  }
  0x1f   : > { %v1432_v7 = vld [vmem:[%s1585_s6 + $0x18] ss:$36 sps:$4 sm:$0xff]  }
  0x20   : > { %1244 = vmatpush3.bf16.msra.mxu0 %v1385_v26  ;;  %v1438_v12 = vld [vmem:[%s1736_s1 + $0x218] sm:$0xff]  }
  0x21   : > { %1266 = vmatpush3.bf16.msra.mxu1 %v1386_v27  ;;  %1245 = vmatprep.subr.bf16.mxu0 %v1387_v28  ;;  %v1442_v16 = vld [vmem:[%s1736_s1 + $0x238] sm:$0xff]  }
  0x22   : > { %1267 = vmatprep.subr.bf16.mxu1 %v1388_v29 }
  0x24   : > { %1246 = vmatpush3.bf16.msra.mxu0 %v1389_v30 }
  0x25   : > { %1268 = vmatpush3.bf16.msra.mxu1 %v1390_v31  ;;  %1275 = vmatprep.subr.bf16.mxu0 %v1397_v36 }
  0x26   : > { %1297 = vmatprep.subr.bf16.mxu1 %v1399_v38 }
  0x27   : > { %870 = vmatmul.mubr.bf16.vlgmr.msra.gmra.mrb[0].mxu0 %v1391_v32 }
  0x28   : > { %911 = vmatmul.mubr.bf16.vlgmr.msra.gmra.mrb[0].mxu1 %v1394_v34  ;;  %1276 = vmatpush3.bf16.msra.mxu0 %v1398_v37 }
  0x29   : > { %1298 = vmatpush3.bf16.msra.mxu1 %v1400_v39  ;;  %1277 = vmatprep.subr.bf16.mxu0 %v1401_v40 }
  0x2a   : > { %1299 = vmatprep.subr.bf16.mxu1 %v1403_v42  ;;  %951 = vmatprep.mubr.bf16.mxu0 %v1430_v4 }
  0x2b   : > { %992 = vmatprep.mubr.bf16.mxu1 %v1434_v8 }
  0x2c   : > { %1278 = vmatpush3.bf16.msra.mxu0 %v1402_v41 }
  0x2d   : > { %1300 = vmatpush3.bf16.msra.mxu1 %v1404_v43  ;;  %1279 = vmatprep.subr.bf16.mxu0 %v1405_v44 }
  0x2e   : > { %1301 = vmatprep.subr.bf16.mxu1 %v1407_v46 }
  0x30   : > { %1280 = vmatpush3.bf16.msra.mxu0 %v1406_v45 }
  0x31   : > { %1302 = vmatpush3.bf16.msra.mxu1 %v1408_v47  ;;  %1281 = vmatprep.subr.bf16.mxu0 %v1409_v48 }
  0x32   : > { %1303 = vmatprep.subr.bf16.mxu1 %v1411_v50 }
  0x34   : > { %1282 = vmatpush3.bf16.msra.mxu0 %v1410_v49  ;;  %v1218_v49 = vld [vmem:[%s1737_s2] ss:$0 sm:$0xff] }
  0x35   : > { %1304 = vmatpush3.bf16.msra.mxu1 %v1412_v51  ;;  %1283 = vmatprep.subr.bf16.mxu0 %v1413_v52  ;;  %v1219_v52 = vld [vmem:[%s1738_s3] ss:$0 sm:$0xff] }
  0x36   : > { %1305 = vmatprep.subr.bf16.mxu1 %v1415_v54 }
  0x38   : > { %1284 = vmatpush3.bf16.msra.mxu0 %v1414_v53 }
  0x39   : > { %1306 = vmatpush3.bf16.msra.mxu1 %v1416_v55  ;;  %1285 = vmatprep.subr.bf16.mxu0 %v1417_v56 }
  0x3a   : > { %1307 = vmatprep.subr.bf16.mxu1 %v1419_v58 }
  0x3c   : > { %1286 = vmatpush3.bf16.msra.mxu0 %v1418_v57 }
  0x3d   : > { %1308 = vmatpush3.bf16.msra.mxu1 %v1420_v59  ;;  %1287 = vmatprep.subr.bf16.mxu0 %v1421_v60 }
  0x3e   : > { %1309 = vmatprep.subr.bf16.mxu1 %v1423_v62 }
  0x40   : > { %1288 = vmatpush3.bf16.msra.mxu0 %v1422_v61 }
  0x41   : > { %1310 = vmatpush3.bf16.msra.mxu1 %v1424_v63  ;;  %1289 = vmatprep.subr.bf16.mxu0 %v1425_v0 }
  0x42   : > { %1311 = vmatprep.subr.bf16.mxu1 %v1427_v2 }
  0x44   : > { %1290 = vmatpush3.bf16.msra.mxu0 %v1426_v1 }
  0x45   : > { %1328 = vmatprep.subr.bf16.mxu0 %v1452_v6  ;;  %1312 = vmatpush3.bf16.msra.mxu1 %v1431_v5 }
  0x47   : > { %952 = vmatmul.mubr.bf16.vlgmr.msra.gmra.mrb[4].mxu0 %v1428_v3 }
  0x48   : > { %1344 = vmatprep.mubr.msk.bf16.mxu0 %vm1453_vm0, %v1452_v6  ;;  %1329 = vmatpush3.bf16.msra.mxu0 %v1435_v9 }
  0x49   : > { %993 = vmatmul.mubr.bf16.vlgmr.msra.gmra.mrb[4].mxu1 %v1432_v7  ;;  %1330 = vmatprep.subr.bf16.mxu0 %v1452_v6 }
  0x4c   : > { %1331 = vmatpush3.bf16.msra.mxu0 %v1436_v10 }
  0x4d   : > { %1332 = vmatprep.subr.bf16.mxu0 %v1452_v6 }
  0x50   : > { %1333 = vmatpush3.bf16.msra.mxu0 %v1437_v11 }
  0x51   : > { %1334 = vmatprep.subr.bf16.mxu0 %v1452_v6 }
  0x54   : > { %1335 = vmatpush3.bf16.msra.mxu0 %v1438_v12 }
  0x55   : > { %1336 = vmatprep.subr.bf16.mxu0 %v1452_v6 }
  0x58   : > { %1337 = vmatpush3.bf16.msra.mxu0 %v1439_v13 }
  0x59   : > { %1338 = vmatprep.subr.bf16.mxu0 %v1452_v6 }
  0x5c   : > { %1339 = vmatpush3.bf16.msra.mxu0 %v1440_v14 }
  0x5d   : > { %1340 = vmatprep.subr.bf16.mxu0 %v1452_v6 }
  0x60   : > { %1341 = vmatpush3.bf16.msra.mxu0 %v1441_v15 }
  0x61   : > { %1342 = vmatprep.subr.bf16.mxu0 %v1452_v6 }
  0x64   : > { %1343 = vmatpush3.bf16.msra.mxu0 %v1442_v16 }
  0x67   : > { %1345 = vmatmul.mubr.bf16.vlgmr.msra.gmra.mrb[8].mxu0 %v1443_v17 }
  0xfa   : > { %v1247_v18 = vpop.f32.mrb[0].mxu0 }
  0xfb   : > { %v1269_v19 = vpop.f32.mrb[0].mxu1  ;;  %v1248_v20 = vpop.f32.mrb[1].mxu0 }
  0xfc   : > { %v1249_v21 = vadd.f32 %v1248_v20, %v1247_v18  ;;  %v1270_v22 = vpop.f32.mrb[1].mxu1  ;;  %v1250_v23 = vpop.f32.mrb[2].mxu0 }
  0xfd   : > { %v1271_v24 = vadd.f32 %v1270_v22, %v1269_v19  ;;  %v1272_v25 = vpop.f32.mrb[2].mxu1  ;;  %v1251_v26 = vpop.f32.mrb[3].mxu0 }
  0xfe   : > { %v1252_v27 = vadd.f32 %v1251_v26, %v1250_v23  ;;  %v1273_v28 = vpop.f32.mrb[3].mxu1 }
  0xff   : > { %v913_v29 = vadd.f32 %v1271_v24, %v1249_v21  ;;  %v1274_v30 = vadd.f32 %v1273_v28, %v1272_v25 }
 0x101   : > { %v916_v31 = vadd.f32 %v1274_v30, %v1252_v27 }
 0x11a   : > { %v1291_v32 = vpop.f32.mrb[4].mxu0 }
 0x11b   : > { %v1292_v33 = vpop.f32.mrb[5].mxu0 }
 0x11c   : > { %v1293_v34 = vadd.f32 %v1292_v33, %v1291_v32  ;;  %v1294_v35 = vpop.f32.mrb[6].mxu0  ;;  %v1313_v36 = vpop.f32.mrb[4].mxu1 }
 0x11d   : > { %v1295_v37 = vpop.f32.mrb[7].mxu0  ;;  %v1314_v40 = vpop.f32.mrb[5].mxu1 }
 0x11e   : > { %v954_v38 = vadd.f32 %v1293_v34, %v913_v29  ;;  %v1296_v39 = vadd.f32 %v1295_v37, %v1294_v35  ;;  %v1315_v41 = vadd.f32 %v1314_v40, %v1313_v36  ;;  %v1316_v42 = vpop.f32.mrb[6].mxu1 }
 0x11f   : > { %v1317_v44 = vpop.f32.mrb[7].mxu1 }
 0x120   : > { %v957_v43 = vadd.f32 %v1296_v39, %v916_v31  ;;  %v1318_v45 = vadd.f32 %v1317_v44, %v1316_v42  ;;  %v995_v46 = vadd.f32 %v1315_v41, %v954_v38 }
 0x122   : > { %v998_v47 = vadd.f32 %v1318_v45, %v957_v43 }
 0x13a   : > { %v1035_v48 = vpop.f32.mrb[8].mxu0 }
 0x13b   : > { %v1036_v50 = vadd.f32 %v1035_v48, %v995_v46  ;;  %v1346_v51 = vpop.f32.mrb[9].mxu0 }
 0x13c   : > { %v1038_v53 = vpop.f32.mrb[10].mxu0 }
 0x13d   : > { %v1049_v54 = vmul.f32 %v1218_v49, %v1036_v50  ;;  %v1039_v55 = vadd.f32 %v1038_v53, %v998_v47  ;;  %v1347_v56 = vpop.f32.mrb[11].mxu0 }
 0x13f   : > { %v1058_v57 = vadd.f32 %v1219_v52, %v1049_v54  ;;  %v1050_v58 = vmul.f32 %v1218_v49, %v1039_v55 }
 0x141   : > { %v1059_v59 = vadd.f32 %v1219_v52, %v1050_v58  ;;  %v1060_v60 = vmax.f32 %v1058_v57, 0.0 }
 0x143   : > { %v1061_v61 = vmax.f32 %v1059_v59, 0.0 }
 0x145   : > { %v1229_v62 = vpack.c.bf16 %v1061_v61, %v1060_v60 }
 0x147   : > { %1230 = vst [vmem:[%s202_s5] sm:$0xff] %v1229_v62  }
 0x148 PF: > { %s14_s15 = sadd.s32 1, %s1450_s15  }
 0x149   : > { %p11_p4 = scmp.ge.s32.totalorder %s14_s15, 4  }
 0x14b   :  { %13 = sbr.rel (!%p11_p4) target bundleno = 1 (0x1), region = 66 }

// kernel: bevencode_forward.26
= control target key start
LH: loop header
LB: loop body
LE: loop exit
PB: predicated region body
PF: predicated region fallthrough
CT: control target
= control target key end

     0   :  { %s2560_s18 = smov 0   ;;  %s3198_s0 = inlined_call_operand.vmem [shape: bf16[128,1152], index: 0, kind: input, shape index: {}]   ;;  %s3199_s1 = inlined_call_operand.vmem [shape: bf16[1152,256], index: 1, kind: input, shape index: {}]   ;;  %s3200_s2 = inlined_call_operand.vmem [shape: f32[1,256], index: 2, kind: input, shape index: {}]   ;;  %s3201_s3 = inlined_call_operand.vmem [shape: f32[1,256], index: 3, kind: input, shape index: {}]   ;;  %s3202_s4 = inlined_call_operand.vmem [shape: bf16[128,256], index: 4, kind: input, shape index: {}]   ;;  %s3203_s5 = inlined_call_operand.vmem [shape: bf16[128,256], index: 5, kind: output, shape index: {}]  }
   0x1 LB: > { %s1950_s19 = sadd.s32 4294967295, %s2527_s18   ;;  %p1954_p0 = scmp.ge.s32.totalorder %s2527_s18, 1  ;;  %s2527_s18 = sphi %s2560_s18, %s15_s18  }
   0x2   : > { %p201_p1 = scmp.lt.s32.totalorder %s2527_s18, 3 }
   0x4   : > { %p202_p2 = pnand %p1954_p0, %p201_p1 }
   0x5   : > { %v2253_v0 = vld [vmem:[%s3199_s1 + $0x4] ss:$8 sps:$4 sm:$0xff] (!%p202_p2)   ;;  %v2257_v2 = vld [vmem:[%s3199_s1] ss:$8 sps:$4 sm:$0xff] (!%p202_p2)   ;;  %v2259_v4 = vld [vmem:[%s3199_s1 + $0x14] ss:$8 sps:$4 sm:$0xff] (!%p202_p2)  }
   0x6   : > { %205 = sbr.rel (%p202_p2) target bundleno = 407 (0x197), region = 40  ;;  %v2255_v1 = vld [vmem:[%s3199_s1 + $0x204] ss:$8 sps:$4 sm:$0xff] (!%p202_p2)   ;;  %1347 = vmatprep.subr.bf16.mxu1 (!%p202_p2), %v2253_v0  ;;  %v2258_v3 = vld [vmem:[%s3199_s1 + $0x200] ss:$8 sps:$4 sm:$0xff] (!%p202_p2)   ;;  %s1955_s9 = sshll.u32 (!%p202_p2), %s1950_s19, 3 }
   0x7   : > { %1493 = vmatprep.subr.bf16.mxu0 (!%p202_p2), %v2255_v1  ;;  %1348 = vmatpush1.bf16.msra.mxu1 (!%p202_p2), %v2257_v2  ;;  %v2261_v5 = vld [vmem:[%s3199_s1 + $0x214] ss:$8 sps:$4 sm:$0xff] (!%p202_p2)   ;;  %v2263_v6 = vld [vmem:[%s3199_s1 + $0x10] ss:$8 sps:$4 sm:$0xff] (!%p202_p2)   ;;  %v2265_v8 = vld [vmem:[%s3199_s1 + $0x24] ss:$8 sps:$4 sm:$0xff] (!%p202_p2)  }
   0x8   : > { %1494 = vmatpush1.bf16.msra.mxu0 (!%p202_p2), %v2258_v3  ;;  %1349 = vmatprep.subr.bf16.mxu1 (!%p202_p2), %v2259_v4  ;;  %v2264_v7 = vld [vmem:[%s3199_s1 + $0x210] ss:$8 sps:$4 sm:$0xff] (!%p202_p2)   ;;  %v2267_v9 = vld [vmem:[%s3199_s1 + $0x224] ss:$8 sps:$4 sm:$0xff] (!%p202_p2)   ;;  %v2269_v10 = vld [vmem:[%s3199_s1 + $0x20] ss:$8 sps:$4 sm:$0xff] (!%p202_p2)  }
   0x9   : > { %1495 = vmatprep.subr.bf16.mxu0 (!%p202_p2), %v2261_v5  ;;  %v2270_v11 = vld [vmem:[%s3199_s1 + $0x220] ss:$8 sps:$4 sm:$0xff] (!%p202_p2)   ;;  %v2271_v12 = vld [vmem:[%s3199_s1 + $0x34] ss:$8 sps:$4 sm:$0xff] (!%p202_p2)   ;;  %v2275_v14 = vld [vmem:[%s3199_s1 + $0x30] ss:$8 sps:$4 sm:$0xff] (!%p202_p2)  }
   0xa   : > { %v2273_v13 = vld [vmem:[%s3199_s1 + $0x234] ss:$8 sps:$4 sm:$0xff] (!%p202_p2)   ;;  %v2276_v15 = vld [vmem:[%s3199_s1 + $0x230] ss:$8 sps:$4 sm:$0xff] (!%p202_p2)   ;;  %v2277_v16 = vld [vmem:[%s3199_s1 + $0x44] ss:$8 sps:$4 sm:$0xff] (!%p202_p2)  }
   0xb   : > { %1350 = vmatpush1.bf16.msra.mxu1 (!%p202_p2), %v2263_v6  ;;  %v2279_v17 = vld [vmem:[%s3199_s1 + $0x244] ss:$8 sps:$4 sm:$0xff] (!%p202_p2)   ;;  %v2281_v18 = vld [vmem:[%s3199_s1 + $0x40] ss:$8 sps:$4 sm:$0xff] (!%p202_p2)   ;;  %v2283_v20 = vld [vmem:[%s3199_s1 + $0x54] ss:$8 sps:$4 sm:$0xff] (!%p202_p2)  }
   0xc   : > { %1496 = vmatpush1.bf16.msra.mxu0 (!%p202_p2), %v2264_v7  ;;  %1351 = vmatprep.subr.bf16.mxu1 (!%p202_p2), %v2265_v8  ;;  %v2282_v19 = vld [vmem:[%s3199_s1 + $0x240] ss:$8 sps:$4 sm:$0xff] (!%p202_p2)   ;;  %v2285_v21 = vld [vmem:[%s3199_s1 + $0x254] ss:$8 sps:$4 sm:$0xff] (!%p202_p2)   ;;  %v2287_v22 = vld [vmem:[%s3199_s1 + $0x50] ss:$8 sps:$4 sm:$0xff] (!%p202_p2)  }
   0xd   : > { %1497 = vmatprep.subr.bf16.mxu0 %v2267_v9  ;;  %v2288_v23 = vld [vmem:[%s3199_s1 + $0x250] ss:$8 sps:$4 sm:$0xff]   ;;  %v2289_v24 = vld [vmem:[%s3199_s1 + $0x64] ss:$8 sps:$4 sm:$0xff]   ;;  %v2293_v26 = vld [vmem:[%s3199_s1 + $0x60] ss:$8 sps:$4 sm:$0xff]  }
   0xe   : > { %v2291_v25 = vld [vmem:[%s3199_s1 + $0x264] ss:$8 sps:$4 sm:$0xff]   ;;  %v2294_v27 = vld [vmem:[%s3199_s1 + $0x260] ss:$8 sps:$4 sm:$0xff]   ;;  %v2295_v28 = vld [vmem:[%s3199_s1 + $0x74] ss:$8 sps:$4 sm:$0xff]  }
   0xf   : > { %1352 = vmatpush1.bf16.msra.mxu1 %v2269_v10  ;;  %v2297_v29 = vld [vmem:[%s3199_s1 + $0x274] ss:$8 sps:$4 sm:$0xff]   ;;  %v2299_v30 = vld [vmem:[%s3199_s1 + $0x70] ss:$8 sps:$4 sm:$0xff]   ;;  %v2301_v32 = vld [vmem:[%s3199_s1 + $0x84] ss:$8 sps:$4 sm:$0xff]  }
  0x10   : > { %1498 = vmatpush1.bf16.msra.mxu0 %v2270_v11  ;;  %1353 = vmatprep.subr.bf16.mxu1 %v2271_v12  ;;  %v2300_v31 = vld [vmem:[%s3199_s1 + $0x270] ss:$8 sps:$4 sm:$0xff]   ;;  %p238_p3 = scmp.lt.s32.totalorder %s1955_s9, 15  ;;  %v2303_v33 = vld [vmem:[%s3199_s1 + $0x284] ss:$8 sps:$4 sm:$0xff]  }
  0x11   : > { %1499 = vmatprep.subr.bf16.mxu0 %v2273_v13  ;;  %v2305_v34 = vld [vmem:[%s3199_s1 + $0x80] ss:$8 sps:$4 sm:$0xff]   ;;  %v2307_v36 = vld [vmem:[%s3199_s1 + $0x94] ss:$8 sps:$4 sm:$0xff]   ;;  %v2311_v38 = vld [vmem:[%s3199_s1 + $0x90] ss:$8 sps:$4 sm:$0xff]  }
  0x12   : > { %v2306_v35 = vld [vmem:[%s3199_s1 + $0x280] ss:$8 sps:$4 sm:$0xff]   ;;  %s3205_s9 = smov (!%p238_p3, %s1955_s9), 15  ;;  %v2309_v37 = vld [vmem:[%s3199_s1 + $0x294] ss:$8 sps:$4 sm:$0xff]  }
  0x13   : > { %1354 = vmatpush1.bf16.msra.mxu1 %v2275_v14  ;;  %v2312_v39 = vld [vmem:[%s3199_s1 + $0x290] ss:$8 sps:$4 sm:$0xff]   ;;  %v2313_v40 = vld [vmem:[%s3199_s1 + $0xa4] ss:$8 sps:$4 sm:$0xff]   ;;  %s2243_s8 = smul.u32 36, %s3205_s9 }
  0x14   : > { %1500 = vmatpush1.bf16.msra.mxu0 %v2276_v15  ;;  %1355 = vmatprep.subr.bf16.mxu1 %v2277_v16  ;;  %v2315_v41 = vld [vmem:[%s3199_s1 + $0x2a4] ss:$8 sps:$4 sm:$0xff]   ;;  %v2317_v42 = vld [vmem:[%s3199_s1 + $0xa0] ss:$8 sps:$4 sm:$0xff]   ;;  %v2319_v44 = vld [vmem:[%s3199_s1 + $0xb4] ss:$8 sps:$4 sm:$0xff]  }
  0x15   : > { %1501 = vmatprep.subr.bf16.mxu0 %v2279_v17  ;;  %v2318_v43 = vld [vmem:[%s3199_s1 + $0x2a0] ss:$8 sps:$4 sm:$0xff]   ;;  %s2711_s21 = scalar_lea.vmem %s3198_s0, %s2243_s8  ;;  %v2321_v45 = vld [vmem:[%s3199_s1 + $0x2b4] ss:$8 sps:$4 sm:$0xff]   ;;  %v2323_v46 = vld [vmem:[%s3199_s1 + $0xb0] ss:$8 sps:$4 sm:$0xff]  }
  0x16   : > { %v2324_v47 = vld [vmem:[%s3199_s1 + $0x2b0] ss:$8 sps:$4 sm:$0xff]   ;;  %v2351_v48 = vld [vmem:[%s2711_s21 + $0x4] ss:$36 sps:$4 sm:$0xff]   ;;  %v2331_v54 = vld [vmem:[%s3199_s1 + $0xd4] ss:$8 sps:$4 sm:$0xff]  }
  0x17   : > { %1356 = vmatpush1.bf16.msra.mxu1 %v2281_v18  ;;  %v2325_v49 = vld [vmem:[%s3199_s1 + $0xc4] ss:$8 sps:$4 sm:$0xff]   ;;  %1379 = vmatprep.mubr.bf16.mxu1 %v2351_v48  ;;  %v2357_v51 = vld [vmem:[%s2711_s21 + $0x14] ss:$36 sps:$4 sm:$0xff]   ;;  %v2329_v52 = vld [vmem:[%s3199_s1 + $0xc0] ss:$8 sps:$4 sm:$0xff]  }
  0x18   : > { %1502 = vmatpush1.bf16.msra.mxu0 %v2282_v19  ;;  %1357 = vmatprep.subr.bf16.mxu1 %v2283_v20  ;;  %v2327_v50 = vld [vmem:[%s3199_s1 + $0x2c4] ss:$8 sps:$4 sm:$0xff]   ;;  %v2330_v53 = vld [vmem:[%s3199_s1 + $0x2c0] ss:$8 sps:$4 sm:$0xff]   ;;  %v2333_v55 = vld [vmem:[%s3199_s1 + $0x2d4] ss:$8 sps:$4 sm:$0xff]  }
  0x19   : > { %1503 = vmatprep.subr.bf16.mxu0 %v2285_v21  ;;  %1525 = vmatprep.mubr.bf16.mxu0 %v2357_v51  ;;  %v2335_v56 = vld [vmem:[%s3199_s1 + $0xd0] ss:$8 sps:$4 sm:$0xff]   ;;  %v2337_v58 = vld [vmem:[%s3199_s1 + $0xe4] ss:$8 sps:$4 sm:$0xff]   ;;  %v2341_v60 = vld [vmem:[%s3199_s1 + $0xe0] ss:$8 sps:$4 sm:$0xff]  }
  0x1a   : > { %v2336_v57 = vld [vmem:[%s3199_s1 + $0x2d0] ss:$8 sps:$4 sm:$0xff]   ;;  %v2339_v59 = vld [vmem:[%s3199_s1 + $0x2e4] ss:$8 sps:$4 sm:$0xff]   ;;  %v2342_v61 = vld [vmem:[%s3199_s1 + $0x2e0] ss:$8 sps:$4 sm:$0xff]  }
  0x1b   : > { %1358 = vmatpush1.bf16.msra.mxu1 %v2287_v22  ;;  %v2343_v62 = vld [vmem:[%s3199_s1 + $0xf4] ss:$8 sps:$4 sm:$0xff]   ;;  %v2347_v0 = vld [vmem:[%s3199_s1 + $0xf0] ss:$8 sps:$4 sm:$0xff]   ;;  %v2354_v2 = vld [vmem:[%s3199_s1 + $0x104] ss:$8 sps:$4 sm:$0xff]  }
  0x1c   : > { %1504 = vmatpush1.bf16.msra.mxu0 %v2288_v23  ;;  %1359 = vmatprep.subr.bf16.mxu1 %v2289_v24  ;;  %v2345_v63 = vld [vmem:[%s3199_s1 + $0x2f4] ss:$8 sps:$4 sm:$0xff]   ;;  %v2348_v1 = vld [vmem:[%s3199_s1 + $0x2f0] ss:$8 sps:$4 sm:$0xff]   ;;  %v2360_v3 = vld [vmem:[%s3199_s1 + $0x304] ss:$8 sps:$4 sm:$0xff]  }
  0x1d   : > { %1505 = vmatprep.subr.bf16.mxu0 %v2291_v25  ;;  %v2349_v4 = vld [vmem:[%s2711_s21] ss:$36 sps:$4 sm:$0xff]   ;;  %v2355_v6 = vld [vmem:[%s2711_s21 + $0x10] ss:$36 sps:$4 sm:$0xff]   ;;  %v2419_v20 = vld [vmem:[%s2711_s21 + $0x48] ss:$36 sps:$4 sm:$0xff]  }
  0x1e   : > { %v2352_v5 = vld [vmem:[%s3199_s1 + $0x100] ss:$8 sps:$4 sm:$0xff]   ;;  %v2363_v8 = vld [vmem:[%s3199_s1 + $0x114] ss:$8 sps:$4 sm:$0xff]   ;;  %v2361_v10 = vld [vmem:[%s3199_s1 + $0x110] ss:$8 sps:$4 sm:$0xff]  }
  0x1f   : > { %1360 = vmatpush1.bf16.msra.mxu1 %v2293_v26  ;;  %v2358_v7 = vld [vmem:[%s3199_s1 + $0x300] ss:$8 sps:$4 sm:$0xff]   ;;  %v2366_v9 = vld [vmem:[%s3199_s1 + $0x314] ss:$8 sps:$4 sm:$0xff]   ;;  %v2364_v11 = vld [vmem:[%s3199_s1 + $0x310] ss:$8 sps:$4 sm:$0xff]  }
  0x20   : > { %1506 = vmatpush1.bf16.msra.mxu0 %v2294_v27  ;;  %1361 = vmatprep.subr.bf16.mxu1 %v2295_v28  ;;  %v2369_v12 = vld [vmem:[%s3199_s1 + $0x124] ss:$8 sps:$4 sm:$0xff]   ;;  %v2367_v14 = vld [vmem:[%s3199_s1 + $0x120] ss:$8 sps:$4 sm:$0xff]   ;;  %v2375_v16 = vld [vmem:[%s3199_s1 + $0x134] ss:$8 sps:$4 sm:$0xff]  }
  0x21   : > { %1507 = vmatprep.subr.bf16.mxu0 %v2297_v29  ;;  %v2372_v13 = vld [vmem:[%s3199_s1 + $0x324] ss:$8 sps:$4 sm:$0xff]   ;;  %v2370_v15 = vld [vmem:[%s3199_s1 + $0x320] ss:$8 sps:$4 sm:$0xff]   ;;  %v2378_v17 = vld [vmem:[%s3199_s1 + $0x334] ss:$8 sps:$4 sm:$0xff]  }
  0x22   : > { %v2415_v18 = vld [vmem:[%s2711_s21 + $0x4c] ss:$36 sps:$4 sm:$0xff]   ;;  %v2417_v19 = vld [vmem:[%s2711_s21 + $0x5c] ss:$36 sps:$4 sm:$0xff]  }
  0x23   : > { %1362 = vmatpush1.bf16.msra.mxu1 %v2299_v30  ;;  %v2373_v21 = vld [vmem:[%s3199_s1 + $0x130] ss:$8 sps:$4 sm:$0xff]   ;;  %v2381_v24 = vld [vmem:[%s3199_s1 + $0x144] ss:$8 sps:$4 sm:$0xff]   ;;  %v2379_v26 = vld [vmem:[%s3199_s1 + $0x140] ss:$8 sps:$4 sm:$0xff]  }
  0x24   : > { %1508 = vmatpush1.bf16.msra.mxu0 %v2300_v31  ;;  %1363 = vmatprep.subr.bf16.mxu1 %v2301_v32  ;;  %v2376_v22 = vld [vmem:[%s3199_s1 + $0x330] ss:$8 sps:$4 sm:$0xff]   ;;  %v2384_v25 = vld [vmem:[%s3199_s1 + $0x344] ss:$8 sps:$4 sm:$0xff]   ;;  %v2382_v27 = vld [vmem:[%s3199_s1 + $0x340] ss:$8 sps:$4 sm:$0xff]  }
  0x25   : > { %1509 = vmatprep.subr.bf16.mxu0 %v2303_v33  ;;  %v2423_v23 = vld [vmem:[%s2711_s21 + $0x58] ss:$36 sps:$4 sm:$0xff]   ;;  %v2435_v31 = vld [vmem:[%s2711_s21 + $0xa4] ss:$36 sps:$4 sm:$0xff]   ;;  %v2437_v32 = vld [vmem:[%s2711_s21 + $0x90] ss:$36 sps:$4 sm:$0xff]  }
  0x26   : > { %v2387_v28 = vld [vmem:[%s3199_s1 + $0x154] ss:$8 sps:$4 sm:$0xff]   ;;  %v2385_v33 = vld [vmem:[%s3199_s1 + $0x150] ss:$8 sps:$4 sm:$0xff]   ;;  %v2405_v48 = vld [vmem:[%s3199_s1 + $0x184] ss:$8 sps:$4 sm:$0xff]  }
  0x27   : > { %1364 = vmatpush1.bf16.msra.mxu1 %v2305_v34  ;;  %v2390_v29 = vld [vmem:[%s3199_s1 + $0x354] ss:$8 sps:$4 sm:$0xff]   ;;  %v2388_v34 = vld [vmem:[%s3199_s1 + $0x350] ss:$8 sps:$4 sm:$0xff]   ;;  %v2406_v51 = vld [vmem:[%s3199_s1 + $0x380] ss:$8 sps:$4 sm:$0xff]  }
  0x28   : > { %1510 = vmatpush1.bf16.msra.mxu0 %v2306_v35  ;;  %1365 = vmatprep.subr.bf16.mxu1 %v2307_v36  ;;  %v2433_v30 = vld [vmem:[%s2711_s21 + $0x94] ss:$36 sps:$4 sm:$0xff]   ;;  %v2441_v35 = vld [vmem:[%s2711_s21 + $0xa0] ss:$36 sps:$4 sm:$0xff]  }
  0x29   : > { %1511 = vmatprep.subr.bf16.mxu0 %v2309_v37  ;;  %v2393_v36 = vld [vmem:[%s3199_s1 + $0x164] ss:$8 sps:$4 sm:$0xff]  }
  0x2a   : > { %v2396_v37 = vld [vmem:[%s3199_s1 + $0x364] ss:$8 sps:$4 sm:$0xff]  }
  0x2b   : > { %1366 = vmatpush1.bf16.msra.mxu1 %v2311_v38  ;;  %v2391_v38 = vld [vmem:[%s3199_s1 + $0x160] ss:$8 sps:$4 sm:$0xff]  }
  0x2c   : > { %1512 = vmatpush1.bf16.msra.mxu0 %v2312_v39  ;;  %1367 = vmatprep.subr.bf16.mxu1 %v2313_v40  ;;  %v2394_v39 = vld [vmem:[%s3199_s1 + $0x360] ss:$8 sps:$4 sm:$0xff]   ;;  %v2399_v40 = vld [vmem:[%s3199_s1 + $0x174] ss:$8 sps:$4 sm:$0xff]  }
  0x2d   : > { %1513 = vmatprep.subr.bf16.mxu0 %v2315_v41  ;;  %v2402_v41 = vld [vmem:[%s3199_s1 + $0x374] ss:$8 sps:$4 sm:$0xff]  }
  0x2f   : > { %1368 = vmatpush1.bf16.msra.mxu1 %v2317_v42  ;;  %v2451_v42 = vld [vmem:[%s2711_s21 + $0xdc] ss:$36 sps:$4 sm:$0xff]  }
  0x30   : > { %1514 = vmatpush1.bf16.msra.mxu0 %v2318_v43  ;;  %1369 = vmatprep.subr.bf16.mxu1 %v2319_v44  ;;  %v2453_v43 = vld [vmem:[%s2711_s21 + $0xec] ss:$36 sps:$4 sm:$0xff]   ;;  %v2455_v44 = vld [vmem:[%s2711_s21 + $0xd8] ss:$36 sps:$4 sm:$0xff]  }
  0x31   : > { %1515 = vmatprep.subr.bf16.mxu0 %v2321_v45  ;;  %v2397_v45 = vld [vmem:[%s3199_s1 + $0x170] ss:$8 sps:$4 sm:$0xff]  }
  0x33   : > { %1370 = vmatpush1.bf16.msra.mxu1 %v2323_v46  ;;  %v2400_v46 = vld [vmem:[%s3199_s1 + $0x370] ss:$8 sps:$4 sm:$0xff]  }
  0x34   : > { %1516 = vmatpush1.bf16.msra.mxu0 %v2324_v47  ;;  %1371 = vmatprep.subr.bf16.mxu1 %v2325_v49  ;;  %v2459_v47 = vld [vmem:[%s2711_s21 + $0xe8] ss:$36 sps:$4 sm:$0xff]  }
  0x35   : > { %1517 = vmatprep.subr.bf16.mxu0 %v2327_v50  ;;  %v2408_v49 = vld [vmem:[%s3199_s1 + $0x384] ss:$8 sps:$4 sm:$0xff]   ;;  %v2403_v50 = vld [vmem:[%s3199_s1 + $0x180] ss:$8 sps:$4 sm:$0xff]  }
  0x37   : > { %1372 = vmatpush1.bf16.msra.mxu1 %v2329_v52  ;;  %v2411_v52 = vld [vmem:[%s3199_s1 + $0x194] ss:$8 sps:$4 sm:$0xff]  }
  0x38   : > { %1518 = vmatpush1.bf16.msra.mxu0 %v2330_v53  ;;  %1373 = vmatprep.subr.bf16.mxu1 %v2331_v54  ;;  %v2414_v53 = vld [vmem:[%s3199_s1 + $0x394] ss:$8 sps:$4 sm:$0xff]   ;;  %v2471_v54 = vld [vmem:[%s2711_s21 + $0xc] ss:$36 sps:$4 sm:$0xff]  }
  0x39   : > { %1519 = vmatprep.subr.bf16.mxu0 %v2333_v55  ;;  %v2474_v55 = vld [vmem:[%s2711_s21 + $0x1c] ss:$36 sps:$4 sm:$0xff]  }
  0x3b   : > { %1374 = vmatpush1.bf16.msra.mxu1 %v2335_v56  ;;  %v2409_v56 = vld [vmem:[%s3199_s1 + $0x190] ss:$8 sps:$4 sm:$0xff]  }
  0x3c   : > { %1520 = vmatpush1.bf16.msra.mxu0 %v2336_v57  ;;  %1375 = vmatprep.subr.bf16.mxu1 %v2337_v58  ;;  %v2412_v57 = vld [vmem:[%s3199_s1 + $0x390] ss:$8 sps:$4 sm:$0xff]   ;;  %v2422_v58 = vld [vmem:[%s3199_s1 + $0x1a4] ss:$8 sps:$4 sm:$0xff]  }
  0x3d   : > { %1521 = vmatprep.subr.bf16.mxu0 %v2339_v59  ;;  %v2426_v59 = vld [vmem:[%s3199_s1 + $0x3a4] ss:$8 sps:$4 sm:$0xff]  }
  0x3f   : > { %1376 = vmatpush1.bf16.msra.mxu1 %v2341_v60  ;;  %v2420_v60 = vld [vmem:[%s3199_s1 + $0x1a0] ss:$8 sps:$4 sm:$0xff]  }
  0x40   : > { %1522 = vmatpush1.bf16.msra.mxu0 %v2342_v61  ;;  %1377 = vmatprep.subr.bf16.mxu1 %v2343_v62  ;;  %v2424_v61 = vld [vmem:[%s3199_s1 + $0x3a0] ss:$8 sps:$4 sm:$0xff]   ;;  %v2429_v62 = vld [vmem:[%s3199_s1 + $0x1b4] ss:$8 sps:$4 sm:$0xff]  }
  0x41   : > { %1523 = vmatprep.subr.bf16.mxu0 %v2345_v63  ;;  %v2432_v63 = vld [vmem:[%s3199_s1 + $0x3b4] ss:$8 sps:$4 sm:$0xff]  }
  0x43   : > { %1378 = vmatpush1.bf16.msra.mxu1 %v2347_v0  ;;  %v2427_v0 = vld [vmem:[%s3199_s1 + $0x1b0] ss:$8 sps:$4 sm:$0xff]  }
  0x44   : > { %1524 = vmatpush1.bf16.msra.mxu0 %v2348_v1  ;;  %1420 = vmatprep.subr.bf16.mxu1 %v2354_v2  ;;  %v2430_v1 = vld [vmem:[%s3199_s1 + $0x3b0] ss:$8 sps:$4 sm:$0xff]   ;;  %v2440_v2 = vld [vmem:[%s3199_s1 + $0x1c4] ss:$8 sps:$4 sm:$0xff]  }
  0x45   : > { %1566 = vmatprep.subr.bf16.mxu0 %v2360_v3  ;;  %v2444_v3 = vld [vmem:[%s3199_s1 + $0x3c4] ss:$8 sps:$4 sm:$0xff]  }
  0x46   : > { %1380 = vmatmul.mubr.bf16.vlgmr.msra.gmra.mrb[0].mxu1 %v2349_v4  ;;  %v2438_v4 = vld [vmem:[%s3199_s1 + $0x1c0] ss:$8 sps:$4 sm:$0xff]  }
  0x47   : > { %1526 = vmatmul.mubr.bf16.vlgmr.msra.gmra.mrb[0].mxu0 %v2355_v6  ;;  %1421 = vmatpush1.bf16.msra.mxu1 %v2352_v5  ;;  %v2442_v5 = vld [vmem:[%s3199_s1 + $0x3c0] ss:$8 sps:$4 sm:$0xff]   ;;  %v2447_v6 = vld [vmem:[%s3199_s1 + $0x1d4] ss:$8 sps:$4 sm:$0xff]  }
  0x48   : > { %1567 = vmatpush1.bf16.msra.mxu0 %v2358_v7  ;;  %1422 = vmatprep.subr.bf16.mxu1 %v2363_v8  ;;  %v2450_v7 = vld [vmem:[%s3199_s1 + $0x3d4] ss:$8 sps:$4 sm:$0xff]   ;;  %v2445_v8 = vld [vmem:[%s3199_s1 + $0x1d0] ss:$8 sps:$4 sm:$0xff]  }
  0x49   : > { %1568 = vmatprep.subr.bf16.mxu0 %v2366_v9  ;;  %1389 = vmatprep.mubr.bf16.mxu1 %v2415_v18  ;;  %v2448_v9 = vld [vmem:[%s3199_s1 + $0x3d0] ss:$8 sps:$4 sm:$0xff]   ;;  %v2477_v18 = vld [vmem:[%s3199_s1 + $0x404] ss:$8 sps:$4 sm:$0xff]  }
  0x4a   : > { %1535 = vmatprep.mubr.bf16.mxu0 %v2417_v19  ;;  %v2469_v19 = vld [vmem:[%s2711_s21 + $0x8] ss:$36 sps:$4 sm:$0xff]  }
  0x4b   : > { %1423 = vmatpush1.bf16.msra.mxu1 %v2361_v10  ;;  %v2458_v10 = vld [vmem:[%s3199_s1 + $0x1e4] ss:$8 sps:$4 sm:$0xff]  }
  0x4c   : > { %1569 = vmatpush1.bf16.msra.mxu0 %v2364_v11  ;;  %1424 = vmatprep.subr.bf16.mxu1 %v2369_v12  ;;  %v2462_v11 = vld [vmem:[%s3199_s1 + $0x3e4] ss:$8 sps:$4 sm:$0xff]   ;;  %v2456_v12 = vld [vmem:[%s3199_s1 + $0x1e0] ss:$8 sps:$4 sm:$0xff]  }
  0x4d   : > { %1570 = vmatprep.subr.bf16.mxu0 %v2372_v13  ;;  %v2460_v13 = vld [vmem:[%s3199_s1 + $0x3e0] ss:$8 sps:$4 sm:$0xff]  }
  0x4e   : > { %1390 = vmatmul.mubr.bf16.gmra.mrb[4].mxu1 %v2419_v20  ;;  %v2472_v20 = vld [vmem:[%s2711_s21 + $0x18] ss:$36 sps:$4 sm:$0xff]  }
  0x4f   : > { %1425 = vmatpush1.bf16.msra.mxu1 %v2367_v14  ;;  %1536 = vmatmul.mubr.bf16.gmra.mrb[4].mxu0 %v2423_v23  ;;  %v2465_v14 = vld [vmem:[%s3199_s1 + $0x1f4] ss:$8 sps:$4 sm:$0xff]  }
  0x50   : > { %1571 = vmatpush1.bf16.msra.mxu0 %v2370_v15  ;;  %1426 = vmatprep.subr.bf16.mxu1 %v2375_v16  ;;  %v2468_v15 = vld [vmem:[%s3199_s1 + $0x3f4] ss:$8 sps:$4 sm:$0xff]   ;;  %v2463_v16 = vld [vmem:[%s3199_s1 + $0x1f0] ss:$8 sps:$4 sm:$0xff]  }
  0x51   : > { %1572 = vmatprep.subr.bf16.mxu0 %v2378_v17  ;;  %1399 = vmatprep.mubr.bf16.mxu1 %v2433_v30  ;;  %v2466_v17 = vld [vmem:[%s3199_s1 + $0x3f0] ss:$8 sps:$4 sm:$0xff]   ;;  %v2492_v30 = vld [vmem:[%s3199_s1 + $0x434] ss:$8 sps:$4 sm:$0xff]  }
  0x52   : > { %1545 = vmatprep.mubr.bf16.mxu0 %v2435_v31  ;;  %v2481_v23 = vld [vmem:[%s2711_s21 + $0x54] ss:$36 sps:$4 sm:$0xff]   ;;  %v2493_v31 = vld [vmem:[%s2711_s21 + $0x9c] ss:$36 sps:$4 sm:$0xff]  }
  0x53   : > { %1427 = vmatpush1.bf16.msra.mxu1 %v2373_v21  ;;  %v2475_v21 = vld [vmem:[%s3199_s1 + $0x400] ss:$8 sps:$4 sm:$0xff]  }
  0x54   : > { %1573 = vmatpush1.bf16.msra.mxu0 %v2376_v22  ;;  %1428 = vmatprep.subr.bf16.mxu1 %v2381_v24  ;;  %v2480_v22 = vld [vmem:[%s3199_s1 + $0x414] ss:$8 sps:$4 sm:$0xff]   ;;  %v2483_v24 = vld [vmem:[%s2711_s21 + $0x64] ss:$36 sps:$4 sm:$0xff]  }
  0x55   : > { %1574 = vmatprep.subr.bf16.mxu0 %v2384_v25  ;;  %v2478_v25 = vld [vmem:[%s3199_s1 + $0x410] ss:$8 sps:$4 sm:$0xff]  }
  0x56   : > { %1400 = vmatmul.mubr.bf16.gmra.mrb[8].mxu1 %v2437_v32  ;;  %v2495_v32 = vld [vmem:[%s2711_s21 + $0xac] ss:$36 sps:$4 sm:$0xff]  }
  0x57   : > { %1429 = vmatpush1.bf16.msra.mxu1 %v2379_v26  ;;  %1546 = vmatmul.mubr.bf16.gmra.mrb[8].mxu0 %v2441_v35  ;;  %v2489_v26 = vld [vmem:[%s3199_s1 + $0x424] ss:$8 sps:$4 sm:$0xff]   ;;  %v2497_v35 = vld [vmem:[%s2711_s21 + $0x98] ss:$36 sps:$4 sm:$0xff]  }
  0x58   : > { %1575 = vmatpush1.bf16.msra.mxu0 %v2382_v27  ;;  %1430 = vmatprep.subr.bf16.mxu1 %v2387_v28  ;;  %v2485_v27 = vld [vmem:[%s2711_s21 + $0x50] ss:$36 sps:$4 sm:$0xff]   ;;  %v2486_v28 = vld [vmem:[%s2711_s21 + $0x60] ss:$36 sps:$4 sm:$0xff]  }
  0x59   : > { %1576 = vmatprep.subr.bf16.mxu0 %v2390_v29  ;;  %1409 = vmatprep.mubr.bf16.mxu1 %v2451_v42  ;;  %v2487_v29 = vld [vmem:[%s3199_s1 + $0x420] ss:$8 sps:$4 sm:$0xff]   ;;  %v2513_v42 = vld [vmem:[%s3199_s1 + $0x464] ss:$8 sps:$4 sm:$0xff]  }
  0x5a   : > { %1555 = vmatprep.mubr.bf16.mxu0 %v2453_v43  ;;  %v2509_v43 = vld [vmem:[%s2711_s21 + $0xe0] ss:$36 sps:$4 sm:$0xff]  }
  0x5b   : > { %1431 = vmatpush1.bf16.msra.mxu1 %v2385_v33  ;;  %v2490_v33 = vld [vmem:[%s3199_s1 + $0x430] ss:$8 sps:$4 sm:$0xff]  }
  0x5c   : > { %1577 = vmatpush1.bf16.msra.mxu0 %v2388_v34  ;;  %1432 = vmatprep.subr.bf16.mxu1 %v2393_v36  ;;  %v2501_v34 = vld [vmem:[%s3199_s1 + $0x444] ss:$8 sps:$4 sm:$0xff]  }
  0x5d   : > { %1578 = vmatprep.subr.bf16.mxu0 %v2396_v37  ;;  %v2498_v36 = vld [vmem:[%s2711_s21 + $0xa8] ss:$36 sps:$4 sm:$0xff]  }
  0x5e   : > { %1410 = vmatmul.mubr.bf16.gmra.mrb[12].mxu1 %v2455_v44  ;;  %v2499_v37 = vld [vmem:[%s3199_s1 + $0x440] ss:$8 sps:$4 sm:$0xff]   ;;  %v2510_v44 = vld [vmem:[%s2711_s21 + $0xf0] ss:$36 sps:$4 sm:$0xff]  }
  0x5f   : > { %1433 = vmatpush1.bf16.msra.mxu1 %v2391_v38  ;;  %1556 = vmatmul.mubr.bf16.gmra.mrb[12].mxu0 %v2459_v47  ;;  %v2504_v38 = vld [vmem:[%s3199_s1 + $0x454] ss:$8 sps:$4 sm:$0xff]   ;;  %v2514_v47 = vld [vmem:[%s3199_s1 + $0x470] ss:$8 sps:$4 sm:$0xff]  }
  0x60   : > { %1579 = vmatpush1.bf16.msra.mxu0 %v2394_v39  ;;  %1434 = vmatprep.subr.bf16.mxu1 %v2399_v40  ;;  %v2505_v39 = vld [vmem:[%s2711_s21 + $0xe4] ss:$36 sps:$4 sm:$0xff]   ;;  %v2507_v40 = vld [vmem:[%s2711_s21 + $0xf4] ss:$36 sps:$4 sm:$0xff]  }
  0x61   : > { %1580 = vmatprep.subr.bf16.mxu0 %v2402_v41  ;;  %1452 = vmatprep.mubr.bf16.mxu1 %v2471_v54  ;;  %v2502_v41 = vld [vmem:[%s3199_s1 + $0x450] ss:$8 sps:$4 sm:$0xff]  }
  0x62   : > { %1598 = vmatprep.mubr.bf16.mxu0 %v2474_v55 }
  0x63   : > { %1435 = vmatpush1.bf16.msra.mxu1 %v2397_v45  ;;  %v2511_v45 = vld [vmem:[%s3199_s1 + $0x460] ss:$8 sps:$4 sm:$0xff]  }
  0x64   : > { %1581 = vmatpush1.bf16.msra.mxu0 %v2400_v46  ;;  %1436 = vmatprep.subr.bf16.mxu1 %v2405_v48  ;;  %v2516_v46 = vld [vmem:[%s3199_s1 + $0x474] ss:$8 sps:$4 sm:$0xff]   ;;  %v2529_v48 = vmov 0  }
  0x65   : > { %1582 = vmatprep.subr.bf16.mxu0 %v2408_v49  ;;  %v2517_v49 = vld [vmem:[%s2711_s21 + $0x20] ss:$36 sps:$4 sm:$0xff]  }
  0x67   : > { %1437 = vmatpush1.bf16.msra.mxu1 %v2403_v50  ;;  %v2518_v50 = vld [vmem:[%s2711_s21 + $0xb0] ss:$36 sps:$4 sm:$0xff]  }
  0x68   : > { %1583 = vmatpush1.bf16.msra.mxu0 %v2406_v51  ;;  %1438 = vmatprep.subr.bf16.mxu1 %v2411_v52  ;;  %v2519_v51 = vld [vmem:[%s2711_s21 + $0x68] ss:$36 sps:$4 sm:$0xff]   ;;  %v2520_v52 = vld [vmem:[%s2711_s21 + $0xf8] ss:$36 sps:$4 sm:$0xff]   ;;  %s2153_s21 = sshll.u32 %s3205_s9, 3 }
  0x69   : > { %1584 = vmatprep.subr.bf16.mxu0 %v2414_v53  ;;  %s249_s24 = scalar_lea.vmem %s3202_s4, %s2153_s21  ;;  %s3145_s6 = scalar_lea.vmem %s3203_s5, %s2153_s21 }
  0x6b   : > { %1439 = vmatpush1.bf16.msra.mxu1 %v2409_v56 }
  0x6c   : > { %1585 = vmatpush1.bf16.msra.mxu0 %v2412_v57  ;;  %1440 = vmatprep.subr.bf16.mxu1 %v2422_v58 }
  0x6d   : > { %1586 = vmatprep.subr.bf16.mxu0 %v2426_v59 }
  0x6f   : > { %1441 = vmatpush1.bf16.msra.mxu1 %v2420_v60 }
  0x70   : > { %1587 = vmatpush1.bf16.msra.mxu0 %v2424_v61  ;;  %1442 = vmatprep.subr.bf16.mxu1 %v2429_v62 }
  0x71   : > { %1588 = vmatprep.subr.bf16.mxu0 %v2432_v63 }
  0x73   : > { %1443 = vmatpush1.bf16.msra.mxu1 %v2427_v0 }
  0x74   : > { %1589 = vmatpush1.bf16.msra.mxu0 %v2430_v1  ;;  %1444 = vmatprep.subr.bf16.mxu1 %v2440_v2  ;;  %v1714_v2 = vlaneseq }
  0x75   : > { %1590 = vmatprep.subr.bf16.mxu0 %v2444_v3 }
  0x77   : > { %1445 = vmatpush1.bf16.msra.mxu1 %v2438_v4 }
  0x78   : > { %1591 = vmatpush1.bf16.msra.mxu0 %v2442_v5  ;;  %1446 = vmatprep.subr.bf16.mxu1 %v2447_v6 }
  0x79   : > { %1592 = vmatprep.subr.bf16.mxu0 %v2450_v7 }
  0x7b   : > { %1447 = vmatpush1.bf16.msra.mxu1 %v2445_v8 }
  0x7c   : > { %1593 = vmatpush1.bf16.msra.mxu0 %v2448_v9  ;;  %1448 = vmatprep.subr.bf16.mxu1 %v2458_v10  ;;  %v1715_v10 = vshrl.u32 %v1714_v2, 7 }
  0x7d   : > { %1594 = vmatprep.subr.bf16.mxu0 %v2462_v11 }
  0x7f   : > { %1449 = vmatpush1.bf16.msra.mxu1 %v2456_v12 }
  0x80   : > { %1595 = vmatpush1.bf16.msra.mxu0 %v2460_v13  ;;  %1450 = vmatprep.subr.bf16.mxu1 %v2465_v14 }
  0x81   : > { %1596 = vmatprep.subr.bf16.mxu0 %v2468_v15 }
  0x83   : > { %1451 = vmatpush1.bf16.msra.mxu1 %v2463_v16  ;;  %v1716_v16 = vsub.s32 0, %v1715_v10 }
  0x84   : > { %1597 = vmatpush1.bf16.msra.mxu0 %v2466_v17  ;;  %2163 = vmatprep.subr.bf16.mxu1 %v2477_v18  ;;  %v1720_v17 = vsub.s32 1, %v1715_v10 }
  0x85   : > { %1639 = vmatprep.subr.bf16.mxu0 %v2477_v18 }
  0x86   : > { %1453 = vmatmul.mubr.bf16.vlgmr.msra.gmra.mrb[0].mxu1 %v2469_v19 }
  0x87   : > { %1599 = vmatmul.mubr.bf16.vlgmr.msra.gmra.mrb[0].mxu0 %v2472_v20  ;;  %2171 = vmatpush1.bf16.msra.mxu1 %v2475_v21 }
  0x88   : > { %1640 = vmatpush1.bf16.msra.mxu0 %v2475_v21  ;;  %2164 = vmatprep.subr.bf16.mxu1 %v2480_v22  ;;  %v1712_v21 = vld [vmem:[%s3200_s2] sm:$0x3] }
  0x89   : > { %1641 = vmatprep.subr.bf16.mxu0 %v2480_v22  ;;  %1462 = vmatprep.mubr.bf16.mxu1 %v2481_v23  ;;  %v1740_v22 = vld [vmem:[%s3201_s3] sm:$0x3] }
  0x8a   : > { %1608 = vmatprep.mubr.bf16.mxu0 %v2483_v24 }
  0x8b   : > { %2172 = vmatpush1.bf16.msra.mxu1 %v2478_v25 }
  0x8c   : > { %1642 = vmatpush1.bf16.msra.mxu0 %v2478_v25  ;;  %2165 = vmatprep.subr.bf16.mxu1 %v2489_v26 }
  0x8d   : > { %1643 = vmatprep.subr.bf16.mxu0 %v2489_v26  ;;  %v1768_v26 = vld [vmem:[%s249_s24] sm:$0xff] }
  0x8e   : > { %1463 = vmatmul.mubr.bf16.gmra.mrb[4].mxu1 %v2485_v27  ;;  %v1772_v27 = vld [vmem:[%s249_s24 + $0x20] sm:$0xff] }
  0x8f   : > { %1609 = vmatmul.mubr.bf16.gmra.mrb[4].mxu0 %v2486_v28  ;;  %2173 = vmatpush1.bf16.msra.mxu1 %v2487_v29 }
  0x90   : > { %1644 = vmatpush1.bf16.msra.mxu0 %v2487_v29  ;;  %2166 = vmatprep.subr.bf16.mxu1 %v2492_v30  ;;  %v3086_v29 = vld [vmem:[%s249_s24 + $0x8] sm:$0xff] }
  0x91   : > { %1645 = vmatprep.subr.bf16.mxu0 %v2492_v30  ;;  %1472 = vmatprep.mubr.bf16.mxu1 %v2493_v31  ;;  %v3088_v30 = vld [vmem:[%s249_s24 + $0x28] sm:$0xff]  ;;  %v3090_v31 = vrot.slane %v1712_v21, %v1716_v16 }
  0x92   : > { %1618 = vmatprep.mubr.bf16.mxu0 %v2495_v32  ;;  %v3092_v32 = vrot.slane %v1740_v22, %v1716_v16 }
  0x93   : > { %2174 = vmatpush1.bf16.msra.mxu1 %v2490_v33 }
  0x94   : > { %1646 = vmatpush1.bf16.msra.mxu0 %v2490_v33  ;;  %2167 = vmatprep.subr.bf16.mxu1 %v2501_v34  ;;  %v3094_v33 = vrot.slane %v1712_v21, %v1720_v17 }
  0x95   : > { %1647 = vmatprep.subr.bf16.mxu0 %v2501_v34  ;;  %v3096_v34 = vrot.slane %v1740_v22, %v1720_v17 }
  0x96   : > { %1473 = vmatmul.mubr.bf16.gmra.mrb[8].mxu1 %v2497_v35  ;;  %v3098_v35 = vld [vmem:[%s249_s24 + $0x10] sm:$0xff] }
  0x97   : > { %1619 = vmatmul.mubr.bf16.gmra.mrb[8].mxu0 %v2498_v36  ;;  %2175 = vmatpush1.bf16.msra.mxu1 %v2499_v37  ;;  %v3100_v36 = vld [vmem:[%s249_s24 + $0x30] sm:$0xff] }
  0x98   : > { %1648 = vmatpush1.bf16.msra.mxu0 %v2499_v37  ;;  %2168 = vmatprep.subr.bf16.mxu1 %v2504_v38  ;;  %v1776_v37 = vunpack.c.l.bf16 %v1768_v26 }
  0x99   : > { %1649 = vmatprep.subr.bf16.mxu0 %v2504_v38  ;;  %1482 = vmatprep.mubr.bf16.mxu1 %v2505_v39  ;;  %v1784_v38 = vunpack.c.l.bf16 %v1772_v27  ;;  %v1777_v39 = vunpack.c.h.bf16 %v1768_v26 }
  0x9a   : > { %1628 = vmatprep.mubr.bf16.mxu0 %v2507_v40  ;;  %v1785_v40 = vunpack.c.h.bf16 %v1772_v27 }
  0x9b   : > { %2176 = vmatpush1.bf16.msra.mxu1 %v2502_v41 }
  0x9c   : > { %1650 = vmatpush1.bf16.msra.mxu0 %v2502_v41  ;;  %2169 = vmatprep.subr.bf16.mxu1 %v2513_v42  ;;  %v3102_v41 = vld [vmem:[%s249_s24 + $0x18] sm:$0xff] }
  0x9d   : > { %1651 = vmatprep.subr.bf16.mxu0 %v2513_v42  ;;  %v3104_v42 = vld [vmem:[%s249_s24 + $0x38] sm:$0xff]  ;;  %v1782_v2 = vunpack.c.l.bf16 %v3102_v41 }
  0x9e   : > { %1483 = vmatmul.mubr.bf16.gmra.mrb[12].mxu1 %v2509_v43  ;;  %v1778_v43 = vunpack.c.l.bf16 %v3086_v29 }
  0x9f   : > { %1629 = vmatmul.mubr.bf16.gmra.mrb[12].mxu0 %v2510_v44  ;;  %2177 = vmatpush1.bf16.msra.mxu1 %v2511_v45  ;;  %v1786_v44 = vunpack.c.l.bf16 %v3088_v30 }
  0xa0   : > { %1652 = vmatpush1.bf16.msra.mxu0 %v2511_v45  ;;  %2170 = vmatprep.subr.bf16.mxu1 %v2516_v46  ;;  %v1779_v45 = vunpack.c.h.bf16 %v3086_v29 }
  0xa1   : > { %1653 = vmatprep.subr.bf16.mxu0 %v2516_v46  ;;  %1671 = vmatprep.mubr.bf16.mxu0 %v2529_v48  ;;  %v1787_v46 = vunpack.c.h.bf16 %v3088_v30 }
  0xa2   : > { %1691 = vmatprep.mubr.bf16.mxu1 %v2529_v48 }
  0xa3   : > { %2178 = vmatpush1.bf16.msra.mxu1 %v2514_v47 }
  0xa4   : > { %1654 = vmatpush1.bf16.msra.mxu0 %v2514_v47 }
  0xa6   : > { %1692 = vmatmul.mubr.bf16.vlgmr.msra.gmra.mrb[16].mxu1 %v2518_v50  ;;  %v1788_v50 = vunpack.c.l.bf16 %v3100_v36 }
  0xa7   : > { %1672 = vmatmul.mubr.bf16.vlgmr.msra.gmra.mrb[0].mxu0 %v2517_v49  ;;  %1701 = vmatprep.mubr.bf16.mxu1 %v2529_v48  ;;  %v1780_v49 = vunpack.c.l.bf16 %v3098_v35 }
  0xa8   : > { %1681 = vmatprep.mubr.bf16.mxu0 %v2529_v48 }
  0xae   : > { %1702 = vmatmul.mubr.bf16.gmra.mrb[20].mxu1 %v2520_v52  ;;  %v1789_v52 = vunpack.c.h.bf16 %v3100_v36 }
  0xaf   : > { %1682 = vmatmul.mubr.bf16.gmra.mrb[4].mxu0 %v2519_v51  ;;  %v1781_v51 = vunpack.c.h.bf16 %v3098_v35 }
 0x159   : > { %v3046_v53 = vpop.f32.mrb[0].mxu1 }
 0x15a   : > { %v3048_v54 = vpop.f32.mrb[1].mxu1 }
 0x15b   : > { %v3050_v55 = vpop.f32.mrb[2].mxu1 }
 0x15c   : > { %v3052_v56 = vpop.f32.mrb[3].mxu1 }
 0x161   : > { %v3054_v57 = vpop.f32.mrb[4].mxu1 }
 0x162   : > { %v3056_v58 = vpop.f32.mrb[5].mxu1 }
 0x163   : > { %v3058_v59 = vpop.f32.mrb[6].mxu1 }
 0x164   : > { %v3060_v60 = vpop.f32.mrb[7].mxu1 }
 0x169   : > { %v1474_v61 = vpop.f32.mrb[8].mxu1 }
 0x16a   : > { %v1620_v62 = vpop.f32.mrb[8].mxu0  ;;  %v1476_v0 = vpop.f32.mrb[9].mxu1 }
 0x16b   : > { %v2187_v63 = vadd.f32 %v1620_v62, %v1474_v61  ;;  %v1622_v1 = vpop.f32.mrb[9].mxu0  ;;  %v1478_v4 = vpop.f32.mrb[10].mxu1 }
 0x16c   : > { %v2189_v3 = vadd.f32 %v1622_v1, %v1476_v0  ;;  %v1624_v5 = vpop.f32.mrb[10].mxu0  ;;  %v1480_v7 = vpop.f32.mrb[11].mxu1 }
 0x16d   : > { %v3062_v6 = vadd.f32 %v1624_v5, %v1478_v4  ;;  %v1626_v8 = vpop.f32.mrb[11].mxu0  ;;  %v1790_v4 = vunpack.c.l.bf16 %v3104_v42 }
 0x16e   : > { %v3064_v9 = vadd.f32 %v1626_v8, %v1480_v7 }
 0x171   : > { %v1484_v11 = vpop.f32.mrb[12].mxu1 }
 0x172   : > { %v1630_v12 = vpop.f32.mrb[12].mxu0  ;;  %v1486_v14 = vpop.f32.mrb[13].mxu1 }
 0x173   : > { %v3072_v13 = vadd.f32 %v1630_v12, %v1484_v11  ;;  %v1632_v15 = vpop.f32.mrb[13].mxu0  ;;  %v1488_v19 = vpop.f32.mrb[14].mxu1  ;;  %v1783_v11 = vunpack.c.h.bf16 %v3102_v41  ;;  %v1791_v12 = vunpack.c.h.bf16 %v3104_v42 }
 0x174   : > { %v3074_v18 = vadd.f32 %v1632_v15, %v1486_v14  ;;  %v1634_v20 = vpop.f32.mrb[14].mxu0  ;;  %v1490_v24 = vpop.f32.mrb[15].mxu1 }
 0x175   : > { %v3082_v23 = vadd.f32 %v1634_v20, %v1488_v19  ;;  %v1636_v25 = vpop.f32.mrb[15].mxu0 }
 0x176   : > { %v3084_v28 = vadd.f32 %v1636_v25, %v1490_v24 }
 0x179   : > { %v1693_v48 = vpop.f32.mrb[16].mxu1 }
 0x17a   : > { %v1673_v47 = vpop.f32.mrb[0].mxu0  ;;  %v2188_v62 = vadd.f32 %v2187_v63, %v1693_v48  ;;  %v1695_v1 = vpop.f32.mrb[17].mxu1 }
 0x17b   : > { %v2179_v61 = vadd.f32 %v1673_v47, %v3046_v53  ;;  %v1675_v0 = vpop.f32.mrb[1].mxu0  ;;  %v2190_v7 = vadd.f32 %v2189_v3, %v1695_v1  ;;  %v1697_v10 = vpop.f32.mrb[18].mxu1 }
 0x17c   : > { %v2180_v5 = vadd.f32 %v1675_v0, %v3048_v54  ;;  %v1677_v8 = vpop.f32.mrb[2].mxu0  ;;  %v1732_v53 = vmul.f32 %v2188_v62, %v3090_v31  ;;  %v2192_v15 = vadd.f32 %v3062_v6, %v1697_v10  ;;  %v1699_v17 = vpop.f32.mrb[19].mxu1 }
 0x17d   : > { %v1724_v14 = vmul.f32 %v2179_v61, %v3090_v31  ;;  %v2181_v63 = vadd.f32 %v1677_v8, %v3050_v55  ;;  %v1679_v16 = vpop.f32.mrb[3].mxu0  ;;  %v1733_v54 = vmul.f32 %v2190_v7, %v3094_v33  ;;  %v2194_v20 = vadd.f32 %v3064_v9, %v1699_v17 }
 0x17e   : > { %v1725_v19 = vmul.f32 %v2180_v5, %v3094_v33  ;;  %v2182_v3 = vadd.f32 %v1679_v16, %v3052_v56  ;;  %v1760_v22 = vadd.f32 %v3092_v32, %v1732_v53  ;;  %v1734_v55 = vmul.f32 %v2192_v15, %v3090_v31 }
 0x17f   : > { %v1752_v21 = vadd.f32 %v3092_v32, %v1724_v14  ;;  %v1726_v24 = vmul.f32 %v2181_v63, %v3090_v31  ;;  %v1761_v25 = vadd.f32 %v3096_v34, %v1733_v54  ;;  %v1735_v27 = vmul.f32 %v2194_v20, %v3094_v33 }
 0x180   : > { %v1753_v6 = vadd.f32 %v3096_v34, %v1725_v19  ;;  %v1727_v26 = vmul.f32 %v2182_v3, %v3094_v33  ;;  %v1800_v56 = vadd.f32 %v1784_v38, %v1760_v22  ;;  %v1762_v30 = vadd.f32 %v3092_v32, %v1734_v55 }
 0x181   : > { %v1792_v29 = vadd.f32 %v1776_v37, %v1752_v21  ;;  %v1754_v9 = vadd.f32 %v3092_v32, %v1726_v24  ;;  %v1801_v48 = vadd.f32 %v1785_v40, %v1761_v25  ;;  %v1763_v62 = vadd.f32 %v3096_v34, %v1735_v27  ;;  %v1703_v1 = vpop.f32.mrb[20].mxu1 }
 0x182   : > { %v1793_v47 = vadd.f32 %v1777_v39, %v1753_v6  ;;  %v1755_v61 = vadd.f32 %v3096_v34, %v1727_v26  ;;  %v1683_v0 = vpop.f32.mrb[4].mxu0  ;;  %v1816_v7 = vmax.f32 %v1800_v56, 0.0  ;;  %v1802_v10 = vadd.f32 %v1786_v44, %v1762_v30  ;;  %v1705_v37 = vpop.f32.mrb[21].mxu1 }
 0x183   : > { %v1808_v5 = vmax.f32 %v1792_v29, 0.0  ;;  %v1794_v8 = vadd.f32 %v1778_v43, %v1754_v9  ;;  %v1685_v14 = vpop.f32.mrb[5].mxu0  ;;  %v1817_v53 = vmax.f32 %v1801_v48, 0.0  ;;  %v1803_v15 = vadd.f32 %v1787_v46, %v1763_v62  ;;  %v1707_v39 = vpop.f32.mrb[22].mxu1 }
 0x184   : > { %v1809_v38 = vmax.f32 %v1793_v47, 0.0  ;;  %v1795_v63 = vadd.f32 %v1779_v45, %v1755_v61  ;;  %v1687_v16 = vpop.f32.mrb[6].mxu0  ;;  %v1818_v17 = vmax.f32 %v1802_v10, 0.0  ;;  %v2183_v43 = vadd.f32 %v1683_v0, %v3054_v57  ;;  %v1709_v54 = vpop.f32.mrb[23].mxu1 }
 0x185   : > { %v1810_v40 = vmax.f32 %v1794_v8, 0.0  ;;  %v2196_v44 = vadd.f32 %v3072_v13, %v1703_v1  ;;  %v1689_v19 = vpop.f32.mrb[7].mxu0  ;;  %v2159_v46 = vpack.c.bf16 %v1817_v53, %v1816_v7  ;;  %v1819_v20 = vmax.f32 %v1803_v15, 0.0 }
 0x186   : > { %v2155_v45 = vpack.c.bf16 %v1809_v38, %v1808_v5  ;;  %v1811_v3 = vmax.f32 %v1795_v63, 0.0  ;;  %v1728_v21 = vmul.f32 %v2183_v43, %v3090_v31  ;;  %v2184_v24 = vadd.f32 %v1685_v14, %v3056_v58 }
 0x187   : > { %v1736_v22 = vmul.f32 %v2196_v44, %v3090_v31  ;;  %v2198_v55 = vadd.f32 %v3074_v18, %v1705_v37  ;;  %1876 = vst [vmem:[%s3145_s6 + $0x20] sm:$0xff] %v2159_v46  ;;  %v2160_v13 = vpack.c.bf16 %v1819_v20, %v1818_v17  ;;  %v2185_v6 = vadd.f32 %v1687_v16, %v3058_v59 }
 0x188   : > { %1872 = vst [vmem:[%s3145_s6] sm:$0xff] %v2155_v45  ;;  %v2156_v57 = vpack.c.bf16 %v1811_v3, %v1810_v40  ;;  %v2200_v25 = vadd.f32 %v3082_v23, %v1707_v39  ;;  %v1756_v26 = vadd.f32 %v3092_v32, %v1728_v21  ;;  %v1729_v29 = vmul.f32 %v2184_v24, %v3094_v33 }
 0x189   : > { %v1764_v27 = vadd.f32 %v3092_v32, %v1736_v22  ;;  %v1737_v56 = vmul.f32 %v2198_v55, %v3094_v33  ;;  %1877 = vst [vmem:[%s3145_s6 + $0x28] sm:$0xff] %v2160_v13  ;;  %v1730_v58 = vmul.f32 %v2185_v6, %v3090_v31  ;;  %v2186_v9 = vadd.f32 %v1689_v19, %v3060_v60 }
 0x18a   : > { %1873 = vst [vmem:[%s3145_s6 + $0x8] sm:$0xff] %v2156_v57  ;;  %v1738_v18 = vmul.f32 %v2200_v25, %v3090_v31  ;;  %v2202_v59 = vadd.f32 %v3084_v28, %v1709_v54  ;;  %v1796_v23 = vadd.f32 %v1780_v49, %v1756_v26  ;;  %v1757_v47 = vadd.f32 %v3096_v34, %v1729_v29 }
 0x18b   : > { %v1804_v30 = vadd.f32 %v1788_v50, %v1764_v27  ;;  %v1765_v48 = vadd.f32 %v3096_v34, %v1737_v56  ;;  %v1758_v61 = vadd.f32 %v3092_v32, %v1730_v58  ;;  %v1731_v31 = vmul.f32 %v2186_v9, %v3094_v33 }
 0x18c   : > { %v1766_v62 = vadd.f32 %v3092_v32, %v1738_v18  ;;  %v1739_v60 = vmul.f32 %v2202_v59, %v3094_v33  ;;  %v1812_v0 = vmax.f32 %v1796_v23, 0.0  ;;  %v1797_v49 = vadd.f32 %v1781_v51, %v1757_v47 }
 0x18d   : > { %v1820_v28 = vmax.f32 %v1804_v30, 0.0  ;;  %v1805_v50 = vadd.f32 %v1789_v52, %v1765_v48  ;;  %v1798_v1 = vadd.f32 %v1782_v2, %v1758_v61  ;;  %v1759_v5 = vadd.f32 %v3096_v34, %v1731_v31 }
 0x18e   : > { %v1806_v32 = vadd.f32 %v1790_v4, %v1766_v62  ;;  %v1767_v33 = vadd.f32 %v3096_v34, %v1739_v60  ;;  %v1813_v7 = vmax.f32 %v1797_v49, 0.0 }
 0x18f   : > { %v1821_v35 = vmax.f32 %v1805_v50, 0.0  ;;  %v1814_v51 = vmax.f32 %v1798_v1, 0.0  ;;  %v1799_v36 = vadd.f32 %v1783_v11, %v1759_v5 }
 0x190   : > { %v1822_v8 = vmax.f32 %v1806_v32, 0.0  ;;  %v1807_v52 = vadd.f32 %v1791_v12, %v1767_v33  ;;  %v2157_v2 = vpack.c.bf16 %v1813_v7, %v1812_v0 }
 0x191   : > { %v2161_v10 = vpack.c.bf16 %v1821_v35, %v1820_v28  ;;  %v1815_v14 = vmax.f32 %v1799_v36, 0.0 }
 0x192   : > { %v1823_v4 = vmax.f32 %v1807_v52, 0.0  ;;  %1874 = vst [vmem:[%s3145_s6 + $0x10] sm:$0xff] %v2157_v2 }
 0x193   : > { %1878 = vst [vmem:[%s3145_s6 + $0x30] sm:$0xff] %v2161_v10  ;;  %v2158_v37 = vpack.c.bf16 %v1815_v14, %v1814_v51 }
 0x194   : > { %v2162_v38 = vpack.c.bf16 %v1823_v4, %v1822_v8 }
 0x195   : > { %1875 = vst [vmem:[%s3145_s6 + $0x18] sm:$0xff] %v2158_v37 }
 0x196   : > { %1879 = vst [vmem:[%s3145_s6 + $0x38] sm:$0xff] %v2162_v38 }
 0x197 PF: > { %s15_s18 = sadd.s32 1, %s2527_s18  }
 0x198   : > { %p12_p4 = scmp.ge.s32.totalorder %s15_s18, 4  }
 0x19a   :  { %14 = sbr.rel (!%p12_p4) target bundleno = 1 (0x1), region = 73 }

// kernel: bevencode_forward.27
= control target key start
LH: loop header
LB: loop body
LE: loop exit
PB: predicated region body
PF: predicated region fallthrough
CT: control target
= control target key end

     0   :  { %s4340_s15 = smov 0   ;;  %s5381_s0 = inlined_call_operand.vmem [shape: bf16[128,2304], index: 0, kind: input, shape index: {}]   ;;  %s5382_s1 = inlined_call_operand.vmem [shape: bf16[2304,256], index: 1, kind: input, shape index: {}]   ;;  %s5383_s2 = inlined_call_operand.vmem [shape: f32[1,256], index: 2, kind: input, shape index: {}]   ;;  %s5384_s3 = inlined_call_operand.vmem [shape: f32[1,256], index: 3, kind: input, shape index: {}]   ;;  %s5385_s4 = inlined_call_operand.vmem [shape: bf16[128,256], index: 4, kind: output, shape index: {}]  }
   0x1 LB: > { %s3209_s16 = sadd.s32 4294967295, %s4313_s15   ;;  %p3213_p0 = scmp.ge.s32.totalorder %s4313_s15, 1  ;;  %s4313_s15 = sphi %s4340_s15, %s14_s15  }
   0x2   : > { %p164_p1 = scmp.lt.s32.totalorder %s4313_s15, 3 }
   0x4   : > { %p165_p2 = pnand %p3213_p0, %p164_p1 }
   0x5   : > { %v3767_v0 = vld [vmem:[%s5382_s1 + $0x4] ss:$8 sps:$4 sm:$0xff] (!%p165_p2)   ;;  %v3771_v2 = vld [vmem:[%s5382_s1] ss:$8 sps:$4 sm:$0xff] (!%p165_p2)   ;;  %v3773_v4 = vld [vmem:[%s5382_s1 + $0x14] ss:$8 sps:$4 sm:$0xff] (!%p165_p2)  }
   0x6   : > { %168 = sbr.rel (%p165_p2) target bundleno = 563 (0x233), region = 36  ;;  %v3769_v1 = vld [vmem:[%s5382_s1 + $0x404] ss:$8 sps:$4 sm:$0xff] (!%p165_p2)   ;;  %2366 = vmatprep.subr.bf16.mxu1 (!%p165_p2), %v3767_v0  ;;  %v3772_v3 = vld [vmem:[%s5382_s1 + $0x400] ss:$8 sps:$4 sm:$0xff] (!%p165_p2)   ;;  %s3214_s29 = sshll.u32 (!%p165_p2), %s3209_s16, 3 }
   0x7   : > { %2658 = vmatprep.subr.bf16.mxu0 (!%p165_p2), %v3769_v1  ;;  %2367 = vmatpush1.bf16.msra.mxu1 (!%p165_p2), %v3771_v2  ;;  %v3775_v5 = vld [vmem:[%s5382_s1 + $0x414] ss:$8 sps:$4 sm:$0xff] (!%p165_p2)   ;;  %v3777_v6 = vld [vmem:[%s5382_s1 + $0x10] ss:$8 sps:$4 sm:$0xff] (!%p165_p2)   ;;  %v3779_v8 = vld [vmem:[%s5382_s1 + $0x24] ss:$8 sps:$4 sm:$0xff] (!%p165_p2)  }
   0x8   : > { %2659 = vmatpush1.bf16.msra.mxu0 (!%p165_p2), %v3772_v3  ;;  %2368 = vmatprep.subr.bf16.mxu1 (!%p165_p2), %v3773_v4  ;;  %v3778_v7 = vld [vmem:[%s5382_s1 + $0x410] ss:$8 sps:$4 sm:$0xff] (!%p165_p2)   ;;  %v3781_v9 = vld [vmem:[%s5382_s1 + $0x424] ss:$8 sps:$4 sm:$0xff] (!%p165_p2)   ;;  %v3783_v10 = vld [vmem:[%s5382_s1 + $0x20] ss:$8 sps:$4 sm:$0xff] (!%p165_p2)  }
   0x9   : > { %2660 = vmatprep.subr.bf16.mxu0 (!%p165_p2), %v3775_v5  ;;  %v3784_v11 = vld [vmem:[%s5382_s1 + $0x420] ss:$8 sps:$4 sm:$0xff] (!%p165_p2)   ;;  %v3785_v12 = vld [vmem:[%s5382_s1 + $0x34] ss:$8 sps:$4 sm:$0xff] (!%p165_p2)   ;;  %v3789_v14 = vld [vmem:[%s5382_s1 + $0x30] ss:$8 sps:$4 sm:$0xff] (!%p165_p2)  }
   0xa   : > { %v3787_v13 = vld [vmem:[%s5382_s1 + $0x434] ss:$8 sps:$4 sm:$0xff] (!%p165_p2)   ;;  %v3790_v15 = vld [vmem:[%s5382_s1 + $0x430] ss:$8 sps:$4 sm:$0xff] (!%p165_p2)   ;;  %v3791_v16 = vld [vmem:[%s5382_s1 + $0x44] ss:$8 sps:$4 sm:$0xff] (!%p165_p2)  }
   0xb   : > { %2369 = vmatpush1.bf16.msra.mxu1 (!%p165_p2), %v3777_v6  ;;  %v3793_v17 = vld [vmem:[%s5382_s1 + $0x444] ss:$8 sps:$4 sm:$0xff] (!%p165_p2)   ;;  %v3795_v18 = vld [vmem:[%s5382_s1 + $0x40] ss:$8 sps:$4 sm:$0xff] (!%p165_p2)   ;;  %v3797_v20 = vld [vmem:[%s5382_s1 + $0x54] ss:$8 sps:$4 sm:$0xff] (!%p165_p2)  }
   0xc   : > { %2661 = vmatpush1.bf16.msra.mxu0 (!%p165_p2), %v3778_v7  ;;  %2370 = vmatprep.subr.bf16.mxu1 (!%p165_p2), %v3779_v8  ;;  %v3796_v19 = vld [vmem:[%s5382_s1 + $0x440] ss:$8 sps:$4 sm:$0xff] (!%p165_p2)   ;;  %v3799_v21 = vld [vmem:[%s5382_s1 + $0x454] ss:$8 sps:$4 sm:$0xff] (!%p165_p2)   ;;  %v3801_v22 = vld [vmem:[%s5382_s1 + $0x50] ss:$8 sps:$4 sm:$0xff] (!%p165_p2)  }
   0xd   : > { %2662 = vmatprep.subr.bf16.mxu0 %v3781_v9  ;;  %v3802_v23 = vld [vmem:[%s5382_s1 + $0x450] ss:$8 sps:$4 sm:$0xff]   ;;  %v3803_v24 = vld [vmem:[%s5382_s1 + $0x64] ss:$8 sps:$4 sm:$0xff]   ;;  %v3807_v26 = vld [vmem:[%s5382_s1 + $0x60] ss:$8 sps:$4 sm:$0xff]  }
   0xe   : > { %v3805_v25 = vld [vmem:[%s5382_s1 + $0x464] ss:$8 sps:$4 sm:$0xff]   ;;  %v3808_v27 = vld [vmem:[%s5382_s1 + $0x460] ss:$8 sps:$4 sm:$0xff]   ;;  %v3809_v28 = vld [vmem:[%s5382_s1 + $0x74] ss:$8 sps:$4 sm:$0xff]  }
   0xf   : > { %2371 = vmatpush1.bf16.msra.mxu1 %v3783_v10  ;;  %v3811_v29 = vld [vmem:[%s5382_s1 + $0x474] ss:$8 sps:$4 sm:$0xff]   ;;  %v3813_v30 = vld [vmem:[%s5382_s1 + $0x70] ss:$8 sps:$4 sm:$0xff]   ;;  %v3815_v32 = vld [vmem:[%s5382_s1 + $0x84] ss:$8 sps:$4 sm:$0xff]  }
  0x10   : > { %2663 = vmatpush1.bf16.msra.mxu0 %v3784_v11  ;;  %2372 = vmatprep.subr.bf16.mxu1 %v3785_v12  ;;  %v3814_v31 = vld [vmem:[%s5382_s1 + $0x470] ss:$8 sps:$4 sm:$0xff]   ;;  %p193_p3 = scmp.lt.s32.totalorder %s3214_s29, 15  ;;  %v3817_v33 = vld [vmem:[%s5382_s1 + $0x484] ss:$8 sps:$4 sm:$0xff]  }
  0x11   : > { %2664 = vmatprep.subr.bf16.mxu0 %v3787_v13  ;;  %v3819_v34 = vld [vmem:[%s5382_s1 + $0x80] ss:$8 sps:$4 sm:$0xff]   ;;  %v3821_v36 = vld [vmem:[%s5382_s1 + $0x94] ss:$8 sps:$4 sm:$0xff]   ;;  %v3825_v38 = vld [vmem:[%s5382_s1 + $0x90] ss:$8 sps:$4 sm:$0xff]  }
  0x12   : > { %v3820_v35 = vld [vmem:[%s5382_s1 + $0x480] ss:$8 sps:$4 sm:$0xff]   ;;  %s5387_s29 = smov (!%p193_p3, %s3214_s29), 15  ;;  %v3823_v37 = vld [vmem:[%s5382_s1 + $0x494] ss:$8 sps:$4 sm:$0xff]  }
  0x13   : > { %2373 = vmatpush1.bf16.msra.mxu1 %v3789_v14  ;;  %v3826_v39 = vld [vmem:[%s5382_s1 + $0x490] ss:$8 sps:$4 sm:$0xff]   ;;  %v3827_v40 = vld [vmem:[%s5382_s1 + $0xa4] ss:$8 sps:$4 sm:$0xff]   ;;  %s3758_s27 = smul.u32 72, %s5387_s29  ;;  %s3589_s21 = sshll.u32 %s5387_s29, 3 }
  0x14   : > { %2665 = vmatpush1.bf16.msra.mxu0 %v3790_v15  ;;  %2374 = vmatprep.subr.bf16.mxu1 %v3791_v16  ;;  %v3829_v41 = vld [vmem:[%s5382_s1 + $0x4a4] ss:$8 sps:$4 sm:$0xff]   ;;  %v3831_v42 = vld [vmem:[%s5382_s1 + $0xa0] ss:$8 sps:$4 sm:$0xff]   ;;  %v3833_v44 = vld [vmem:[%s5382_s1 + $0xb4] ss:$8 sps:$4 sm:$0xff]   ;;  %s5344_s23 = scalar_lea.vmem %s5385_s4, %s3589_s21 }
  0x15   : > { %2666 = vmatprep.subr.bf16.mxu0 %v3793_v17  ;;  %v3832_v43 = vld [vmem:[%s5382_s1 + $0x4a0] ss:$8 sps:$4 sm:$0xff]   ;;  %s4491_s12 = scalar_lea.vmem %s5381_s0, %s3758_s27  ;;  %v3835_v45 = vld [vmem:[%s5382_s1 + $0x4b4] ss:$8 sps:$4 sm:$0xff]   ;;  %v3837_v46 = vld [vmem:[%s5382_s1 + $0xb0] ss:$8 sps:$4 sm:$0xff]  }
  0x16   : > { %v3838_v47 = vld [vmem:[%s5382_s1 + $0x4b0] ss:$8 sps:$4 sm:$0xff]   ;;  %v3865_v48 = vld [vmem:[%s4491_s12 + $0x4] ss:$72 sps:$4 sm:$0xff]   ;;  %v3843_v52 = vld [vmem:[%s5382_s1 + $0xc0] ss:$8 sps:$4 sm:$0xff]  }
  0x17   : > { %2375 = vmatpush1.bf16.msra.mxu1 %v3795_v18  ;;  %v3839_v49 = vld [vmem:[%s5382_s1 + $0xc4] ss:$8 sps:$4 sm:$0xff]   ;;  %2398 = vmatprep.mubr.bf16.mxu1 %v3865_v48  ;;  %v3844_v53 = vld [vmem:[%s5382_s1 + $0x4c0] ss:$8 sps:$4 sm:$0xff]   ;;  %v3845_v54 = vld [vmem:[%s5382_s1 + $0xd4] ss:$8 sps:$4 sm:$0xff]  }
  0x18   : > { %2667 = vmatpush1.bf16.msra.mxu0 %v3796_v19  ;;  %2376 = vmatprep.subr.bf16.mxu1 %v3797_v20  ;;  %v3841_v50 = vld [vmem:[%s5382_s1 + $0x4c4] ss:$8 sps:$4 sm:$0xff]   ;;  %v3847_v55 = vld [vmem:[%s5382_s1 + $0x4d4] ss:$8 sps:$4 sm:$0xff]   ;;  %v3849_v56 = vld [vmem:[%s5382_s1 + $0xd0] ss:$8 sps:$4 sm:$0xff]  }
  0x19   : > { %2668 = vmatprep.subr.bf16.mxu0 %v3799_v21  ;;  %v3871_v51 = vld [vmem:[%s4491_s12 + $0x24] ss:$72 sps:$4 sm:$0xff]   ;;  %v3850_v57 = vld [vmem:[%s5382_s1 + $0x4d0] ss:$8 sps:$4 sm:$0xff]   ;;  %v3855_v60 = vld [vmem:[%s5382_s1 + $0xe0] ss:$8 sps:$4 sm:$0xff]  }
  0x1a   : > { %2690 = vmatprep.mubr.bf16.mxu0 %v3871_v51  ;;  %v3851_v58 = vld [vmem:[%s5382_s1 + $0xe4] ss:$8 sps:$4 sm:$0xff]   ;;  %v3856_v61 = vld [vmem:[%s5382_s1 + $0x4e0] ss:$8 sps:$4 sm:$0xff]   ;;  %v3857_v62 = vld [vmem:[%s5382_s1 + $0xf4] ss:$8 sps:$4 sm:$0xff]  }
  0x1b   : > { %2377 = vmatpush1.bf16.msra.mxu1 %v3801_v22  ;;  %v3853_v59 = vld [vmem:[%s5382_s1 + $0x4e4] ss:$8 sps:$4 sm:$0xff]   ;;  %v3859_v63 = vld [vmem:[%s5382_s1 + $0x4f4] ss:$8 sps:$4 sm:$0xff]   ;;  %v3861_v0 = vld [vmem:[%s5382_s1 + $0xf0] ss:$8 sps:$4 sm:$0xff]  }
  0x1c   : > { %2669 = vmatpush1.bf16.msra.mxu0 %v3802_v23  ;;  %2378 = vmatprep.subr.bf16.mxu1 %v3803_v24  ;;  %v3862_v1 = vld [vmem:[%s5382_s1 + $0x4f0] ss:$8 sps:$4 sm:$0xff]   ;;  %v3868_v2 = vld [vmem:[%s5382_s1 + $0x104] ss:$8 sps:$4 sm:$0xff]   ;;  %v3863_v4 = vld [vmem:[%s4491_s12] ss:$72 sps:$4 sm:$0xff]  }
  0x1d   : > { %2670 = vmatprep.subr.bf16.mxu0 %v3805_v25  ;;  %v3874_v3 = vld [vmem:[%s5382_s1 + $0x504] ss:$8 sps:$4 sm:$0xff]   ;;  %v3866_v5 = vld [vmem:[%s5382_s1 + $0x100] ss:$8 sps:$4 sm:$0xff]   ;;  %v3877_v8 = vld [vmem:[%s5382_s1 + $0x114] ss:$8 sps:$4 sm:$0xff]  }
  0x1e   : > { %v3869_v6 = vld [vmem:[%s4491_s12 + $0x20] ss:$72 sps:$4 sm:$0xff]   ;;  %v3880_v9 = vld [vmem:[%s5382_s1 + $0x514] ss:$8 sps:$4 sm:$0xff]   ;;  %v3875_v10 = vld [vmem:[%s5382_s1 + $0x110] ss:$8 sps:$4 sm:$0xff]  }
  0x1f   : > { %2379 = vmatpush1.bf16.msra.mxu1 %v3807_v26  ;;  %v3872_v7 = vld [vmem:[%s5382_s1 + $0x500] ss:$8 sps:$4 sm:$0xff]   ;;  %v3878_v11 = vld [vmem:[%s5382_s1 + $0x510] ss:$8 sps:$4 sm:$0xff]   ;;  %v3883_v12 = vld [vmem:[%s5382_s1 + $0x124] ss:$8 sps:$4 sm:$0xff]  }
  0x20   : > { %2671 = vmatpush1.bf16.msra.mxu0 %v3808_v27  ;;  %2380 = vmatprep.subr.bf16.mxu1 %v3809_v28  ;;  %v3886_v13 = vld [vmem:[%s5382_s1 + $0x524] ss:$8 sps:$4 sm:$0xff]   ;;  %v3881_v14 = vld [vmem:[%s5382_s1 + $0x120] ss:$8 sps:$4 sm:$0xff]   ;;  %v3889_v16 = vld [vmem:[%s5382_s1 + $0x134] ss:$8 sps:$4 sm:$0xff]  }
  0x21   : > { %2672 = vmatprep.subr.bf16.mxu0 %v3811_v29  ;;  %v3884_v15 = vld [vmem:[%s5382_s1 + $0x520] ss:$8 sps:$4 sm:$0xff]   ;;  %v3929_v17 = vld [vmem:[%s4491_s12 + $0x94] ss:$72 sps:$4 sm:$0xff]   ;;  %v3887_v19 = vld [vmem:[%s5382_s1 + $0x130] ss:$8 sps:$4 sm:$0xff]  }
  0x22   : > { %v3892_v18 = vld [vmem:[%s5382_s1 + $0x534] ss:$8 sps:$4 sm:$0xff]   ;;  %v3890_v20 = vld [vmem:[%s5382_s1 + $0x530] ss:$8 sps:$4 sm:$0xff]   ;;  %v3895_v22 = vld [vmem:[%s5382_s1 + $0x144] ss:$8 sps:$4 sm:$0xff]  }
  0x23   : > { %2381 = vmatpush1.bf16.msra.mxu1 %v3813_v30  ;;  %v3934_v21 = vld [vmem:[%s4491_s12 + $0xb4] ss:$72 sps:$4 sm:$0xff]   ;;  %v3898_v23 = vld [vmem:[%s5382_s1 + $0x544] ss:$8 sps:$4 sm:$0xff]   ;;  %v3939_v24 = vld [vmem:[%s4491_s12 + $0x90] ss:$72 sps:$4 sm:$0xff]  }
  0x24   : > { %2673 = vmatpush1.bf16.msra.mxu0 %v3814_v31  ;;  %2382 = vmatprep.subr.bf16.mxu1 %v3815_v32  ;;  %v3940_v25 = vld [vmem:[%s4491_s12 + $0xb0] ss:$72 sps:$4 sm:$0xff]   ;;  %v3893_v26 = vld [vmem:[%s5382_s1 + $0x140] ss:$8 sps:$4 sm:$0xff]   ;;  %v3901_v28 = vld [vmem:[%s5382_s1 + $0x154] ss:$8 sps:$4 sm:$0xff]  }
  0x25   : > { %2674 = vmatprep.subr.bf16.mxu0 %v3817_v33  ;;  %v3896_v27 = vld [vmem:[%s5382_s1 + $0x540] ss:$8 sps:$4 sm:$0xff]   ;;  %v3947_v29 = vld [vmem:[%s4491_s12 + $0x124] ss:$72 sps:$4 sm:$0xff]   ;;  %v3904_v30 = vld [vmem:[%s5382_s1 + $0x554] ss:$8 sps:$4 sm:$0xff]  }
  0x26   : > { %v3899_v31 = vld [vmem:[%s5382_s1 + $0x150] ss:$8 sps:$4 sm:$0xff]   ;;  %v3952_v33 = vld [vmem:[%s4491_s12 + $0x144] ss:$72 sps:$4 sm:$0xff]   ;;  %v3920_v51 = vld [vmem:[%s5382_s1 + $0x580] ss:$8 sps:$4 sm:$0xff]  }
  0x27   : > { %2383 = vmatpush1.bf16.msra.mxu1 %v3819_v34  ;;  %v3902_v32 = vld [vmem:[%s5382_s1 + $0x550] ss:$8 sps:$4 sm:$0xff]   ;;  %v3907_v34 = vld [vmem:[%s5382_s1 + $0x164] ss:$8 sps:$4 sm:$0xff]  }
  0x28   : > { %2675 = vmatpush1.bf16.msra.mxu0 %v3820_v35  ;;  %2384 = vmatprep.subr.bf16.mxu1 %v3821_v36  ;;  %v3910_v35 = vld [vmem:[%s5382_s1 + $0x564] ss:$8 sps:$4 sm:$0xff]   ;;  %v3957_v36 = vld [vmem:[%s4491_s12 + $0x120] ss:$72 sps:$4 sm:$0xff]   ;;  %v3975_v48 = vld [vmem:[%s4491_s12 + $0x1b0] ss:$72 sps:$4 sm:$0xff]  }
  0x29   : > { %2676 = vmatprep.subr.bf16.mxu0 %v3823_v37  ;;  %v3958_v37 = vld [vmem:[%s4491_s12 + $0x140] ss:$72 sps:$4 sm:$0xff]  }
  0x2b   : > { %2385 = vmatpush1.bf16.msra.mxu1 %v3825_v38  ;;  %v3905_v38 = vld [vmem:[%s5382_s1 + $0x160] ss:$8 sps:$4 sm:$0xff]  }
  0x2c   : > { %2677 = vmatpush1.bf16.msra.mxu0 %v3826_v39  ;;  %2386 = vmatprep.subr.bf16.mxu1 %v3827_v40  ;;  %v3908_v39 = vld [vmem:[%s5382_s1 + $0x560] ss:$8 sps:$4 sm:$0xff]   ;;  %v3913_v40 = vld [vmem:[%s5382_s1 + $0x174] ss:$8 sps:$4 sm:$0xff]  }
  0x2d   : > { %2678 = vmatprep.subr.bf16.mxu0 %v3829_v41  ;;  %v3965_v41 = vld [vmem:[%s4491_s12 + $0x1b4] ss:$72 sps:$4 sm:$0xff]  }
  0x2f   : > { %2387 = vmatpush1.bf16.msra.mxu1 %v3831_v42  ;;  %v3916_v42 = vld [vmem:[%s5382_s1 + $0x574] ss:$8 sps:$4 sm:$0xff]  }
  0x30   : > { %2679 = vmatpush1.bf16.msra.mxu0 %v3832_v43  ;;  %2388 = vmatprep.subr.bf16.mxu1 %v3833_v44  ;;  %v3911_v43 = vld [vmem:[%s5382_s1 + $0x170] ss:$8 sps:$4 sm:$0xff]  }
  0x31   : > { %2680 = vmatprep.subr.bf16.mxu0 %v3835_v45  ;;  %v3914_v44 = vld [vmem:[%s5382_s1 + $0x570] ss:$8 sps:$4 sm:$0xff]   ;;  %v3970_v45 = vld [vmem:[%s4491_s12 + $0x1d4] ss:$72 sps:$4 sm:$0xff]  }
  0x33   : > { %2389 = vmatpush1.bf16.msra.mxu1 %v3837_v46  ;;  %v3919_v46 = vld [vmem:[%s5382_s1 + $0x184] ss:$8 sps:$4 sm:$0xff]  }
  0x34   : > { %2681 = vmatpush1.bf16.msra.mxu0 %v3838_v47  ;;  %2390 = vmatprep.subr.bf16.mxu1 %v3839_v49  ;;  %v3922_v47 = vld [vmem:[%s5382_s1 + $0x584] ss:$8 sps:$4 sm:$0xff]   ;;  %v3976_v49 = vld [vmem:[%s4491_s12 + $0x1d0] ss:$72 sps:$4 sm:$0xff]  }
  0x35   : > { %2682 = vmatprep.subr.bf16.mxu0 %v3841_v50  ;;  %v3917_v50 = vld [vmem:[%s5382_s1 + $0x180] ss:$8 sps:$4 sm:$0xff]  }
  0x37   : > { %2391 = vmatpush1.bf16.msra.mxu1 %v3843_v52  ;;  %v3925_v52 = vld [vmem:[%s5382_s1 + $0x194] ss:$8 sps:$4 sm:$0xff]  }
  0x38   : > { %2683 = vmatpush1.bf16.msra.mxu0 %v3844_v53  ;;  %2392 = vmatprep.subr.bf16.mxu1 %v3845_v54  ;;  %v3928_v53 = vld [vmem:[%s5382_s1 + $0x594] ss:$8 sps:$4 sm:$0xff]  }
  0x39   : > { %2684 = vmatprep.subr.bf16.mxu0 %v3847_v55  ;;  %v3985_v54 = vld [vmem:[%s4491_s12 + $0xc] ss:$72 sps:$4 sm:$0xff]   ;;  %v3923_v55 = vld [vmem:[%s5382_s1 + $0x190] ss:$8 sps:$4 sm:$0xff]  }
  0x3b   : > { %2393 = vmatpush1.bf16.msra.mxu1 %v3849_v56  ;;  %v3926_v56 = vld [vmem:[%s5382_s1 + $0x590] ss:$8 sps:$4 sm:$0xff]  }
  0x3c   : > { %2685 = vmatpush1.bf16.msra.mxu0 %v3850_v57  ;;  %2394 = vmatprep.subr.bf16.mxu1 %v3851_v58  ;;  %v3991_v57 = vld [vmem:[%s4491_s12 + $0x2c] ss:$72 sps:$4 sm:$0xff]  }
  0x3d   : > { %2686 = vmatprep.subr.bf16.mxu0 %v3853_v59  ;;  %v3933_v58 = vld [vmem:[%s5382_s1 + $0x1a4] ss:$8 sps:$4 sm:$0xff]  }
  0x3e   : > { %v3938_v59 = vld [vmem:[%s5382_s1 + $0x5a4] ss:$8 sps:$4 sm:$0xff]  }
  0x3f   : > { %2395 = vmatpush1.bf16.msra.mxu1 %v3855_v60  ;;  %v3931_v60 = vld [vmem:[%s5382_s1 + $0x1a0] ss:$8 sps:$4 sm:$0xff]  }
  0x40   : > { %2687 = vmatpush1.bf16.msra.mxu0 %v3856_v61  ;;  %2396 = vmatprep.subr.bf16.mxu1 %v3857_v62  ;;  %v3936_v61 = vld [vmem:[%s5382_s1 + $0x5a0] ss:$8 sps:$4 sm:$0xff]   ;;  %v3943_v62 = vld [vmem:[%s5382_s1 + $0x1b4] ss:$8 sps:$4 sm:$0xff]  }
  0x41   : > { %2688 = vmatprep.subr.bf16.mxu0 %v3859_v63  ;;  %v3946_v63 = vld [vmem:[%s5382_s1 + $0x5b4] ss:$8 sps:$4 sm:$0xff]  }
  0x43   : > { %2397 = vmatpush1.bf16.msra.mxu1 %v3861_v0  ;;  %v3941_v0 = vld [vmem:[%s5382_s1 + $0x1b0] ss:$8 sps:$4 sm:$0xff]  }
  0x44   : > { %2689 = vmatpush1.bf16.msra.mxu0 %v3862_v1  ;;  %2439 = vmatprep.subr.bf16.mxu1 %v3868_v2  ;;  %v3944_v1 = vld [vmem:[%s5382_s1 + $0x5b0] ss:$8 sps:$4 sm:$0xff]   ;;  %v3951_v2 = vld [vmem:[%s5382_s1 + $0x1c4] ss:$8 sps:$4 sm:$0xff]  }
  0x45   : > { %2731 = vmatprep.subr.bf16.mxu0 %v3874_v3  ;;  %v3956_v3 = vld [vmem:[%s5382_s1 + $0x5c4] ss:$8 sps:$4 sm:$0xff]  }
  0x46   : > { %2399 = vmatmul.mubr.bf16.vlgmr.msra.gmra.mrb[0].mxu1 %v3863_v4  ;;  %v3949_v4 = vld [vmem:[%s5382_s1 + $0x1c0] ss:$8 sps:$4 sm:$0xff]  }
  0x47   : > { %2691 = vmatmul.mubr.bf16.vlgmr.msra.gmra.mrb[0].mxu0 %v3869_v6  ;;  %2440 = vmatpush1.bf16.msra.mxu1 %v3866_v5  ;;  %v3954_v5 = vld [vmem:[%s5382_s1 + $0x5c0] ss:$8 sps:$4 sm:$0xff]   ;;  %v3961_v6 = vld [vmem:[%s5382_s1 + $0x1d4] ss:$8 sps:$4 sm:$0xff]  }
  0x48   : > { %2732 = vmatpush1.bf16.msra.mxu0 %v3872_v7  ;;  %2441 = vmatprep.subr.bf16.mxu1 %v3877_v8  ;;  %v3964_v7 = vld [vmem:[%s5382_s1 + $0x5d4] ss:$8 sps:$4 sm:$0xff]   ;;  %v3959_v8 = vld [vmem:[%s5382_s1 + $0x1d0] ss:$8 sps:$4 sm:$0xff]  }
  0x49   : > { %2733 = vmatprep.subr.bf16.mxu0 %v3880_v9  ;;  %2408 = vmatprep.mubr.bf16.mxu1 %v3929_v17  ;;  %v3962_v9 = vld [vmem:[%s5382_s1 + $0x5d0] ss:$8 sps:$4 sm:$0xff]  }
  0x4a   : > { %2700 = vmatprep.mubr.bf16.mxu0 %v3934_v21  ;;  %v3980_v17 = vld [vmem:[%s5382_s1 + $0x5f0] ss:$8 sps:$4 sm:$0xff]   ;;  %v3986_v21 = vld [vmem:[%s5382_s1 + $0x200] ss:$8 sps:$4 sm:$0xff]  }
  0x4b   : > { %2442 = vmatpush1.bf16.msra.mxu1 %v3875_v10  ;;  %v3969_v10 = vld [vmem:[%s5382_s1 + $0x1e4] ss:$8 sps:$4 sm:$0xff]  }
  0x4c   : > { %2734 = vmatpush1.bf16.msra.mxu0 %v3878_v11  ;;  %2443 = vmatprep.subr.bf16.mxu1 %v3883_v12  ;;  %v3974_v11 = vld [vmem:[%s5382_s1 + $0x5e4] ss:$8 sps:$4 sm:$0xff]   ;;  %v3967_v12 = vld [vmem:[%s5382_s1 + $0x1e0] ss:$8 sps:$4 sm:$0xff]  }
  0x4d   : > { %2735 = vmatprep.subr.bf16.mxu0 %v3886_v13  ;;  %v3972_v13 = vld [vmem:[%s5382_s1 + $0x5e0] ss:$8 sps:$4 sm:$0xff]  }
  0x4e   : > { %2409 = vmatmul.mubr.bf16.gmra.mrb[4].mxu1 %v3939_v24  ;;  %v3997_v24 = vld [vmem:[%s5382_s1 + $0x214] ss:$8 sps:$4 sm:$0xff]  }
  0x4f   : > { %2444 = vmatpush1.bf16.msra.mxu1 %v3881_v14  ;;  %2701 = vmatmul.mubr.bf16.gmra.mrb[4].mxu0 %v3940_v25  ;;  %v3979_v14 = vld [vmem:[%s5382_s1 + $0x1f4] ss:$8 sps:$4 sm:$0xff]  }
  0x50   : > { %2736 = vmatpush1.bf16.msra.mxu0 %v3884_v15  ;;  %2445 = vmatprep.subr.bf16.mxu1 %v3889_v16  ;;  %v3982_v15 = vld [vmem:[%s5382_s1 + $0x5f4] ss:$8 sps:$4 sm:$0xff]   ;;  %v3977_v16 = vld [vmem:[%s5382_s1 + $0x1f0] ss:$8 sps:$4 sm:$0xff]  }
  0x51   : > { %2737 = vmatprep.subr.bf16.mxu0 %v3892_v18  ;;  %2418 = vmatprep.mubr.bf16.mxu1 %v3947_v29  ;;  %v3988_v18 = vld [vmem:[%s5382_s1 + $0x204] ss:$8 sps:$4 sm:$0xff]   ;;  %v4000_v25 = vld [vmem:[%s5382_s1 + $0x614] ss:$8 sps:$4 sm:$0xff]   ;;  %v3998_v29 = vld [vmem:[%s5382_s1 + $0x610] ss:$8 sps:$4 sm:$0xff]  }
  0x52   : > { %2710 = vmatprep.mubr.bf16.mxu0 %v3952_v33  ;;  %v4059_v33 = vld [vmem:[%s4491_s12 + $0x98] ss:$72 sps:$4 sm:$0xff]  }
  0x53   : > { %2446 = vmatpush1.bf16.msra.mxu1 %v3887_v19  ;;  %v3994_v19 = vld [vmem:[%s5382_s1 + $0x604] ss:$8 sps:$4 sm:$0xff]  }
  0x54   : > { %2738 = vmatpush1.bf16.msra.mxu0 %v3890_v20  ;;  %2447 = vmatprep.subr.bf16.mxu1 %v3895_v22  ;;  %v3983_v20 = vld [vmem:[%s4491_s12 + $0x8] ss:$72 sps:$4 sm:$0xff]  }
  0x55   : > { %2739 = vmatprep.subr.bf16.mxu0 %v3898_v23  ;;  %v3989_v22 = vld [vmem:[%s4491_s12 + $0x28] ss:$72 sps:$4 sm:$0xff]  }
  0x56   : > { %2419 = vmatmul.mubr.bf16.gmra.mrb[8].mxu1 %v3957_v36  ;;  %v3992_v23 = vld [vmem:[%s5382_s1 + $0x600] ss:$8 sps:$4 sm:$0xff]   ;;  %v4009_v36 = vld [vmem:[%s5382_s1 + $0x234] ss:$8 sps:$4 sm:$0xff]  }
  0x57   : > { %2448 = vmatpush1.bf16.msra.mxu1 %v3893_v26  ;;  %2711 = vmatmul.mubr.bf16.gmra.mrb[8].mxu0 %v3958_v37  ;;  %v4049_v26 = vld [vmem:[%s4491_s12 + $0x9c] ss:$72 sps:$4 sm:$0xff]  }
  0x58   : > { %2740 = vmatpush1.bf16.msra.mxu0 %v3896_v27  ;;  %2449 = vmatprep.subr.bf16.mxu1 %v3901_v28  ;;  %v4054_v27 = vld [vmem:[%s4491_s12 + $0xbc] ss:$72 sps:$4 sm:$0xff]   ;;  %v3995_v28 = vld [vmem:[%s5382_s1 + $0x210] ss:$8 sps:$4 sm:$0xff]  }
  0x59   : > { %2741 = vmatprep.subr.bf16.mxu0 %v3904_v30  ;;  %2428 = vmatprep.mubr.bf16.mxu1 %v3965_v41  ;;  %v4003_v30 = vld [vmem:[%s5382_s1 + $0x224] ss:$8 sps:$4 sm:$0xff]   ;;  %v4012_v37 = vld [vmem:[%s5382_s1 + $0x634] ss:$8 sps:$4 sm:$0xff]   ;;  %v4010_v41 = vld [vmem:[%s5382_s1 + $0x630] ss:$8 sps:$4 sm:$0xff]  }
  0x5a   : > { %2720 = vmatprep.mubr.bf16.mxu0 %v3970_v45  ;;  %v4077_v45 = vld [vmem:[%s4491_s12 + $0x128] ss:$72 sps:$4 sm:$0xff]  }
  0x5b   : > { %2450 = vmatpush1.bf16.msra.mxu1 %v3899_v31  ;;  %v4006_v31 = vld [vmem:[%s5382_s1 + $0x624] ss:$8 sps:$4 sm:$0xff]  }
  0x5c   : > { %2742 = vmatpush1.bf16.msra.mxu0 %v3902_v32  ;;  %2451 = vmatprep.subr.bf16.mxu1 %v3907_v34  ;;  %v4001_v32 = vld [vmem:[%s5382_s1 + $0x220] ss:$8 sps:$4 sm:$0xff]  }
  0x5d   : > { %2743 = vmatprep.subr.bf16.mxu0 %v3910_v35  ;;  %v4060_v34 = vld [vmem:[%s4491_s12 + $0xb8] ss:$72 sps:$4 sm:$0xff]  }
  0x5e   : > { %2429 = vmatmul.mubr.bf16.gmra.mrb[12].mxu1 %v3975_v48  ;;  %v4004_v35 = vld [vmem:[%s5382_s1 + $0x620] ss:$8 sps:$4 sm:$0xff]   ;;  %v4021_v48 = vld [vmem:[%s5382_s1 + $0x254] ss:$8 sps:$4 sm:$0xff]  }
  0x5f   : > { %2452 = vmatpush1.bf16.msra.mxu1 %v3905_v38  ;;  %2721 = vmatmul.mubr.bf16.gmra.mrb[12].mxu0 %v3976_v49  ;;  %v4067_v38 = vld [vmem:[%s4491_s12 + $0x12c] ss:$72 sps:$4 sm:$0xff]  }
  0x60   : > { %2744 = vmatpush1.bf16.msra.mxu0 %v3908_v39  ;;  %2453 = vmatprep.subr.bf16.mxu1 %v3913_v40  ;;  %v4072_v39 = vld [vmem:[%s4491_s12 + $0x14c] ss:$72 sps:$4 sm:$0xff]   ;;  %v4007_v40 = vld [vmem:[%s5382_s1 + $0x230] ss:$8 sps:$4 sm:$0xff]  }
  0x61   : > { %2745 = vmatprep.subr.bf16.mxu0 %v3916_v42  ;;  %2471 = vmatprep.mubr.bf16.mxu1 %v3985_v54  ;;  %v4015_v42 = vld [vmem:[%s5382_s1 + $0x244] ss:$8 sps:$4 sm:$0xff]   ;;  %v4024_v49 = vld [vmem:[%s5382_s1 + $0x654] ss:$8 sps:$4 sm:$0xff]  }
  0x62   : > { %2763 = vmatprep.mubr.bf16.mxu0 %v3991_v57  ;;  %v4027_v54 = vld [vmem:[%s5382_s1 + $0x264] ss:$8 sps:$4 sm:$0xff]   ;;  %v4028_v57 = vld [vmem:[%s5382_s1 + $0x660] ss:$8 sps:$4 sm:$0xff]  }
  0x63   : > { %2454 = vmatpush1.bf16.msra.mxu1 %v3911_v43  ;;  %v4018_v43 = vld [vmem:[%s5382_s1 + $0x644] ss:$8 sps:$4 sm:$0xff]  }
  0x64   : > { %2746 = vmatpush1.bf16.msra.mxu0 %v3914_v44  ;;  %2455 = vmatprep.subr.bf16.mxu1 %v3919_v46  ;;  %v4013_v44 = vld [vmem:[%s5382_s1 + $0x240] ss:$8 sps:$4 sm:$0xff]  }
  0x65   : > { %2747 = vmatprep.subr.bf16.mxu0 %v3922_v47  ;;  %v4078_v46 = vld [vmem:[%s4491_s12 + $0x148] ss:$72 sps:$4 sm:$0xff]  }
  0x66   : > { %v4016_v47 = vld [vmem:[%s5382_s1 + $0x640] ss:$8 sps:$4 sm:$0xff]  }
  0x67   : > { %2456 = vmatpush1.bf16.msra.mxu1 %v3917_v50  ;;  %v4085_v50 = vld [vmem:[%s4491_s12 + $0x1bc] ss:$72 sps:$4 sm:$0xff]  }
  0x68   : > { %2748 = vmatpush1.bf16.msra.mxu0 %v3920_v51  ;;  %2457 = vmatprep.subr.bf16.mxu1 %v3925_v52  ;;  %v4090_v51 = vld [vmem:[%s4491_s12 + $0x1dc] ss:$72 sps:$4 sm:$0xff]   ;;  %v4019_v52 = vld [vmem:[%s5382_s1 + $0x250] ss:$8 sps:$4 sm:$0xff]  }
  0x69   : > { %2749 = vmatprep.subr.bf16.mxu0 %v3928_v53  ;;  %v4022_v53 = vld [vmem:[%s5382_s1 + $0x650] ss:$8 sps:$4 sm:$0xff]  }
  0x6b   : > { %2458 = vmatpush1.bf16.msra.mxu1 %v3923_v55  ;;  %v4030_v55 = vld [vmem:[%s5382_s1 + $0x664] ss:$8 sps:$4 sm:$0xff]  }
  0x6c   : > { %2750 = vmatpush1.bf16.msra.mxu0 %v3926_v56  ;;  %2459 = vmatprep.subr.bf16.mxu1 %v3933_v58  ;;  %v4025_v56 = vld [vmem:[%s5382_s1 + $0x260] ss:$8 sps:$4 sm:$0xff]  }
  0x6d   : > { %2751 = vmatprep.subr.bf16.mxu0 %v3938_v59  ;;  %v4095_v58 = vld [vmem:[%s4491_s12 + $0x1b8] ss:$72 sps:$4 sm:$0xff]  }
  0x6e   : > { %v4096_v59 = vld [vmem:[%s4491_s12 + $0x1d8] ss:$72 sps:$4 sm:$0xff]  }
  0x6f   : > { %2460 = vmatpush1.bf16.msra.mxu1 %v3931_v60  ;;  %v4033_v60 = vld [vmem:[%s5382_s1 + $0x274] ss:$8 sps:$4 sm:$0xff]  }
  0x70   : > { %2752 = vmatpush1.bf16.msra.mxu0 %v3936_v61  ;;  %2461 = vmatprep.subr.bf16.mxu1 %v3943_v62  ;;  %v4036_v61 = vld [vmem:[%s5382_s1 + $0x674] ss:$8 sps:$4 sm:$0xff]  }
  0x71   : > { %2753 = vmatprep.subr.bf16.mxu0 %v3946_v63  ;;  %v4105_v62 = vld [vmem:[%s4491_s12 + $0x14] ss:$72 sps:$4 sm:$0xff]  }
  0x72   : > { %v4111_v63 = vld [vmem:[%s4491_s12 + $0x34] ss:$72 sps:$4 sm:$0xff]  }
  0x73   : > { %2462 = vmatpush1.bf16.msra.mxu1 %v3941_v0  ;;  %v4031_v0 = vld [vmem:[%s5382_s1 + $0x270] ss:$8 sps:$4 sm:$0xff]  }
  0x74   : > { %2754 = vmatpush1.bf16.msra.mxu0 %v3944_v1  ;;  %2463 = vmatprep.subr.bf16.mxu1 %v3951_v2  ;;  %v4034_v1 = vld [vmem:[%s5382_s1 + $0x670] ss:$8 sps:$4 sm:$0xff]   ;;  %v4039_v2 = vld [vmem:[%s5382_s1 + $0x284] ss:$8 sps:$4 sm:$0xff]  }
  0x75   : > { %2755 = vmatprep.subr.bf16.mxu0 %v3956_v3  ;;  %v4042_v3 = vld [vmem:[%s5382_s1 + $0x684] ss:$8 sps:$4 sm:$0xff]  }
  0x77   : > { %2464 = vmatpush1.bf16.msra.mxu1 %v3949_v4  ;;  %v4037_v4 = vld [vmem:[%s5382_s1 + $0x280] ss:$8 sps:$4 sm:$0xff]  }
  0x78   : > { %2756 = vmatpush1.bf16.msra.mxu0 %v3954_v5  ;;  %2465 = vmatprep.subr.bf16.mxu1 %v3961_v6  ;;  %v4040_v5 = vld [vmem:[%s5382_s1 + $0x680] ss:$8 sps:$4 sm:$0xff]   ;;  %v4045_v6 = vld [vmem:[%s5382_s1 + $0x294] ss:$8 sps:$4 sm:$0xff]  }
  0x79   : > { %2757 = vmatprep.subr.bf16.mxu0 %v3964_v7  ;;  %v4048_v7 = vld [vmem:[%s5382_s1 + $0x694] ss:$8 sps:$4 sm:$0xff]  }
  0x7b   : > { %2466 = vmatpush1.bf16.msra.mxu1 %v3959_v8  ;;  %v4043_v8 = vld [vmem:[%s5382_s1 + $0x290] ss:$8 sps:$4 sm:$0xff]  }
  0x7c   : > { %2758 = vmatpush1.bf16.msra.mxu0 %v3962_v9  ;;  %2467 = vmatprep.subr.bf16.mxu1 %v3969_v10  ;;  %v4046_v9 = vld [vmem:[%s5382_s1 + $0x690] ss:$8 sps:$4 sm:$0xff]   ;;  %v4053_v10 = vld [vmem:[%s5382_s1 + $0x2a4] ss:$8 sps:$4 sm:$0xff]  }
  0x7d   : > { %2759 = vmatprep.subr.bf16.mxu0 %v3974_v11  ;;  %v4058_v11 = vld [vmem:[%s5382_s1 + $0x6a4] ss:$8 sps:$4 sm:$0xff]  }
  0x7f   : > { %2468 = vmatpush1.bf16.msra.mxu1 %v3967_v12  ;;  %v4051_v12 = vld [vmem:[%s5382_s1 + $0x2a0] ss:$8 sps:$4 sm:$0xff]  }
  0x80   : > { %2760 = vmatpush1.bf16.msra.mxu0 %v3972_v13  ;;  %2469 = vmatprep.subr.bf16.mxu1 %v3979_v14  ;;  %v4056_v13 = vld [vmem:[%s5382_s1 + $0x6a0] ss:$8 sps:$4 sm:$0xff]   ;;  %v4063_v14 = vld [vmem:[%s5382_s1 + $0x2b4] ss:$8 sps:$4 sm:$0xff]  }
  0x81   : > { %2761 = vmatprep.subr.bf16.mxu0 %v3982_v15  ;;  %v4066_v15 = vld [vmem:[%s5382_s1 + $0x6b4] ss:$8 sps:$4 sm:$0xff]  }
  0x83   : > { %2470 = vmatpush1.bf16.msra.mxu1 %v3977_v16  ;;  %v4061_v16 = vld [vmem:[%s5382_s1 + $0x2b0] ss:$8 sps:$4 sm:$0xff]  }
  0x84   : > { %2762 = vmatpush1.bf16.msra.mxu0 %v3980_v17  ;;  %2512 = vmatprep.subr.bf16.mxu1 %v3988_v18  ;;  %v4064_v17 = vld [vmem:[%s5382_s1 + $0x6b0] ss:$8 sps:$4 sm:$0xff]   ;;  %v4071_v18 = vld [vmem:[%s5382_s1 + $0x2c4] ss:$8 sps:$4 sm:$0xff]  }
  0x85   : > { %2804 = vmatprep.subr.bf16.mxu0 %v3994_v19  ;;  %v4076_v19 = vld [vmem:[%s5382_s1 + $0x6c4] ss:$8 sps:$4 sm:$0xff]  }
  0x86   : > { %2472 = vmatmul.mubr.bf16.vlgmr.msra.gmra.mrb[0].mxu1 %v3983_v20  ;;  %v4069_v20 = vld [vmem:[%s5382_s1 + $0x2c0] ss:$8 sps:$4 sm:$0xff]  }
  0x87   : > { %2764 = vmatmul.mubr.bf16.vlgmr.msra.gmra.mrb[0].mxu0 %v3989_v22  ;;  %2513 = vmatpush1.bf16.msra.mxu1 %v3986_v21  ;;  %v4074_v21 = vld [vmem:[%s5382_s1 + $0x6c0] ss:$8 sps:$4 sm:$0xff]   ;;  %v4081_v22 = vld [vmem:[%s5382_s1 + $0x2d4] ss:$8 sps:$4 sm:$0xff]  }
  0x88   : > { %2805 = vmatpush1.bf16.msra.mxu0 %v3992_v23  ;;  %2514 = vmatprep.subr.bf16.mxu1 %v3997_v24  ;;  %v4084_v23 = vld [vmem:[%s5382_s1 + $0x6d4] ss:$8 sps:$4 sm:$0xff]   ;;  %v4079_v24 = vld [vmem:[%s5382_s1 + $0x2d0] ss:$8 sps:$4 sm:$0xff]  }
  0x89   : > { %2806 = vmatprep.subr.bf16.mxu0 %v4000_v25  ;;  %2481 = vmatprep.mubr.bf16.mxu1 %v4049_v26  ;;  %v4082_v25 = vld [vmem:[%s5382_s1 + $0x6d0] ss:$8 sps:$4 sm:$0xff]   ;;  %v4089_v26 = vld [vmem:[%s5382_s1 + $0x2e4] ss:$8 sps:$4 sm:$0xff]  }
  0x8a   : > { %2773 = vmatprep.mubr.bf16.mxu0 %v4054_v27  ;;  %v4094_v27 = vld [vmem:[%s5382_s1 + $0x6e4] ss:$8 sps:$4 sm:$0xff]  }
  0x8b   : > { %2515 = vmatpush1.bf16.msra.mxu1 %v3995_v28  ;;  %v4087_v28 = vld [vmem:[%s5382_s1 + $0x2e0] ss:$8 sps:$4 sm:$0xff]  }
  0x8c   : > { %2807 = vmatpush1.bf16.msra.mxu0 %v3998_v29  ;;  %2516 = vmatprep.subr.bf16.mxu1 %v4003_v30  ;;  %v4092_v29 = vld [vmem:[%s5382_s1 + $0x6e0] ss:$8 sps:$4 sm:$0xff]   ;;  %v4099_v30 = vld [vmem:[%s5382_s1 + $0x2f4] ss:$8 sps:$4 sm:$0xff]  }
  0x8d   : > { %2808 = vmatprep.subr.bf16.mxu0 %v4006_v31  ;;  %v4102_v31 = vld [vmem:[%s5382_s1 + $0x6f4] ss:$8 sps:$4 sm:$0xff]  }
  0x8e   : > { %2482 = vmatmul.mubr.bf16.gmra.mrb[4].mxu1 %v4059_v33  ;;  %v4100_v33 = vld [vmem:[%s5382_s1 + $0x6f0] ss:$8 sps:$4 sm:$0xff]  }
  0x8f   : > { %2774 = vmatmul.mubr.bf16.gmra.mrb[4].mxu0 %v4060_v34  ;;  %2517 = vmatpush1.bf16.msra.mxu1 %v4001_v32  ;;  %v4097_v32 = vld [vmem:[%s5382_s1 + $0x2f0] ss:$8 sps:$4 sm:$0xff]   ;;  %v4108_v34 = vld [vmem:[%s5382_s1 + $0x304] ss:$8 sps:$4 sm:$0xff]  }
  0x90   : > { %2809 = vmatpush1.bf16.msra.mxu0 %v4004_v35  ;;  %2518 = vmatprep.subr.bf16.mxu1 %v4009_v36  ;;  %v4114_v35 = vld [vmem:[%s5382_s1 + $0x704] ss:$8 sps:$4 sm:$0xff]   ;;  %v4103_v36 = vld [vmem:[%s4491_s12 + $0x10] ss:$72 sps:$4 sm:$0xff]  }
  0x91   : > { %2810 = vmatprep.subr.bf16.mxu0 %v4012_v37  ;;  %2491 = vmatprep.mubr.bf16.mxu1 %v4067_v38  ;;  %v4106_v37 = vld [vmem:[%s5382_s1 + $0x300] ss:$8 sps:$4 sm:$0xff]   ;;  %v4109_v38 = vld [vmem:[%s4491_s12 + $0x30] ss:$72 sps:$4 sm:$0xff]  }
  0x92   : > { %2783 = vmatprep.mubr.bf16.mxu0 %v4072_v39  ;;  %v4112_v39 = vld [vmem:[%s5382_s1 + $0x700] ss:$8 sps:$4 sm:$0xff]  }
  0x93   : > { %2519 = vmatpush1.bf16.msra.mxu1 %v4007_v40  ;;  %v4117_v40 = vld [vmem:[%s5382_s1 + $0x314] ss:$8 sps:$4 sm:$0xff]  }
  0x94   : > { %2811 = vmatpush1.bf16.msra.mxu0 %v4010_v41  ;;  %2520 = vmatprep.subr.bf16.mxu1 %v4015_v42  ;;  %v4120_v41 = vld [vmem:[%s5382_s1 + $0x714] ss:$8 sps:$4 sm:$0xff]   ;;  %v4169_v42 = vld [vmem:[%s4491_s12 + $0xa4] ss:$72 sps:$4 sm:$0xff]  }
  0x95   : > { %2812 = vmatprep.subr.bf16.mxu0 %v4018_v43  ;;  %v4171_v43 = vld [vmem:[%s4491_s12 + $0xc4] ss:$72 sps:$4 sm:$0xff]  }
  0x96   : > { %2492 = vmatmul.mubr.bf16.gmra.mrb[8].mxu1 %v4077_v45  ;;  %v4118_v45 = vld [vmem:[%s5382_s1 + $0x710] ss:$8 sps:$4 sm:$0xff]  }
  0x97   : > { %2784 = vmatmul.mubr.bf16.gmra.mrb[8].mxu0 %v4078_v46  ;;  %2521 = vmatpush1.bf16.msra.mxu1 %v4013_v44  ;;  %v4115_v44 = vld [vmem:[%s5382_s1 + $0x310] ss:$8 sps:$4 sm:$0xff]   ;;  %v4123_v46 = vld [vmem:[%s5382_s1 + $0x324] ss:$8 sps:$4 sm:$0xff]  }
  0x98   : > { %2813 = vmatpush1.bf16.msra.mxu0 %v4016_v47  ;;  %2522 = vmatprep.subr.bf16.mxu1 %v4021_v48  ;;  %v4126_v47 = vld [vmem:[%s5382_s1 + $0x724] ss:$8 sps:$4 sm:$0xff]   ;;  %v4121_v48 = vld [vmem:[%s5382_s1 + $0x320] ss:$8 sps:$4 sm:$0xff]  }
  0x99   : > { %2814 = vmatprep.subr.bf16.mxu0 %v4024_v49  ;;  %2501 = vmatprep.mubr.bf16.mxu1 %v4085_v50  ;;  %v4124_v49 = vld [vmem:[%s5382_s1 + $0x720] ss:$8 sps:$4 sm:$0xff]  }
  0x9a   : > { %2793 = vmatprep.mubr.bf16.mxu0 %v4090_v51  ;;  %v4173_v50 = vld [vmem:[%s4491_s12 + $0xa0] ss:$72 sps:$4 sm:$0xff]  }
  0x9b   : > { %2523 = vmatpush1.bf16.msra.mxu1 %v4019_v52  ;;  %v4177_v51 = vld [vmem:[%s4491_s12 + $0xc0] ss:$72 sps:$4 sm:$0xff]   ;;  %v4129_v52 = vld [vmem:[%s5382_s1 + $0x334] ss:$8 sps:$4 sm:$0xff]  }
  0x9c   : > { %2815 = vmatpush1.bf16.msra.mxu0 %v4022_v53  ;;  %2524 = vmatprep.subr.bf16.mxu1 %v4027_v54  ;;  %v4132_v53 = vld [vmem:[%s5382_s1 + $0x734] ss:$8 sps:$4 sm:$0xff]  }
  0x9d   : > { %2816 = vmatprep.subr.bf16.mxu0 %v4030_v55  ;;  %v4187_v54 = vld [vmem:[%s4491_s12 + $0x134] ss:$72 sps:$4 sm:$0xff]  }
  0x9e   : > { %2502 = vmatmul.mubr.bf16.gmra.mrb[12].mxu1 %v4095_v58  ;;  %v4189_v55 = vld [vmem:[%s4491_s12 + $0x154] ss:$72 sps:$4 sm:$0xff]   ;;  %v4135_v58 = vld [vmem:[%s5382_s1 + $0x344] ss:$8 sps:$4 sm:$0xff]  }
  0x9f   : > { %2794 = vmatmul.mubr.bf16.gmra.mrb[12].mxu0 %v4096_v59  ;;  %2525 = vmatpush1.bf16.msra.mxu1 %v4025_v56  ;;  %v4127_v56 = vld [vmem:[%s5382_s1 + $0x330] ss:$8 sps:$4 sm:$0xff]   ;;  %v4138_v59 = vld [vmem:[%s5382_s1 + $0x744] ss:$8 sps:$4 sm:$0xff]  }
  0xa0   : > { %2817 = vmatpush1.bf16.msra.mxu0 %v4028_v57  ;;  %2526 = vmatprep.subr.bf16.mxu1 %v4033_v60  ;;  %v4130_v57 = vld [vmem:[%s5382_s1 + $0x730] ss:$8 sps:$4 sm:$0xff]   ;;  %v4133_v60 = vld [vmem:[%s5382_s1 + $0x340] ss:$8 sps:$4 sm:$0xff]  }
  0xa1   : > { %2818 = vmatprep.subr.bf16.mxu0 %v4036_v61  ;;  %2544 = vmatprep.mubr.bf16.mxu1 %v4105_v62  ;;  %v4136_v61 = vld [vmem:[%s5382_s1 + $0x740] ss:$8 sps:$4 sm:$0xff]   ;;  %v4191_v62 = vld [vmem:[%s4491_s12 + $0x130] ss:$72 sps:$4 sm:$0xff]  }
  0xa2   : > { %2836 = vmatprep.mubr.bf16.mxu0 %v4111_v63  ;;  %v4195_v63 = vld [vmem:[%s4491_s12 + $0x150] ss:$72 sps:$4 sm:$0xff]  }
  0xa3   : > { %2527 = vmatpush1.bf16.msra.mxu1 %v4031_v0  ;;  %v4141_v0 = vld [vmem:[%s5382_s1 + $0x354] ss:$8 sps:$4 sm:$0xff]  }
  0xa4   : > { %2819 = vmatpush1.bf16.msra.mxu0 %v4034_v1  ;;  %2528 = vmatprep.subr.bf16.mxu1 %v4039_v2  ;;  %v4144_v1 = vld [vmem:[%s5382_s1 + $0x754] ss:$8 sps:$4 sm:$0xff]   ;;  %v4205_v2 = vld [vmem:[%s4491_s12 + $0x1c4] ss:$72 sps:$4 sm:$0xff]  }
  0xa5   : > { %2820 = vmatprep.subr.bf16.mxu0 %v4042_v3  ;;  %v4207_v3 = vld [vmem:[%s4491_s12 + $0x1e4] ss:$72 sps:$4 sm:$0xff]  }
  0xa7   : > { %2529 = vmatpush1.bf16.msra.mxu1 %v4037_v4  ;;  %v4139_v4 = vld [vmem:[%s5382_s1 + $0x350] ss:$8 sps:$4 sm:$0xff]  }
  0xa8   : > { %2821 = vmatpush1.bf16.msra.mxu0 %v4040_v5  ;;  %2530 = vmatprep.subr.bf16.mxu1 %v4045_v6  ;;  %v4142_v5 = vld [vmem:[%s5382_s1 + $0x750] ss:$8 sps:$4 sm:$0xff]   ;;  %v4147_v6 = vld [vmem:[%s5382_s1 + $0x364] ss:$8 sps:$4 sm:$0xff]  }
  0xa9   : > { %2822 = vmatprep.subr.bf16.mxu0 %v4048_v7  ;;  %v4150_v7 = vld [vmem:[%s5382_s1 + $0x764] ss:$8 sps:$4 sm:$0xff]  }
  0xab   : > { %2531 = vmatpush1.bf16.msra.mxu1 %v4043_v8  ;;  %v4145_v8 = vld [vmem:[%s5382_s1 + $0x360] ss:$8 sps:$4 sm:$0xff]  }
  0xac   : > { %2823 = vmatpush1.bf16.msra.mxu0 %v4046_v9  ;;  %2532 = vmatprep.subr.bf16.mxu1 %v4053_v10  ;;  %v4148_v9 = vld [vmem:[%s5382_s1 + $0x760] ss:$8 sps:$4 sm:$0xff]  }
  0xad   : > { %2824 = vmatprep.subr.bf16.mxu0 %v4058_v11  ;;  %v4209_v10 = vld [vmem:[%s4491_s12 + $0x1c0] ss:$72 sps:$4 sm:$0xff]  }
  0xae   : > { %v4213_v11 = vld [vmem:[%s4491_s12 + $0x1e0] ss:$72 sps:$4 sm:$0xff]  }
  0xaf   : > { %2533 = vmatpush1.bf16.msra.mxu1 %v4051_v12  ;;  %v4153_v12 = vld [vmem:[%s5382_s1 + $0x374] ss:$8 sps:$4 sm:$0xff]  }
  0xb0   : > { %2825 = vmatpush1.bf16.msra.mxu0 %v4056_v13  ;;  %2534 = vmatprep.subr.bf16.mxu1 %v4063_v14  ;;  %v4156_v13 = vld [vmem:[%s5382_s1 + $0x774] ss:$8 sps:$4 sm:$0xff]  }
  0xb1   : > { %2826 = vmatprep.subr.bf16.mxu0 %v4066_v15  ;;  %v4225_v14 = vld [vmem:[%s4491_s12 + $0x1c] ss:$72 sps:$4 sm:$0xff]  }
  0xb2   : > { %v4228_v15 = vld [vmem:[%s4491_s12 + $0x3c] ss:$72 sps:$4 sm:$0xff]  }
  0xb3   : > { %2535 = vmatpush1.bf16.msra.mxu1 %v4061_v16  ;;  %v4151_v16 = vld [vmem:[%s5382_s1 + $0x370] ss:$8 sps:$4 sm:$0xff]  }
  0xb4   : > { %2827 = vmatpush1.bf16.msra.mxu0 %v4064_v17  ;;  %2536 = vmatprep.subr.bf16.mxu1 %v4071_v18  ;;  %v4154_v17 = vld [vmem:[%s5382_s1 + $0x770] ss:$8 sps:$4 sm:$0xff]   ;;  %v4159_v18 = vld [vmem:[%s5382_s1 + $0x384] ss:$8 sps:$4 sm:$0xff]  }
  0xb5   : > { %2828 = vmatprep.subr.bf16.mxu0 %v4076_v19  ;;  %v4162_v19 = vld [vmem:[%s5382_s1 + $0x784] ss:$8 sps:$4 sm:$0xff]  }
  0xb7   : > { %2537 = vmatpush1.bf16.msra.mxu1 %v4069_v20  ;;  %v4157_v20 = vld [vmem:[%s5382_s1 + $0x380] ss:$8 sps:$4 sm:$0xff]  }
  0xb8   : > { %2829 = vmatpush1.bf16.msra.mxu0 %v4074_v21  ;;  %2538 = vmatprep.subr.bf16.mxu1 %v4081_v22  ;;  %v4160_v21 = vld [vmem:[%s5382_s1 + $0x780] ss:$8 sps:$4 sm:$0xff]   ;;  %v4165_v22 = vld [vmem:[%s5382_s1 + $0x394] ss:$8 sps:$4 sm:$0xff]  }
  0xb9   : > { %2830 = vmatprep.subr.bf16.mxu0 %v4084_v23  ;;  %v4168_v23 = vld [vmem:[%s5382_s1 + $0x794] ss:$8 sps:$4 sm:$0xff]  }
  0xbb   : > { %2539 = vmatpush1.bf16.msra.mxu1 %v4079_v24  ;;  %v4163_v24 = vld [vmem:[%s5382_s1 + $0x390] ss:$8 sps:$4 sm:$0xff]  }
  0xbc   : > { %2831 = vmatpush1.bf16.msra.mxu0 %v4082_v25  ;;  %2540 = vmatprep.subr.bf16.mxu1 %v4089_v26  ;;  %v4166_v25 = vld [vmem:[%s5382_s1 + $0x790] ss:$8 sps:$4 sm:$0xff]   ;;  %v4176_v26 = vld [vmem:[%s5382_s1 + $0x3a4] ss:$8 sps:$4 sm:$0xff]  }
  0xbd   : > { %2832 = vmatprep.subr.bf16.mxu0 %v4094_v27  ;;  %v4180_v27 = vld [vmem:[%s5382_s1 + $0x7a4] ss:$8 sps:$4 sm:$0xff]  }
  0xbf   : > { %2541 = vmatpush1.bf16.msra.mxu1 %v4087_v28  ;;  %v4174_v28 = vld [vmem:[%s5382_s1 + $0x3a0] ss:$8 sps:$4 sm:$0xff]  }
  0xc0   : > { %2833 = vmatpush1.bf16.msra.mxu0 %v4092_v29  ;;  %2542 = vmatprep.subr.bf16.mxu1 %v4099_v30  ;;  %v4178_v29 = vld [vmem:[%s5382_s1 + $0x7a0] ss:$8 sps:$4 sm:$0xff]   ;;  %v4183_v30 = vld [vmem:[%s5382_s1 + $0x3b4] ss:$8 sps:$4 sm:$0xff]  }
  0xc1   : > { %2834 = vmatprep.subr.bf16.mxu0 %v4102_v31  ;;  %v4186_v31 = vld [vmem:[%s5382_s1 + $0x7b4] ss:$8 sps:$4 sm:$0xff]  }
  0xc3   : > { %2543 = vmatpush1.bf16.msra.mxu1 %v4097_v32  ;;  %v4181_v32 = vld [vmem:[%s5382_s1 + $0x3b0] ss:$8 sps:$4 sm:$0xff]  }
  0xc4   : > { %2835 = vmatpush1.bf16.msra.mxu0 %v4100_v33  ;;  %2585 = vmatprep.subr.bf16.mxu1 %v4108_v34  ;;  %v4184_v33 = vld [vmem:[%s5382_s1 + $0x7b0] ss:$8 sps:$4 sm:$0xff]   ;;  %v4194_v34 = vld [vmem:[%s5382_s1 + $0x3c4] ss:$8 sps:$4 sm:$0xff]  }
  0xc5   : > { %2877 = vmatprep.subr.bf16.mxu0 %v4114_v35  ;;  %v4198_v35 = vld [vmem:[%s5382_s1 + $0x7c4] ss:$8 sps:$4 sm:$0xff]  }
  0xc6   : > { %2545 = vmatmul.mubr.bf16.vlgmr.msra.gmra.mrb[0].mxu1 %v4103_v36  ;;  %v4192_v36 = vld [vmem:[%s5382_s1 + $0x3c0] ss:$8 sps:$4 sm:$0xff]  }
  0xc7   : > { %2837 = vmatmul.mubr.bf16.vlgmr.msra.gmra.mrb[0].mxu0 %v4109_v38  ;;  %2586 = vmatpush1.bf16.msra.mxu1 %v4106_v37  ;;  %v4196_v37 = vld [vmem:[%s5382_s1 + $0x7c0] ss:$8 sps:$4 sm:$0xff]   ;;  %v4201_v38 = vld [vmem:[%s5382_s1 + $0x3d4] ss:$8 sps:$4 sm:$0xff]  }
  0xc8   : > { %2878 = vmatpush1.bf16.msra.mxu0 %v4112_v39  ;;  %2587 = vmatprep.subr.bf16.mxu1 %v4117_v40  ;;  %v4204_v39 = vld [vmem:[%s5382_s1 + $0x7d4] ss:$8 sps:$4 sm:$0xff]   ;;  %v4199_v40 = vld [vmem:[%s5382_s1 + $0x3d0] ss:$8 sps:$4 sm:$0xff]  }
  0xc9   : > { %2879 = vmatprep.subr.bf16.mxu0 %v4120_v41  ;;  %2554 = vmatprep.mubr.bf16.mxu1 %v4169_v42  ;;  %v4202_v41 = vld [vmem:[%s5382_s1 + $0x7d0] ss:$8 sps:$4 sm:$0xff]   ;;  %v4212_v42 = vld [vmem:[%s5382_s1 + $0x3e4] ss:$8 sps:$4 sm:$0xff]  }
  0xca   : > { %2846 = vmatprep.mubr.bf16.mxu0 %v4171_v43  ;;  %v4216_v43 = vld [vmem:[%s5382_s1 + $0x7e4] ss:$8 sps:$4 sm:$0xff]  }
  0xcb   : > { %2588 = vmatpush1.bf16.msra.mxu1 %v4115_v44  ;;  %v4210_v44 = vld [vmem:[%s5382_s1 + $0x3e0] ss:$8 sps:$4 sm:$0xff]  }
  0xcc   : > { %2880 = vmatpush1.bf16.msra.mxu0 %v4118_v45  ;;  %2589 = vmatprep.subr.bf16.mxu1 %v4123_v46  ;;  %v4214_v45 = vld [vmem:[%s5382_s1 + $0x7e0] ss:$8 sps:$4 sm:$0xff]   ;;  %v4219_v46 = vld [vmem:[%s5382_s1 + $0x3f4] ss:$8 sps:$4 sm:$0xff]  }
  0xcd   : > { %2881 = vmatprep.subr.bf16.mxu0 %v4126_v47  ;;  %v4222_v47 = vld [vmem:[%s5382_s1 + $0x7f4] ss:$8 sps:$4 sm:$0xff]  }
  0xce   : > { %2555 = vmatmul.mubr.bf16.gmra.mrb[4].mxu1 %v4173_v50  ;;  %v4231_v50 = vld [vmem:[%s5382_s1 + $0x804] ss:$8 sps:$4 sm:$0xff]  }
  0xcf   : > { %2847 = vmatmul.mubr.bf16.gmra.mrb[4].mxu0 %v4177_v51  ;;  %2590 = vmatpush1.bf16.msra.mxu1 %v4121_v48  ;;  %v4217_v48 = vld [vmem:[%s5382_s1 + $0x3f0] ss:$8 sps:$4 sm:$0xff]  }
  0xd0   : > { %2882 = vmatpush1.bf16.msra.mxu0 %v4124_v49  ;;  %2591 = vmatprep.subr.bf16.mxu1 %v4129_v52  ;;  %v4220_v49 = vld [vmem:[%s5382_s1 + $0x7f0] ss:$8 sps:$4 sm:$0xff]  }
  0xd1   : > { %2883 = vmatprep.subr.bf16.mxu0 %v4132_v53  ;;  %2564 = vmatprep.mubr.bf16.mxu1 %v4187_v54  ;;  %v4223_v51 = vld [vmem:[%s4491_s12 + $0x18] ss:$72 sps:$4 sm:$0xff]   ;;  %v4234_v54 = vld [vmem:[%s5382_s1 + $0x814] ss:$8 sps:$4 sm:$0xff]  }
  0xd2   : > { %2856 = vmatprep.mubr.bf16.mxu0 %v4189_v55  ;;  %v4226_v52 = vld [vmem:[%s4491_s12 + $0x38] ss:$72 sps:$4 sm:$0xff]   ;;  %v4235_v55 = vld [vmem:[%s4491_s12 + $0xac] ss:$72 sps:$4 sm:$0xff]  }
  0xd3   : > { %2592 = vmatpush1.bf16.msra.mxu1 %v4127_v56  ;;  %v4229_v53 = vld [vmem:[%s5382_s1 + $0x800] ss:$8 sps:$4 sm:$0xff]   ;;  %v4237_v56 = vld [vmem:[%s4491_s12 + $0xcc] ss:$72 sps:$4 sm:$0xff]  }
  0xd4   : > { %2884 = vmatpush1.bf16.msra.mxu0 %v4130_v57  ;;  %2593 = vmatprep.subr.bf16.mxu1 %v4135_v58  ;;  %v4232_v57 = vld [vmem:[%s5382_s1 + $0x810] ss:$8 sps:$4 sm:$0xff]   ;;  %v4243_v58 = vld [vmem:[%s5382_s1 + $0x824] ss:$8 sps:$4 sm:$0xff]  }
  0xd5   : > { %2885 = vmatprep.subr.bf16.mxu0 %v4138_v59  ;;  %v4239_v59 = vld [vmem:[%s4491_s12 + $0xa8] ss:$72 sps:$4 sm:$0xff]  }
  0xd6   : > { %2565 = vmatmul.mubr.bf16.gmra.mrb[8].mxu1 %v4191_v62  ;;  %v4246_v62 = vld [vmem:[%s5382_s1 + $0x834] ss:$8 sps:$4 sm:$0xff]  }
  0xd7   : > { %2857 = vmatmul.mubr.bf16.gmra.mrb[8].mxu0 %v4195_v63  ;;  %2594 = vmatpush1.bf16.msra.mxu1 %v4133_v60  ;;  %v4240_v60 = vld [vmem:[%s4491_s12 + $0xc8] ss:$72 sps:$4 sm:$0xff]   ;;  %v4247_v63 = vld [vmem:[%s4491_s12 + $0x13c] ss:$72 sps:$4 sm:$0xff]  }
  0xd8   : > { %2886 = vmatpush1.bf16.msra.mxu0 %v4136_v61  ;;  %2595 = vmatprep.subr.bf16.mxu1 %v4141_v0  ;;  %v4241_v61 = vld [vmem:[%s5382_s1 + $0x820] ss:$8 sps:$4 sm:$0xff]   ;;  %v4249_v0 = vld [vmem:[%s4491_s12 + $0x15c] ss:$72 sps:$4 sm:$0xff]  }
  0xd9   : > { %2887 = vmatprep.subr.bf16.mxu0 %v4144_v1  ;;  %2574 = vmatprep.mubr.bf16.mxu1 %v4205_v2  ;;  %v4244_v1 = vld [vmem:[%s5382_s1 + $0x830] ss:$8 sps:$4 sm:$0xff]   ;;  %v4255_v2 = vld [vmem:[%s5382_s1 + $0x844] ss:$8 sps:$4 sm:$0xff]  }
  0xda   : > { %2866 = vmatprep.mubr.bf16.mxu0 %v4207_v3  ;;  %v4251_v3 = vld [vmem:[%s4491_s12 + $0x138] ss:$72 sps:$4 sm:$0xff]  }
  0xdb   : > { %2596 = vmatpush1.bf16.msra.mxu1 %v4139_v4  ;;  %v4252_v4 = vld [vmem:[%s4491_s12 + $0x158] ss:$72 sps:$4 sm:$0xff]  }
  0xdc   : > { %2888 = vmatpush1.bf16.msra.mxu0 %v4142_v5  ;;  %2597 = vmatprep.subr.bf16.mxu1 %v4147_v6  ;;  %v4253_v5 = vld [vmem:[%s5382_s1 + $0x840] ss:$8 sps:$4 sm:$0xff]   ;;  %v4258_v6 = vld [vmem:[%s5382_s1 + $0x854] ss:$8 sps:$4 sm:$0xff]  }
  0xdd   : > { %2889 = vmatprep.subr.bf16.mxu0 %v4150_v7  ;;  %v4259_v7 = vld [vmem:[%s4491_s12 + $0x1cc] ss:$72 sps:$4 sm:$0xff]  }
  0xde   : > { %2575 = vmatmul.mubr.bf16.gmra.mrb[12].mxu1 %v4209_v10  ;;  %v4267_v10 = vld [vmem:[%s5382_s1 + $0x864] ss:$8 sps:$4 sm:$0xff]  }
  0xdf   : > { %2867 = vmatmul.mubr.bf16.gmra.mrb[12].mxu0 %v4213_v11  ;;  %2598 = vmatpush1.bf16.msra.mxu1 %v4145_v8  ;;  %v4261_v8 = vld [vmem:[%s4491_s12 + $0x1ec] ss:$72 sps:$4 sm:$0xff]   ;;  %v4263_v11 = vld [vmem:[%s4491_s12 + $0x1c8] ss:$72 sps:$4 sm:$0xff]  }
  0xe0   : > { %2890 = vmatpush1.bf16.msra.mxu0 %v4148_v9  ;;  %2599 = vmatprep.subr.bf16.mxu1 %v4153_v12  ;;  %v4256_v9 = vld [vmem:[%s5382_s1 + $0x850] ss:$8 sps:$4 sm:$0xff]  }
  0xe1   : > { %2891 = vmatprep.subr.bf16.mxu0 %v4156_v13  ;;  %2617 = vmatprep.mubr.bf16.mxu1 %v4225_v14  ;;  %v4264_v12 = vld [vmem:[%s4491_s12 + $0x1e8] ss:$72 sps:$4 sm:$0xff]   ;;  %v4270_v14 = vld [vmem:[%s5382_s1 + $0x874] ss:$8 sps:$4 sm:$0xff]  }
  0xe2   : > { %2909 = vmatprep.mubr.bf16.mxu0 %v4228_v15  ;;  %v4265_v13 = vld [vmem:[%s5382_s1 + $0x860] ss:$8 sps:$4 sm:$0xff]   ;;  %v4297_v15 = vld [vmem:[%s4491_s12 + $0x44] ss:$72 sps:$4 sm:$0xff]  }
  0xe3   : > { %2600 = vmatpush1.bf16.msra.mxu1 %v4151_v16  ;;  %v4300_v16 = vld [vmem:[%s4491_s12 + $0x164] ss:$72 sps:$4 sm:$0xff]  }
  0xe4   : > { %2892 = vmatpush1.bf16.msra.mxu0 %v4154_v17  ;;  %2601 = vmatprep.subr.bf16.mxu1 %v4159_v18  ;;  %v4268_v17 = vld [vmem:[%s5382_s1 + $0x870] ss:$8 sps:$4 sm:$0xff]   ;;  %v4273_v18 = vld [vmem:[%s5382_s1 + $0x884] ss:$8 sps:$4 sm:$0xff]  }
  0xe5   : > { %2893 = vmatprep.subr.bf16.mxu0 %v4162_v19  ;;  %v4271_v19 = vld [vmem:[%s5382_s1 + $0x880] ss:$8 sps:$4 sm:$0xff]  }
  0xe7   : > { %2602 = vmatpush1.bf16.msra.mxu1 %v4157_v20  ;;  %v4276_v20 = vld [vmem:[%s5382_s1 + $0x894] ss:$8 sps:$4 sm:$0xff]  }
  0xe8   : > { %2894 = vmatpush1.bf16.msra.mxu0 %v4160_v21  ;;  %2603 = vmatprep.subr.bf16.mxu1 %v4165_v22  ;;  %v4274_v21 = vld [vmem:[%s5382_s1 + $0x890] ss:$8 sps:$4 sm:$0xff]   ;;  %v4279_v22 = vld [vmem:[%s5382_s1 + $0x8a4] ss:$8 sps:$4 sm:$0xff]  }
  0xe9   : > { %2895 = vmatprep.subr.bf16.mxu0 %v4168_v23  ;;  %v4277_v23 = vld [vmem:[%s5382_s1 + $0x8a0] ss:$8 sps:$4 sm:$0xff]  }
  0xeb   : > { %2604 = vmatpush1.bf16.msra.mxu1 %v4163_v24  ;;  %v4282_v24 = vld [vmem:[%s5382_s1 + $0x8b4] ss:$8 sps:$4 sm:$0xff]  }
  0xec   : > { %2896 = vmatpush1.bf16.msra.mxu0 %v4166_v25  ;;  %2605 = vmatprep.subr.bf16.mxu1 %v4176_v26  ;;  %v4280_v25 = vld [vmem:[%s5382_s1 + $0x8b0] ss:$8 sps:$4 sm:$0xff]   ;;  %v4285_v26 = vld [vmem:[%s5382_s1 + $0x8c4] ss:$8 sps:$4 sm:$0xff]  }
  0xed   : > { %2897 = vmatprep.subr.bf16.mxu0 %v4180_v27  ;;  %v4283_v27 = vld [vmem:[%s5382_s1 + $0x8c0] ss:$8 sps:$4 sm:$0xff]  }
  0xef   : > { %2606 = vmatpush1.bf16.msra.mxu1 %v4174_v28  ;;  %v4288_v28 = vld [vmem:[%s5382_s1 + $0x8d4] ss:$8 sps:$4 sm:$0xff]  }
  0xf0   : > { %2898 = vmatpush1.bf16.msra.mxu0 %v4178_v29  ;;  %2607 = vmatprep.subr.bf16.mxu1 %v4183_v30  ;;  %v4286_v29 = vld [vmem:[%s5382_s1 + $0x8d0] ss:$8 sps:$4 sm:$0xff]   ;;  %v4291_v30 = vld [vmem:[%s5382_s1 + $0x8e4] ss:$8 sps:$4 sm:$0xff]  }
  0xf1   : > { %2899 = vmatprep.subr.bf16.mxu0 %v4186_v31  ;;  %v4289_v31 = vld [vmem:[%s5382_s1 + $0x8e0] ss:$8 sps:$4 sm:$0xff]  }
  0xf3   : > { %2608 = vmatpush1.bf16.msra.mxu1 %v4181_v32  ;;  %v4294_v32 = vld [vmem:[%s5382_s1 + $0x8f4] ss:$8 sps:$4 sm:$0xff]  }
  0xf4   : > { %2900 = vmatpush1.bf16.msra.mxu0 %v4184_v33  ;;  %2609 = vmatprep.subr.bf16.mxu1 %v4194_v34  ;;  %v4292_v33 = vld [vmem:[%s5382_s1 + $0x8f0] ss:$8 sps:$4 sm:$0xff]   ;;  %v4295_v34 = vld [vmem:[%s4491_s12 + $0x40] ss:$72 sps:$4 sm:$0xff]  }
  0xf5   : > { %2901 = vmatprep.subr.bf16.mxu0 %v4198_v35  ;;  %v4298_v35 = vld [vmem:[%s4491_s12 + $0x160] ss:$72 sps:$4 sm:$0xff]  }
  0xf7   : > { %2610 = vmatpush1.bf16.msra.mxu1 %v4192_v36  ;;  %v4301_v36 = vld [vmem:[%s4491_s12 + $0xd4] ss:$72 sps:$4 sm:$0xff]  }
  0xf8   : > { %2902 = vmatpush1.bf16.msra.mxu0 %v4196_v37  ;;  %2611 = vmatprep.subr.bf16.mxu1 %v4201_v38  ;;  %v4303_v37 = vld [vmem:[%s4491_s12 + $0x1f4] ss:$72 sps:$4 sm:$0xff]   ;;  %v4305_v38 = vld [vmem:[%s4491_s12 + $0xd0] ss:$72 sps:$4 sm:$0xff]  }
  0xf9   : > { %2903 = vmatprep.subr.bf16.mxu0 %v4204_v39  ;;  %v4306_v39 = vld [vmem:[%s4491_s12 + $0x1f0] ss:$72 sps:$4 sm:$0xff]  }
  0xfb   : > { %2612 = vmatpush1.bf16.msra.mxu1 %v4199_v40 }
  0xfc   : > { %2904 = vmatpush1.bf16.msra.mxu0 %v4202_v41  ;;  %2613 = vmatprep.subr.bf16.mxu1 %v4212_v42 }
  0xfd   : > { %2905 = vmatprep.subr.bf16.mxu0 %v4216_v43 }
  0xff   : > { %2614 = vmatpush1.bf16.msra.mxu1 %v4210_v44 }
 0x100   : > { %2906 = vmatpush1.bf16.msra.mxu0 %v4214_v45  ;;  %2615 = vmatprep.subr.bf16.mxu1 %v4219_v46 }
 0x101   : > { %2907 = vmatprep.subr.bf16.mxu0 %v4222_v47 }
 0x103   : > { %2616 = vmatpush1.bf16.msra.mxu1 %v4217_v48 }
 0x104   : > { %2908 = vmatpush1.bf16.msra.mxu0 %v4220_v49  ;;  %3598 = vmatprep.subr.bf16.mxu1 %v4231_v50 }
 0x105   : > { %2950 = vmatprep.subr.bf16.mxu0 %v4231_v50 }
 0x106   : > { %2618 = vmatmul.mubr.bf16.vlgmr.msra.gmra.mrb[0].mxu1 %v4223_v51 }
 0x107   : > { %2910 = vmatmul.mubr.bf16.vlgmr.msra.gmra.mrb[0].mxu0 %v4226_v52  ;;  %3614 = vmatpush1.bf16.msra.mxu1 %v4229_v53 }
 0x108   : > { %2951 = vmatpush1.bf16.msra.mxu0 %v4229_v53  ;;  %3599 = vmatprep.subr.bf16.mxu1 %v4234_v54 }
 0x109   : > { %2952 = vmatprep.subr.bf16.mxu0 %v4234_v54  ;;  %2627 = vmatprep.mubr.bf16.mxu1 %v4235_v55 }
 0x10a   : > { %2919 = vmatprep.mubr.bf16.mxu0 %v4237_v56 }
 0x10b   : > { %3615 = vmatpush1.bf16.msra.mxu1 %v4232_v57 }
 0x10c   : > { %2953 = vmatpush1.bf16.msra.mxu0 %v4232_v57  ;;  %3600 = vmatprep.subr.bf16.mxu1 %v4243_v58 }
 0x10d   : > { %2954 = vmatprep.subr.bf16.mxu0 %v4243_v58 }
 0x10e   : > { %2628 = vmatmul.mubr.bf16.gmra.mrb[4].mxu1 %v4239_v59 }
 0x10f   : > { %2920 = vmatmul.mubr.bf16.gmra.mrb[4].mxu0 %v4240_v60  ;;  %3616 = vmatpush1.bf16.msra.mxu1 %v4241_v61 }
 0x110   : > { %2955 = vmatpush1.bf16.msra.mxu0 %v4241_v61  ;;  %3601 = vmatprep.subr.bf16.mxu1 %v4246_v62 }
 0x111   : > { %2956 = vmatprep.subr.bf16.mxu0 %v4246_v62  ;;  %2637 = vmatprep.mubr.bf16.mxu1 %v4247_v63 }
 0x112   : > { %2929 = vmatprep.mubr.bf16.mxu0 %v4249_v0 }
 0x113   : > { %3617 = vmatpush1.bf16.msra.mxu1 %v4244_v1 }
 0x114   : > { %2957 = vmatpush1.bf16.msra.mxu0 %v4244_v1  ;;  %3602 = vmatprep.subr.bf16.mxu1 %v4255_v2 }
 0x115   : > { %2958 = vmatprep.subr.bf16.mxu0 %v4255_v2 }
 0x116   : > { %2638 = vmatmul.mubr.bf16.gmra.mrb[8].mxu1 %v4251_v3 }
 0x117   : > { %2930 = vmatmul.mubr.bf16.gmra.mrb[8].mxu0 %v4252_v4  ;;  %3618 = vmatpush1.bf16.msra.mxu1 %v4253_v5 }
 0x118   : > { %2959 = vmatpush1.bf16.msra.mxu0 %v4253_v5  ;;  %3603 = vmatprep.subr.bf16.mxu1 %v4258_v6 }
 0x119   : > { %2960 = vmatprep.subr.bf16.mxu0 %v4258_v6  ;;  %2647 = vmatprep.mubr.bf16.mxu1 %v4259_v7 }
 0x11a   : > { %2939 = vmatprep.mubr.bf16.mxu0 %v4261_v8  ;;  %v3025_v8 = vlaneseq }
 0x11b   : > { %3619 = vmatpush1.bf16.msra.mxu1 %v4256_v9 }
 0x11c   : > { %2961 = vmatpush1.bf16.msra.mxu0 %v4256_v9  ;;  %3604 = vmatprep.subr.bf16.mxu1 %v4267_v10  ;;  %v3026_v9 = vshrl.u32 %v3025_v8, 7 }
 0x11d   : > { %2962 = vmatprep.subr.bf16.mxu0 %v4267_v10 }
 0x11e   : > { %2648 = vmatmul.mubr.bf16.gmra.mrb[12].mxu1 %v4263_v11  ;;  %v3027_v10 = vsub.s32 0, %v3026_v9  ;;  %v3023_v11 = vld [vmem:[%s5383_s2] sm:$0x3] }
 0x11f   : > { %2940 = vmatmul.mubr.bf16.gmra.mrb[12].mxu0 %v4264_v12  ;;  %3620 = vmatpush1.bf16.msra.mxu1 %v4265_v13  ;;  %v3031_v12 = vsub.s32 1, %v3026_v9 }
 0x120   : > { %2963 = vmatpush1.bf16.msra.mxu0 %v4265_v13  ;;  %3605 = vmatprep.subr.bf16.mxu1 %v4270_v14  ;;  %v3051_v13 = vld [vmem:[%s5384_s3] sm:$0x3] }
 0x121   : > { %2964 = vmatprep.subr.bf16.mxu0 %v4270_v14  ;;  %2982 = vmatprep.mubr.bf16.mxu0 %v4297_v15  ;;  %v5316_v14 = vrot.slane %v3023_v11, %v3027_v10 }
 0x122   : > { %3002 = vmatprep.mubr.bf16.mxu1 %v4300_v16 }
 0x123   : > { %3621 = vmatpush1.bf16.msra.mxu1 %v4268_v17 }
 0x124   : > { %2965 = vmatpush1.bf16.msra.mxu0 %v4268_v17  ;;  %3606 = vmatprep.subr.bf16.mxu1 %v4273_v18  ;;  %v5318_v17 = vrot.slane %v3023_v11, %v3031_v12 }
 0x125   : > { %2966 = vmatprep.subr.bf16.mxu0 %v4273_v18 }
 0x127   : > { %3622 = vmatpush1.bf16.msra.mxu1 %v4271_v19 }
 0x128   : > { %2967 = vmatpush1.bf16.msra.mxu0 %v4271_v19  ;;  %3607 = vmatprep.subr.bf16.mxu1 %v4276_v20  ;;  %v5320_v19 = vrot.slane %v3051_v13, %v3027_v10 }
 0x129   : > { %2968 = vmatprep.subr.bf16.mxu0 %v4276_v20 }
 0x12b   : > { %3623 = vmatpush1.bf16.msra.mxu1 %v4274_v21 }
 0x12c   : > { %2969 = vmatpush1.bf16.msra.mxu0 %v4274_v21  ;;  %3608 = vmatprep.subr.bf16.mxu1 %v4279_v22 }
 0x12d   : > { %2970 = vmatprep.subr.bf16.mxu0 %v4279_v22 }
 0x12f   : > { %3624 = vmatpush1.bf16.msra.mxu1 %v4277_v23 }
 0x130   : > { %2971 = vmatpush1.bf16.msra.mxu0 %v4277_v23  ;;  %3609 = vmatprep.subr.bf16.mxu1 %v4282_v24 }
 0x131   : > { %2972 = vmatprep.subr.bf16.mxu0 %v4282_v24  ;;  %v5322_v24 = vrot.slane %v3051_v13, %v3031_v12 }
 0x133   : > { %3625 = vmatpush1.bf16.msra.mxu1 %v4280_v25 }
 0x134   : > { %2973 = vmatpush1.bf16.msra.mxu0 %v4280_v25  ;;  %3610 = vmatprep.subr.bf16.mxu1 %v4285_v26 }
 0x135   : > { %2974 = vmatprep.subr.bf16.mxu0 %v4285_v26 }
 0x137   : > { %3626 = vmatpush1.bf16.msra.mxu1 %v4283_v27 }
 0x138   : > { %2975 = vmatpush1.bf16.msra.mxu0 %v4283_v27  ;;  %3611 = vmatprep.subr.bf16.mxu1 %v4288_v28 }
 0x139   : > { %2976 = vmatprep.subr.bf16.mxu0 %v4288_v28 }
 0x13b   : > { %3627 = vmatpush1.bf16.msra.mxu1 %v4286_v29 }
 0x13c   : > { %2977 = vmatpush1.bf16.msra.mxu0 %v4286_v29  ;;  %3612 = vmatprep.subr.bf16.mxu1 %v4291_v30 }
 0x13d   : > { %2978 = vmatprep.subr.bf16.mxu0 %v4291_v30 }
 0x13f   : > { %3628 = vmatpush1.bf16.msra.mxu1 %v4289_v31 }
 0x140   : > { %2979 = vmatpush1.bf16.msra.mxu0 %v4289_v31  ;;  %3613 = vmatprep.subr.bf16.mxu1 %v4294_v32 }
 0x141   : > { %2980 = vmatprep.subr.bf16.mxu0 %v4294_v32 }
 0x143   : > { %3629 = vmatpush1.bf16.msra.mxu1 %v4292_v33 }
 0x144   : > { %2981 = vmatpush1.bf16.msra.mxu0 %v4292_v33 }
 0x146   : > { %3003 = vmatmul.mubr.bf16.vlgmr.msra.gmra.mrb[16].mxu1 %v4298_v35 }
 0x147   : > { %2983 = vmatmul.mubr.bf16.vlgmr.msra.gmra.mrb[0].mxu0 %v4295_v34  ;;  %3012 = vmatprep.mubr.bf16.mxu1 %v4303_v37 }
 0x148   : > { %2992 = vmatprep.mubr.bf16.mxu0 %v4301_v36 }
 0x14e   : > { %3013 = vmatmul.mubr.bf16.gmra.mrb[20].mxu1 %v4306_v39 }
 0x14f   : > { %2993 = vmatmul.mubr.bf16.gmra.mrb[4].mxu0 %v4305_v38 }
 0x1d9   : > { %v2619_v40 = vpop.f32.mrb[0].mxu1 }
 0x1da   : > { %v2621_v41 = vpop.f32.mrb[1].mxu1 }
 0x1db   : > { %v2623_v42 = vpop.f32.mrb[2].mxu1 }
 0x1dc   : > { %v2625_v43 = vpop.f32.mrb[3].mxu1 }
 0x1e1   : > { %v5294_v44 = vpop.f32.mrb[4].mxu1 }
 0x1e2   : > { %v5296_v45 = vpop.f32.mrb[5].mxu1 }
 0x1e3   : > { %v5298_v46 = vpop.f32.mrb[6].mxu1 }
 0x1e4   : > { %v5300_v47 = vpop.f32.mrb[7].mxu1 }
 0x1e9   : > { %v2639_v48 = vpop.f32.mrb[8].mxu1 }
 0x1ea   : > { %v2931_v49 = vpop.f32.mrb[8].mxu0  ;;  %v2641_v51 = vpop.f32.mrb[9].mxu1 }
 0x1eb   : > { %v3638_v50 = vadd.f32 %v2931_v49, %v2639_v48  ;;  %v2933_v52 = vpop.f32.mrb[9].mxu0  ;;  %v2643_v54 = vpop.f32.mrb[10].mxu1 }
 0x1ec   : > { %v3640_v53 = vadd.f32 %v2933_v52, %v2641_v51  ;;  %v2935_v55 = vpop.f32.mrb[10].mxu0  ;;  %v2645_v57 = vpop.f32.mrb[11].mxu1 }
 0x1ed   : > { %v3642_v56 = vadd.f32 %v2935_v55, %v2643_v54  ;;  %v2937_v58 = vpop.f32.mrb[11].mxu0 }
 0x1ee   : > { %v3644_v59 = vadd.f32 %v2937_v58, %v2645_v57 }
 0x1f1   : > { %v2649_v60 = vpop.f32.mrb[12].mxu1 }
 0x1f2   : > { %v2941_v61 = vpop.f32.mrb[12].mxu0  ;;  %v2651_v63 = vpop.f32.mrb[13].mxu1 }
 0x1f3   : > { %v5302_v62 = vadd.f32 %v2941_v61, %v2649_v60  ;;  %v2943_v0 = vpop.f32.mrb[13].mxu0  ;;  %v2653_v2 = vpop.f32.mrb[14].mxu1 }
 0x1f4   : > { %v5304_v1 = vadd.f32 %v2943_v0, %v2651_v63  ;;  %v2945_v3 = vpop.f32.mrb[14].mxu0  ;;  %v2655_v5 = vpop.f32.mrb[15].mxu1 }
 0x1f5   : > { %v5306_v4 = vadd.f32 %v2945_v3, %v2653_v2  ;;  %v2947_v6 = vpop.f32.mrb[15].mxu0 }
 0x1f6   : > { %v5308_v7 = vadd.f32 %v2947_v6, %v2655_v5 }
 0x219   : > { %v3004_v16 = vpop.f32.mrb[16].mxu1 }
 0x21a   : > { %v2984_v15 = vpop.f32.mrb[0].mxu0  ;;  %v3639_v20 = vadd.f32 %v3638_v50, %v3004_v16  ;;  %v3006_v22 = vpop.f32.mrb[17].mxu1 }
 0x21b   : > { %v3630_v18 = vadd.f32 %v2984_v15, %v2619_v40  ;;  %v2986_v21 = vpop.f32.mrb[1].mxu0  ;;  %v3641_v25 = vadd.f32 %v3640_v53, %v3006_v22  ;;  %v3008_v27 = vpop.f32.mrb[18].mxu1 }
 0x21c   : > { %v3631_v23 = vadd.f32 %v2986_v21, %v2621_v41  ;;  %v2988_v26 = vpop.f32.mrb[2].mxu0  ;;  %v3043_v29 = vmul.f32 %v3639_v20, %v5316_v14  ;;  %v3643_v31 = vadd.f32 %v3642_v56, %v3008_v27  ;;  %v3010_v33 = vpop.f32.mrb[19].mxu1 }
 0x21d   : > { %v3035_v28 = vmul.f32 %v3630_v18, %v5316_v14  ;;  %v3632_v30 = vadd.f32 %v2988_v26, %v2623_v42  ;;  %v2990_v32 = vpop.f32.mrb[3].mxu0  ;;  %v3044_v35 = vmul.f32 %v3641_v25, %v5318_v17  ;;  %v3645_v37 = vadd.f32 %v3644_v59, %v3010_v33 }
 0x21e   : > { %v3036_v34 = vmul.f32 %v3631_v23, %v5318_v17  ;;  %v3633_v36 = vadd.f32 %v2990_v32, %v2625_v43  ;;  %v3071_v39 = vadd.f32 %v5320_v19, %v3043_v29  ;;  %v3045_v41 = vmul.f32 %v3643_v31, %v5316_v14 }
 0x21f   : > { %v3063_v38 = vadd.f32 %v5320_v19, %v3035_v28  ;;  %v3037_v40 = vmul.f32 %v3632_v30, %v5316_v14  ;;  %v3072_v48 = vadd.f32 %v5322_v24, %v3044_v35  ;;  %v3046_v50 = vmul.f32 %v3645_v37, %v5318_v17 }
 0x220   : > { %v3064_v42 = vadd.f32 %v5322_v24, %v3036_v34  ;;  %v3038_v49 = vmul.f32 %v3633_v36, %v5318_v17  ;;  %v3087_v43 = vmax.f32 %v3071_v39, 0.0  ;;  %v3073_v53 = vadd.f32 %v5320_v19, %v3045_v41 }
 0x221   : > { %v3079_v51 = vmax.f32 %v3063_v38, 0.0  ;;  %v3065_v52 = vadd.f32 %v5320_v19, %v3037_v40  ;;  %v3088_v55 = vmax.f32 %v3072_v48, 0.0  ;;  %v3074_v57 = vadd.f32 %v5322_v24, %v3046_v50  ;;  %v3014_v59 = vpop.f32.mrb[20].mxu1 }
 0x222   : > { %v3080_v54 = vmax.f32 %v3064_v42, 0.0  ;;  %v3066_v56 = vadd.f32 %v5322_v24, %v3038_v49  ;;  %v2994_v58 = vpop.f32.mrb[4].mxu0  ;;  %v3089_v61 = vmax.f32 %v3073_v53, 0.0  ;;  %v3647_v0 = vadd.f32 %v5302_v62, %v3014_v59  ;;  %v3016_v3 = vpop.f32.mrb[21].mxu1 }
 0x223   : > { %v3081_v60 = vmax.f32 %v3065_v52, 0.0  ;;  %v3634_v63 = vadd.f32 %v2994_v58, %v5294_v44  ;;  %v2996_v2 = vpop.f32.mrb[5].mxu0  ;;  %v3594_v6 = vpack.c.bf16 %v3088_v55, %v3087_v43  ;;  %v3090_v9 = vmax.f32 %v3074_v57, 0.0  ;;  %v3018_v11 = vpop.f32.mrb[22].mxu1 }
 0x224   : > { %v3590_v5 = vpack.c.bf16 %v3080_v54, %v3079_v51  ;;  %v3082_v8 = vmax.f32 %v3066_v56, 0.0  ;;  %v2998_v10 = vpop.f32.mrb[6].mxu0  ;;  %v3047_v13 = vmul.f32 %v3647_v0, %v5316_v14  ;;  %v3635_v44 = vadd.f32 %v2996_v2, %v5296_v45  ;;  %v3020_v16 = vpop.f32.mrb[23].mxu1 }
 0x225   : > { %v3039_v12 = vmul.f32 %v3634_v63, %v5316_v14  ;;  %v3649_v15 = vadd.f32 %v5304_v1, %v3016_v3  ;;  %v3000_v62 = vpop.f32.mrb[7].mxu0  ;;  %3147 = vst [vmem:[%s5344_s23 + $0x20] sm:$0xff] %v3594_v6  ;;  %v3595_v20 = vpack.c.bf16 %v3090_v9, %v3089_v61  ;;  %v3636_v21 = vadd.f32 %v2998_v10, %v5298_v46 }
 0x226   : > { %3143 = vst [vmem:[%s5344_s23] sm:$0xff] %v3590_v5  ;;  %v3591_v18 = vpack.c.bf16 %v3082_v8, %v3081_v60  ;;  %v3651_v22 = vadd.f32 %v5306_v4, %v3018_v11  ;;  %v3075_v25 = vadd.f32 %v5320_v19, %v3047_v13  ;;  %v3040_v26 = vmul.f32 %v3635_v44, %v5318_v17 }
 0x227   : > { %v3067_v23 = vadd.f32 %v5320_v19, %v3039_v12  ;;  %v3048_v45 = vmul.f32 %v3649_v15, %v5318_v17  ;;  %3148 = vst [vmem:[%s5344_s23 + $0x28] sm:$0xff] %v3595_v20  ;;  %v3041_v1 = vmul.f32 %v3636_v21, %v5316_v14  ;;  %v3637_v28 = vadd.f32 %v3000_v62, %v5300_v47 }
 0x228   : > { %3144 = vst [vmem:[%s5344_s23 + $0x8] sm:$0xff] %v3591_v18  ;;  %v3049_v27 = vmul.f32 %v3651_v22, %v5316_v14  ;;  %v3653_v46 = vadd.f32 %v5308_v7, %v3020_v16  ;;  %v3091_v4 = vmax.f32 %v3075_v25, 0.0  ;;  %v3068_v30 = vadd.f32 %v5322_v24, %v3040_v26 }
 0x229   : > { %v3083_v29 = vmax.f32 %v3067_v23, 0.0  ;;  %v3076_v31 = vadd.f32 %v5322_v24, %v3048_v45  ;;  %v3069_v32 = vadd.f32 %v5320_v19, %v3041_v1  ;;  %v3042_v34 = vmul.f32 %v3637_v28, %v5318_v17 }
 0x22a   : > { %v3077_v33 = vadd.f32 %v5320_v19, %v3049_v27  ;;  %v3050_v14 = vmul.f32 %v3653_v46, %v5318_v17  ;;  %v3084_v47 = vmax.f32 %v3068_v30, 0.0 }
 0x22b   : > { %v3092_v7 = vmax.f32 %v3076_v31, 0.0  ;;  %v3085_v35 = vmax.f32 %v3069_v32, 0.0  ;;  %v3070_v37 = vadd.f32 %v5322_v24, %v3042_v34 }
 0x22c   : > { %v3093_v36 = vmax.f32 %v3077_v33, 0.0  ;;  %v3078_v38 = vadd.f32 %v5322_v24, %v3050_v14  ;;  %v3592_v39 = vpack.c.bf16 %v3084_v47, %v3083_v29 }
 0x22d   : > { %v3596_v40 = vpack.c.bf16 %v3092_v7, %v3091_v4  ;;  %v3086_v41 = vmax.f32 %v3070_v37, 0.0 }
 0x22e   : > { %v3094_v42 = vmax.f32 %v3078_v38, 0.0  ;;  %3145 = vst [vmem:[%s5344_s23 + $0x10] sm:$0xff] %v3592_v39 }
 0x22f   : > { %3149 = vst [vmem:[%s5344_s23 + $0x30] sm:$0xff] %v3596_v40  ;;  %v3593_v19 = vpack.c.bf16 %v3086_v41, %v3085_v35 }
 0x230   : > { %v3597_v48 = vpack.c.bf16 %v3094_v42, %v3093_v36 }
 0x231   : > { %3146 = vst [vmem:[%s5344_s23 + $0x18] sm:$0xff] %v3593_v19 }
 0x232   : > { %3150 = vst [vmem:[%s5344_s23 + $0x38] sm:$0xff] %v3597_v48 }
 0x233 PF: > { %s14_s15 = sadd.s32 1, %s4313_s15  }
 0x234   : > { %p11_p4 = scmp.ge.s32.totalorder %s14_s15, 4  }
 0x236   :  { %13 = sbr.rel (!%p11_p4) target bundleno = 1 (0x1), region = 66 }

// kernel: bevencode_forward.29
= control target key start
LH: loop header
LB: loop body
LE: loop exit
PB: predicated region body
PF: predicated region fallthrough
CT: control target
= control target key end

     0   :  { %s912_s15 = smov 0   ;;  %s1115_s0 = inlined_call_operand.vmem [shape: bf16[512,128], index: 0, kind: input, shape index: {}]   ;;  %s1116_s1 = inlined_call_operand.vmem [shape: bf16[128,4], index: 1, kind: input, shape index: {}]   ;;  %s1117_s2 = inlined_call_operand.vmem [shape: f32[1,4], index: 2, kind: input, shape index: {}]   ;;  %s1118_s3 = inlined_call_operand.vmem [shape: f32[1,4], index: 3, kind: input, shape index: {}]   ;;  %s1119_s4 = inlined_call_operand.vmem [shape: f32[512,4], index: 4, kind: output, shape index: {}]  }
   0x1 LB: > { %s722_s16 = sadd.s32 4294967295, %s885_s15   ;;  %p726_p0 = scmp.ge.s32.totalorder %s885_s15, 1  ;;  %s885_s15 = sphi %s912_s15, %s14_s15  }
   0x2   : > { %p163_p1 = scmp.lt.s32.totalorder %s885_s15, 3 }
   0x4   : > { %p164_p2 = pnand %p726_p0, %p163_p1 }
   0x5   : > { %v855_v0 = vld [vmem:[%s1116_s1] sm:$0xff] (!%p164_p2)   ;;  %s727_s19 = sshll.u32 (!%p164_p2), %s722_s16, 5  ;;  %v856_v1 = vld [vmem:[%s1116_s1 + $0x8] sm:$0xff] (!%p164_p2)   ;;  %v857_v2 = vld [vmem:[%s1116_s1 + $0x10] sm:$0xff] (!%p164_p2)   ;;  %vm633_vm0 = vcmask (!%p164_p2), 31744  }
   0x6   : > { %167 = sbr.rel (%p164_p2) target bundleno = 282 (0x11a), region = 36  ;;  %p190_p3 = scmp.lt.s32.totalorder (!%p164_p2), %s727_s19, 63  ;;  %783 = vmatprep.subr.bf16.mxu0 (!%p164_p2), %v855_v0  ;;  %831 = vmatprep.subr.bf16.mxu1 (!%p164_p2), %v855_v0  ;;  %v858_v3 = vld [vmem:[%s1116_s1 + $0x18] sm:$0xff] (!%p164_p2)   ;;  %v859_v6 = vld [vmem:[%s1116_s1 + $0x20] sm:$0xff] (!%p164_p2)   ;;  %v860_v7 = vld [vmem:[%s1116_s1 + $0x28] sm:$0xff] (!%p164_p2)  }
   0x7   : > { %784 = vmatpush3.bf16.msra.mxu0 (!%p164_p2), %v855_v0  ;;  %839 = vmatpush3.bf16.msra.mxu1 (!%p164_p2), %v855_v0  ;;  %v861_v8 = vld [vmem:[%s1116_s1 + $0x30] sm:$0xff] (!%p164_p2)   ;;  %v862_v9 = vld [vmem:[%s1116_s1 + $0x38] sm:$0xff] (!%p164_p2)   ;;  %v971_v24 = vld [vmem:[%s1117_s2] ss:$0 sm:$0xff] (!%p164_p2) }
   0x8   : > { %785 = vmatprep.subr.bf16.mxu0 (!%p164_p2), %v856_v1  ;;  %832 = vmatprep.subr.bf16.mxu1 (!%p164_p2), %v856_v1  ;;  %v977_v26 = vld [vmem:[%s1118_s3] ss:$0 sm:$0xff] (!%p164_p2) }
   0xb   : > { %786 = vmatpush3.bf16.msra.mxu0 (!%p164_p2), %v856_v1  ;;  %840 = vmatpush3.bf16.msra.mxu1 (!%p164_p2), %v856_v1 }
   0xc   : > { %787 = vmatprep.subr.bf16.mxu0 (!%p164_p2), %v857_v2  ;;  %833 = vmatprep.subr.bf16.mxu1 (!%p164_p2), %v857_v2 }
   0xd   : > { %s1121_s19 = smov (!%p190_p3, %s727_s19), 63 }
   0xe   : > { %s728_s24 = sshll.u32 %s1121_s19, 2  ;;  %s730_s14 = sshll.u32 %s1121_s19, 3 }
   0xf   : > { %s935_s27 = scalar_lea.vmem %s1115_s0, %s728_s24  ;;  %788 = vmatpush3.bf16.msra.mxu0 %v857_v2  ;;  %841 = vmatpush3.bf16.msra.mxu1 %v857_v2  ;;  %s984_s21 = scalar_lea.vmem %s1119_s4, %s730_s14 }
  0x10   : > { %v863_v4 = vld [vmem:[%s935_s27] sm:$0xff]   ;;  %789 = vmatprep.subr.bf16.mxu0 %v858_v3  ;;  %834 = vmatprep.subr.bf16.mxu1 %v858_v3  ;;  %v865_v10 = vld [vmem:[%s935_s27 + $0x8] sm:$0xff]   ;;  %v867_v12 = vld [vmem:[%s935_s27 + $0x10] sm:$0xff]  }
  0x11   : > { %v864_v5 = vld [vmem:[%s935_s27 + $0x40] sm:$0xff]   ;;  %799 = vmatprep.mubr.bf16.mxu0 %v863_v4  ;;  %v866_v11 = vld [vmem:[%s935_s27 + $0x48] sm:$0xff]   ;;  %v868_v13 = vld [vmem:[%s935_s27 + $0x50] sm:$0xff]  }
  0x12   : > { %815 = vmatprep.mubr.bf16.mxu1 %v864_v5  ;;  %v869_v14 = vld [vmem:[%s935_s27 + $0x18] sm:$0xff]   ;;  %v871_v16 = vld [vmem:[%s935_s27 + $0x20] sm:$0xff]   ;;  %v873_v18 = vld [vmem:[%s935_s27 + $0x28] sm:$0xff]  }
  0x13   : > { %790 = vmatpush3.bf16.msra.mxu0 %v858_v3  ;;  %842 = vmatpush3.bf16.msra.mxu1 %v858_v3  ;;  %v870_v15 = vld [vmem:[%s935_s27 + $0x58] sm:$0xff]   ;;  %v872_v17 = vld [vmem:[%s935_s27 + $0x60] sm:$0xff]   ;;  %v874_v19 = vld [vmem:[%s935_s27 + $0x68] sm:$0xff]  }
  0x14   : > { %791 = vmatprep.subr.bf16.mxu0 %v859_v6  ;;  %835 = vmatprep.subr.bf16.mxu1 %v859_v6  ;;  %v875_v20 = vld [vmem:[%s935_s27 + $0x30] sm:$0xff]   ;;  %v877_v22 = vld [vmem:[%s935_s27 + $0x38] sm:$0xff]  }
  0x15   : > { %v876_v21 = vld [vmem:[%s935_s27 + $0x70] sm:$0xff]   ;;  %v878_v23 = vld [vmem:[%s935_s27 + $0x78] sm:$0xff]  }
  0x17   : > { %792 = vmatpush3.bf16.msra.mxu0 %v859_v6  ;;  %843 = vmatpush3.bf16.msra.mxu1 %v859_v6 }
  0x18   : > { %793 = vmatprep.subr.bf16.mxu0 %v860_v7  ;;  %836 = vmatprep.subr.bf16.mxu1 %v860_v7 }
  0x1b   : > { %794 = vmatpush3.bf16.msra.mxu0 %v860_v7  ;;  %844 = vmatpush3.bf16.msra.mxu1 %v860_v7 }
  0x1c   : > { %795 = vmatprep.subr.bf16.mxu0 %v861_v8  ;;  %837 = vmatprep.subr.bf16.mxu1 %v861_v8 }
  0x1f   : > { %796 = vmatpush3.bf16.msra.mxu0 %v861_v8  ;;  %845 = vmatpush3.bf16.msra.mxu1 %v861_v8 }
  0x20   : > { %797 = vmatprep.subr.bf16.mxu0 %v862_v9  ;;  %838 = vmatprep.subr.bf16.mxu1 %v862_v9 }
  0x23   : > { %798 = vmatpush3.bf16.msra.mxu0 %v862_v9  ;;  %846 = vmatpush3.bf16.msra.mxu1 %v862_v9 }
  0x26   : > { %800 = vmatmul.mubr.bf16.vlgmr.msra.gmra.mrb[0].mxu0 %v865_v10  ;;  %816 = vmatmul.mubr.bf16.vlgmr.msra.gmra.mrb[0].mxu1 %v866_v11 }
  0x27   : > { %803 = vmatprep.mubr.bf16.mxu0 %v867_v12  ;;  %819 = vmatprep.mubr.bf16.mxu1 %v868_v13 }
  0x2e   : > { %804 = vmatmul.mubr.bf16.gmra.mrb[4].mxu0 %v869_v14  ;;  %820 = vmatmul.mubr.bf16.gmra.mrb[4].mxu1 %v870_v15 }
  0x2f   : > { %807 = vmatprep.mubr.bf16.mxu0 %v871_v16  ;;  %823 = vmatprep.mubr.bf16.mxu1 %v872_v17 }
  0x36   : > { %808 = vmatmul.mubr.bf16.gmra.mrb[8].mxu0 %v873_v18  ;;  %824 = vmatmul.mubr.bf16.gmra.mrb[8].mxu1 %v874_v19 }
  0x37   : > { %811 = vmatprep.mubr.bf16.mxu0 %v875_v20  ;;  %827 = vmatprep.mubr.bf16.mxu1 %v876_v21 }
  0x3e   : > { %812 = vmatmul.mubr.bf16.gmra.mrb[12].mxu0 %v877_v22  ;;  %828 = vmatmul.mubr.bf16.gmra.mrb[12].mxu1 %v878_v23 }
  0xf9   : > { %v801_v25 = vpop.f32.mrb[0].mxu0  ;;  %v817_v27 = vpop.f32.mrb[0].mxu1 }
  0xfa   : > { %v564_v28 = vmul.f32 %v801_v25, %v971_v24  ;;  %v580_v29 = vmul.f32 %v817_v27, %v971_v24  ;;  %v428_v30 = vpop.f32.mrb[1].mxu0  ;;  %v492_v31 = vpop.f32.mrb[1].mxu1 }
  0xfb   : > { %v562_v32 = vmul.f32 %v971_v24, %v428_v30  ;;  %v578_v33 = vmul.f32 %v971_v24, %v492_v31  ;;  %v802_v34 = vpop.f32.mrb[2].mxu0  ;;  %v818_v35 = vpop.f32.mrb[2].mxu1 }
  0xfc   : > { %v603_v36 = vadd.f32 %v977_v26, %v564_v28  ;;  %v619_v37 = vadd.f32 %v977_v26, %v580_v29  ;;  %v565_v38 = vmul.f32 %v802_v34, %v971_v24  ;;  %v581_v39 = vmul.f32 %v818_v35, %v971_v24  ;;  %v431_v40 = vpop.f32.mrb[3].mxu0  ;;  %v495_v41 = vpop.f32.mrb[3].mxu1 }
  0xfd   : > { %v601_v42 = vadd.f32 %v977_v26, %v562_v32  ;;  %v617_v43 = vadd.f32 %v977_v26, %v578_v33  ;;  %v563_v44 = vmul.f32 %v971_v24, %v431_v40  ;;  %v579_v45 = vmul.f32 %v971_v24, %v495_v41 }
  0xfe   : > { %636 = vst.msk [vmem:[%s984_s21 + $0x10] sm:$0xff] %vm633_vm0, %v603_v36  ;;  %652 = vst.msk [vmem:[%s984_s21 + $0x90] sm:$0xff] %vm633_vm0, %v619_v37  ;;  %v604_v46 = vadd.f32 %v977_v26, %v565_v38  ;;  %v620_v47 = vadd.f32 %v977_v26, %v581_v39 }
  0xff   : > { %634 = vst.msk [vmem:[%s984_s21] sm:$0xff] %vm633_vm0, %v601_v42  ;;  %650 = vst.msk [vmem:[%s984_s21 + $0x80] sm:$0xff] %vm633_vm0, %v617_v43  ;;  %v602_v48 = vadd.f32 %v977_v26, %v563_v44  ;;  %v618_v49 = vadd.f32 %v977_v26, %v579_v45 }
 0x100   : > { %637 = vst.msk [vmem:[%s984_s21 + $0x18] sm:$0xff] %vm633_vm0, %v604_v46  ;;  %653 = vst.msk [vmem:[%s984_s21 + $0x98] sm:$0xff] %vm633_vm0, %v620_v47 }
 0x101   : > { %635 = vst.msk [vmem:[%s984_s21 + $0x8] sm:$0xff] %vm633_vm0, %v602_v48  ;;  %651 = vst.msk [vmem:[%s984_s21 + $0x88] sm:$0xff] %vm633_vm0, %v618_v49  ;;  %v805_v50 = vpop.f32.mrb[4].mxu0  ;;  %v821_v51 = vpop.f32.mrb[4].mxu1 }
 0x102   : > { %v568_v52 = vmul.f32 %v805_v50, %v971_v24  ;;  %v584_v53 = vmul.f32 %v821_v51, %v971_v24  ;;  %v444_v54 = vpop.f32.mrb[5].mxu0  ;;  %v508_v55 = vpop.f32.mrb[5].mxu1 }
 0x103   : > { %v566_v56 = vmul.f32 %v971_v24, %v444_v54  ;;  %v582_v57 = vmul.f32 %v971_v24, %v508_v55  ;;  %v806_v58 = vpop.f32.mrb[6].mxu0  ;;  %v822_v59 = vpop.f32.mrb[6].mxu1 }
 0x104   : > { %v607_v60 = vadd.f32 %v977_v26, %v568_v52  ;;  %v623_v61 = vadd.f32 %v977_v26, %v584_v53  ;;  %v569_v62 = vmul.f32 %v806_v58, %v971_v24  ;;  %v585_v63 = vmul.f32 %v822_v59, %v971_v24  ;;  %v447_v0 = vpop.f32.mrb[7].mxu0  ;;  %v511_v1 = vpop.f32.mrb[7].mxu1 }
 0x105   : > { %v605_v2 = vadd.f32 %v977_v26, %v566_v56  ;;  %v621_v3 = vadd.f32 %v977_v26, %v582_v57  ;;  %v567_v4 = vmul.f32 %v971_v24, %v447_v0  ;;  %v583_v5 = vmul.f32 %v971_v24, %v511_v1 }
 0x106   : > { %640 = vst.msk [vmem:[%s984_s21 + $0x30] sm:$0xff] %vm633_vm0, %v607_v60  ;;  %656 = vst.msk [vmem:[%s984_s21 + $0xb0] sm:$0xff] %vm633_vm0, %v623_v61  ;;  %v608_v6 = vadd.f32 %v977_v26, %v569_v62  ;;  %v624_v7 = vadd.f32 %v977_v26, %v585_v63 }
 0x107   : > { %638 = vst.msk [vmem:[%s984_s21 + $0x20] sm:$0xff] %vm633_vm0, %v605_v2  ;;  %654 = vst.msk [vmem:[%s984_s21 + $0xa0] sm:$0xff] %vm633_vm0, %v621_v3  ;;  %v606_v8 = vadd.f32 %v977_v26, %v567_v4  ;;  %v622_v9 = vadd.f32 %v977_v26, %v583_v5 }
 0x108   : > { %641 = vst.msk [vmem:[%s984_s21 + $0x38] sm:$0xff] %vm633_vm0, %v608_v6  ;;  %657 = vst.msk [vmem:[%s984_s21 + $0xb8] sm:$0xff] %vm633_vm0, %v624_v7 }
 0x109   : > { %639 = vst.msk [vmem:[%s984_s21 + $0x28] sm:$0xff] %vm633_vm0, %v606_v8  ;;  %655 = vst.msk [vmem:[%s984_s21 + $0xa8] sm:$0xff] %vm633_vm0, %v622_v9  ;;  %v809_v10 = vpop.f32.mrb[8].mxu0  ;;  %v825_v11 = vpop.f32.mrb[8].mxu1 }
 0x10a   : > { %v572_v12 = vmul.f32 %v809_v10, %v971_v24  ;;  %v588_v13 = vmul.f32 %v825_v11, %v971_v24  ;;  %v460_v14 = vpop.f32.mrb[9].mxu0  ;;  %v524_v15 = vpop.f32.mrb[9].mxu1 }
 0x10b   : > { %v570_v16 = vmul.f32 %v971_v24, %v460_v14  ;;  %v586_v17 = vmul.f32 %v971_v24, %v524_v15  ;;  %v810_v18 = vpop.f32.mrb[10].mxu0  ;;  %v826_v19 = vpop.f32.mrb[10].mxu1 }
 0x10c   : > { %v611_v20 = vadd.f32 %v977_v26, %v572_v12  ;;  %v627_v21 = vadd.f32 %v977_v26, %v588_v13  ;;  %v573_v22 = vmul.f32 %v810_v18, %v971_v24  ;;  %v589_v23 = vmul.f32 %v826_v19, %v971_v24  ;;  %v463_v25 = vpop.f32.mrb[11].mxu0  ;;  %v527_v27 = vpop.f32.mrb[11].mxu1 }
 0x10d   : > { %v609_v28 = vadd.f32 %v977_v26, %v570_v16  ;;  %v625_v29 = vadd.f32 %v977_v26, %v586_v17  ;;  %v571_v30 = vmul.f32 %v971_v24, %v463_v25  ;;  %v587_v31 = vmul.f32 %v971_v24, %v527_v27 }
 0x10e   : > { %644 = vst.msk [vmem:[%s984_s21 + $0x50] sm:$0xff] %vm633_vm0, %v611_v20  ;;  %660 = vst.msk [vmem:[%s984_s21 + $0xd0] sm:$0xff] %vm633_vm0, %v627_v21  ;;  %v612_v32 = vadd.f32 %v977_v26, %v573_v22  ;;  %v628_v33 = vadd.f32 %v977_v26, %v589_v23 }
 0x10f   : > { %642 = vst.msk [vmem:[%s984_s21 + $0x40] sm:$0xff] %vm633_vm0, %v609_v28  ;;  %658 = vst.msk [vmem:[%s984_s21 + $0xc0] sm:$0xff] %vm633_vm0, %v625_v29  ;;  %v610_v34 = vadd.f32 %v977_v26, %v571_v30  ;;  %v626_v35 = vadd.f32 %v977_v26, %v587_v31 }
 0x110   : > { %645 = vst.msk [vmem:[%s984_s21 + $0x58] sm:$0xff] %vm633_vm0, %v612_v32  ;;  %661 = vst.msk [vmem:[%s984_s21 + $0xd8] sm:$0xff] %vm633_vm0, %v628_v33 }
 0x111   : > { %643 = vst.msk [vmem:[%s984_s21 + $0x48] sm:$0xff] %vm633_vm0, %v610_v34  ;;  %659 = vst.msk [vmem:[%s984_s21 + $0xc8] sm:$0xff] %vm633_vm0, %v626_v35  ;;  %v813_v36 = vpop.f32.mrb[12].mxu0  ;;  %v829_v37 = vpop.f32.mrb[12].mxu1 }
 0x112   : > { %v576_v38 = vmul.f32 %v813_v36, %v971_v24  ;;  %v592_v39 = vmul.f32 %v829_v37, %v971_v24  ;;  %v476_v40 = vpop.f32.mrb[13].mxu0  ;;  %v540_v41 = vpop.f32.mrb[13].mxu1 }
 0x113   : > { %v574_v42 = vmul.f32 %v971_v24, %v476_v40  ;;  %v590_v43 = vmul.f32 %v971_v24, %v540_v41  ;;  %v814_v44 = vpop.f32.mrb[14].mxu0  ;;  %v830_v45 = vpop.f32.mrb[14].mxu1 }
 0x114   : > { %v615_v46 = vadd.f32 %v977_v26, %v576_v38  ;;  %v631_v47 = vadd.f32 %v977_v26, %v592_v39  ;;  %v577_v48 = vmul.f32 %v814_v44, %v971_v24  ;;  %v593_v49 = vmul.f32 %v830_v45, %v971_v24  ;;  %v479_v50 = vpop.f32.mrb[15].mxu0  ;;  %v543_v51 = vpop.f32.mrb[15].mxu1 }
 0x115   : > { %v613_v52 = vadd.f32 %v977_v26, %v574_v42  ;;  %v629_v53 = vadd.f32 %v977_v26, %v590_v43  ;;  %v575_v54 = vmul.f32 %v971_v24, %v479_v50  ;;  %v591_v55 = vmul.f32 %v971_v24, %v543_v51 }
 0x116   : > { %648 = vst.msk [vmem:[%s984_s21 + $0x70] sm:$0xff] %vm633_vm0, %v615_v46  ;;  %664 = vst.msk [vmem:[%s984_s21 + $0xf0] sm:$0xff] %vm633_vm0, %v631_v47  ;;  %v616_v56 = vadd.f32 %v977_v26, %v577_v48  ;;  %v632_v57 = vadd.f32 %v977_v26, %v593_v49 }
 0x117   : > { %646 = vst.msk [vmem:[%s984_s21 + $0x60] sm:$0xff] %vm633_vm0, %v613_v52  ;;  %662 = vst.msk [vmem:[%s984_s21 + $0xe0] sm:$0xff] %vm633_vm0, %v629_v53  ;;  %v614_v58 = vadd.f32 %v977_v26, %v575_v54  ;;  %v630_v59 = vadd.f32 %v977_v26, %v591_v55 }
 0x118   : > { %649 = vst.msk [vmem:[%s984_s21 + $0x78] sm:$0xff] %vm633_vm0, %v616_v56  ;;  %665 = vst.msk [vmem:[%s984_s21 + $0xf8] sm:$0xff] %vm633_vm0, %v632_v57 }
 0x119   : > { %647 = vst.msk [vmem:[%s984_s21 + $0x68] sm:$0xff] %vm633_vm0, %v614_v58  ;;  %663 = vst.msk [vmem:[%s984_s21 + $0xe8] sm:$0xff] %vm633_vm0, %v630_v59 }
 0x11a PF: > { %s14_s15 = sadd.s32 1, %s885_s15  }
 0x11b   : > { %p11_p4 = scmp.ge.s32.totalorder %s14_s15, 4  }
 0x11d   :  { %13 = sbr.rel (!%p11_p4) target bundleno = 1 (0x1), region = 66 }

// kernel: bevencode_forward.28
= control target key start
LH: loop header
LB: loop body
LE: loop exit
PB: predicated region body
PF: predicated region fallthrough
CT: control target
= control target key end

     0   :  { %s7106_s15 = smov 0   ;;  %s8325_s0 = inlined_call_operand.vmem [shape: bf16[512,2304], index: 0, kind: input, shape index: {}]   ;;  %s8326_s1 = inlined_call_operand.vmem [shape: bf16[2304,128], index: 1, kind: input, shape index: {}]   ;;  %s8327_s2 = inlined_call_operand.vmem [shape: f32[1,128], index: 2, kind: input, shape index: {}]   ;;  %s8328_s3 = inlined_call_operand.vmem [shape: f32[1,128], index: 3, kind: input, shape index: {}]   ;;  %s8329_s4 = inlined_call_operand.vmem [shape: bf16[512,128], index: 4, kind: output, shape index: {}]  }
   0x1 LB: > { %s4860_s16 = sadd.s32 4294967295, %s7079_s15   ;;  %p4864_p0 = scmp.ge.s32.totalorder %s7079_s15, 1  ;;  %s7079_s15 = sphi %s7106_s15, %s14_s15  }
   0x2   : > { %p164_p1 = scmp.lt.s32.totalorder %s7079_s15, 3 }
   0x4   : > { %p165_p2 = pnand %p4864_p0, %p164_p1 }
   0x5   : > { %v6497_v0 = vld [vmem:[%s8326_s1 + $0x40] sm:$0xff] (!%p165_p2)   ;;  %s4865_s19 = sshll.u32 (!%p165_p2), %s4860_s16, 5  ;;  %v6499_v2 = vld [vmem:[%s8326_s1 + $0x48] sm:$0xff] (!%p165_p2)   ;;  %v6501_v4 = vld [vmem:[%s8326_s1 + $0x50] sm:$0xff] (!%p165_p2)  }
   0x6   : > { %168 = sbr.rel (%p165_p2) target bundleno = 836 (0x344), region = 36  ;;  %v6498_v1 = vld [vmem:[%s8326_s1] sm:$0xff] (!%p165_p2)   ;;  %5464 = vmatprep.subr.bf16.mxu0 (!%p165_p2), %v6497_v0  ;;  %6472 = vmatprep.subr.bf16.mxu1 (!%p165_p2), %v6497_v0  ;;  %p192_p3 = scmp.lt.s32.totalorder (!%p165_p2), %s4865_s19, 63  ;;  %v6500_v3 = vld [vmem:[%s8326_s1 + $0x8] sm:$0xff] (!%p165_p2)   ;;  %v6502_v5 = vld [vmem:[%s8326_s1 + $0x10] sm:$0xff] (!%p165_p2)  }
   0x7   : > { %5465 = vmatpush3.bf16.msra.mxu0 (!%p165_p2), %v6498_v1  ;;  %6480 = vmatpush3.bf16.msra.mxu1 (!%p165_p2), %v6498_v1  ;;  %v6503_v6 = vld [vmem:[%s8326_s1 + $0x58] sm:$0xff] (!%p165_p2)   ;;  %v6505_v8 = vld [vmem:[%s8326_s1 + $0x60] sm:$0xff] (!%p165_p2)   ;;  %v6507_v10 = vld [vmem:[%s8326_s1 + $0x68] sm:$0xff] (!%p165_p2)  }
   0x8   : > { %5466 = vmatprep.subr.bf16.mxu0 (!%p165_p2), %v6499_v2  ;;  %6473 = vmatprep.subr.bf16.mxu1 (!%p165_p2), %v6499_v2  ;;  %v6504_v7 = vld [vmem:[%s8326_s1 + $0x18] sm:$0xff] (!%p165_p2)   ;;  %v6506_v9 = vld [vmem:[%s8326_s1 + $0x20] sm:$0xff] (!%p165_p2)   ;;  %v6508_v13 = vld [vmem:[%s8326_s1 + $0x28] sm:$0xff] (!%p165_p2)  }
   0x9   : > { %v6509_v14 = vld [vmem:[%s8326_s1 + $0x70] sm:$0xff] (!%p165_p2)   ;;  %v6511_v16 = vld [vmem:[%s8326_s1 + $0x78] sm:$0xff] (!%p165_p2)   ;;  %v6519_v18 = vld [vmem:[%s8326_s1 + $0xc0] sm:$0xff] (!%p165_p2)  }
   0xa   : > { %v6510_v15 = vld [vmem:[%s8326_s1 + $0x30] sm:$0xff] (!%p165_p2)   ;;  %v6512_v17 = vld [vmem:[%s8326_s1 + $0x38] sm:$0xff] (!%p165_p2)   ;;  %v6521_v20 = vld [vmem:[%s8326_s1 + $0x140] sm:$0xff] (!%p165_p2)  }
   0xb   : > { %5467 = vmatpush3.bf16.msra.mxu0 (!%p165_p2), %v6500_v3  ;;  %6481 = vmatpush3.bf16.msra.mxu1 (!%p165_p2), %v6500_v3  ;;  %v6520_v22 = vld [vmem:[%s8326_s1 + $0x80] sm:$0xff] (!%p165_p2)   ;;  %v6529_v26 = vld [vmem:[%s8326_s1 + $0xc8] sm:$0xff] (!%p165_p2)   ;;  %v6539_v30 = vld [vmem:[%s8326_s1 + $0xd0] sm:$0xff] (!%p165_p2)  }
   0xc   : > { %5468 = vmatprep.subr.bf16.mxu0 (!%p165_p2), %v6501_v4  ;;  %6474 = vmatprep.subr.bf16.mxu1 (!%p165_p2), %v6501_v4  ;;  %v6522_v23 = vld [vmem:[%s8326_s1 + $0x100] sm:$0xff] (!%p165_p2)   ;;  %v6530_v27 = vld [vmem:[%s8326_s1 + $0x88] sm:$0xff] (!%p165_p2)   ;;  %v6541_v33 = vld [vmem:[%s8326_s1 + $0x150] sm:$0xff] (!%p165_p2)  }
   0xd   : > { %s8331_s19 = smov (!%p192_p3, %s4865_s19), 63  ;;  %v6531_v28 = vld [vmem:[%s8326_s1 + $0x148] sm:$0xff]   ;;  %v6540_v36 = vld [vmem:[%s8326_s1 + $0x90] sm:$0xff]   ;;  %v6549_v38 = vld [vmem:[%s8326_s1 + $0xd8] sm:$0xff]  }
   0xe   : > { %s6488_s6 = smul.u32 72, %s8331_s19  ;;  %v6532_v29 = vld [vmem:[%s8326_s1 + $0x108] sm:$0xff]   ;;  %v6542_v37 = vld [vmem:[%s8326_s1 + $0x110] sm:$0xff]   ;;  %v6551_v39 = vld [vmem:[%s8326_s1 + $0x158] sm:$0xff]   ;;  %s4868_s10 = sshll.u32 %s8331_s19, 2 }
   0xf   : > { %5469 = vmatpush3.bf16.msra.mxu0 %v6502_v5  ;;  %6482 = vmatpush3.bf16.msra.mxu1 %v6502_v5  ;;  %v6550_v42 = vld [vmem:[%s8326_s1 + $0x98] sm:$0xff]   ;;  %v6559_v46 = vld [vmem:[%s8326_s1 + $0xe0] sm:$0xff]   ;;  %v6569_v52 = vld [vmem:[%s8326_s1 + $0xe8] sm:$0xff]   ;;  %s8216_s14 = scalar_lea.vmem %s8329_s4, %s4868_s10 }
  0x10   : > { %5470 = vmatprep.subr.bf16.mxu0 %v6503_v6  ;;  %6475 = vmatprep.subr.bf16.mxu1 %v6503_v6  ;;  %s7147_s13 = scalar_lea.vmem %s8325_s0, %s6488_s6  ;;  %v6552_v43 = vld [vmem:[%s8326_s1 + $0x118] sm:$0xff]   ;;  %v6560_v47 = vld [vmem:[%s8326_s1 + $0xa0] sm:$0xff]   ;;  %v6570_v55 = vld [vmem:[%s8326_s1 + $0xa8] sm:$0xff]  }
  0x11   : > { %v6515_v11 = vld [vmem:[%s7147_s13 + $0x4] ss:$72 sps:$4 sm:$0xff]   ;;  %v6513_v19 = vld [vmem:[%s7147_s13] ss:$72 sps:$4 sm:$0xff]   ;;  %v6523_v24 = vld [vmem:[%s7147_s13 + $0x94] ss:$72 sps:$4 sm:$0xff]  }
  0x12   : > { %v6518_v12 = vld [vmem:[%s7147_s13 + $0x484] ss:$72 sps:$4 sm:$0xff]   ;;  %3117 = vmatprep.mubr.bf16.mxu0 %v6515_v11  ;;  %v6516_v21 = vld [vmem:[%s7147_s13 + $0x480] ss:$72 sps:$4 sm:$0xff]   ;;  %v6525_v25 = vld [vmem:[%s7147_s13 + $0x514] ss:$72 sps:$4 sm:$0xff]  }
  0x13   : > { %5471 = vmatpush3.bf16.msra.mxu0 %v6504_v7  ;;  %6483 = vmatpush3.bf16.msra.mxu1 %v6504_v7  ;;  %v6527_v31 = vld [vmem:[%s7147_s13 + $0x90] ss:$72 sps:$4 sm:$0xff]   ;;  %v6533_v34 = vld [vmem:[%s7147_s13 + $0x124] ss:$72 sps:$4 sm:$0xff]   ;;  %v6537_v40 = vld [vmem:[%s7147_s13 + $0x120] ss:$72 sps:$4 sm:$0xff]  }
  0x14   : > { %5472 = vmatprep.subr.bf16.mxu0 %v6505_v8  ;;  %6476 = vmatprep.subr.bf16.mxu1 %v6505_v8  ;;  %v6528_v32 = vld [vmem:[%s7147_s13 + $0x510] ss:$72 sps:$4 sm:$0xff]   ;;  %v6535_v35 = vld [vmem:[%s7147_s13 + $0x5a4] ss:$72 sps:$4 sm:$0xff]   ;;  %v6538_v41 = vld [vmem:[%s7147_s13 + $0x5a0] ss:$72 sps:$4 sm:$0xff]  }
  0x15   : > { %3181 = vmatprep.mubr.bf16.mxu1 %v6518_v12  ;;  %v6543_v44 = vld [vmem:[%s7147_s13 + $0x1b4] ss:$72 sps:$4 sm:$0xff]   ;;  %v6561_v48 = vld [vmem:[%s8326_s1 + $0x160] sm:$0xff]   ;;  %v6547_v50 = vld [vmem:[%s7147_s13 + $0x1b0] ss:$72 sps:$4 sm:$0xff]  }
  0x16   : > { %v6545_v45 = vld [vmem:[%s7147_s13 + $0x634] ss:$72 sps:$4 sm:$0xff]   ;;  %v6562_v49 = vld [vmem:[%s8326_s1 + $0x120] sm:$0xff]   ;;  %v6548_v51 = vld [vmem:[%s7147_s13 + $0x630] ss:$72 sps:$4 sm:$0xff]  }
  0x17   : > { %5473 = vmatpush3.bf16.msra.mxu0 %v6506_v9  ;;  %6484 = vmatpush3.bf16.msra.mxu1 %v6506_v9  ;;  %v6553_v53 = vld [vmem:[%s7147_s13 + $0x244] ss:$72 sps:$4 sm:$0xff]   ;;  %v6579_v58 = vld [vmem:[%s8326_s1 + $0xf0] sm:$0xff]   ;;  %v6557_v59 = vld [vmem:[%s7147_s13 + $0x240] ss:$72 sps:$4 sm:$0xff]  }
  0x18   : > { %5474 = vmatprep.subr.bf16.mxu0 %v6507_v10  ;;  %6477 = vmatprep.subr.bf16.mxu1 %v6507_v10  ;;  %v6555_v54 = vld [vmem:[%s7147_s13 + $0x6c4] ss:$72 sps:$4 sm:$0xff]   ;;  %v6558_v60 = vld [vmem:[%s7147_s13 + $0x6c0] ss:$72 sps:$4 sm:$0xff]   ;;  %v6580_v61 = vld [vmem:[%s8326_s1 + $0xb0] sm:$0xff]  }
  0x19   : > { %v6571_v56 = vld [vmem:[%s8326_s1 + $0x168] sm:$0xff]   ;;  %v6563_v62 = vld [vmem:[%s7147_s13 + $0x2d4] ss:$72 sps:$4 sm:$0xff]   ;;  %v6567_v6 = vld [vmem:[%s7147_s13 + $0x2d0] ss:$72 sps:$4 sm:$0xff]  }
  0x1a   : > { %v6572_v57 = vld [vmem:[%s8326_s1 + $0x128] sm:$0xff]   ;;  %v6581_v63 = vld [vmem:[%s8326_s1 + $0x170] sm:$0xff]   ;;  %v6589_v2 = vld [vmem:[%s8326_s1 + $0xf8] sm:$0xff]  }
  0x1b   : > { %5475 = vmatpush3.bf16.msra.mxu0 %v6508_v13  ;;  %6485 = vmatpush3.bf16.msra.mxu1 %v6508_v13  ;;  %v6582_v0 = vld [vmem:[%s8326_s1 + $0x130] sm:$0xff]   ;;  %v6590_v3 = vld [vmem:[%s8326_s1 + $0xb8] sm:$0xff]   ;;  %v6573_v8 = vld [vmem:[%s7147_s13 + $0x364] ss:$72 sps:$4 sm:$0xff]  }
  0x1c   : > { %5476 = vmatprep.subr.bf16.mxu0 %v6509_v14  ;;  %6478 = vmatprep.subr.bf16.mxu1 %v6509_v14  ;;  %v6565_v1 = vld [vmem:[%s7147_s13 + $0x754] ss:$72 sps:$4 sm:$0xff]   ;;  %v6568_v7 = vld [vmem:[%s7147_s13 + $0x750] ss:$72 sps:$4 sm:$0xff]   ;;  %v6575_v9 = vld [vmem:[%s7147_s13 + $0x7e4] ss:$72 sps:$4 sm:$0xff]  }
  0x1d   : > { %v6591_v4 = vld [vmem:[%s8326_s1 + $0x178] sm:$0xff]   ;;  %v6599_v10 = vld [vmem:[%s8326_s1 + $0x1c0] sm:$0xff]  }
  0x1e   : > { %v6592_v5 = vld [vmem:[%s8326_s1 + $0x138] sm:$0xff]   ;;  %v6601_v11 = vld [vmem:[%s8326_s1 + $0x240] sm:$0xff]  }
  0x1f   : > { %5477 = vmatpush3.bf16.msra.mxu0 %v6510_v15  ;;  %6486 = vmatpush3.bf16.msra.mxu1 %v6510_v15  ;;  %v6577_v12 = vld [vmem:[%s7147_s13 + $0x360] ss:$72 sps:$4 sm:$0xff]   ;;  %v6583_v14 = vld [vmem:[%s7147_s13 + $0x3f4] ss:$72 sps:$4 sm:$0xff]  }
  0x20   : > { %5478 = vmatprep.subr.bf16.mxu0 %v6511_v16  ;;  %6479 = vmatprep.subr.bf16.mxu1 %v6511_v16  ;;  %v6578_v13 = vld [vmem:[%s7147_s13 + $0x7e0] ss:$72 sps:$4 sm:$0xff]   ;;  %v6585_v15 = vld [vmem:[%s7147_s13 + $0x874] ss:$72 sps:$4 sm:$0xff]   ;;  %v6587_v16 = vld [vmem:[%s7147_s13 + $0x3f0] ss:$72 sps:$4 sm:$0xff]  }
  0x23   : > { %5479 = vmatpush3.bf16.msra.mxu0 %v6512_v17  ;;  %6487 = vmatpush3.bf16.msra.mxu1 %v6512_v17  ;;  %v6588_v17 = vld [vmem:[%s7147_s13 + $0x870] ss:$72 sps:$4 sm:$0xff]  }
  0x24   : > { %5576 = vmatprep.subr.bf16.mxu1 %v6519_v18  ;;  %5688 = vmatprep.subr.bf16.mxu0 %v6521_v20  ;;  %v6595_v18 = vld [vmem:[%s7147_s13 + $0xc] ss:$72 sps:$4 sm:$0xff]   ;;  %v6593_v20 = vld [vmem:[%s7147_s13 + $0x8] ss:$72 sps:$4 sm:$0xff]  }
  0x26   : > { %3118 = vmatmul.mubr.bf16.vlgmr.msra.gmra.mrb[0].mxu0 %v6513_v19  ;;  %3182 = vmatmul.mubr.bf16.vlgmr.msra.gmra.mrb[0].mxu1 %v6516_v21  ;;  %v6598_v19 = vld [vmem:[%s7147_s13 + $0x14] ss:$72 sps:$4 sm:$0xff]   ;;  %v6596_v21 = vld [vmem:[%s7147_s13 + $0x10] ss:$72 sps:$4 sm:$0xff]  }
  0x27   : > { %5577 = vmatpush3.bf16.msra.mxu1 %v6520_v22  ;;  %5689 = vmatpush3.bf16.msra.mxu0 %v6522_v23  ;;  %v6600_v22 = vld [vmem:[%s8326_s1 + $0x180] sm:$0xff]  }
  0x28   : > { %3125 = vmatprep.mubr.bf16.mxu0 %v6523_v24  ;;  %3189 = vmatprep.mubr.bf16.mxu1 %v6525_v25  ;;  %v6602_v23 = vld [vmem:[%s8326_s1 + $0x200] sm:$0xff]  }
  0x29   : > { %5578 = vmatprep.subr.bf16.mxu1 %v6529_v26  ;;  %5690 = vmatprep.subr.bf16.mxu0 %v6531_v28  ;;  %v6603_v24 = vld [vmem:[%s7147_s13 + $0x9c] ss:$72 sps:$4 sm:$0xff]   ;;  %v6615_v26 = vld [vmem:[%s8326_s1 + $0x1c8] sm:$0xff]  }
  0x2a   : > { %v6605_v25 = vld [vmem:[%s7147_s13 + $0xa4] ss:$72 sps:$4 sm:$0xff]  }
  0x2b   : > { %5579 = vmatpush3.bf16.msra.mxu1 %v6530_v27  ;;  %5691 = vmatpush3.bf16.msra.mxu0 %v6532_v29  ;;  %v6617_v27 = vld [vmem:[%s8326_s1 + $0x248] sm:$0xff]  }
  0x2c   : > { %5580 = vmatprep.subr.bf16.mxu1 %v6539_v30  ;;  %5692 = vmatprep.subr.bf16.mxu0 %v6541_v33  ;;  %v6616_v28 = vld [vmem:[%s8326_s1 + $0x188] sm:$0xff]   ;;  %v6631_v30 = vld [vmem:[%s8326_s1 + $0x1d0] sm:$0xff]  }
  0x2d   : > { %v6618_v29 = vld [vmem:[%s8326_s1 + $0x208] sm:$0xff]   ;;  %v6633_v33 = vld [vmem:[%s8326_s1 + $0x250] sm:$0xff]  }
  0x2e   : > { %3126 = vmatmul.mubr.bf16.gmra.mrb[4].mxu0 %v6527_v31  ;;  %3190 = vmatmul.mubr.bf16.gmra.mrb[4].mxu1 %v6528_v32  ;;  %v6607_v31 = vld [vmem:[%s7147_s13 + $0x98] ss:$72 sps:$4 sm:$0xff]  }
  0x2f   : > { %3133 = vmatprep.mubr.bf16.mxu0 %v6533_v34  ;;  %3197 = vmatprep.mubr.bf16.mxu1 %v6535_v35  ;;  %v6608_v32 = vld [vmem:[%s7147_s13 + $0xa0] ss:$72 sps:$4 sm:$0xff]   ;;  %v6609_v34 = vld [vmem:[%s7147_s13 + $0x12c] ss:$72 sps:$4 sm:$0xff]  }
  0x30   : > { %5581 = vmatpush3.bf16.msra.mxu1 %v6540_v36  ;;  %5693 = vmatpush3.bf16.msra.mxu0 %v6542_v37  ;;  %v6611_v35 = vld [vmem:[%s7147_s13 + $0x134] ss:$72 sps:$4 sm:$0xff]  }
  0x31   : > { %5582 = vmatprep.subr.bf16.mxu1 %v6549_v38  ;;  %5694 = vmatprep.subr.bf16.mxu0 %v6551_v39  ;;  %v6632_v36 = vld [vmem:[%s8326_s1 + $0x190] sm:$0xff]   ;;  %v6647_v38 = vld [vmem:[%s8326_s1 + $0x1d8] sm:$0xff]  }
  0x32   : > { %v6634_v37 = vld [vmem:[%s8326_s1 + $0x210] sm:$0xff]   ;;  %v6649_v39 = vld [vmem:[%s8326_s1 + $0x258] sm:$0xff]  }
  0x34   : > { %5583 = vmatpush3.bf16.msra.mxu1 %v6550_v42  ;;  %5695 = vmatpush3.bf16.msra.mxu0 %v6552_v43  ;;  %v6648_v42 = vld [vmem:[%s8326_s1 + $0x198] sm:$0xff]  }
  0x35   : > { %5584 = vmatprep.subr.bf16.mxu1 %v6559_v46  ;;  %5696 = vmatprep.subr.bf16.mxu0 %v6561_v48  ;;  %v6650_v43 = vld [vmem:[%s8326_s1 + $0x218] sm:$0xff]   ;;  %v6663_v46 = vld [vmem:[%s8326_s1 + $0x1e0] sm:$0xff]  }
  0x36   : > { %3134 = vmatmul.mubr.bf16.gmra.mrb[8].mxu0 %v6537_v40  ;;  %3198 = vmatmul.mubr.bf16.gmra.mrb[8].mxu1 %v6538_v41  ;;  %v6613_v40 = vld [vmem:[%s7147_s13 + $0x128] ss:$72 sps:$4 sm:$0xff]   ;;  %v6665_v48 = vld [vmem:[%s8326_s1 + $0x260] sm:$0xff]  }
  0x37   : > { %3141 = vmatprep.mubr.bf16.mxu0 %v6543_v44  ;;  %3205 = vmatprep.mubr.bf16.mxu1 %v6545_v45  ;;  %v6614_v41 = vld [vmem:[%s7147_s13 + $0x130] ss:$72 sps:$4 sm:$0xff]   ;;  %v6619_v44 = vld [vmem:[%s7147_s13 + $0x1bc] ss:$72 sps:$4 sm:$0xff]  }
  0x38   : > { %5585 = vmatpush3.bf16.msra.mxu1 %v6560_v47  ;;  %5697 = vmatpush3.bf16.msra.mxu0 %v6562_v49  ;;  %v6621_v45 = vld [vmem:[%s7147_s13 + $0x1c4] ss:$72 sps:$4 sm:$0xff]  }
  0x39   : > { %5586 = vmatprep.subr.bf16.mxu1 %v6569_v52  ;;  %5698 = vmatprep.subr.bf16.mxu0 %v6571_v56  ;;  %v6664_v47 = vld [vmem:[%s8326_s1 + $0x1a0] sm:$0xff]   ;;  %v6625_v52 = vld [vmem:[%s7147_s13 + $0x24c] ss:$72 sps:$4 sm:$0xff]  }
  0x3a   : > { %v6666_v49 = vld [vmem:[%s8326_s1 + $0x220] sm:$0xff]   ;;  %v6681_v56 = vld [vmem:[%s8326_s1 + $0x268] sm:$0xff]  }
  0x3c   : > { %5587 = vmatpush3.bf16.msra.mxu1 %v6570_v55  ;;  %5699 = vmatpush3.bf16.msra.mxu0 %v6572_v57  ;;  %v6680_v55 = vld [vmem:[%s8326_s1 + $0x1a8] sm:$0xff]  }
  0x3d   : > { %5588 = vmatprep.subr.bf16.mxu1 %v6579_v58  ;;  %5700 = vmatprep.subr.bf16.mxu0 %v6581_v63  ;;  %v6682_v57 = vld [vmem:[%s8326_s1 + $0x228] sm:$0xff]   ;;  %v6696_v63 = vld [vmem:[%s8326_s1 + $0x1b0] sm:$0xff]  }
  0x3e   : > { %3142 = vmatmul.mubr.bf16.gmra.mrb[12].mxu0 %v6547_v50  ;;  %3206 = vmatmul.mubr.bf16.gmra.mrb[12].mxu1 %v6548_v51  ;;  %v6623_v50 = vld [vmem:[%s7147_s13 + $0x1b8] ss:$72 sps:$4 sm:$0xff]   ;;  %v6629_v58 = vld [vmem:[%s7147_s13 + $0x248] ss:$72 sps:$4 sm:$0xff]  }
  0x3f   : > { %3149 = vmatprep.mubr.bf16.mxu0 %v6553_v53  ;;  %3213 = vmatprep.mubr.bf16.mxu1 %v6555_v54  ;;  %v6624_v51 = vld [vmem:[%s7147_s13 + $0x1c0] ss:$72 sps:$4 sm:$0xff]   ;;  %v6627_v53 = vld [vmem:[%s7147_s13 + $0x254] ss:$72 sps:$4 sm:$0xff]  }
  0x40   : > { %5589 = vmatpush3.bf16.msra.mxu1 %v6580_v61  ;;  %5701 = vmatpush3.bf16.msra.mxu0 %v6582_v0  ;;  %v6679_v54 = vld [vmem:[%s8326_s1 + $0x1e8] sm:$0xff]   ;;  %v6697_v0 = vld [vmem:[%s8326_s1 + $0x270] sm:$0xff]  }
  0x41   : > { %5590 = vmatprep.subr.bf16.mxu1 %v6589_v2  ;;  %5702 = vmatprep.subr.bf16.mxu0 %v6591_v4  ;;  %v6637_v61 = vld [vmem:[%s7147_s13 + $0x2e4] ss:$72 sps:$4 sm:$0xff]   ;;  %v6639_v2 = vld [vmem:[%s7147_s13 + $0x2d8] ss:$72 sps:$4 sm:$0xff]  }
  0x42   : > { %v6641_v4 = vld [vmem:[%s7147_s13 + $0x36c] ss:$72 sps:$4 sm:$0xff]  }
  0x44   : > { %5591 = vmatpush3.bf16.msra.mxu1 %v6590_v3  ;;  %5703 = vmatpush3.bf16.msra.mxu0 %v6592_v5  ;;  %v6640_v3 = vld [vmem:[%s7147_s13 + $0x2e0] ss:$72 sps:$4 sm:$0xff]   ;;  %v6643_v5 = vld [vmem:[%s7147_s13 + $0x374] ss:$72 sps:$4 sm:$0xff]  }
  0x45   : > { %5800 = vmatprep.subr.bf16.mxu1 %v6599_v10  ;;  %5912 = vmatprep.subr.bf16.mxu0 %v6601_v11  ;;  %v6714_v10 = vld [vmem:[%s8326_s1 + $0x238] sm:$0xff]  }
  0x46   : > { %3150 = vmatmul.mubr.bf16.gmra.mrb[16].mxu0 %v6557_v59  ;;  %3214 = vmatmul.mubr.bf16.gmra.mrb[16].mxu1 %v6558_v60  ;;  %v6630_v59 = vld [vmem:[%s7147_s13 + $0x250] ss:$72 sps:$4 sm:$0xff]   ;;  %v6635_v60 = vld [vmem:[%s7147_s13 + $0x2dc] ss:$72 sps:$4 sm:$0xff]  }
  0x47   : > { %3157 = vmatprep.mubr.bf16.mxu0 %v6563_v62  ;;  %3221 = vmatprep.mubr.bf16.mxu1 %v6565_v1  ;;  %v6695_v62 = vld [vmem:[%s8326_s1 + $0x1f0] sm:$0xff]  }
  0x48   : > { %v6698_v1 = vld [vmem:[%s8326_s1 + $0x230] sm:$0xff]  }
  0x49   : > { %v6646_v11 = vld [vmem:[%s7147_s13 + $0x370] ss:$72 sps:$4 sm:$0xff]  }
  0x4e   : > { %3158 = vmatmul.mubr.bf16.gmra.mrb[20].mxu0 %v6567_v6  ;;  %3222 = vmatmul.mubr.bf16.gmra.mrb[20].mxu1 %v6568_v7  ;;  %v6711_v6 = vld [vmem:[%s8326_s1 + $0x1f8] sm:$0xff]  }
  0x4f   : > { %3165 = vmatprep.mubr.bf16.mxu0 %v6573_v8  ;;  %3229 = vmatprep.mubr.bf16.mxu1 %v6575_v9  ;;  %v6712_v7 = vld [vmem:[%s8326_s1 + $0x1b8] sm:$0xff]   ;;  %v6645_v8 = vld [vmem:[%s7147_s13 + $0x368] ss:$72 sps:$4 sm:$0xff]  }
  0x50   : > { %v6713_v9 = vld [vmem:[%s8326_s1 + $0x278] sm:$0xff]  }
  0x56   : > { %3166 = vmatmul.mubr.bf16.gmra.mrb[24].mxu0 %v6577_v12  ;;  %3230 = vmatmul.mubr.bf16.gmra.mrb[24].mxu1 %v6578_v13  ;;  %v6651_v12 = vld [vmem:[%s7147_s13 + $0x3fc] ss:$72 sps:$4 sm:$0xff]  }
  0x57   : > { %3173 = vmatprep.mubr.bf16.mxu0 %v6583_v14  ;;  %3237 = vmatprep.mubr.bf16.mxu1 %v6585_v15  ;;  %v6653_v13 = vld [vmem:[%s7147_s13 + $0x404] ss:$72 sps:$4 sm:$0xff]   ;;  %v6655_v15 = vld [vmem:[%s7147_s13 + $0x3f8] ss:$72 sps:$4 sm:$0xff]  }
  0x58   : > { %v6727_v14 = vld [vmem:[%s8326_s1 + $0x2c0] sm:$0xff]  }
  0x5e   : > { %3174 = vmatmul.mubr.bf16.gmra.mrb[28].mxu0 %v6587_v16  ;;  %3238 = vmatmul.mubr.bf16.gmra.mrb[28].mxu1 %v6588_v17  ;;  %v6656_v16 = vld [vmem:[%s7147_s13 + $0x400] ss:$72 sps:$4 sm:$0xff]  }
  0x5f   : > { %3278 = vmatprep.mubr.bf16.mxu1 %v6595_v18  ;;  %3439 = vmatprep.mubr.bf16.mxu0 %v6598_v19  ;;  %v6729_v17 = vld [vmem:[%s8326_s1 + $0x340] sm:$0xff]   ;;  %v6657_v18 = vld [vmem:[%s7147_s13 + $0x48c] ss:$72 sps:$4 sm:$0xff]  }
  0x60   : > { %v6659_v19 = vld [vmem:[%s7147_s13 + $0x494] ss:$72 sps:$4 sm:$0xff]  }
  0x66   : > { %3279 = vmatmul.mubr.bf16.vlgmr.msra.gmra.mrb[32].mxu1 %v6593_v20  ;;  %3440 = vmatmul.mubr.bf16.vlgmr.msra.gmra.mrb[32].mxu0 %v6596_v21  ;;  %v6661_v20 = vld [vmem:[%s7147_s13 + $0x488] ss:$72 sps:$4 sm:$0xff]  }
  0x67   : > { %5801 = vmatpush3.bf16.msra.mxu1 %v6600_v22  ;;  %5913 = vmatpush3.bf16.msra.mxu0 %v6602_v23  ;;  %v6662_v21 = vld [vmem:[%s7147_s13 + $0x490] ss:$72 sps:$4 sm:$0xff]   ;;  %v6667_v22 = vld [vmem:[%s7147_s13 + $0x51c] ss:$72 sps:$4 sm:$0xff]  }
  0x68   : > { %3286 = vmatprep.mubr.bf16.mxu1 %v6603_v24  ;;  %3447 = vmatprep.mubr.bf16.mxu0 %v6605_v25  ;;  %v6669_v23 = vld [vmem:[%s7147_s13 + $0x524] ss:$72 sps:$4 sm:$0xff]   ;;  %v6671_v24 = vld [vmem:[%s7147_s13 + $0x518] ss:$72 sps:$4 sm:$0xff]  }
  0x69   : > { %5802 = vmatprep.subr.bf16.mxu1 %v6615_v26  ;;  %5914 = vmatprep.subr.bf16.mxu0 %v6617_v27  ;;  %v6672_v25 = vld [vmem:[%s7147_s13 + $0x520] ss:$72 sps:$4 sm:$0xff]   ;;  %v6673_v26 = vld [vmem:[%s7147_s13 + $0x5ac] ss:$72 sps:$4 sm:$0xff]  }
  0x6a   : > { %v6675_v27 = vld [vmem:[%s7147_s13 + $0x5b4] ss:$72 sps:$4 sm:$0xff]  }
  0x6b   : > { %5803 = vmatpush3.bf16.msra.mxu1 %v6616_v28  ;;  %5915 = vmatpush3.bf16.msra.mxu0 %v6618_v29  ;;  %v6677_v28 = vld [vmem:[%s7147_s13 + $0x5a8] ss:$72 sps:$4 sm:$0xff]  }
  0x6c   : > { %5804 = vmatprep.subr.bf16.mxu1 %v6631_v30  ;;  %5916 = vmatprep.subr.bf16.mxu0 %v6633_v33  ;;  %v6678_v29 = vld [vmem:[%s7147_s13 + $0x5b0] ss:$72 sps:$4 sm:$0xff]   ;;  %v6683_v30 = vld [vmem:[%s7147_s13 + $0x63c] ss:$72 sps:$4 sm:$0xff]   ;;  %v6688_v33 = vld [vmem:[%s7147_s13 + $0x640] ss:$72 sps:$4 sm:$0xff]  }
  0x6e   : > { %3287 = vmatmul.mubr.bf16.gmra.mrb[36].mxu1 %v6607_v31  ;;  %3448 = vmatmul.mubr.bf16.gmra.mrb[36].mxu0 %v6608_v32  ;;  %v6685_v31 = vld [vmem:[%s7147_s13 + $0x644] ss:$72 sps:$4 sm:$0xff]   ;;  %v6687_v32 = vld [vmem:[%s7147_s13 + $0x638] ss:$72 sps:$4 sm:$0xff]  }
  0x6f   : > { %3294 = vmatprep.mubr.bf16.mxu1 %v6609_v34  ;;  %3455 = vmatprep.mubr.bf16.mxu0 %v6611_v35  ;;  %v6689_v34 = vld [vmem:[%s7147_s13 + $0x6cc] ss:$72 sps:$4 sm:$0xff]  }
  0x70   : > { %5805 = vmatpush3.bf16.msra.mxu1 %v6632_v36  ;;  %5917 = vmatpush3.bf16.msra.mxu0 %v6634_v37  ;;  %v6691_v35 = vld [vmem:[%s7147_s13 + $0x6d4] ss:$72 sps:$4 sm:$0xff]   ;;  %v6693_v36 = vld [vmem:[%s7147_s13 + $0x6c8] ss:$72 sps:$4 sm:$0xff]  }
  0x71   : > { %5806 = vmatprep.subr.bf16.mxu1 %v6647_v38  ;;  %5918 = vmatprep.subr.bf16.mxu0 %v6649_v39  ;;  %v6694_v37 = vld [vmem:[%s7147_s13 + $0x6d0] ss:$72 sps:$4 sm:$0xff]   ;;  %v6699_v38 = vld [vmem:[%s7147_s13 + $0x75c] ss:$72 sps:$4 sm:$0xff]  }
  0x72   : > { %v6701_v39 = vld [vmem:[%s7147_s13 + $0x764] ss:$72 sps:$4 sm:$0xff]  }
  0x74   : > { %5807 = vmatpush3.bf16.msra.mxu1 %v6648_v42  ;;  %5919 = vmatpush3.bf16.msra.mxu0 %v6650_v43  ;;  %v6705_v42 = vld [vmem:[%s7147_s13 + $0x7ec] ss:$72 sps:$4 sm:$0xff]  }
  0x75   : > { %5808 = vmatprep.subr.bf16.mxu1 %v6663_v46  ;;  %5920 = vmatprep.subr.bf16.mxu0 %v6665_v48  ;;  %v6707_v43 = vld [vmem:[%s7147_s13 + $0x7f4] ss:$72 sps:$4 sm:$0xff]   ;;  %v6719_v48 = vld [vmem:[%s7147_s13 + $0x878] ss:$72 sps:$4 sm:$0xff]  }
  0x76   : > { %3295 = vmatmul.mubr.bf16.gmra.mrb[40].mxu1 %v6613_v40  ;;  %3456 = vmatmul.mubr.bf16.gmra.mrb[40].mxu0 %v6614_v41  ;;  %v6703_v40 = vld [vmem:[%s7147_s13 + $0x758] ss:$72 sps:$4 sm:$0xff]   ;;  %v6715_v46 = vld [vmem:[%s7147_s13 + $0x87c] ss:$72 sps:$4 sm:$0xff]  }
  0x77   : > { %3302 = vmatprep.mubr.bf16.mxu1 %v6619_v44  ;;  %3463 = vmatprep.mubr.bf16.mxu0 %v6621_v45  ;;  %v6704_v41 = vld [vmem:[%s7147_s13 + $0x760] ss:$72 sps:$4 sm:$0xff]   ;;  %v6710_v45 = vld [vmem:[%s7147_s13 + $0x7f0] ss:$72 sps:$4 sm:$0xff]  }
  0x78   : > { %5809 = vmatpush3.bf16.msra.mxu1 %v6664_v47  ;;  %5921 = vmatpush3.bf16.msra.mxu0 %v6666_v49  ;;  %v6709_v44 = vld [vmem:[%s7147_s13 + $0x7e8] ss:$72 sps:$4 sm:$0xff]   ;;  %v6717_v47 = vld [vmem:[%s7147_s13 + $0x884] ss:$72 sps:$4 sm:$0xff]  }
  0x79   : > { %5810 = vmatprep.subr.bf16.mxu1 %v6679_v54  ;;  %5922 = vmatprep.subr.bf16.mxu0 %v6681_v56  ;;  %v6720_v49 = vld [vmem:[%s7147_s13 + $0x880] ss:$72 sps:$4 sm:$0xff]   ;;  %v6731_v56 = vld [vmem:[%s7147_s13 + $0xac] ss:$72 sps:$4 sm:$0xff]  }
  0x7a   : > { %v6728_v54 = vld [vmem:[%s8326_s1 + $0x280] sm:$0xff]  }
  0x7c   : > { %5811 = vmatpush3.bf16.msra.mxu1 %v6680_v55  ;;  %5923 = vmatpush3.bf16.msra.mxu0 %v6682_v57  ;;  %v6730_v55 = vld [vmem:[%s8326_s1 + $0x300] sm:$0xff]   ;;  %v6733_v57 = vld [vmem:[%s7147_s13 + $0xb4] ss:$72 sps:$4 sm:$0xff]  }
  0x7d   : > { %5812 = vmatprep.subr.bf16.mxu1 %v6695_v62  ;;  %5924 = vmatprep.subr.bf16.mxu0 %v6697_v0  ;;  %v6759_v62 = vld [vmem:[%s8326_s1 + $0x2d0] sm:$0xff]  }
  0x7e   : > { %3303 = vmatmul.mubr.bf16.gmra.mrb[44].mxu1 %v6623_v50  ;;  %3464 = vmatmul.mubr.bf16.gmra.mrb[44].mxu0 %v6624_v51  ;;  %v6723_v50 = vld [vmem:[%s7147_s13 + $0x1c] ss:$72 sps:$4 sm:$0xff]   ;;  %v6735_v0 = vld [vmem:[%s7147_s13 + $0xa8] ss:$72 sps:$4 sm:$0xff]  }
  0x7f   : > { %3310 = vmatprep.mubr.bf16.mxu1 %v6625_v52  ;;  %3471 = vmatprep.mubr.bf16.mxu0 %v6627_v53  ;;  %v6726_v51 = vld [vmem:[%s7147_s13 + $0x24] ss:$72 sps:$4 sm:$0xff]   ;;  %v6721_v52 = vld [vmem:[%s7147_s13 + $0x18] ss:$72 sps:$4 sm:$0xff]  }
  0x80   : > { %5813 = vmatpush3.bf16.msra.mxu1 %v6696_v63  ;;  %5925 = vmatpush3.bf16.msra.mxu0 %v6698_v1  ;;  %v6724_v53 = vld [vmem:[%s7147_s13 + $0x20] ss:$72 sps:$4 sm:$0xff]   ;;  %v6761_v63 = vld [vmem:[%s8326_s1 + $0x350] sm:$0xff]  }
  0x81   : > { %5814 = vmatprep.subr.bf16.mxu1 %v6711_v6  ;;  %5926 = vmatprep.subr.bf16.mxu0 %v6713_v9  ;;  %v6736_v1 = vld [vmem:[%s7147_s13 + $0xb0] ss:$72 sps:$4 sm:$0xff]  }
  0x82   : > { %v6775_v6 = vld [vmem:[%s8326_s1 + $0x2d8] sm:$0xff]  }
  0x83   : > { %v6778_v9 = vld [vmem:[%s8326_s1 + $0x318] sm:$0xff]  }
  0x84   : > { %5815 = vmatpush3.bf16.msra.mxu1 %v6712_v7  ;;  %5927 = vmatpush3.bf16.msra.mxu0 %v6714_v10  ;;  %v6777_v7 = vld [vmem:[%s8326_s1 + $0x358] sm:$0xff]   ;;  %v6791_v10 = vld [vmem:[%s8326_s1 + $0x2e0] sm:$0xff]  }
  0x85   : > { %6024 = vmatprep.subr.bf16.mxu1 %v6727_v14  ;;  %6136 = vmatprep.subr.bf16.mxu0 %v6729_v17  ;;  %v6747_v14 = vld [vmem:[%s7147_s13 + $0x1cc] ss:$72 sps:$4 sm:$0xff]   ;;  %v6794_v17 = vld [vmem:[%s8326_s1 + $0x320] sm:$0xff]  }
  0x86   : > { %3311 = vmatmul.mubr.bf16.gmra.mrb[48].mxu1 %v6629_v58  ;;  %3472 = vmatmul.mubr.bf16.gmra.mrb[48].mxu0 %v6630_v59  ;;  %v6743_v58 = vld [vmem:[%s8326_s1 + $0x2c8] sm:$0xff]  }
  0x87   : > { %3318 = vmatprep.mubr.bf16.mxu1 %v6635_v60  ;;  %3479 = vmatprep.mubr.bf16.mxu0 %v6637_v61  ;;  %v6745_v59 = vld [vmem:[%s8326_s1 + $0x348] sm:$0xff]  }
  0x88   : > { %v6744_v60 = vld [vmem:[%s8326_s1 + $0x288] sm:$0xff]  }
  0x89   : > { %v6746_v61 = vld [vmem:[%s8326_s1 + $0x308] sm:$0xff]  }
  0x8e   : > { %3319 = vmatmul.mubr.bf16.gmra.mrb[52].mxu1 %v6639_v2  ;;  %3480 = vmatmul.mubr.bf16.gmra.mrb[52].mxu0 %v6640_v3  ;;  %v6737_v2 = vld [vmem:[%s7147_s13 + $0x13c] ss:$72 sps:$4 sm:$0xff]  }
  0x8f   : > { %3326 = vmatprep.mubr.bf16.mxu1 %v6641_v4  ;;  %3487 = vmatprep.mubr.bf16.mxu0 %v6643_v5  ;;  %v6739_v3 = vld [vmem:[%s7147_s13 + $0x144] ss:$72 sps:$4 sm:$0xff]   ;;  %v6760_v4 = vld [vmem:[%s8326_s1 + $0x290] sm:$0xff]  }
  0x90   : > { %v6762_v5 = vld [vmem:[%s8326_s1 + $0x310] sm:$0xff]  }
  0x96   : > { %3327 = vmatmul.mubr.bf16.gmra.mrb[56].mxu1 %v6645_v8  ;;  %3488 = vmatmul.mubr.bf16.gmra.mrb[56].mxu0 %v6646_v11  ;;  %v6776_v8 = vld [vmem:[%s8326_s1 + $0x298] sm:$0xff]   ;;  %v6793_v11 = vld [vmem:[%s8326_s1 + $0x360] sm:$0xff]  }
  0x97   : > { %3334 = vmatprep.mubr.bf16.mxu1 %v6651_v12  ;;  %3495 = vmatprep.mubr.bf16.mxu0 %v6653_v13  ;;  %v6741_v12 = vld [vmem:[%s7147_s13 + $0x138] ss:$72 sps:$4 sm:$0xff]  }
  0x98   : > { %v6742_v13 = vld [vmem:[%s7147_s13 + $0x140] ss:$72 sps:$4 sm:$0xff]  }
  0x9e   : > { %3335 = vmatmul.mubr.bf16.gmra.mrb[60].mxu1 %v6655_v15  ;;  %3496 = vmatmul.mubr.bf16.gmra.mrb[60].mxu0 %v6656_v16  ;;  %v6749_v15 = vld [vmem:[%s7147_s13 + $0x1d4] ss:$72 sps:$4 sm:$0xff]   ;;  %v6792_v16 = vld [vmem:[%s8326_s1 + $0x2a0] sm:$0xff]  }
  0x9f   : > { %3342 = vmatprep.mubr.bf16.mxu1 %v6657_v18  ;;  %3503 = vmatprep.mubr.bf16.mxu0 %v6659_v19  ;;  %v6807_v18 = vld [vmem:[%s8326_s1 + $0x2e8] sm:$0xff]  }
  0xa0   : > { %v6809_v19 = vld [vmem:[%s8326_s1 + $0x368] sm:$0xff]  }
  0xa6   : > { %3343 = vmatmul.mubr.bf16.gmra.mrb[64].mxu1 %v6661_v20  ;;  %3504 = vmatmul.mubr.bf16.gmra.mrb[64].mxu0 %v6662_v21  ;;  %v6808_v20 = vld [vmem:[%s8326_s1 + $0x2a8] sm:$0xff]  }
  0xa7   : > { %3350 = vmatprep.mubr.bf16.mxu1 %v6667_v22  ;;  %3511 = vmatprep.mubr.bf16.mxu0 %v6669_v23  ;;  %v6810_v21 = vld [vmem:[%s8326_s1 + $0x328] sm:$0xff]  }
  0xa8   : > { %v6751_v22 = vld [vmem:[%s7147_s13 + $0x1c8] ss:$72 sps:$4 sm:$0xff]  }
  0xae   : > { %3351 = vmatmul.mubr.bf16.gmra.mrb[68].mxu1 %v6671_v24  ;;  %3512 = vmatmul.mubr.bf16.gmra.mrb[68].mxu0 %v6672_v25  ;;  %v6752_v25 = vld [vmem:[%s7147_s13 + $0x1d0] ss:$72 sps:$4 sm:$0xff]  }
  0xaf   : > { %3358 = vmatprep.mubr.bf16.mxu1 %v6673_v26  ;;  %3519 = vmatprep.mubr.bf16.mxu0 %v6675_v27  ;;  %v6823_v26 = vld [vmem:[%s8326_s1 + $0x2f0] sm:$0xff]  }
  0xb0   : > { %v6825_v27 = vld [vmem:[%s8326_s1 + $0x370] sm:$0xff]  }
  0xb6   : > { %3359 = vmatmul.mubr.bf16.gmra.mrb[72].mxu1 %v6677_v28  ;;  %3520 = vmatmul.mubr.bf16.gmra.mrb[72].mxu0 %v6678_v29 }
  0xb7   : > { %3366 = vmatprep.mubr.bf16.mxu1 %v6683_v30  ;;  %3527 = vmatprep.mubr.bf16.mxu0 %v6685_v31  ;;  %v6753_v30 = vld [vmem:[%s7147_s13 + $0x25c] ss:$72 sps:$4 sm:$0xff]  }
  0xbe   : > { %3367 = vmatmul.mubr.bf16.gmra.mrb[76].mxu1 %v6687_v32  ;;  %3528 = vmatmul.mubr.bf16.gmra.mrb[76].mxu0 %v6688_v33 }
  0xbf   : > { %3374 = vmatprep.mubr.bf16.mxu1 %v6689_v34  ;;  %3535 = vmatprep.mubr.bf16.mxu0 %v6691_v35  ;;  %v6755_v35 = vld [vmem:[%s7147_s13 + $0x264] ss:$72 sps:$4 sm:$0xff]  }
  0xc6   : > { %3375 = vmatmul.mubr.bf16.gmra.mrb[80].mxu1 %v6693_v36  ;;  %3536 = vmatmul.mubr.bf16.gmra.mrb[80].mxu0 %v6694_v37  ;;  %v6824_v36 = vld [vmem:[%s8326_s1 + $0x2b0] sm:$0xff]  }
  0xc7   : > { %3382 = vmatprep.mubr.bf16.mxu1 %v6699_v38  ;;  %3543 = vmatprep.mubr.bf16.mxu0 %v6701_v39  ;;  %v6826_v39 = vld [vmem:[%s8326_s1 + $0x330] sm:$0xff]  }
  0xce   : > { %3383 = vmatmul.mubr.bf16.gmra.mrb[84].mxu1 %v6703_v40  ;;  %3544 = vmatmul.mubr.bf16.gmra.mrb[84].mxu0 %v6704_v41  ;;  %v6839_v40 = vld [vmem:[%s8326_s1 + $0x2f8] sm:$0xff]  }
  0xcf   : > { %3390 = vmatprep.mubr.bf16.mxu1 %v6705_v42  ;;  %3551 = vmatprep.mubr.bf16.mxu0 %v6707_v43  ;;  %v6841_v41 = vld [vmem:[%s8326_s1 + $0x378] sm:$0xff]  }
  0xd6   : > { %3391 = vmatmul.mubr.bf16.gmra.mrb[88].mxu1 %v6709_v44  ;;  %3552 = vmatmul.mubr.bf16.gmra.mrb[88].mxu0 %v6710_v45  ;;  %v6840_v44 = vld [vmem:[%s8326_s1 + $0x2b8] sm:$0xff]  }
  0xd7   : > { %3398 = vmatprep.mubr.bf16.mxu1 %v6715_v46  ;;  %3559 = vmatprep.mubr.bf16.mxu0 %v6717_v47  ;;  %v6842_v45 = vld [vmem:[%s8326_s1 + $0x338] sm:$0xff]   ;;  %v6855_v46 = vld [vmem:[%s8326_s1 + $0x3c0] sm:$0xff]  }
  0xd8   : > { %v6857_v47 = vld [vmem:[%s8326_s1 + $0x440] sm:$0xff]  }
  0xde   : > { %3399 = vmatmul.mubr.bf16.gmra.mrb[92].mxu1 %v6719_v48  ;;  %3560 = vmatmul.mubr.bf16.gmra.mrb[92].mxu0 %v6720_v49  ;;  %v6757_v48 = vld [vmem:[%s7147_s13 + $0x258] ss:$72 sps:$4 sm:$0xff]  }
  0xdf   : > { %3600 = vmatprep.mubr.bf16.mxu1 %v6723_v50  ;;  %3761 = vmatprep.mubr.bf16.mxu0 %v6726_v51  ;;  %v6758_v49 = vld [vmem:[%s7147_s13 + $0x260] ss:$72 sps:$4 sm:$0xff]  }
  0xe6   : > { %3601 = vmatmul.mubr.bf16.vlgmr.msra.gmra.mrb[96].mxu1 %v6721_v52  ;;  %3762 = vmatmul.mubr.bf16.vlgmr.msra.gmra.mrb[96].mxu0 %v6724_v53 }
  0xe7   : > { %6025 = vmatpush3.bf16.msra.mxu1 %v6728_v54  ;;  %6137 = vmatpush3.bf16.msra.mxu0 %v6730_v55 }
  0xe8   : > { %3608 = vmatprep.mubr.bf16.mxu1 %v6731_v56  ;;  %3769 = vmatprep.mubr.bf16.mxu0 %v6733_v57 }
  0xe9   : > { %6026 = vmatprep.subr.bf16.mxu1 %v6743_v58  ;;  %6138 = vmatprep.subr.bf16.mxu0 %v6745_v59  ;;  %v6763_v58 = vld [vmem:[%s7147_s13 + $0x2ec] ss:$72 sps:$4 sm:$0xff]  }
  0xea   : > { %v6765_v59 = vld [vmem:[%s7147_s13 + $0x2f4] ss:$72 sps:$4 sm:$0xff]  }
  0xeb   : > { %6027 = vmatpush3.bf16.msra.mxu1 %v6744_v60  ;;  %6139 = vmatpush3.bf16.msra.mxu0 %v6746_v61 }
  0xec   : > { %6028 = vmatprep.subr.bf16.mxu1 %v6759_v62  ;;  %6140 = vmatprep.subr.bf16.mxu0 %v6761_v63 }
  0xee   : > { %3609 = vmatmul.mubr.bf16.gmra.mrb[100].mxu1 %v6735_v0  ;;  %3770 = vmatmul.mubr.bf16.gmra.mrb[100].mxu0 %v6736_v1 }
  0xef   : > { %3616 = vmatprep.mubr.bf16.mxu1 %v6737_v2  ;;  %3777 = vmatprep.mubr.bf16.mxu0 %v6739_v3  ;;  %v6767_v2 = vld [vmem:[%s7147_s13 + $0x2e8] ss:$72 sps:$4 sm:$0xff]  }
  0xf0   : > { %6029 = vmatpush3.bf16.msra.mxu1 %v6760_v4  ;;  %6141 = vmatpush3.bf16.msra.mxu0 %v6762_v5  ;;  %v6768_v5 = vld [vmem:[%s7147_s13 + $0x2f0] ss:$72 sps:$4 sm:$0xff]  }
  0xf1   : > { %6030 = vmatprep.subr.bf16.mxu1 %v6775_v6  ;;  %6142 = vmatprep.subr.bf16.mxu0 %v6777_v7 }
  0xf4   : > { %6031 = vmatpush3.bf16.msra.mxu1 %v6776_v8  ;;  %6143 = vmatpush3.bf16.msra.mxu0 %v6778_v9 }
  0xf5   : > { %6032 = vmatprep.subr.bf16.mxu1 %v6791_v10  ;;  %6144 = vmatprep.subr.bf16.mxu0 %v6793_v11  ;;  %v6769_v10 = vld [vmem:[%s7147_s13 + $0x37c] ss:$72 sps:$4 sm:$0xff]  }
  0xf6   : > { %3617 = vmatmul.mubr.bf16.gmra.mrb[104].mxu1 %v6741_v12  ;;  %3778 = vmatmul.mubr.bf16.gmra.mrb[104].mxu0 %v6742_v13  ;;  %v6771_v11 = vld [vmem:[%s7147_s13 + $0x384] ss:$72 sps:$4 sm:$0xff]  }
  0xf7   : > { %3624 = vmatprep.mubr.bf16.mxu1 %v6747_v14  ;;  %3785 = vmatprep.mubr.bf16.mxu0 %v6749_v15 }
  0xf8   : > { %6033 = vmatpush3.bf16.msra.mxu1 %v6792_v16  ;;  %6145 = vmatpush3.bf16.msra.mxu0 %v6794_v17  ;;  %v6773_v16 = vld [vmem:[%s7147_s13 + $0x378] ss:$72 sps:$4 sm:$0xff]  }
  0xf9   : > { %v5480_v23 = vpop.f32.mrb[0].mxu0  ;;  %v5528_v24 = vpop.f32.mrb[0].mxu1  ;;  %6034 = vmatprep.subr.bf16.mxu1 %v6807_v18  ;;  %6146 = vmatprep.subr.bf16.mxu0 %v6809_v19  ;;  %v6774_v17 = vld [vmem:[%s7147_s13 + $0x380] ss:$72 sps:$4 sm:$0xff]  }
  0xfa   : > { %v5481_v28 = vpop.f32.mrb[1].mxu0  ;;  %v5529_v29 = vpop.f32.mrb[1].mxu1 }
  0xfb   : > { %v7553_v31 = vadd.f32 %v5481_v28, %v5480_v23  ;;  %v7555_v32 = vadd.f32 %v5529_v29, %v5528_v24  ;;  %v5483_v33 = vpop.f32.mrb[2].mxu0  ;;  %v5531_v34 = vpop.f32.mrb[2].mxu1 }
  0xfc   : > { %v5484_v37 = vpop.f32.mrb[3].mxu0  ;;  %v5532_v38 = vpop.f32.mrb[3].mxu1  ;;  %6035 = vmatpush3.bf16.msra.mxu1 %v6808_v20  ;;  %6147 = vmatpush3.bf16.msra.mxu0 %v6810_v21 }
  0xfd   : > { %v7570_v42 = vadd.f32 %v5484_v37, %v5483_v33  ;;  %v7572_v43 = vadd.f32 %v5532_v38, %v5531_v34  ;;  %6036 = vmatprep.subr.bf16.mxu1 %v6823_v26  ;;  %6148 = vmatprep.subr.bf16.mxu0 %v6825_v27  ;;  %v6779_v26 = vld [vmem:[%s7147_s13 + $0x40c] ss:$72 sps:$4 sm:$0xff]  }
  0xfe   : > { %3625 = vmatmul.mubr.bf16.gmra.mrb[108].mxu1 %v6751_v22  ;;  %3786 = vmatmul.mubr.bf16.gmra.mrb[108].mxu0 %v6752_v25  ;;  %v6781_v27 = vld [vmem:[%s7147_s13 + $0x414] ss:$72 sps:$4 sm:$0xff]  }
  0xff   : > { %3632 = vmatprep.mubr.bf16.mxu1 %v6753_v30  ;;  %3793 = vmatprep.mubr.bf16.mxu0 %v6755_v35 }
 0x100   : > { %6037 = vmatpush3.bf16.msra.mxu1 %v6824_v36  ;;  %6149 = vmatpush3.bf16.msra.mxu0 %v6826_v39  ;;  %v6783_v36 = vld [vmem:[%s7147_s13 + $0x408] ss:$72 sps:$4 sm:$0xff]  }
 0x101   : > { %v5486_v50 = vpop.f32.mrb[4].mxu0  ;;  %v5534_v51 = vpop.f32.mrb[4].mxu1  ;;  %6038 = vmatprep.subr.bf16.mxu1 %v6839_v40  ;;  %6150 = vmatprep.subr.bf16.mxu0 %v6841_v41  ;;  %v6784_v39 = vld [vmem:[%s7147_s13 + $0x410] ss:$72 sps:$4 sm:$0xff]  }
 0x102   : > { %v5487_v52 = vpop.f32.mrb[5].mxu0  ;;  %v5535_v53 = vpop.f32.mrb[5].mxu1 }
 0x103   : > { %v7588_v54 = vadd.f32 %v5487_v52, %v5486_v50  ;;  %v7590_v55 = vadd.f32 %v5535_v53, %v5534_v51  ;;  %v5489_v56 = vpop.f32.mrb[6].mxu0  ;;  %v5537_v57 = vpop.f32.mrb[6].mxu1  ;;  %v6789_v52 = vld [vmem:[%s7147_s13 + $0x498] ss:$72 sps:$4 sm:$0xff]  }
 0x104   : > { %v5490_v60 = vpop.f32.mrb[7].mxu0  ;;  %v5538_v61 = vpop.f32.mrb[7].mxu1  ;;  %6039 = vmatpush3.bf16.msra.mxu1 %v6840_v44  ;;  %6151 = vmatpush3.bf16.msra.mxu0 %v6842_v45  ;;  %v6790_v53 = vld [vmem:[%s7147_s13 + $0x4a0] ss:$72 sps:$4 sm:$0xff]  }
 0x105   : > { %v7594_v62 = vadd.f32 %v5490_v60, %v5489_v56  ;;  %v7596_v63 = vadd.f32 %v5538_v61, %v5537_v57  ;;  %6248 = vmatprep.subr.bf16.mxu1 %v6855_v46  ;;  %6360 = vmatprep.subr.bf16.mxu0 %v6857_v47  ;;  %v6785_v46 = vld [vmem:[%s7147_s13 + $0x49c] ss:$72 sps:$4 sm:$0xff]  }
 0x106   : > { %3633 = vmatmul.mubr.bf16.gmra.mrb[112].mxu1 %v6757_v48  ;;  %3794 = vmatmul.mubr.bf16.gmra.mrb[112].mxu0 %v6758_v49  ;;  %v6787_v47 = vld [vmem:[%s7147_s13 + $0x4a4] ss:$72 sps:$4 sm:$0xff]  }
 0x107   : > { %3640 = vmatprep.mubr.bf16.mxu1 %v6763_v58  ;;  %3801 = vmatprep.mubr.bf16.mxu0 %v6765_v59 }
 0x109   : > { %v5492_v0 = vpop.f32.mrb[8].mxu0  ;;  %v5540_v1 = vpop.f32.mrb[8].mxu1 }
 0x10a   : > { %v5493_v3 = vpop.f32.mrb[9].mxu0  ;;  %v5541_v4 = vpop.f32.mrb[9].mxu1 }
 0x10b   : > { %v7600_v6 = vadd.f32 %v5493_v3, %v5492_v0  ;;  %v7602_v7 = vadd.f32 %v5541_v4, %v5540_v1  ;;  %v5495_v8 = vpop.f32.mrb[10].mxu0  ;;  %v5543_v9 = vpop.f32.mrb[10].mxu1  ;;  %v6797_v3 = vld [vmem:[%s7147_s13 + $0x534] ss:$72 sps:$4 sm:$0xff]  }
 0x10c   : > { %v5496_v12 = vpop.f32.mrb[11].mxu0  ;;  %v5544_v13 = vpop.f32.mrb[11].mxu1 }
 0x10d   : > { %v7606_v14 = vadd.f32 %v5496_v12, %v5495_v8  ;;  %v7608_v15 = vadd.f32 %v5544_v13, %v5543_v9  ;;  %v6799_v12 = vld [vmem:[%s7147_s13 + $0x528] ss:$72 sps:$4 sm:$0xff]  }
 0x10e   : > { %3641 = vmatmul.mubr.bf16.gmra.mrb[116].mxu1 %v6767_v2  ;;  %3802 = vmatmul.mubr.bf16.gmra.mrb[116].mxu0 %v6768_v5  ;;  %v6795_v2 = vld [vmem:[%s7147_s13 + $0x52c] ss:$72 sps:$4 sm:$0xff]  }
 0x10f   : > { %3648 = vmatprep.mubr.bf16.mxu1 %v6769_v10  ;;  %3809 = vmatprep.mubr.bf16.mxu0 %v6771_v11 }
 0x111   : > { %v5498_v18 = vpop.f32.mrb[12].mxu0  ;;  %v5546_v19 = vpop.f32.mrb[12].mxu1 }
 0x112   : > { %v5499_v20 = vpop.f32.mrb[13].mxu0  ;;  %v5547_v21 = vpop.f32.mrb[13].mxu1 }
 0x113   : > { %v7612_v22 = vadd.f32 %v5499_v20, %v5498_v18  ;;  %v7614_v23 = vadd.f32 %v5547_v21, %v5546_v19  ;;  %v5501_v24 = vpop.f32.mrb[14].mxu0  ;;  %v5549_v25 = vpop.f32.mrb[14].mxu1 }
 0x114   : > { %v5502_v28 = vpop.f32.mrb[15].mxu0  ;;  %v5550_v29 = vpop.f32.mrb[15].mxu1 }
 0x115   : > { %v7618_v30 = vadd.f32 %v5502_v28, %v5501_v24  ;;  %v7620_v33 = vadd.f32 %v5550_v29, %v5549_v25  ;;  %v6801_v24 = vld [vmem:[%s7147_s13 + $0x5bc] ss:$72 sps:$4 sm:$0xff]  }
 0x116   : > { %3649 = vmatmul.mubr.bf16.gmra.mrb[120].mxu1 %v6773_v16  ;;  %3810 = vmatmul.mubr.bf16.gmra.mrb[120].mxu0 %v6774_v17  ;;  %v6800_v17 = vld [vmem:[%s7147_s13 + $0x530] ss:$72 sps:$4 sm:$0xff]   ;;  %v6803_v25 = vld [vmem:[%s7147_s13 + $0x5c4] ss:$72 sps:$4 sm:$0xff]  }
 0x117   : > { %3656 = vmatprep.mubr.bf16.mxu1 %v6779_v26  ;;  %3817 = vmatprep.mubr.bf16.mxu0 %v6781_v27 }
 0x119   : > { %v5504_v34 = vpop.f32.mrb[16].mxu0  ;;  %v5552_v35 = vpop.f32.mrb[16].mxu1 }
 0x11a   : > { %v5505_v37 = vpop.f32.mrb[17].mxu0  ;;  %v5553_v38 = vpop.f32.mrb[17].mxu1 }
 0x11b   : > { %v7624_v40 = vadd.f32 %v5505_v37, %v5504_v34  ;;  %v7626_v41 = vadd.f32 %v5553_v38, %v5552_v35  ;;  %v5507_v44 = vpop.f32.mrb[18].mxu0  ;;  %v5555_v45 = vpop.f32.mrb[18].mxu1  ;;  %v6805_v34 = vld [vmem:[%s7147_s13 + $0x5b8] ss:$72 sps:$4 sm:$0xff]  }
 0x11c   : > { %v5508_v48 = vpop.f32.mrb[19].mxu0  ;;  %v5556_v49 = vpop.f32.mrb[19].mxu1  ;;  %v6806_v35 = vld [vmem:[%s7147_s13 + $0x5c0] ss:$72 sps:$4 sm:$0xff]  }
 0x11d   : > { %v7630_v50 = vadd.f32 %v5508_v48, %v5507_v44  ;;  %v7632_v51 = vadd.f32 %v5556_v49, %v5555_v45  ;;  %v6811_v48 = vld [vmem:[%s7147_s13 + $0x64c] ss:$72 sps:$4 sm:$0xff]  }
 0x11e   : > { %3657 = vmatmul.mubr.bf16.gmra.mrb[124].mxu1 %v6783_v36  ;;  %3818 = vmatmul.mubr.bf16.gmra.mrb[124].mxu0 %v6784_v39  ;;  %v6813_v49 = vld [vmem:[%s7147_s13 + $0x654] ss:$72 sps:$4 sm:$0xff]  }
 0x11f   : > { %3664 = vmatprep.mubr.bf16.mxu1 %v6785_v46  ;;  %3825 = vmatprep.mubr.bf16.mxu0 %v6787_v47 }
 0x121   : > { %v5510_v56 = vpop.f32.mrb[20].mxu0  ;;  %v5558_v57 = vpop.f32.mrb[20].mxu1 }
 0x122   : > { %v5511_v58 = vpop.f32.mrb[21].mxu0  ;;  %v5559_v59 = vpop.f32.mrb[21].mxu1 }
 0x123   : > { %v7636_v60 = vadd.f32 %v5511_v58, %v5510_v56  ;;  %v7638_v61 = vadd.f32 %v5559_v59, %v5558_v57  ;;  %v5513_v0 = vpop.f32.mrb[22].mxu0  ;;  %v5561_v1 = vpop.f32.mrb[22].mxu1 }
 0x124   : > { %v5514_v4 = vpop.f32.mrb[23].mxu0  ;;  %v5562_v5 = vpop.f32.mrb[23].mxu1 }
 0x125   : > { %v7642_v8 = vadd.f32 %v5514_v4, %v5513_v0  ;;  %v7644_v9 = vadd.f32 %v5562_v5, %v5561_v1  ;;  %v6815_v0 = vld [vmem:[%s7147_s13 + $0x648] ss:$72 sps:$4 sm:$0xff]  }
 0x126   : > { %3665 = vmatmul.mubr.bf16.gmra.mrb[128].mxu1 %v6789_v52  ;;  %3826 = vmatmul.mubr.bf16.gmra.mrb[128].mxu0 %v6790_v53 }
 0x127   : > { %3672 = vmatprep.mubr.bf16.mxu1 %v6795_v2  ;;  %3833 = vmatprep.mubr.bf16.mxu0 %v6797_v3  ;;  %v6816_v3 = vld [vmem:[%s7147_s13 + $0x650] ss:$72 sps:$4 sm:$0xff]  }
 0x129   : > { %v5516_v10 = vpop.f32.mrb[24].mxu0  ;;  %v5564_v11 = vpop.f32.mrb[24].mxu1 }
 0x12a   : > { %v5517_v13 = vpop.f32.mrb[25].mxu0  ;;  %v5565_v16 = vpop.f32.mrb[25].mxu1 }
 0x12b   : > { %v7648_v18 = vadd.f32 %v5517_v13, %v5516_v10  ;;  %v7650_v19 = vadd.f32 %v5565_v16, %v5564_v11  ;;  %v5519_v20 = vpop.f32.mrb[26].mxu0  ;;  %v5567_v21 = vpop.f32.mrb[26].mxu1  ;;  %v6819_v13 = vld [vmem:[%s7147_s13 + $0x6e4] ss:$72 sps:$4 sm:$0xff]  }
 0x12c   : > { %v5520_v26 = vpop.f32.mrb[27].mxu0  ;;  %v5568_v27 = vpop.f32.mrb[27].mxu1 }
 0x12d   : > { %v7654_v28 = vadd.f32 %v5520_v26, %v5519_v20  ;;  %v7656_v29 = vadd.f32 %v5568_v27, %v5567_v21 }
 0x12e   : > { %3673 = vmatmul.mubr.bf16.gmra.mrb[132].mxu1 %v6799_v12  ;;  %3834 = vmatmul.mubr.bf16.gmra.mrb[132].mxu0 %v6800_v17  ;;  %v6817_v12 = vld [vmem:[%s7147_s13 + $0x6dc] ss:$72 sps:$4 sm:$0xff]  }
 0x12f   : > { %3680 = vmatprep.mubr.bf16.mxu1 %v6801_v24  ;;  %3841 = vmatprep.mubr.bf16.mxu0 %v6803_v25 }
 0x131   : > { %v5522_v36 = vpop.f32.mrb[28].mxu0  ;;  %v5570_v37 = vpop.f32.mrb[28].mxu1 }
 0x132   : > { %v5523_v38 = vpop.f32.mrb[29].mxu0  ;;  %v5571_v39 = vpop.f32.mrb[29].mxu1 }
 0x133   : > { %v7660_v44 = vadd.f32 %v5523_v38, %v5522_v36  ;;  %v7662_v45 = vadd.f32 %v5571_v39, %v5570_v37  ;;  %v5525_v46 = vpop.f32.mrb[30].mxu0  ;;  %v5573_v47 = vpop.f32.mrb[30].mxu1  ;;  %v6821_v38 = vld [vmem:[%s7147_s13 + $0x6d8] ss:$72 sps:$4 sm:$0xff]  }
 0x134   : > { %v5526_v52 = vpop.f32.mrb[31].mxu0  ;;  %v5574_v53 = vpop.f32.mrb[31].mxu1 }
 0x135   : > { %v7666_v56 = vadd.f32 %v5526_v52, %v5525_v46  ;;  %v7668_v57 = vadd.f32 %v5574_v53, %v5573_v47  ;;  %v6829_v52 = vld [vmem:[%s7147_s13 + $0x774] ss:$72 sps:$4 sm:$0xff]  }
 0x136   : > { %3681 = vmatmul.mubr.bf16.gmra.mrb[136].mxu1 %v6805_v34  ;;  %3842 = vmatmul.mubr.bf16.gmra.mrb[136].mxu0 %v6806_v35 }
 0x137   : > { %3688 = vmatprep.mubr.bf16.mxu1 %v6811_v48  ;;  %3849 = vmatprep.mubr.bf16.mxu0 %v6813_v49  ;;  %v6827_v49 = vld [vmem:[%s7147_s13 + $0x76c] ss:$72 sps:$4 sm:$0xff]  }
 0x139   : > { %v5592_v58 = vpop.f32.mrb[32].mxu1  ;;  %v5704_v59 = vpop.f32.mrb[32].mxu0 }
 0x13a   : > { %v5593_v1 = vpop.f32.mrb[33].mxu1  ;;  %v5705_v2 = vpop.f32.mrb[33].mxu0 }
 0x13b   : > { %v5594_v4 = vadd.f32 %v5593_v1, %v5592_v58  ;;  %v5706_v5 = vadd.f32 %v5705_v2, %v5704_v59  ;;  %v5595_v10 = vpop.f32.mrb[34].mxu1  ;;  %v5707_v11 = vpop.f32.mrb[34].mxu0 }
 0x13c   : > { %v5596_v16 = vpop.f32.mrb[35].mxu1  ;;  %v5708_v17 = vpop.f32.mrb[35].mxu0 }
 0x13d   : > { %v3281_v20 = vadd.f32 %v5594_v4, %v7553_v31  ;;  %v5597_v21 = vadd.f32 %v5596_v16, %v5595_v10  ;;  %v5709_v24 = vadd.f32 %v5708_v17, %v5707_v11  ;;  %v6822_v31 = vld [vmem:[%s7147_s13 + $0x6e0] ss:$72 sps:$4 sm:$0xff]  }
 0x13e   : > { %3689 = vmatmul.mubr.bf16.gmra.mrb[140].mxu1 %v6815_v0  ;;  %3850 = vmatmul.mubr.bf16.gmra.mrb[140].mxu0 %v6816_v3 }
 0x13f   : > { %v7675_v25 = vadd.f32 %v5706_v5, %v3281_v20  ;;  %v3284_v26 = vadd.f32 %v5597_v21, %v7570_v42  ;;  %3696 = vmatprep.mubr.bf16.mxu1 %v6817_v12  ;;  %3857 = vmatprep.mubr.bf16.mxu0 %v6819_v13  ;;  %v6831_v12 = vld [vmem:[%s7147_s13 + $0x768] ss:$72 sps:$4 sm:$0xff]   ;;  %v6833_v21 = vld [vmem:[%s7147_s13 + $0x7fc] ss:$72 sps:$4 sm:$0xff]  }
 0x141   : > { %v7678_v27 = vadd.f32 %v5709_v24, %v3284_v26  ;;  %v5598_v34 = vpop.f32.mrb[36].mxu1  ;;  %v5710_v35 = vpop.f32.mrb[36].mxu0  ;;  %v6835_v24 = vld [vmem:[%s7147_s13 + $0x804] ss:$72 sps:$4 sm:$0xff]  }
 0x142   : > { %v5599_v36 = vpop.f32.mrb[37].mxu1  ;;  %v5711_v37 = vpop.f32.mrb[37].mxu0 }
 0x143   : > { %v5600_v39 = vadd.f32 %v5599_v36, %v5598_v34  ;;  %v5712_v46 = vadd.f32 %v5711_v37, %v5710_v35  ;;  %v5601_v47 = vpop.f32.mrb[38].mxu1  ;;  %v5713_v48 = vpop.f32.mrb[38].mxu0 }
 0x144   : > { %v5602_v53 = vpop.f32.mrb[39].mxu1  ;;  %v5714_v58 = vpop.f32.mrb[39].mxu0 }
 0x145   : > { %v3289_v42 = vadd.f32 %v5600_v39, %v7588_v54  ;;  %v5603_v59 = vadd.f32 %v5602_v53, %v5601_v47  ;;  %v5715_v0 = vadd.f32 %v5714_v58, %v5713_v48  ;;  %v6832_v54 = vld [vmem:[%s7147_s13 + $0x770] ss:$72 sps:$4 sm:$0xff]  }
 0x146   : > { %3697 = vmatmul.mubr.bf16.gmra.mrb[144].mxu1 %v6821_v38  ;;  %3858 = vmatmul.mubr.bf16.gmra.mrb[144].mxu0 %v6822_v31 }
 0x147   : > { %v7685_v1 = vadd.f32 %v5712_v46, %v3289_v42  ;;  %v3292_v2 = vadd.f32 %v5603_v59, %v7594_v62  ;;  %3704 = vmatprep.mubr.bf16.mxu1 %v6827_v49  ;;  %3865 = vmatprep.mubr.bf16.mxu0 %v6829_v52  ;;  %v6837_v49 = vld [vmem:[%s7147_s13 + $0x7f8] ss:$72 sps:$4 sm:$0xff]   ;;  %v6843_v59 = vld [vmem:[%s7147_s13 + $0x88c] ss:$72 sps:$4 sm:$0xff]  }
 0x149   : > { %v7688_v3 = vadd.f32 %v5715_v0, %v3292_v2  ;;  %v5604_v4 = vpop.f32.mrb[40].mxu1  ;;  %v5716_v5 = vpop.f32.mrb[40].mxu0  ;;  %v6845_v0 = vld [vmem:[%s7147_s13 + $0x894] ss:$72 sps:$4 sm:$0xff]  }
 0x14a   : > { %v5605_v10 = vpop.f32.mrb[41].mxu1  ;;  %v5717_v11 = vpop.f32.mrb[41].mxu0 }
 0x14b   : > { %v5606_v13 = vadd.f32 %v5605_v10, %v5604_v4  ;;  %v5718_v16 = vadd.f32 %v5717_v11, %v5716_v5  ;;  %v5607_v17 = vpop.f32.mrb[42].mxu1  ;;  %v5719_v20 = vpop.f32.mrb[42].mxu0 }
 0x14c   : > { %v5608_v26 = vpop.f32.mrb[43].mxu1  ;;  %v5720_v34 = vpop.f32.mrb[43].mxu0 }
 0x14d   : > { %v3297_v62 = vadd.f32 %v5606_v13, %v7600_v6  ;;  %v5609_v35 = vadd.f32 %v5608_v26, %v5607_v17  ;;  %v5721_v36 = vadd.f32 %v5720_v34, %v5719_v20  ;;  %v6838_v6 = vld [vmem:[%s7147_s13 + $0x800] ss:$72 sps:$4 sm:$0xff]  }
 0x14e   : > { %3705 = vmatmul.mubr.bf16.gmra.mrb[148].mxu1 %v6831_v12  ;;  %3866 = vmatmul.mubr.bf16.gmra.mrb[148].mxu0 %v6832_v54 }
 0x14f   : > { %v7695_v37 = vadd.f32 %v5718_v16, %v3297_v62  ;;  %v3300_v38 = vadd.f32 %v5609_v35, %v7606_v14  ;;  %3712 = vmatprep.mubr.bf16.mxu1 %v6833_v21  ;;  %3873 = vmatprep.mubr.bf16.mxu0 %v6835_v24  ;;  %v6847_v21 = vld [vmem:[%s7147_s13 + $0x888] ss:$72 sps:$4 sm:$0xff]   ;;  %v6851_v35 = vld [vmem:[%s7147_s13 + $0x2c] ss:$72 sps:$4 sm:$0xff]  }
 0x151   : > { %v7698_v31 = vadd.f32 %v5721_v36, %v3300_v38  ;;  %v5610_v39 = vpop.f32.mrb[44].mxu1  ;;  %v5722_v46 = vpop.f32.mrb[44].mxu0  ;;  %v6854_v36 = vld [vmem:[%s7147_s13 + $0x34] ss:$72 sps:$4 sm:$0xff]  }
 0x152   : > { %v5611_v47 = vpop.f32.mrb[45].mxu1  ;;  %v5723_v48 = vpop.f32.mrb[45].mxu0 }
 0x153   : > { %v5612_v52 = vadd.f32 %v5611_v47, %v5610_v39  ;;  %v5724_v53 = vadd.f32 %v5723_v48, %v5722_v46  ;;  %v5613_v58 = vpop.f32.mrb[46].mxu1  ;;  %v5725_v42 = vpop.f32.mrb[46].mxu0 }
 0x154   : > { %v5614_v2 = vpop.f32.mrb[47].mxu1  ;;  %v5726_v4 = vpop.f32.mrb[47].mxu0 }
 0x155   : > { %v3305_v14 = vadd.f32 %v5612_v52, %v7612_v22  ;;  %v5615_v5 = vadd.f32 %v5614_v2, %v5613_v58  ;;  %v5727_v10 = vadd.f32 %v5726_v4, %v5725_v42  ;;  %v6848_v22 = vld [vmem:[%s7147_s13 + $0x890] ss:$72 sps:$4 sm:$0xff]  }
 0x156   : > { %3713 = vmatmul.mubr.bf16.gmra.mrb[152].mxu1 %v6837_v49  ;;  %3874 = vmatmul.mubr.bf16.gmra.mrb[152].mxu0 %v6838_v6 }
 0x157   : > { %v7705_v11 = vadd.f32 %v5724_v53, %v3305_v14  ;;  %v3308_v12 = vadd.f32 %v5615_v5, %v7618_v30  ;;  %3720 = vmatprep.mubr.bf16.mxu1 %v6843_v59  ;;  %3881 = vmatprep.mubr.bf16.mxu0 %v6845_v0  ;;  %v6849_v59 = vld [vmem:[%s7147_s13 + $0x28] ss:$72 sps:$4 sm:$0xff]   ;;  %v6858_v5 = vld [vmem:[%s8326_s1 + $0x400] sm:$0xff]  }
 0x159   : > { %v7708_v54 = vadd.f32 %v5727_v10, %v3308_v12  ;;  %v5616_v13 = vpop.f32.mrb[48].mxu1  ;;  %v5728_v16 = vpop.f32.mrb[48].mxu0 }
 0x15a   : > { %v5617_v17 = vpop.f32.mrb[49].mxu1  ;;  %v5729_v20 = vpop.f32.mrb[49].mxu0 }
 0x15b   : > { %v5618_v24 = vadd.f32 %v5617_v17, %v5616_v13  ;;  %v5730_v26 = vadd.f32 %v5729_v20, %v5728_v16  ;;  %v5619_v34 = vpop.f32.mrb[50].mxu1  ;;  %v5731_v62 = vpop.f32.mrb[50].mxu0  ;;  %v6859_v13 = vld [vmem:[%s7147_s13 + $0xbc] ss:$72 sps:$4 sm:$0xff]  }
 0x15c   : > { %v5620_v38 = vpop.f32.mrb[51].mxu1  ;;  %v5732_v39 = vpop.f32.mrb[51].mxu0  ;;  %v6861_v16 = vld [vmem:[%s7147_s13 + $0xc4] ss:$72 sps:$4 sm:$0xff]  }
 0x15d   : > { %v3313_v30 = vadd.f32 %v5618_v24, %v7624_v40  ;;  %v5621_v46 = vadd.f32 %v5620_v38, %v5619_v34  ;;  %v5733_v47 = vadd.f32 %v5732_v39, %v5731_v62  ;;  %v6852_v40 = vld [vmem:[%s7147_s13 + $0x30] ss:$72 sps:$4 sm:$0xff]   ;;  %v6873_v24 = vld [vmem:[%s8326_s1 + $0x448] sm:$0xff]  }
 0x15e   : > { %3721 = vmatmul.mubr.bf16.gmra.mrb[156].mxu1 %v6847_v21  ;;  %3882 = vmatmul.mubr.bf16.gmra.mrb[156].mxu0 %v6848_v22  ;;  %v6871_v22 = vld [vmem:[%s8326_s1 + $0x3c8] sm:$0xff]  }
 0x15f   : > { %v7715_v48 = vadd.f32 %v5730_v26, %v3313_v30  ;;  %v3316_v49 = vadd.f32 %v5621_v46, %v7630_v50  ;;  %3922 = vmatprep.mubr.bf16.mxu1 %v6851_v35  ;;  %4083 = vmatprep.mubr.bf16.mxu0 %v6854_v36  ;;  %v6856_v50 = vld [vmem:[%s8326_s1 + $0x380] sm:$0xff]   ;;  %v6874_v62 = vld [vmem:[%s8326_s1 + $0x408] sm:$0xff]   ;;  %v6887_v35 = vld [vmem:[%s8326_s1 + $0x3d0] sm:$0xff]  }
 0x161   : > { %v7718_v6 = vadd.f32 %v5733_v47, %v3316_v49  ;;  %v5622_v52 = vpop.f32.mrb[52].mxu1  ;;  %v5734_v53 = vpop.f32.mrb[52].mxu0  ;;  %v6863_v47 = vld [vmem:[%s7147_s13 + $0xb8] ss:$72 sps:$4 sm:$0xff]  }
 0x162   : > { %v5623_v58 = vpop.f32.mrb[53].mxu1  ;;  %v5735_v42 = vpop.f32.mrb[53].mxu0  ;;  %v6864_v49 = vld [vmem:[%s7147_s13 + $0xc0] ss:$72 sps:$4 sm:$0xff]  }
 0x163   : > { %v5624_v0 = vadd.f32 %v5623_v58, %v5622_v52  ;;  %v5736_v2 = vadd.f32 %v5735_v42, %v5734_v53  ;;  %v5625_v4 = vpop.f32.mrb[54].mxu1  ;;  %v5737_v14 = vpop.f32.mrb[54].mxu0 }
 0x164   : > { %v5626_v10 = vpop.f32.mrb[55].mxu1  ;;  %v5738_v12 = vpop.f32.mrb[55].mxu0 }
 0x165   : > { %v3321_v17 = vadd.f32 %v5624_v0, %v7636_v60  ;;  %v5627_v20 = vadd.f32 %v5626_v10, %v5625_v4  ;;  %v5739_v21 = vadd.f32 %v5738_v12, %v5737_v14  ;;  %v6872_v60 = vld [vmem:[%s8326_s1 + $0x388] sm:$0xff]   ;;  %v6888_v4 = vld [vmem:[%s8326_s1 + $0x390] sm:$0xff]   ;;  %v6903_v12 = vld [vmem:[%s8326_s1 + $0x3d8] sm:$0xff]  }
 0x166   : > { %3923 = vmatmul.mubr.bf16.vlgmr.msra.gmra.mrb[160].mxu1 %v6849_v59  ;;  %4084 = vmatmul.mubr.bf16.vlgmr.msra.gmra.mrb[160].mxu0 %v6852_v40  ;;  %v6865_v59 = vld [vmem:[%s7147_s13 + $0x14c] ss:$72 sps:$4 sm:$0xff]  }
 0x167   : > { %v7737_v26 = vadd.f32 %v5736_v2, %v3321_v17  ;;  %v3324_v34 = vadd.f32 %v5627_v20, %v7642_v8  ;;  %6249 = vmatpush3.bf16.msra.mxu1 %v6856_v50  ;;  %6361 = vmatpush3.bf16.msra.mxu0 %v6858_v5  ;;  %v6889_v8 = vld [vmem:[%s8326_s1 + $0x450] sm:$0xff]   ;;  %v6906_v20 = vld [vmem:[%s8326_s1 + $0x418] sm:$0xff]  }
 0x168   : > { %3930 = vmatprep.mubr.bf16.mxu1 %v6859_v13  ;;  %4091 = vmatprep.mubr.bf16.mxu0 %v6861_v16  ;;  %v6867_v40 = vld [vmem:[%s7147_s13 + $0x154] ss:$72 sps:$4 sm:$0xff]  }
 0x169   : > { %v7752_v36 = vadd.f32 %v5739_v21, %v3324_v34  ;;  %v5628_v38 = vpop.f32.mrb[56].mxu1  ;;  %v5740_v39 = vpop.f32.mrb[56].mxu0  ;;  %6250 = vmatprep.subr.bf16.mxu1 %v6871_v22  ;;  %6362 = vmatprep.subr.bf16.mxu0 %v6873_v24  ;;  %v6890_v14 = vld [vmem:[%s8326_s1 + $0x410] sm:$0xff]   ;;  %v6905_v13 = vld [vmem:[%s8326_s1 + $0x458] sm:$0xff]   ;;  %v6919_v24 = vld [vmem:[%s8326_s1 + $0x3e0] sm:$0xff]  }
 0x16a   : > { %v5629_v30 = vpop.f32.mrb[57].mxu1  ;;  %v5741_v46 = vpop.f32.mrb[57].mxu0  ;;  %v6921_v34 = vld [vmem:[%s8326_s1 + $0x460] sm:$0xff]  }
 0x16b   : > { %v5630_v52 = vadd.f32 %v5629_v30, %v5628_v38  ;;  %v5742_v53 = vadd.f32 %v5741_v46, %v5740_v39  ;;  %v5631_v58 = vpop.f32.mrb[58].mxu1  ;;  %v5743_v42 = vpop.f32.mrb[58].mxu0  ;;  %6251 = vmatpush3.bf16.msra.mxu1 %v6872_v60  ;;  %6363 = vmatpush3.bf16.msra.mxu0 %v6874_v62 }
 0x16c   : > { %v5632_v0 = vpop.f32.mrb[59].mxu1  ;;  %v5744_v2 = vpop.f32.mrb[59].mxu0  ;;  %6252 = vmatprep.subr.bf16.mxu1 %v6887_v35  ;;  %6364 = vmatprep.subr.bf16.mxu0 %v6889_v8  ;;  %v6869_v35 = vld [vmem:[%s7147_s13 + $0x148] ss:$72 sps:$4 sm:$0xff]  }
 0x16d   : > { %v3329_v50 = vadd.f32 %v5630_v52, %v7648_v18  ;;  %v5633_v5 = vadd.f32 %v5632_v0, %v5631_v58  ;;  %v5745_v10 = vadd.f32 %v5744_v2, %v5743_v42  ;;  %v6904_v18 = vld [vmem:[%s8326_s1 + $0x398] sm:$0xff]   ;;  %v6920_v58 = vld [vmem:[%s8326_s1 + $0x3a0] sm:$0xff]   ;;  %v6935_v2 = vld [vmem:[%s8326_s1 + $0x3e8] sm:$0xff]  }
 0x16e   : > { %3931 = vmatmul.mubr.bf16.gmra.mrb[164].mxu1 %v6863_v47  ;;  %4092 = vmatmul.mubr.bf16.gmra.mrb[164].mxu0 %v6864_v49  ;;  %v6870_v8 = vld [vmem:[%s7147_s13 + $0x150] ss:$72 sps:$4 sm:$0xff]   ;;  %v6875_v47 = vld [vmem:[%s7147_s13 + $0x1dc] ss:$72 sps:$4 sm:$0xff]  }
 0x16f   : > { %v7771_v16 = vadd.f32 %v5742_v53, %v3329_v50  ;;  %v3332_v17 = vadd.f32 %v5633_v5, %v7654_v28  ;;  %3938 = vmatprep.mubr.bf16.mxu1 %v6865_v59  ;;  %4099 = vmatprep.mubr.bf16.mxu0 %v6867_v40  ;;  %v6877_v49 = vld [vmem:[%s7147_s13 + $0x1e4] ss:$72 sps:$4 sm:$0xff]  }
 0x170   : > { %6253 = vmatpush3.bf16.msra.mxu1 %v6888_v4  ;;  %6365 = vmatpush3.bf16.msra.mxu0 %v6890_v14  ;;  %v6922_v42 = vld [vmem:[%s8326_s1 + $0x420] sm:$0xff]   ;;  %v6937_v4 = vld [vmem:[%s8326_s1 + $0x468] sm:$0xff]  }
 0x171   : > { %v7780_v21 = vadd.f32 %v5745_v10, %v3332_v17  ;;  %v5634_v22 = vpop.f32.mrb[60].mxu1  ;;  %v5746_v28 = vpop.f32.mrb[60].mxu0  ;;  %6254 = vmatprep.subr.bf16.mxu1 %v6903_v12  ;;  %6366 = vmatprep.subr.bf16.mxu0 %v6905_v13  ;;  %v6938_v5 = vld [vmem:[%s8326_s1 + $0x428] sm:$0xff]   ;;  %v6951_v13 = vld [vmem:[%s8326_s1 + $0x3f0] sm:$0xff]  }
 0x172   : > { %v5635_v60 = vpop.f32.mrb[61].mxu1  ;;  %v5747_v62 = vpop.f32.mrb[61].mxu0  ;;  %v6953_v17 = vld [vmem:[%s8326_s1 + $0x470] sm:$0xff]  }
 0x173   : > { %v5636_v38 = vadd.f32 %v5635_v60, %v5634_v22  ;;  %v5748_v39 = vadd.f32 %v5747_v62, %v5746_v28  ;;  %v5637_v30 = vpop.f32.mrb[62].mxu1  ;;  %v5749_v46 = vpop.f32.mrb[62].mxu0  ;;  %v6879_v22 = vld [vmem:[%s7147_s13 + $0x1d8] ss:$72 sps:$4 sm:$0xff]  }
 0x174   : > { %v5638_v52 = vpop.f32.mrb[63].mxu1  ;;  %v5750_v53 = vpop.f32.mrb[63].mxu0  ;;  %6255 = vmatpush3.bf16.msra.mxu1 %v6904_v18  ;;  %6367 = vmatpush3.bf16.msra.mxu0 %v6906_v20  ;;  %v6880_v28 = vld [vmem:[%s7147_s13 + $0x1e0] ss:$72 sps:$4 sm:$0xff]  }
 0x175   : > { %v3337_v59 = vadd.f32 %v5636_v38, %v7660_v44  ;;  %v5639_v40 = vadd.f32 %v5638_v52, %v5637_v30  ;;  %v5751_v0 = vadd.f32 %v5750_v53, %v5749_v46  ;;  %6256 = vmatprep.subr.bf16.mxu1 %v6919_v24  ;;  %6368 = vmatprep.subr.bf16.mxu0 %v6921_v34  ;;  %v6936_v44 = vld [vmem:[%s8326_s1 + $0x3a8] sm:$0xff]   ;;  %v6952_v30 = vld [vmem:[%s8326_s1 + $0x3b0] sm:$0xff]   ;;  %v6967_v53 = vld [vmem:[%s8326_s1 + $0x3f8] sm:$0xff]  }
 0x176   : > { %3939 = vmatmul.mubr.bf16.gmra.mrb[168].mxu1 %v6869_v35  ;;  %4100 = vmatmul.mubr.bf16.gmra.mrb[168].mxu0 %v6870_v8  ;;  %v6881_v35 = vld [vmem:[%s7147_s13 + $0x26c] ss:$72 sps:$4 sm:$0xff]  }
 0x177   : > { %v7805_v14 = vadd.f32 %v5748_v39, %v3337_v59  ;;  %v3340_v50 = vadd.f32 %v5639_v40, %v7666_v56  ;;  %3946 = vmatprep.mubr.bf16.mxu1 %v6875_v47  ;;  %4107 = vmatprep.mubr.bf16.mxu0 %v6877_v49  ;;  %v6883_v8 = vld [vmem:[%s7147_s13 + $0x274] ss:$72 sps:$4 sm:$0xff]  }
 0x178   : > { %6257 = vmatpush3.bf16.msra.mxu1 %v6920_v58  ;;  %6369 = vmatpush3.bf16.msra.mxu0 %v6922_v42  ;;  %v6954_v46 = vld [vmem:[%s8326_s1 + $0x430] sm:$0xff]   ;;  %v6969_v58 = vld [vmem:[%s8326_s1 + $0x478] sm:$0xff]  }
 0x179   : > { %v7814_v10 = vadd.f32 %v5751_v0, %v3340_v50  ;;  %v5640_v12 = vpop.f32.mrb[64].mxu1  ;;  %v5752_v56 = vpop.f32.mrb[64].mxu0  ;;  %6258 = vmatprep.subr.bf16.mxu1 %v6935_v2  ;;  %6370 = vmatprep.subr.bf16.mxu0 %v6937_v4  ;;  %v6968_v59 = vld [vmem:[%s8326_s1 + $0x3b8] sm:$0xff]  }
 0x17a   : > { %v5641_v18 = vpop.f32.mrb[65].mxu1  ;;  %v5753_v20 = vpop.f32.mrb[65].mxu0  ;;  %v6970_v40 = vld [vmem:[%s8326_s1 + $0x438] sm:$0xff]  }
 0x17b   : > { %v5642_v24 = vadd.f32 %v5641_v18, %v5640_v12  ;;  %v5754_v34 = vadd.f32 %v5753_v20, %v5752_v56  ;;  %v5643_v60 = vpop.f32.mrb[66].mxu1  ;;  %v5755_v62 = vpop.f32.mrb[66].mxu0  ;;  %v6891_v18 = vld [vmem:[%s7147_s13 + $0x2fc] ss:$72 sps:$4 sm:$0xff]  }
 0x17c   : > { %v5644_v38 = vpop.f32.mrb[67].mxu1  ;;  %v5756_v39 = vpop.f32.mrb[67].mxu0  ;;  %6259 = vmatpush3.bf16.msra.mxu1 %v6936_v44  ;;  %6371 = vmatpush3.bf16.msra.mxu0 %v6938_v5  ;;  %v6885_v44 = vld [vmem:[%s7147_s13 + $0x268] ss:$72 sps:$4 sm:$0xff]   ;;  %v6893_v20 = vld [vmem:[%s7147_s13 + $0x304] ss:$72 sps:$4 sm:$0xff]  }
 0x17d   : > { %v3345_v47 = vadd.f32 %v5642_v24, %v7555_v32  ;;  %v5645_v49 = vadd.f32 %v5644_v38, %v5643_v60  ;;  %v5757_v52 = vadd.f32 %v5756_v39, %v5755_v62  ;;  %6260 = vmatprep.subr.bf16.mxu1 %v6951_v13  ;;  %6372 = vmatprep.subr.bf16.mxu0 %v6953_v17  ;;  %v6886_v5 = vld [vmem:[%s7147_s13 + $0x270] ss:$72 sps:$4 sm:$0xff]  }
 0x17e   : > { %3947 = vmatmul.mubr.bf16.gmra.mrb[172].mxu1 %v6879_v22  ;;  %4108 = vmatmul.mubr.bf16.gmra.mrb[172].mxu0 %v6880_v28 }
 0x17f   : > { %v7839_v42 = vadd.f32 %v5754_v34, %v3345_v47  ;;  %v3348_v32 = vadd.f32 %v5645_v49, %v7572_v43  ;;  %3954 = vmatprep.mubr.bf16.mxu1 %v6881_v35  ;;  %4115 = vmatprep.mubr.bf16.mxu0 %v6883_v8  ;;  %v6895_v47 = vld [vmem:[%s7147_s13 + $0x2f8] ss:$72 sps:$4 sm:$0xff]  }
 0x180   : > { %6261 = vmatpush3.bf16.msra.mxu1 %v6952_v30  ;;  %6373 = vmatpush3.bf16.msra.mxu0 %v6954_v46 }
 0x181   : > { %v7848_v0 = vadd.f32 %v5757_v52, %v3348_v32  ;;  %v5646_v2 = vpop.f32.mrb[68].mxu1  ;;  %v5758_v4 = vpop.f32.mrb[68].mxu0  ;;  %6262 = vmatprep.subr.bf16.mxu1 %v6967_v53  ;;  %6374 = vmatprep.subr.bf16.mxu0 %v6969_v58  ;;  %v6897_v32 = vld [vmem:[%s7147_s13 + $0x38c] ss:$72 sps:$4 sm:$0xff]  }
 0x182   : > { %v5647_v43 = vpop.f32.mrb[69].mxu1  ;;  %v5759_v50 = vpop.f32.mrb[69].mxu0 }
 0x183   : > { %v5648_v12 = vadd.f32 %v5647_v43, %v5646_v2  ;;  %v5760_v56 = vadd.f32 %v5759_v50, %v5758_v4  ;;  %v5649_v13 = vpop.f32.mrb[70].mxu1  ;;  %v5761_v17 = vpop.f32.mrb[70].mxu0 }
 0x184   : > { %v5650_v22 = vpop.f32.mrb[71].mxu1  ;;  %v5762_v28 = vpop.f32.mrb[71].mxu0  ;;  %6263 = vmatpush3.bf16.msra.mxu1 %v6968_v59  ;;  %6375 = vmatpush3.bf16.msra.mxu0 %v6970_v40  ;;  %v6899_v59 = vld [vmem:[%s7147_s13 + $0x394] ss:$72 sps:$4 sm:$0xff]  }
 0x185   : > { %v3353_v24 = vadd.f32 %v5648_v12, %v7590_v55  ;;  %v5651_v34 = vadd.f32 %v5650_v22, %v5649_v13  ;;  %v5763_v60 = vadd.f32 %v5762_v28, %v5761_v17  ;;  %v6896_v55 = vld [vmem:[%s7147_s13 + $0x300] ss:$72 sps:$4 sm:$0xff]  }
 0x186   : > { %3955 = vmatmul.mubr.bf16.gmra.mrb[176].mxu1 %v6885_v44  ;;  %4116 = vmatmul.mubr.bf16.gmra.mrb[176].mxu0 %v6886_v5 }
 0x187   : > { %v7855_v62 = vadd.f32 %v5760_v56, %v3353_v24  ;;  %v3356_v35 = vadd.f32 %v5651_v34, %v7596_v63  ;;  %3962 = vmatprep.mubr.bf16.mxu1 %v6891_v18  ;;  %4123 = vmatprep.mubr.bf16.mxu0 %v6893_v20  ;;  %v6901_v18 = vld [vmem:[%s7147_s13 + $0x388] ss:$72 sps:$4 sm:$0xff]   ;;  %v6907_v34 = vld [vmem:[%s7147_s13 + $0x41c] ss:$72 sps:$4 sm:$0xff]  }
 0x189   : > { %v7858_v8 = vadd.f32 %v5763_v60, %v3356_v35  ;;  %v5652_v38 = vpop.f32.mrb[72].mxu1  ;;  %v5764_v39 = vpop.f32.mrb[72].mxu0  ;;  %v6909_v60 = vld [vmem:[%s7147_s13 + $0x424] ss:$72 sps:$4 sm:$0xff]  }
 0x18a   : > { %v5653_v30 = vpop.f32.mrb[73].mxu1  ;;  %v5765_v46 = vpop.f32.mrb[73].mxu0 }
 0x18b   : > { %v5654_v49 = vadd.f32 %v5653_v30, %v5652_v38  ;;  %v5766_v52 = vadd.f32 %v5765_v46, %v5764_v39  ;;  %v5655_v53 = vpop.f32.mrb[74].mxu1  ;;  %v5767_v58 = vpop.f32.mrb[74].mxu0 }
 0x18c   : > { %v5656_v40 = vpop.f32.mrb[75].mxu1  ;;  %v5768_v2 = vpop.f32.mrb[75].mxu0 }
 0x18d   : > { %v3361_v63 = vadd.f32 %v5654_v49, %v7602_v7  ;;  %v5657_v4 = vadd.f32 %v5656_v40, %v5655_v53  ;;  %v5769_v43 = vadd.f32 %v5768_v2, %v5767_v58  ;;  %v6902_v7 = vld [vmem:[%s7147_s13 + $0x390] ss:$72 sps:$4 sm:$0xff]  }
 0x18e   : > { %3963 = vmatmul.mubr.bf16.gmra.mrb[180].mxu1 %v6895_v47  ;;  %4124 = vmatmul.mubr.bf16.gmra.mrb[180].mxu0 %v6896_v55 }
 0x18f   : > { %v7865_v50 = vadd.f32 %v5766_v52, %v3361_v63  ;;  %v3364_v44 = vadd.f32 %v5657_v4, %v7608_v15  ;;  %3970 = vmatprep.mubr.bf16.mxu1 %v6897_v32  ;;  %4131 = vmatprep.mubr.bf16.mxu0 %v6899_v59  ;;  %v6911_v32 = vld [vmem:[%s7147_s13 + $0x418] ss:$72 sps:$4 sm:$0xff]   ;;  %v6913_v4 = vld [vmem:[%s7147_s13 + $0x4ac] ss:$72 sps:$4 sm:$0xff]  }
 0x191   : > { %v7868_v5 = vadd.f32 %v5769_v43, %v3364_v44  ;;  %v5658_v12 = vpop.f32.mrb[76].mxu1  ;;  %v5770_v56 = vpop.f32.mrb[76].mxu0  ;;  %v6915_v43 = vld [vmem:[%s7147_s13 + $0x4b4] ss:$72 sps:$4 sm:$0xff]  }
 0x192   : > { %v5659_v13 = vpop.f32.mrb[77].mxu1  ;;  %v5771_v17 = vpop.f32.mrb[77].mxu0 }
 0x193   : > { %v5660_v20 = vadd.f32 %v5659_v13, %v5658_v12  ;;  %v5772_v22 = vadd.f32 %v5771_v17, %v5770_v56  ;;  %v5661_v28 = vpop.f32.mrb[78].mxu1  ;;  %v5773_v24 = vpop.f32.mrb[78].mxu0 }
 0x194   : > { %v5662_v35 = vpop.f32.mrb[79].mxu1  ;;  %v5774_v38 = vpop.f32.mrb[79].mxu0 }
 0x195   : > { %v3369_v15 = vadd.f32 %v5660_v20, %v7614_v23  ;;  %v5663_v39 = vadd.f32 %v5662_v35, %v5661_v28  ;;  %v5775_v30 = vadd.f32 %v5774_v38, %v5773_v24  ;;  %v6912_v23 = vld [vmem:[%s7147_s13 + $0x420] ss:$72 sps:$4 sm:$0xff]  }
 0x196   : > { %3971 = vmatmul.mubr.bf16.gmra.mrb[184].mxu1 %v6901_v18  ;;  %4132 = vmatmul.mubr.bf16.gmra.mrb[184].mxu0 %v6902_v7 }
 0x197   : > { %v7875_v46 = vadd.f32 %v5772_v22, %v3369_v15  ;;  %v3372_v47 = vadd.f32 %v5663_v39, %v7620_v33  ;;  %3978 = vmatprep.mubr.bf16.mxu1 %v6907_v34  ;;  %4139 = vmatprep.mubr.bf16.mxu0 %v6909_v60  ;;  %v6917_v34 = vld [vmem:[%s7147_s13 + $0x4a8] ss:$72 sps:$4 sm:$0xff]   ;;  %v6923_v39 = vld [vmem:[%s7147_s13 + $0x53c] ss:$72 sps:$4 sm:$0xff]  }
 0x199   : > { %v7878_v55 = vadd.f32 %v5775_v30, %v3372_v47  ;;  %v5664_v49 = vpop.f32.mrb[80].mxu1  ;;  %v5776_v52 = vpop.f32.mrb[80].mxu0  ;;  %v6925_v30 = vld [vmem:[%s7147_s13 + $0x544] ss:$72 sps:$4 sm:$0xff]  }
 0x19a   : > { %v5665_v53 = vpop.f32.mrb[81].mxu1  ;;  %v5777_v58 = vpop.f32.mrb[81].mxu0 }
 0x19b   : > { %v5666_v59 = vadd.f32 %v5665_v53, %v5664_v49  ;;  %v5778_v40 = vadd.f32 %v5777_v58, %v5776_v52  ;;  %v5667_v2 = vpop.f32.mrb[82].mxu1  ;;  %v5779_v63 = vpop.f32.mrb[82].mxu0 }
 0x19c   : > { %v5668_v44 = vpop.f32.mrb[83].mxu1  ;;  %v5780_v12 = vpop.f32.mrb[83].mxu0 }
 0x19d   : > { %v3377_v33 = vadd.f32 %v5666_v59, %v7626_v41  ;;  %v5669_v56 = vadd.f32 %v5668_v44, %v5667_v2  ;;  %v5781_v13 = vadd.f32 %v5780_v12, %v5779_v63  ;;  %v6918_v41 = vld [vmem:[%s7147_s13 + $0x4b0] ss:$72 sps:$4 sm:$0xff]  }
 0x19e   : > { %3979 = vmatmul.mubr.bf16.gmra.mrb[188].mxu1 %v6911_v32  ;;  %4140 = vmatmul.mubr.bf16.gmra.mrb[188].mxu0 %v6912_v23 }
 0x19f   : > { %v7885_v17 = vadd.f32 %v5778_v40, %v3377_v33  ;;  %v3380_v18 = vadd.f32 %v5669_v56, %v7632_v51  ;;  %3986 = vmatprep.mubr.bf16.mxu1 %v6913_v4  ;;  %4147 = vmatprep.mubr.bf16.mxu0 %v6915_v43  ;;  %v6927_v4 = vld [vmem:[%s7147_s13 + $0x538] ss:$72 sps:$4 sm:$0xff]   ;;  %v6929_v56 = vld [vmem:[%s7147_s13 + $0x5cc] ss:$72 sps:$4 sm:$0xff]  }
 0x1a1   : > { %v7888_v7 = vadd.f32 %v5781_v13, %v3380_v18  ;;  %v5670_v20 = vpop.f32.mrb[84].mxu1  ;;  %v5782_v22 = vpop.f32.mrb[84].mxu0  ;;  %v6931_v13 = vld [vmem:[%s7147_s13 + $0x5d4] ss:$72 sps:$4 sm:$0xff]  }
 0x1a2   : > { %v5671_v28 = vpop.f32.mrb[85].mxu1  ;;  %v5783_v24 = vpop.f32.mrb[85].mxu0 }
 0x1a3   : > { %v5672_v60 = vadd.f32 %v5671_v28, %v5670_v20  ;;  %v5784_v35 = vadd.f32 %v5783_v24, %v5782_v22  ;;  %v5673_v38 = vpop.f32.mrb[86].mxu1  ;;  %v5785_v15 = vpop.f32.mrb[86].mxu0 }
 0x1a4   : > { %v5674_v47 = vpop.f32.mrb[87].mxu1  ;;  %v5786_v49 = vpop.f32.mrb[87].mxu0 }
 0x1a5   : > { %v3385_v51 = vadd.f32 %v5672_v60, %v7638_v61  ;;  %v5675_v52 = vadd.f32 %v5674_v47, %v5673_v38  ;;  %v5787_v53 = vadd.f32 %v5786_v49, %v5785_v15  ;;  %v6928_v61 = vld [vmem:[%s7147_s13 + $0x540] ss:$72 sps:$4 sm:$0xff]  }
 0x1a6   : > { %3987 = vmatmul.mubr.bf16.gmra.mrb[192].mxu1 %v6917_v34  ;;  %4148 = vmatmul.mubr.bf16.gmra.mrb[192].mxu0 %v6918_v41 }
 0x1a7   : > { %v7895_v58 = vadd.f32 %v5784_v35, %v3385_v51  ;;  %v3388_v32 = vadd.f32 %v5675_v52, %v7644_v9  ;;  %3994 = vmatprep.mubr.bf16.mxu1 %v6923_v39  ;;  %4155 = vmatprep.mubr.bf16.mxu0 %v6925_v30  ;;  %v6933_v39 = vld [vmem:[%s7147_s13 + $0x5c8] ss:$72 sps:$4 sm:$0xff]   ;;  %v6939_v52 = vld [vmem:[%s7147_s13 + $0x65c] ss:$72 sps:$4 sm:$0xff]  }
 0x1a9   : > { %v7898_v23 = vadd.f32 %v5787_v53, %v3388_v32  ;;  %v5676_v59 = vpop.f32.mrb[88].mxu1  ;;  %v5788_v40 = vpop.f32.mrb[88].mxu0  ;;  %v6941_v53 = vld [vmem:[%s7147_s13 + $0x664] ss:$72 sps:$4 sm:$0xff]  }
 0x1aa   : > { %v5677_v2 = vpop.f32.mrb[89].mxu1  ;;  %v5789_v63 = vpop.f32.mrb[89].mxu0 }
 0x1ab   : > { %v5678_v43 = vadd.f32 %v5677_v2, %v5676_v59  ;;  %v5790_v44 = vadd.f32 %v5789_v63, %v5788_v40  ;;  %v5679_v12 = vpop.f32.mrb[90].mxu1  ;;  %v5791_v33 = vpop.f32.mrb[90].mxu0 }
 0x1ac   : > { %v5680_v18 = vpop.f32.mrb[91].mxu1  ;;  %v5792_v20 = vpop.f32.mrb[91].mxu0 }
 0x1ad   : > { %v3393_v9 = vadd.f32 %v5678_v43, %v7650_v19  ;;  %v5681_v22 = vadd.f32 %v5680_v18, %v5679_v12  ;;  %v5793_v28 = vadd.f32 %v5792_v20, %v5791_v33  ;;  %v6934_v19 = vld [vmem:[%s7147_s13 + $0x5d0] ss:$72 sps:$4 sm:$0xff]  }
 0x1ae   : > { %3995 = vmatmul.mubr.bf16.gmra.mrb[196].mxu1 %v6927_v4  ;;  %4156 = vmatmul.mubr.bf16.gmra.mrb[196].mxu0 %v6928_v61 }
 0x1af   : > { %v7905_v24 = vadd.f32 %v5790_v44, %v3393_v9  ;;  %v3396_v34 = vadd.f32 %v5681_v22, %v7656_v29  ;;  %4002 = vmatprep.mubr.bf16.mxu1 %v6929_v56  ;;  %4163 = vmatprep.mubr.bf16.mxu0 %v6931_v13  ;;  %v6943_v56 = vld [vmem:[%s7147_s13 + $0x658] ss:$72 sps:$4 sm:$0xff]   ;;  %v6945_v22 = vld [vmem:[%s7147_s13 + $0x6ec] ss:$72 sps:$4 sm:$0xff]  }
 0x1b1   : > { %v7908_v41 = vadd.f32 %v5793_v28, %v3396_v34  ;;  %v5682_v60 = vpop.f32.mrb[92].mxu1  ;;  %v5794_v35 = vpop.f32.mrb[92].mxu0  ;;  %v6947_v28 = vld [vmem:[%s7147_s13 + $0x6f4] ss:$72 sps:$4 sm:$0xff]  }
 0x1b2   : > { %v5683_v38 = vpop.f32.mrb[93].mxu1  ;;  %v5795_v15 = vpop.f32.mrb[93].mxu0 }
 0x1b3   : > { %v5684_v30 = vadd.f32 %v5683_v38, %v5682_v60  ;;  %v5796_v47 = vadd.f32 %v5795_v15, %v5794_v35  ;;  %v5685_v49 = vpop.f32.mrb[94].mxu1  ;;  %v5797_v51 = vpop.f32.mrb[94].mxu0 }
 0x1b4   : > { %v5686_v32 = vpop.f32.mrb[95].mxu1  ;;  %v5798_v59 = vpop.f32.mrb[95].mxu0 }
 0x1b5   : > { %v3401_v29 = vadd.f32 %v5684_v30, %v7662_v45  ;;  %v5687_v40 = vadd.f32 %v5686_v32, %v5685_v49  ;;  %v5799_v2 = vadd.f32 %v5798_v59, %v5797_v51  ;;  %v6944_v45 = vld [vmem:[%s7147_s13 + $0x660] ss:$72 sps:$4 sm:$0xff]  }
 0x1b6   : > { %4003 = vmatmul.mubr.bf16.gmra.mrb[200].mxu1 %v6933_v39  ;;  %4164 = vmatmul.mubr.bf16.gmra.mrb[200].mxu0 %v6934_v19 }
 0x1b7   : > { %v7915_v63 = vadd.f32 %v5796_v47, %v3401_v29  ;;  %v3404_v4 = vadd.f32 %v5687_v40, %v7668_v57  ;;  %4010 = vmatprep.mubr.bf16.mxu1 %v6939_v52  ;;  %4171 = vmatprep.mubr.bf16.mxu0 %v6941_v53  ;;  %v6949_v52 = vld [vmem:[%s7147_s13 + $0x6e8] ss:$72 sps:$4 sm:$0xff]   ;;  %v6955_v40 = vld [vmem:[%s7147_s13 + $0x77c] ss:$72 sps:$4 sm:$0xff]  }
 0x1b9   : > { %v7918_v61 = vadd.f32 %v5799_v2, %v3404_v4  ;;  %v5816_v43 = vpop.f32.mrb[96].mxu1  ;;  %v5928_v44 = vpop.f32.mrb[96].mxu0  ;;  %v6957_v2 = vld [vmem:[%s7147_s13 + $0x784] ss:$72 sps:$4 sm:$0xff]  }
 0x1ba   : > { %v5817_v12 = vpop.f32.mrb[97].mxu1  ;;  %v5929_v33 = vpop.f32.mrb[97].mxu0 }
 0x1bb   : > { %v5818_v13 = vadd.f32 %v5817_v12, %v5816_v43  ;;  %v5930_v18 = vadd.f32 %v5929_v33, %v5928_v44  ;;  %v5819_v20 = vpop.f32.mrb[98].mxu1  ;;  %v5931_v9 = vpop.f32.mrb[98].mxu0 }
 0x1bc   : > { %v5820_v34 = vpop.f32.mrb[99].mxu1  ;;  %v5932_v60 = vpop.f32.mrb[99].mxu0 }
 0x1bd   : > { %v3603_v57 = vadd.f32 %v5818_v13, %v7675_v25  ;;  %v5821_v35 = vadd.f32 %v5820_v34, %v5819_v20  ;;  %v5933_v38 = vadd.f32 %v5932_v60, %v5931_v9  ;;  %v6950_v25 = vld [vmem:[%s7147_s13 + $0x6f0] ss:$72 sps:$4 sm:$0xff]  }
 0x1be   : > { %4011 = vmatmul.mubr.bf16.gmra.mrb[204].mxu1 %v6943_v56  ;;  %4172 = vmatmul.mubr.bf16.gmra.mrb[204].mxu0 %v6944_v45 }
 0x1bf   : > { %v7925_v15 = vadd.f32 %v5930_v18, %v3603_v57  ;;  %v3606_v39 = vadd.f32 %v5821_v35, %v7678_v27  ;;  %4018 = vmatprep.mubr.bf16.mxu1 %v6945_v22  ;;  %4179 = vmatprep.mubr.bf16.mxu0 %v6947_v28  ;;  %v6959_v22 = vld [vmem:[%s7147_s13 + $0x778] ss:$72 sps:$4 sm:$0xff]   ;;  %v6961_v35 = vld [vmem:[%s7147_s13 + $0x80c] ss:$72 sps:$4 sm:$0xff]  }
 0x1c1   : > { %v7928_v19 = vadd.f32 %v5933_v38, %v3606_v39  ;;  %v5822_v30 = vpop.f32.mrb[100].mxu1  ;;  %v5934_v47 = vpop.f32.mrb[100].mxu0  ;;  %v6963_v38 = vld [vmem:[%s7147_s13 + $0x814] ss:$72 sps:$4 sm:$0xff]  }
 0x1c2   : > { %v5823_v49 = vpop.f32.mrb[101].mxu1  ;;  %v5935_v51 = vpop.f32.mrb[101].mxu0 }
 0x1c3   : > { %v5824_v53 = vadd.f32 %v5823_v49, %v5822_v30  ;;  %v5936_v32 = vadd.f32 %v5935_v51, %v5934_v47  ;;  %v5825_v59 = vpop.f32.mrb[102].mxu1  ;;  %v5937_v29 = vpop.f32.mrb[102].mxu0 }
 0x1c4   : > { %v5826_v4 = vpop.f32.mrb[103].mxu1  ;;  %v5938_v43 = vpop.f32.mrb[103].mxu0 }
 0x1c5   : > { %v3611_v27 = vadd.f32 %v5824_v53, %v7685_v1  ;;  %v5827_v44 = vadd.f32 %v5826_v4, %v5825_v59  ;;  %v5939_v12 = vadd.f32 %v5938_v43, %v5937_v29  ;;  %v6960_v1 = vld [vmem:[%s7147_s13 + $0x780] ss:$72 sps:$4 sm:$0xff]  }
 0x1c6   : > { %4019 = vmatmul.mubr.bf16.gmra.mrb[208].mxu1 %v6949_v52  ;;  %4180 = vmatmul.mubr.bf16.gmra.mrb[208].mxu0 %v6950_v25 }
 0x1c7   : > { %v7935_v33 = vadd.f32 %v5936_v32, %v3611_v27  ;;  %v3614_v56 = vadd.f32 %v5827_v44, %v7688_v3  ;;  %4026 = vmatprep.mubr.bf16.mxu1 %v6955_v40  ;;  %4187 = vmatprep.mubr.bf16.mxu0 %v6957_v2  ;;  %v6965_v40 = vld [vmem:[%s7147_s13 + $0x808] ss:$72 sps:$4 sm:$0xff]   ;;  %v6971_v44 = vld [vmem:[%s7147_s13 + $0x89c] ss:$72 sps:$4 sm:$0xff]  }
 0x1c9   : > { %v7938_v45 = vadd.f32 %v5939_v12, %v3614_v56  ;;  %v5828_v13 = vpop.f32.mrb[104].mxu1  ;;  %v5940_v18 = vpop.f32.mrb[104].mxu0  ;;  %v6973_v12 = vld [vmem:[%s7147_s13 + $0x8a4] ss:$72 sps:$4 sm:$0xff]  }
 0x1ca   : > { %v5829_v20 = vpop.f32.mrb[105].mxu1  ;;  %v5941_v9 = vpop.f32.mrb[105].mxu0 }
 0x1cb   : > { %v5830_v28 = vadd.f32 %v5829_v20, %v5828_v13  ;;  %v5942_v34 = vadd.f32 %v5941_v9, %v5940_v18  ;;  %v5831_v60 = vpop.f32.mrb[106].mxu1  ;;  %v5943_v57 = vpop.f32.mrb[106].mxu0 }
 0x1cc   : > { %v5832_v39 = vpop.f32.mrb[107].mxu1  ;;  %v5944_v30 = vpop.f32.mrb[107].mxu0 }
 0x1cd   : > { %v3619_v3 = vadd.f32 %v5830_v28, %v7695_v37  ;;  %v5833_v47 = vadd.f32 %v5832_v39, %v5831_v60  ;;  %v5945_v49 = vadd.f32 %v5944_v30, %v5943_v57  ;;  %v6966_v37 = vld [vmem:[%s7147_s13 + $0x810] ss:$72 sps:$4 sm:$0xff]  }
 0x1ce   : > { %4027 = vmatmul.mubr.bf16.gmra.mrb[212].mxu1 %v6959_v22  ;;  %4188 = vmatmul.mubr.bf16.gmra.mrb[212].mxu0 %v6960_v1 }
 0x1cf   : > { %v7945_v51 = vadd.f32 %v5942_v34, %v3619_v3  ;;  %v3622_v52 = vadd.f32 %v5833_v47, %v7698_v31  ;;  %4034 = vmatprep.mubr.bf16.mxu1 %v6961_v35  ;;  %4195 = vmatprep.mubr.bf16.mxu0 %v6963_v38  ;;  %v6975_v35 = vld [vmem:[%s7147_s13 + $0x898] ss:$72 sps:$4 sm:$0xff]   ;;  %v6979_v47 = vld [vmem:[%s7147_s13 + $0x3c] ss:$72 sps:$4 sm:$0xff]  }
 0x1d1   : > { %v7948_v25 = vadd.f32 %v5945_v49, %v3622_v52  ;;  %v5834_v53 = vpop.f32.mrb[108].mxu1  ;;  %v5946_v32 = vpop.f32.mrb[108].mxu0  ;;  %v6982_v49 = vld [vmem:[%s7147_s13 + $0x44] ss:$72 sps:$4 sm:$0xff]  }
 0x1d2   : > { %v5835_v59 = vpop.f32.mrb[109].mxu1  ;;  %v5947_v29 = vpop.f32.mrb[109].mxu0 }
 0x1d3   : > { %v5836_v2 = vadd.f32 %v5835_v59, %v5834_v53  ;;  %v5948_v4 = vadd.f32 %v5947_v29, %v5946_v32  ;;  %v5837_v43 = vpop.f32.mrb[110].mxu1  ;;  %v5949_v27 = vpop.f32.mrb[110].mxu0 }
 0x1d4   : > { %v5838_v56 = vpop.f32.mrb[111].mxu1  ;;  %v5950_v13 = vpop.f32.mrb[111].mxu0 }
 0x1d5   : > { %v3627_v31 = vadd.f32 %v5836_v2, %v7705_v11  ;;  %v5839_v18 = vadd.f32 %v5838_v56, %v5837_v43  ;;  %v5951_v20 = vadd.f32 %v5950_v13, %v5949_v27  ;;  %v6976_v11 = vld [vmem:[%s7147_s13 + $0x8a0] ss:$72 sps:$4 sm:$0xff]  }
 0x1d6   : > { %4035 = vmatmul.mubr.bf16.gmra.mrb[216].mxu1 %v6965_v40  ;;  %4196 = vmatmul.mubr.bf16.gmra.mrb[216].mxu0 %v6966_v37 }
 0x1d7   : > { %v7955_v9 = vadd.f32 %v5948_v4, %v3627_v31  ;;  %v3630_v22 = vadd.f32 %v5839_v18, %v7708_v54  ;;  %4042 = vmatprep.mubr.bf16.mxu1 %v6971_v44  ;;  %4203 = vmatprep.mubr.bf16.mxu0 %v6973_v12  ;;  %v6977_v44 = vld [vmem:[%s7147_s13 + $0x38] ss:$72 sps:$4 sm:$0xff]   ;;  %v6983_v18 = vld [vmem:[%s7147_s13 + $0xcc] ss:$72 sps:$4 sm:$0xff]  }
 0x1d9   : > { %v7958_v1 = vadd.f32 %v5951_v20, %v3630_v22  ;;  %v5840_v28 = vpop.f32.mrb[112].mxu1  ;;  %v5952_v34 = vpop.f32.mrb[112].mxu0  ;;  %v6985_v20 = vld [vmem:[%s7147_s13 + $0xd4] ss:$72 sps:$4 sm:$0xff]  }
 0x1da   : > { %v5841_v60 = vpop.f32.mrb[113].mxu1  ;;  %v5953_v57 = vpop.f32.mrb[113].mxu0 }
 0x1db   : > { %v5842_v38 = vadd.f32 %v5841_v60, %v5840_v28  ;;  %v5954_v39 = vadd.f32 %v5953_v57, %v5952_v34  ;;  %v5843_v30 = vpop.f32.mrb[114].mxu1  ;;  %v5955_v3 = vpop.f32.mrb[114].mxu0 }
 0x1dc   : > { %v5844_v52 = vpop.f32.mrb[115].mxu1  ;;  %v5956_v53 = vpop.f32.mrb[115].mxu0 }
 0x1dd   : > { %v3635_v54 = vadd.f32 %v5842_v38, %v7715_v48  ;;  %v5845_v32 = vadd.f32 %v5844_v52, %v5843_v30  ;;  %v5957_v59 = vadd.f32 %v5956_v53, %v5955_v3  ;;  %v6980_v48 = vld [vmem:[%s7147_s13 + $0x40] ss:$72 sps:$4 sm:$0xff]  }
 0x1de   : > { %4043 = vmatmul.mubr.bf16.gmra.mrb[220].mxu1 %v6975_v35  ;;  %4204 = vmatmul.mubr.bf16.gmra.mrb[220].mxu0 %v6976_v11 }
 0x1df   : > { %v7965_v29 = vadd.f32 %v5954_v39, %v3635_v54  ;;  %v3638_v40 = vadd.f32 %v5845_v32, %v7718_v6  ;;  %4244 = vmatprep.mubr.bf16.mxu1 %v6979_v47  ;;  %4405 = vmatprep.mubr.bf16.mxu0 %v6982_v49  ;;  %v6987_v47 = vld [vmem:[%s7147_s13 + $0xc8] ss:$72 sps:$4 sm:$0xff]   ;;  %v6989_v32 = vld [vmem:[%s7147_s13 + $0x15c] ss:$72 sps:$4 sm:$0xff]  }
 0x1e1   : > { %v7968_v37 = vadd.f32 %v5957_v59, %v3638_v40  ;;  %v5846_v2 = vpop.f32.mrb[116].mxu1  ;;  %v5958_v4 = vpop.f32.mrb[116].mxu0  ;;  %v6991_v59 = vld [vmem:[%s7147_s13 + $0x164] ss:$72 sps:$4 sm:$0xff]  }
 0x1e2   : > { %v5847_v43 = vpop.f32.mrb[117].mxu1  ;;  %v5959_v27 = vpop.f32.mrb[117].mxu0 }
 0x1e3   : > { %v5848_v12 = vadd.f32 %v5847_v43, %v5846_v2  ;;  %v5960_v56 = vadd.f32 %v5959_v27, %v5958_v4  ;;  %v5849_v13 = vpop.f32.mrb[118].mxu1  ;;  %v5961_v31 = vpop.f32.mrb[118].mxu0 }
 0x1e4   : > { %v5850_v22 = vpop.f32.mrb[119].mxu1  ;;  %v5962_v28 = vpop.f32.mrb[119].mxu0 }
 0x1e5   : > { %v3643_v6 = vadd.f32 %v5848_v12, %v7737_v26  ;;  %v5851_v34 = vadd.f32 %v5850_v22, %v5849_v13  ;;  %v5963_v60 = vadd.f32 %v5962_v28, %v5961_v31  ;;  %v6988_v26 = vld [vmem:[%s7147_s13 + $0xd0] ss:$72 sps:$4 sm:$0xff]  }
 0x1e6   : > { %4245 = vmatmul.mubr.bf16.vlgmr.msra.gmra.mrb[224].mxu1 %v6977_v44  ;;  %4406 = vmatmul.mubr.bf16.vlgmr.msra.gmra.mrb[224].mxu0 %v6980_v48 }
 0x1e7   : > { %v7975_v57 = vadd.f32 %v5960_v56, %v3643_v6  ;;  %v3646_v35 = vadd.f32 %v5851_v34, %v7752_v36  ;;  %4252 = vmatprep.mubr.bf16.mxu1 %v6983_v18  ;;  %4413 = vmatprep.mubr.bf16.mxu0 %v6985_v20  ;;  %v6993_v18 = vld [vmem:[%s7147_s13 + $0x158] ss:$72 sps:$4 sm:$0xff]   ;;  %v6995_v34 = vld [vmem:[%s7147_s13 + $0x1ec] ss:$72 sps:$4 sm:$0xff]  }
 0x1e9   : > { %v7978_v11 = vadd.f32 %v5963_v60, %v3646_v35  ;;  %v5852_v38 = vpop.f32.mrb[120].mxu1  ;;  %v5964_v39 = vpop.f32.mrb[120].mxu0  ;;  %v6997_v60 = vld [vmem:[%s7147_s13 + $0x1f4] ss:$72 sps:$4 sm:$0xff]  }
 0x1ea   : > { %v5853_v30 = vpop.f32.mrb[121].mxu1  ;;  %v5965_v3 = vpop.f32.mrb[121].mxu0 }
 0x1eb   : > { %v5854_v49 = vadd.f32 %v5853_v30, %v5852_v38  ;;  %v5966_v52 = vadd.f32 %v5965_v3, %v5964_v39  ;;  %v5855_v53 = vpop.f32.mrb[122].mxu1  ;;  %v5967_v54 = vpop.f32.mrb[122].mxu0 }
 0x1ec   : > { %v5856_v40 = vpop.f32.mrb[123].mxu1  ;;  %v5968_v2 = vpop.f32.mrb[123].mxu0 }
 0x1ed   : > { %v3651_v36 = vadd.f32 %v5854_v49, %v7771_v16  ;;  %v5857_v4 = vadd.f32 %v5856_v40, %v5855_v53  ;;  %v5969_v43 = vadd.f32 %v5968_v2, %v5967_v54  ;;  %v6994_v16 = vld [vmem:[%s7147_s13 + $0x160] ss:$72 sps:$4 sm:$0xff]  }
 0x1ee   : > { %4253 = vmatmul.mubr.bf16.gmra.mrb[228].mxu1 %v6987_v47  ;;  %4414 = vmatmul.mubr.bf16.gmra.mrb[228].mxu0 %v6988_v26 }
 0x1ef   : > { %v7985_v27 = vadd.f32 %v5966_v52, %v3651_v36  ;;  %v3654_v44 = vadd.f32 %v5857_v4, %v7780_v21  ;;  %4260 = vmatprep.mubr.bf16.mxu1 %v6989_v32  ;;  %4421 = vmatprep.mubr.bf16.mxu0 %v6991_v59  ;;  %v6999_v32 = vld [vmem:[%s7147_s13 + $0x1e8] ss:$72 sps:$4 sm:$0xff]   ;;  %v7001_v4 = vld [vmem:[%s7147_s13 + $0x27c] ss:$72 sps:$4 sm:$0xff]  }
 0x1f1   : > { %v7988_v48 = vadd.f32 %v5969_v43, %v3654_v44  ;;  %v5858_v12 = vpop.f32.mrb[124].mxu1  ;;  %v5970_v56 = vpop.f32.mrb[124].mxu0  ;;  %v7003_v43 = vld [vmem:[%s7147_s13 + $0x284] ss:$72 sps:$4 sm:$0xff]  }
 0x1f2   : > { %v5859_v13 = vpop.f32.mrb[125].mxu1  ;;  %v5971_v31 = vpop.f32.mrb[125].mxu0 }
 0x1f3   : > { %v5860_v20 = vadd.f32 %v5859_v13, %v5858_v12  ;;  %v5972_v22 = vadd.f32 %v5971_v31, %v5970_v56  ;;  %v5861_v28 = vpop.f32.mrb[126].mxu1  ;;  %v5973_v6 = vpop.f32.mrb[126].mxu0 }
 0x1f4   : > { %v5862_v35 = vpop.f32.mrb[127].mxu1  ;;  %v5974_v38 = vpop.f32.mrb[127].mxu0 }
 0x1f5   : > { %v3659_v21 = vadd.f32 %v5860_v20, %v7805_v14  ;;  %v5863_v39 = vadd.f32 %v5862_v35, %v5861_v28  ;;  %v5975_v30 = vadd.f32 %v5974_v38, %v5973_v6  ;;  %v7000_v14 = vld [vmem:[%s7147_s13 + $0x1f0] ss:$72 sps:$4 sm:$0xff]  }
 0x1f6   : > { %4261 = vmatmul.mubr.bf16.gmra.mrb[232].mxu1 %v6993_v18  ;;  %4422 = vmatmul.mubr.bf16.gmra.mrb[232].mxu0 %v6994_v16 }
 0x1f7   : > { %v7995_v3 = vadd.f32 %v5972_v22, %v3659_v21  ;;  %v3662_v47 = vadd.f32 %v5863_v39, %v7814_v10  ;;  %4268 = vmatprep.mubr.bf16.mxu1 %v6995_v34  ;;  %4429 = vmatprep.mubr.bf16.mxu0 %v6997_v60  ;;  %v7005_v34 = vld [vmem:[%s7147_s13 + $0x278] ss:$72 sps:$4 sm:$0xff]   ;;  %v7007_v39 = vld [vmem:[%s7147_s13 + $0x30c] ss:$72 sps:$4 sm:$0xff]  }
 0x1f9   : > { %v7998_v26 = vadd.f32 %v5975_v30, %v3662_v47  ;;  %v5864_v49 = vpop.f32.mrb[128].mxu1  ;;  %v5976_v52 = vpop.f32.mrb[128].mxu0  ;;  %v7009_v30 = vld [vmem:[%s7147_s13 + $0x314] ss:$72 sps:$4 sm:$0xff]  }
 0x1fa   : > { %v5865_v53 = vpop.f32.mrb[129].mxu1  ;;  %v5977_v54 = vpop.f32.mrb[129].mxu0 }
 0x1fb   : > { %v5866_v59 = vadd.f32 %v5865_v53, %v5864_v49  ;;  %v5978_v40 = vadd.f32 %v5977_v54, %v5976_v52  ;;  %v5867_v2 = vpop.f32.mrb[130].mxu1  ;;  %v5979_v36 = vpop.f32.mrb[130].mxu0 }
 0x1fc   : > { %v5868_v44 = vpop.f32.mrb[131].mxu1  ;;  %v5980_v12 = vpop.f32.mrb[131].mxu0 }
 0x1fd   : > { %v3667_v10 = vadd.f32 %v5866_v59, %v7839_v42  ;;  %v5869_v56 = vadd.f32 %v5868_v44, %v5867_v2  ;;  %v5981_v13 = vadd.f32 %v5980_v12, %v5979_v36  ;;  %v7006_v42 = vld [vmem:[%s7147_s13 + $0x280] ss:$72 sps:$4 sm:$0xff]  }
 0x1fe   : > { %4269 = vmatmul.mubr.bf16.gmra.mrb[236].mxu1 %v6999_v32  ;;  %4430 = vmatmul.mubr.bf16.gmra.mrb[236].mxu0 %v7000_v14 }
 0x1ff   : > { %v8005_v31 = vadd.f32 %v5978_v40, %v3667_v10  ;;  %v3670_v18 = vadd.f32 %v5869_v56, %v7848_v0  ;;  %4276 = vmatprep.mubr.bf16.mxu1 %v7001_v4  ;;  %4437 = vmatprep.mubr.bf16.mxu0 %v7003_v43  ;;  %v7011_v4 = vld [vmem:[%s7147_s13 + $0x308] ss:$72 sps:$4 sm:$0xff]   ;;  %v7013_v56 = vld [vmem:[%s7147_s13 + $0x39c] ss:$72 sps:$4 sm:$0xff]  }
 0x201   : > { %v8008_v16 = vadd.f32 %v5981_v13, %v3670_v18  ;;  %v5870_v20 = vpop.f32.mrb[132].mxu1  ;;  %v5982_v22 = vpop.f32.mrb[132].mxu0  ;;  %v7015_v13 = vld [vmem:[%s7147_s13 + $0x3a4] ss:$72 sps:$4 sm:$0xff]  }
 0x202   : > { %v5871_v28 = vpop.f32.mrb[133].mxu1  ;;  %v5983_v6 = vpop.f32.mrb[133].mxu0 }
 0x203   : > { %v5872_v60 = vadd.f32 %v5871_v28, %v5870_v20  ;;  %v5984_v35 = vadd.f32 %v5983_v6, %v5982_v22  ;;  %v5873_v38 = vpop.f32.mrb[134].mxu1  ;;  %v5985_v21 = vpop.f32.mrb[134].mxu0 }
 0x204   : > { %v5874_v47 = vpop.f32.mrb[135].mxu1  ;;  %v5986_v49 = vpop.f32.mrb[135].mxu0 }
 0x205   : > { %v3675_v0 = vadd.f32 %v5872_v60, %v7855_v62  ;;  %v5875_v52 = vadd.f32 %v5874_v47, %v5873_v38  ;;  %v5987_v53 = vadd.f32 %v5986_v49, %v5985_v21  ;;  %v7012_v62 = vld [vmem:[%s7147_s13 + $0x310] ss:$72 sps:$4 sm:$0xff]  }
 0x206   : > { %4277 = vmatmul.mubr.bf16.gmra.mrb[240].mxu1 %v7005_v34  ;;  %4438 = vmatmul.mubr.bf16.gmra.mrb[240].mxu0 %v7006_v42 }
 0x207   : > { %v8015_v54 = vadd.f32 %v5984_v35, %v3675_v0  ;;  %v3678_v32 = vadd.f32 %v5875_v52, %v7858_v8  ;;  %4284 = vmatprep.mubr.bf16.mxu1 %v7007_v39  ;;  %4445 = vmatprep.mubr.bf16.mxu0 %v7009_v30  ;;  %v7017_v39 = vld [vmem:[%s7147_s13 + $0x398] ss:$72 sps:$4 sm:$0xff]   ;;  %v7019_v52 = vld [vmem:[%s7147_s13 + $0x42c] ss:$72 sps:$4 sm:$0xff]  }
 0x209   : > { %v8018_v14 = vadd.f32 %v5987_v53, %v3678_v32  ;;  %v5876_v59 = vpop.f32.mrb[136].mxu1  ;;  %v5988_v40 = vpop.f32.mrb[136].mxu0  ;;  %v7021_v53 = vld [vmem:[%s7147_s13 + $0x434] ss:$72 sps:$4 sm:$0xff]  }
 0x20a   : > { %v5877_v2 = vpop.f32.mrb[137].mxu1  ;;  %v5989_v36 = vpop.f32.mrb[137].mxu0 }
 0x20b   : > { %v5878_v43 = vadd.f32 %v5877_v2, %v5876_v59  ;;  %v5990_v44 = vadd.f32 %v5989_v36, %v5988_v40  ;;  %v5879_v12 = vpop.f32.mrb[138].mxu1  ;;  %v5991_v10 = vpop.f32.mrb[138].mxu0 }
 0x20c   : > { %v5880_v18 = vpop.f32.mrb[139].mxu1  ;;  %v5992_v20 = vpop.f32.mrb[139].mxu0 }
 0x20d   : > { %v3683_v8 = vadd.f32 %v5878_v43, %v7865_v50  ;;  %v5881_v22 = vadd.f32 %v5880_v18, %v5879_v12  ;;  %v5993_v28 = vadd.f32 %v5992_v20, %v5991_v10  ;;  %v7018_v50 = vld [vmem:[%s7147_s13 + $0x3a0] ss:$72 sps:$4 sm:$0xff]  }
 0x20e   : > { %4285 = vmatmul.mubr.bf16.gmra.mrb[244].mxu1 %v7011_v4  ;;  %4446 = vmatmul.mubr.bf16.gmra.mrb[244].mxu0 %v7012_v62 }
 0x20f   : > { %v8025_v6 = vadd.f32 %v5990_v44, %v3683_v8  ;;  %v3686_v34 = vadd.f32 %v5881_v22, %v7868_v5  ;;  %4292 = vmatprep.mubr.bf16.mxu1 %v7013_v56  ;;  %4453 = vmatprep.mubr.bf16.mxu0 %v7015_v13  ;;  %v7023_v56 = vld [vmem:[%s7147_s13 + $0x428] ss:$72 sps:$4 sm:$0xff]   ;;  %v7027_v22 = vld [vmem:[%s7147_s13 + $0x4bc] ss:$72 sps:$4 sm:$0xff]  }
 0x211   : > { %v8028_v42 = vadd.f32 %v5993_v28, %v3686_v34  ;;  %v5882_v60 = vpop.f32.mrb[140].mxu1  ;;  %v5994_v35 = vpop.f32.mrb[140].mxu0  ;;  %v7030_v28 = vld [vmem:[%s7147_s13 + $0x4c4] ss:$72 sps:$4 sm:$0xff]  }
 0x212   : > { %v5883_v38 = vpop.f32.mrb[141].mxu1  ;;  %v5995_v21 = vpop.f32.mrb[141].mxu0 }
 0x213   : > { %v5884_v30 = vadd.f32 %v5883_v38, %v5882_v60  ;;  %v5996_v47 = vadd.f32 %v5995_v21, %v5994_v35  ;;  %v5885_v49 = vpop.f32.mrb[142].mxu1  ;;  %v5997_v0 = vpop.f32.mrb[142].mxu0 }
 0x214   : > { %v5886_v32 = vpop.f32.mrb[143].mxu1  ;;  %v5998_v59 = vpop.f32.mrb[143].mxu0 }
 0x215   : > { %v3691_v5 = vadd.f32 %v5884_v30, %v7875_v46  ;;  %v5887_v40 = vadd.f32 %v5886_v32, %v5885_v49  ;;  %v5999_v2 = vadd.f32 %v5998_v59, %v5997_v0  ;;  %v7024_v46 = vld [vmem:[%s7147_s13 + $0x430] ss:$72 sps:$4 sm:$0xff]  }
 0x216   : > { %4293 = vmatmul.mubr.bf16.gmra.mrb[248].mxu1 %v7017_v39  ;;  %4454 = vmatmul.mubr.bf16.gmra.mrb[248].mxu0 %v7018_v50 }
 0x217   : > { %v8035_v36 = vadd.f32 %v5996_v47, %v3691_v5  ;;  %v3694_v4 = vadd.f32 %v5887_v40, %v7878_v55  ;;  %4300 = vmatprep.mubr.bf16.mxu1 %v7019_v52  ;;  %4461 = vmatprep.mubr.bf16.mxu0 %v7021_v53  ;;  %v7025_v52 = vld [vmem:[%s7147_s13 + $0x4b8] ss:$72 sps:$4 sm:$0xff]   ;;  %v7033_v40 = vld [vmem:[%s7147_s13 + $0x54c] ss:$72 sps:$4 sm:$0xff]  }
 0x219   : > { %v8038_v62 = vadd.f32 %v5999_v2, %v3694_v4  ;;  %v5888_v43 = vpop.f32.mrb[144].mxu1  ;;  %v6000_v44 = vpop.f32.mrb[144].mxu0  ;;  %v7036_v2 = vld [vmem:[%s7147_s13 + $0x554] ss:$72 sps:$4 sm:$0xff]  }
 0x21a   : > { %v5889_v12 = vpop.f32.mrb[145].mxu1  ;;  %v6001_v10 = vpop.f32.mrb[145].mxu0 }
 0x21b   : > { %v5890_v13 = vadd.f32 %v5889_v12, %v5888_v43  ;;  %v6002_v18 = vadd.f32 %v6001_v10, %v6000_v44  ;;  %v5891_v20 = vpop.f32.mrb[146].mxu1  ;;  %v6003_v8 = vpop.f32.mrb[146].mxu0 }
 0x21c   : > { %v5892_v34 = vpop.f32.mrb[147].mxu1  ;;  %v6004_v60 = vpop.f32.mrb[147].mxu0 }
 0x21d   : > { %v3699_v55 = vadd.f32 %v5890_v13, %v7885_v17  ;;  %v5893_v35 = vadd.f32 %v5892_v34, %v5891_v20  ;;  %v6005_v38 = vadd.f32 %v6004_v60, %v6003_v8  ;;  %v7028_v17 = vld [vmem:[%s7147_s13 + $0x4c0] ss:$72 sps:$4 sm:$0xff]  }
 0x21e   : > { %4301 = vmatmul.mubr.bf16.gmra.mrb[252].mxu1 %v7023_v56  ;;  %4462 = vmatmul.mubr.bf16.gmra.mrb[252].mxu0 %v7024_v46 }
 0x21f   : > { %v8045_v21 = vadd.f32 %v6002_v18, %v3699_v55  ;;  %v3702_v39 = vadd.f32 %v5893_v35, %v7888_v7  ;;  %4308 = vmatprep.mubr.bf16.mxu1 %v7027_v22  ;;  %4469 = vmatprep.mubr.bf16.mxu0 %v7030_v28  ;;  %v7031_v22 = vld [vmem:[%s7147_s13 + $0x548] ss:$72 sps:$4 sm:$0xff]   ;;  %v7039_v35 = vld [vmem:[%s7147_s13 + $0x5dc] ss:$72 sps:$4 sm:$0xff]  }
 0x221   : > { %v8048_v50 = vadd.f32 %v6005_v38, %v3702_v39  ;;  %v5894_v30 = vpop.f32.mrb[148].mxu1  ;;  %v6006_v47 = vpop.f32.mrb[148].mxu0  ;;  %v7042_v38 = vld [vmem:[%s7147_s13 + $0x5e4] ss:$72 sps:$4 sm:$0xff]  }
 0x222   : > { %v5895_v49 = vpop.f32.mrb[149].mxu1  ;;  %v6007_v0 = vpop.f32.mrb[149].mxu0 }
 0x223   : > { %v5896_v53 = vadd.f32 %v5895_v49, %v5894_v30  ;;  %v6008_v32 = vadd.f32 %v6007_v0, %v6006_v47  ;;  %v5897_v59 = vpop.f32.mrb[150].mxu1  ;;  %v6009_v5 = vpop.f32.mrb[150].mxu0 }
 0x224   : > { %v5898_v4 = vpop.f32.mrb[151].mxu1  ;;  %v6010_v43 = vpop.f32.mrb[151].mxu0 }
 0x225   : > { %v3707_v7 = vadd.f32 %v5896_v53, %v7895_v58  ;;  %v5899_v44 = vadd.f32 %v5898_v4, %v5897_v59  ;;  %v6011_v12 = vadd.f32 %v6010_v43, %v6009_v5  ;;  %v7034_v58 = vld [vmem:[%s7147_s13 + $0x550] ss:$72 sps:$4 sm:$0xff]  }
 0x226   : > { %4309 = vmatmul.mubr.bf16.gmra.mrb[0].mxu1 %v7025_v52  ;;  %4470 = vmatmul.mubr.bf16.gmra.mrb[0].mxu0 %v7028_v17 }
 0x227   : > { %v8055_v10 = vadd.f32 %v6008_v32, %v3707_v7  ;;  %v3710_v56 = vadd.f32 %v5899_v44, %v7898_v23  ;;  %4316 = vmatprep.mubr.bf16.mxu1 %v7033_v40  ;;  %4477 = vmatprep.mubr.bf16.mxu0 %v7036_v2  ;;  %v7037_v40 = vld [vmem:[%s7147_s13 + $0x5d8] ss:$72 sps:$4 sm:$0xff]   ;;  %v7045_v44 = vld [vmem:[%s7147_s13 + $0x66c] ss:$72 sps:$4 sm:$0xff]  }
 0x229   : > { %v8058_v46 = vadd.f32 %v6011_v12, %v3710_v56  ;;  %v5900_v13 = vpop.f32.mrb[152].mxu1  ;;  %v6012_v18 = vpop.f32.mrb[152].mxu0  ;;  %v7048_v12 = vld [vmem:[%s7147_s13 + $0x674] ss:$72 sps:$4 sm:$0xff]  }
 0x22a   : > { %v5901_v20 = vpop.f32.mrb[153].mxu1  ;;  %v6013_v8 = vpop.f32.mrb[153].mxu0 }
 0x22b   : > { %v5902_v28 = vadd.f32 %v5901_v20, %v5900_v13  ;;  %v6014_v34 = vadd.f32 %v6013_v8, %v6012_v18  ;;  %v5903_v60 = vpop.f32.mrb[154].mxu1  ;;  %v6015_v55 = vpop.f32.mrb[154].mxu0 }
 0x22c   : > { %v5904_v39 = vpop.f32.mrb[155].mxu1  ;;  %v6016_v30 = vpop.f32.mrb[155].mxu0 }
 0x22d   : > { %v3715_v23 = vadd.f32 %v5902_v28, %v7905_v24  ;;  %v5905_v47 = vadd.f32 %v5904_v39, %v5903_v60  ;;  %v6017_v49 = vadd.f32 %v6016_v30, %v6015_v55  ;;  %v7040_v24 = vld [vmem:[%s7147_s13 + $0x5e0] ss:$72 sps:$4 sm:$0xff]  }
 0x22e   : > { %4317 = vmatmul.mubr.bf16.gmra.mrb[4].mxu1 %v7031_v22  ;;  %4478 = vmatmul.mubr.bf16.gmra.mrb[4].mxu0 %v7034_v58 }
 0x22f   : > { %v8065_v0 = vadd.f32 %v6014_v34, %v3715_v23  ;;  %v3718_v52 = vadd.f32 %v5905_v47, %v7908_v41  ;;  %4324 = vmatprep.mubr.bf16.mxu1 %v7039_v35  ;;  %4485 = vmatprep.mubr.bf16.mxu0 %v7042_v38  ;;  %v7043_v35 = vld [vmem:[%s7147_s13 + $0x668] ss:$72 sps:$4 sm:$0xff]   ;;  %v7051_v47 = vld [vmem:[%s7147_s13 + $0x6fc] ss:$72 sps:$4 sm:$0xff]  }
 0x231   : > { %v8068_v17 = vadd.f32 %v6017_v49, %v3718_v52  ;;  %v5906_v53 = vpop.f32.mrb[156].mxu1  ;;  %v6018_v32 = vpop.f32.mrb[156].mxu0  ;;  %v7054_v49 = vld [vmem:[%s7147_s13 + $0x704] ss:$72 sps:$4 sm:$0xff]  }
 0x232   : > { %v5907_v59 = vpop.f32.mrb[157].mxu1  ;;  %v6019_v5 = vpop.f32.mrb[157].mxu0 }
 0x233   : > { %v5908_v2 = vadd.f32 %v5907_v59, %v5906_v53  ;;  %v6020_v4 = vadd.f32 %v6019_v5, %v6018_v32  ;;  %v5909_v43 = vpop.f32.mrb[158].mxu1  ;;  %v6021_v7 = vpop.f32.mrb[158].mxu0 }
 0x234   : > { %v5910_v56 = vpop.f32.mrb[159].mxu1  ;;  %v6022_v13 = vpop.f32.mrb[159].mxu0 }
 0x235   : > { %v3723_v41 = vadd.f32 %v5908_v2, %v7915_v63  ;;  %v5911_v18 = vadd.f32 %v5910_v56, %v5909_v43  ;;  %v6023_v20 = vadd.f32 %v6022_v13, %v6021_v7  ;;  %v7046_v63 = vld [vmem:[%s7147_s13 + $0x670] ss:$72 sps:$4 sm:$0xff]  }
 0x236   : > { %4325 = vmatmul.mubr.bf16.gmra.mrb[8].mxu1 %v7037_v40  ;;  %4486 = vmatmul.mubr.bf16.gmra.mrb[8].mxu0 %v7040_v24 }
 0x237   : > { %v8075_v8 = vadd.f32 %v6020_v4, %v3723_v41  ;;  %v3726_v22 = vadd.f32 %v5911_v18, %v7918_v61  ;;  %4332 = vmatprep.mubr.bf16.mxu1 %v7045_v44  ;;  %4493 = vmatprep.mubr.bf16.mxu0 %v7048_v12  ;;  %v7049_v44 = vld [vmem:[%s7147_s13 + $0x6f8] ss:$72 sps:$4 sm:$0xff]   ;;  %v7057_v18 = vld [vmem:[%s7147_s13 + $0x78c] ss:$72 sps:$4 sm:$0xff]  }
 0x239   : > { %v8078_v58 = vadd.f32 %v6023_v20, %v3726_v22  ;;  %v6040_v28 = vpop.f32.mrb[160].mxu1  ;;  %v6152_v34 = vpop.f32.mrb[160].mxu0  ;;  %v7060_v20 = vld [vmem:[%s7147_s13 + $0x794] ss:$72 sps:$4 sm:$0xff]  }
 0x23a   : > { %v6041_v60 = vpop.f32.mrb[161].mxu1  ;;  %v6153_v55 = vpop.f32.mrb[161].mxu0 }
 0x23b   : > { %v6042_v38 = vadd.f32 %v6041_v60, %v6040_v28  ;;  %v6154_v39 = vadd.f32 %v6153_v55, %v6152_v34  ;;  %v6043_v30 = vpop.f32.mrb[162].mxu1  ;;  %v6155_v23 = vpop.f32.mrb[162].mxu0 }
 0x23c   : > { %v6044_v52 = vpop.f32.mrb[163].mxu1  ;;  %v6156_v53 = vpop.f32.mrb[163].mxu0 }
 0x23d   : > { %v3925_v61 = vadd.f32 %v6042_v38, %v7925_v15  ;;  %v6045_v32 = vadd.f32 %v6044_v52, %v6043_v30  ;;  %v6157_v59 = vadd.f32 %v6156_v53, %v6155_v23  ;;  %v7052_v15 = vld [vmem:[%s7147_s13 + $0x700] ss:$72 sps:$4 sm:$0xff]  }
 0x23e   : > { %4333 = vmatmul.mubr.bf16.gmra.mrb[12].mxu1 %v7043_v35  ;;  %4494 = vmatmul.mubr.bf16.gmra.mrb[12].mxu0 %v7046_v63 }
 0x23f   : > { %v8085_v5 = vadd.f32 %v6154_v39, %v3925_v61  ;;  %v3928_v40 = vadd.f32 %v6045_v32, %v7928_v19  ;;  %4340 = vmatprep.mubr.bf16.mxu1 %v7051_v47  ;;  %4501 = vmatprep.mubr.bf16.mxu0 %v7054_v49  ;;  %v7055_v47 = vld [vmem:[%s7147_s13 + $0x788] ss:$72 sps:$4 sm:$0xff]   ;;  %v7063_v32 = vld [vmem:[%s7147_s13 + $0x81c] ss:$72 sps:$4 sm:$0xff]  }
 0x241   : > { %v8088_v24 = vadd.f32 %v6157_v59, %v3928_v40  ;;  %v6046_v2 = vpop.f32.mrb[164].mxu1  ;;  %v6158_v4 = vpop.f32.mrb[164].mxu0  ;;  %v7066_v59 = vld [vmem:[%s7147_s13 + $0x824] ss:$72 sps:$4 sm:$0xff]  }
 0x242   : > { %v6047_v43 = vpop.f32.mrb[165].mxu1  ;;  %v6159_v7 = vpop.f32.mrb[165].mxu0 }
 0x243   : > { %v6048_v12 = vadd.f32 %v6047_v43, %v6046_v2  ;;  %v6160_v56 = vadd.f32 %v6159_v7, %v6158_v4  ;;  %v6049_v13 = vpop.f32.mrb[166].mxu1  ;;  %v6161_v41 = vpop.f32.mrb[166].mxu0 }
 0x244   : > { %v6050_v22 = vpop.f32.mrb[167].mxu1  ;;  %v6162_v28 = vpop.f32.mrb[167].mxu0 }
 0x245   : > { %v3933_v19 = vadd.f32 %v6048_v12, %v7935_v33  ;;  %v6051_v34 = vadd.f32 %v6050_v22, %v6049_v13  ;;  %v6163_v60 = vadd.f32 %v6162_v28, %v6161_v41  ;;  %v7058_v33 = vld [vmem:[%s7147_s13 + $0x790] ss:$72 sps:$4 sm:$0xff]  }
 0x246   : > { %4341 = vmatmul.mubr.bf16.gmra.mrb[16].mxu1 %v7049_v44  ;;  %4502 = vmatmul.mubr.bf16.gmra.mrb[16].mxu0 %v7052_v15 }
 0x247   : > { %v8095_v55 = vadd.f32 %v6160_v56, %v3933_v19  ;;  %v3936_v35 = vadd.f32 %v6051_v34, %v7938_v45  ;;  %4348 = vmatprep.mubr.bf16.mxu1 %v7057_v18  ;;  %4509 = vmatprep.mubr.bf16.mxu0 %v7060_v20  ;;  %v7061_v18 = vld [vmem:[%s7147_s13 + $0x818] ss:$72 sps:$4 sm:$0xff]   ;;  %v7069_v34 = vld [vmem:[%s7147_s13 + $0x8ac] ss:$72 sps:$4 sm:$0xff]  }
 0x249   : > { %v8098_v63 = vadd.f32 %v6163_v60, %v3936_v35  ;;  %v6052_v38 = vpop.f32.mrb[168].mxu1  ;;  %v6164_v39 = vpop.f32.mrb[168].mxu0  ;;  %v7072_v60 = vld [vmem:[%s7147_s13 + $0x8b4] ss:$72 sps:$4 sm:$0xff]  }
 0x24a   : > { %v6053_v30 = vpop.f32.mrb[169].mxu1  ;;  %v6165_v23 = vpop.f32.mrb[169].mxu0 }
 0x24b   : > { %v6054_v49 = vadd.f32 %v6053_v30, %v6052_v38  ;;  %v6166_v52 = vadd.f32 %v6165_v23, %v6164_v39  ;;  %v6055_v53 = vpop.f32.mrb[170].mxu1  ;;  %v6167_v61 = vpop.f32.mrb[170].mxu0 }
 0x24c   : > { %v6056_v40 = vpop.f32.mrb[171].mxu1  ;;  %v6168_v2 = vpop.f32.mrb[171].mxu0 }
 0x24d   : > { %v3941_v45 = vadd.f32 %v6054_v49, %v7945_v51  ;;  %v6057_v4 = vadd.f32 %v6056_v40, %v6055_v53  ;;  %v6169_v43 = vadd.f32 %v6168_v2, %v6167_v61  ;;  %v7064_v51 = vld [vmem:[%s7147_s13 + $0x820] ss:$72 sps:$4 sm:$0xff]  }
 0x24e   : > { %4349 = vmatmul.mubr.bf16.gmra.mrb[20].mxu1 %v7055_v47  ;;  %4510 = vmatmul.mubr.bf16.gmra.mrb[20].mxu0 %v7058_v33 }
 0x24f   : > { %v8105_v7 = vadd.f32 %v6166_v52, %v3941_v45  ;;  %v3944_v44 = vadd.f32 %v6057_v4, %v7948_v25  ;;  %4356 = vmatprep.mubr.bf16.mxu1 %v7063_v32  ;;  %4517 = vmatprep.mubr.bf16.mxu0 %v7066_v59  ;;  %v7067_v32 = vld [vmem:[%s7147_s13 + $0x8a8] ss:$72 sps:$4 sm:$0xff]  }
 0x250   : > { %v7070_v59 = vld [vmem:[%s7147_s13 + $0x8b0] ss:$72 sps:$4 sm:$0xff]  }
 0x251   : > { %v8108_v15 = vadd.f32 %v6169_v43, %v3944_v44  ;;  %v6058_v12 = vpop.f32.mrb[172].mxu1  ;;  %v6170_v56 = vpop.f32.mrb[172].mxu0 }
 0x252   : > { %v6059_v13 = vpop.f32.mrb[173].mxu1  ;;  %v6171_v41 = vpop.f32.mrb[173].mxu0 }
 0x253   : > { %v6060_v20 = vadd.f32 %v6059_v13, %v6058_v12  ;;  %v6172_v22 = vadd.f32 %v6171_v41, %v6170_v56  ;;  %v6061_v28 = vpop.f32.mrb[174].mxu1  ;;  %v6173_v19 = vpop.f32.mrb[174].mxu0 }
 0x254   : > { %v6062_v35 = vpop.f32.mrb[175].mxu1  ;;  %v6174_v38 = vpop.f32.mrb[175].mxu0 }
 0x255   : > { %v3949_v25 = vadd.f32 %v6060_v20, %v7955_v9  ;;  %v6063_v39 = vadd.f32 %v6062_v35, %v6061_v28  ;;  %v6175_v30 = vadd.f32 %v6174_v38, %v6173_v19 }
 0x256   : > { %4357 = vmatmul.mubr.bf16.gmra.mrb[24].mxu1 %v7061_v18  ;;  %4518 = vmatmul.mubr.bf16.gmra.mrb[24].mxu0 %v7064_v51 }
 0x257   : > { %v8115_v23 = vadd.f32 %v6172_v22, %v3949_v25  ;;  %v3952_v47 = vadd.f32 %v6063_v39, %v7958_v1  ;;  %4364 = vmatprep.mubr.bf16.mxu1 %v7069_v34  ;;  %4525 = vmatprep.mubr.bf16.mxu0 %v7072_v60 }
 0x259   : > { %v8118_v33 = vadd.f32 %v6175_v30, %v3952_v47  ;;  %v6064_v49 = vpop.f32.mrb[176].mxu1  ;;  %v6176_v52 = vpop.f32.mrb[176].mxu0 }
 0x25a   : > { %v6065_v53 = vpop.f32.mrb[177].mxu1  ;;  %v6177_v61 = vpop.f32.mrb[177].mxu0 }
 0x25b   : > { %v6066_v40 = vadd.f32 %v6065_v53, %v6064_v49  ;;  %v6178_v9 = vadd.f32 %v6177_v61, %v6176_v52  ;;  %v6067_v2 = vpop.f32.mrb[178].mxu1  ;;  %v6179_v45 = vpop.f32.mrb[178].mxu0 }
 0x25c   : > { %v6068_v4 = vpop.f32.mrb[179].mxu1  ;;  %v6180_v43 = vpop.f32.mrb[179].mxu0 }
 0x25d   : > { %v3957_v44 = vadd.f32 %v6066_v40, %v7965_v29  ;;  %v6069_v12 = vadd.f32 %v6068_v4, %v6067_v2  ;;  %v6181_v1 = vadd.f32 %v6180_v43, %v6179_v45 }
 0x25e   : > { %4365 = vmatmul.mubr.bf16.gmra.mrb[28].mxu1 %v7067_v32  ;;  %4526 = vmatmul.mubr.bf16.gmra.mrb[28].mxu0 %v7070_v59 }
 0x25f   : > { %v8123_v56 = vadd.f32 %v6178_v9, %v3957_v44  ;;  %v3960_v13 = vadd.f32 %v6069_v12, %v7968_v37 }
 0x261   : > { %v8126_v41 = vadd.f32 %v6181_v1, %v3960_v13  ;;  %v6070_v18 = vpop.f32.mrb[180].mxu1  ;;  %v6182_v51 = vpop.f32.mrb[180].mxu0 }
 0x262   : > { %v6071_v20 = vpop.f32.mrb[181].mxu1  ;;  %v6183_v22 = vpop.f32.mrb[181].mxu0 }
 0x263   : > { %v6072_v28 = vadd.f32 %v6071_v20, %v6070_v18  ;;  %v6184_v19 = vadd.f32 %v6183_v22, %v6182_v51  ;;  %v6073_v34 = vpop.f32.mrb[182].mxu1  ;;  %v6185_v60 = vpop.f32.mrb[182].mxu0 }
 0x264   : > { %v6074_v35 = vpop.f32.mrb[183].mxu1  ;;  %v6186_v29 = vpop.f32.mrb[183].mxu0 }
 0x265   : > { %v3965_v38 = vadd.f32 %v6072_v28, %v7975_v57  ;;  %v6075_v25 = vadd.f32 %v6074_v35, %v6073_v34  ;;  %v6187_v39 = vadd.f32 %v6186_v29, %v6185_v60 }
 0x267   : > { %v8129_v30 = vadd.f32 %v6184_v19, %v3965_v38  ;;  %v3968_v37 = vadd.f32 %v6075_v25, %v7978_v11 }
 0x269   : > { %v8132_v47 = vadd.f32 %v6187_v39, %v3968_v37  ;;  %v6076_v49 = vpop.f32.mrb[184].mxu1  ;;  %v6188_v52 = vpop.f32.mrb[184].mxu0 }
 0x26a   : > { %v6077_v53 = vpop.f32.mrb[185].mxu1  ;;  %v6189_v61 = vpop.f32.mrb[185].mxu0 }
 0x26b   : > { %v6078_v32 = vadd.f32 %v6077_v53, %v6076_v49  ;;  %v6190_v59 = vadd.f32 %v6189_v61, %v6188_v52  ;;  %v6079_v40 = vpop.f32.mrb[186].mxu1  ;;  %v6191_v9 = vpop.f32.mrb[186].mxu0 }
 0x26c   : > { %v6080_v2 = vpop.f32.mrb[187].mxu1  ;;  %v6192_v45 = vpop.f32.mrb[187].mxu0 }
 0x26d   : > { %v3973_v57 = vadd.f32 %v6078_v32, %v7985_v27  ;;  %v6081_v4 = vadd.f32 %v6080_v2, %v6079_v40  ;;  %v6193_v43 = vadd.f32 %v6192_v45, %v6191_v9 }
 0x26f   : > { %v8135_v44 = vadd.f32 %v6190_v59, %v3973_v57  ;;  %v3976_v11 = vadd.f32 %v6081_v4, %v7988_v48 }
 0x271   : > { %v8138_v12 = vadd.f32 %v6193_v43, %v3976_v11  ;;  %v6082_v1 = vpop.f32.mrb[188].mxu1  ;;  %v6194_v13 = vpop.f32.mrb[188].mxu0 }
 0x272   : > { %v6083_v18 = vpop.f32.mrb[189].mxu1  ;;  %v6195_v51 = vpop.f32.mrb[189].mxu0 }
 0x273   : > { %v6084_v20 = vadd.f32 %v6083_v18, %v6082_v1  ;;  %v6196_v22 = vadd.f32 %v6195_v51, %v6194_v13  ;;  %v6085_v28 = vpop.f32.mrb[190].mxu1  ;;  %v6197_v19 = vpop.f32.mrb[190].mxu0 }
 0x274   : > { %v6086_v34 = vpop.f32.mrb[191].mxu1  ;;  %v6198_v60 = vpop.f32.mrb[191].mxu0 }
 0x275   : > { %v3981_v27 = vadd.f32 %v6084_v20, %v7995_v3  ;;  %v6087_v35 = vadd.f32 %v6086_v34, %v6085_v28  ;;  %v6199_v29 = vadd.f32 %v6198_v60, %v6197_v19 }
 0x277   : > { %v8141_v38 = vadd.f32 %v6196_v22, %v3981_v27  ;;  %v3984_v48 = vadd.f32 %v6087_v35, %v7998_v26 }
 0x279   : > { %v8144_v25 = vadd.f32 %v6199_v29, %v3984_v48  ;;  %v6088_v39 = vpop.f32.mrb[192].mxu1  ;;  %v6200_v37 = vpop.f32.mrb[192].mxu0 }
 0x27a   : > { %v6089_v49 = vpop.f32.mrb[193].mxu1  ;;  %v6201_v52 = vpop.f32.mrb[193].mxu0 }
 0x27b   : > { %v6090_v53 = vadd.f32 %v6089_v49, %v6088_v39  ;;  %v6202_v61 = vadd.f32 %v6201_v52, %v6200_v37  ;;  %v6091_v32 = vpop.f32.mrb[194].mxu1  ;;  %v6203_v59 = vpop.f32.mrb[194].mxu0 }
 0x27c   : > { %v6092_v40 = vpop.f32.mrb[195].mxu1  ;;  %v6204_v9 = vpop.f32.mrb[195].mxu0 }
 0x27d   : > { %v3989_v3 = vadd.f32 %v6090_v53, %v8005_v31  ;;  %v6093_v2 = vadd.f32 %v6092_v40, %v6091_v32  ;;  %v6205_v45 = vadd.f32 %v6204_v9, %v6203_v59 }
 0x27f   : > { %v8147_v57 = vadd.f32 %v6202_v61, %v3989_v3  ;;  %v3992_v26 = vadd.f32 %v6093_v2, %v8008_v16 }
 0x281   : > { %v8150_v4 = vadd.f32 %v6205_v45, %v3992_v26  ;;  %v6094_v43 = vpop.f32.mrb[196].mxu1  ;;  %v6206_v11 = vpop.f32.mrb[196].mxu0 }
 0x282   : > { %v6095_v1 = vpop.f32.mrb[197].mxu1  ;;  %v6207_v13 = vpop.f32.mrb[197].mxu0 }
 0x283   : > { %v6096_v18 = vadd.f32 %v6095_v1, %v6094_v43  ;;  %v6208_v51 = vadd.f32 %v6207_v13, %v6206_v11  ;;  %v6097_v20 = vpop.f32.mrb[198].mxu1  ;;  %v6209_v22 = vpop.f32.mrb[198].mxu0 }
 0x284   : > { %v6098_v28 = vpop.f32.mrb[199].mxu1  ;;  %v6210_v19 = vpop.f32.mrb[199].mxu0 }
 0x285   : > { %v3997_v31 = vadd.f32 %v6096_v18, %v8015_v54  ;;  %v6099_v34 = vadd.f32 %v6098_v28, %v6097_v20  ;;  %v6211_v60 = vadd.f32 %v6210_v19, %v6209_v22 }
 0x287   : > { %v8153_v27 = vadd.f32 %v6208_v51, %v3997_v31  ;;  %v4000_v16 = vadd.f32 %v6099_v34, %v8018_v14 }
 0x289   : > { %v8156_v35 = vadd.f32 %v6211_v60, %v4000_v16  ;;  %v6100_v29 = vpop.f32.mrb[200].mxu1  ;;  %v6212_v48 = vpop.f32.mrb[200].mxu0 }
 0x28a   : > { %v6101_v39 = vpop.f32.mrb[201].mxu1  ;;  %v6213_v37 = vpop.f32.mrb[201].mxu0 }
 0x28b   : > { %v6102_v49 = vadd.f32 %v6101_v39, %v6100_v29  ;;  %v6214_v52 = vadd.f32 %v6213_v37, %v6212_v48  ;;  %v6103_v53 = vpop.f32.mrb[202].mxu1  ;;  %v6215_v61 = vpop.f32.mrb[202].mxu0 }
 0x28c   : > { %v6104_v32 = vpop.f32.mrb[203].mxu1  ;;  %v6216_v59 = vpop.f32.mrb[203].mxu0 }
 0x28d   : > { %v4005_v54 = vadd.f32 %v6102_v49, %v8025_v6  ;;  %v6105_v40 = vadd.f32 %v6104_v32, %v6103_v53  ;;  %v6217_v9 = vadd.f32 %v6216_v59, %v6215_v61 }
 0x28f   : > { %v8159_v3 = vadd.f32 %v6214_v52, %v4005_v54  ;;  %v4008_v14 = vadd.f32 %v6105_v40, %v8028_v42 }
 0x291   : > { %v8162_v2 = vadd.f32 %v6217_v9, %v4008_v14  ;;  %v6106_v45 = vpop.f32.mrb[204].mxu1  ;;  %v6218_v26 = vpop.f32.mrb[204].mxu0 }
 0x292   : > { %v6107_v43 = vpop.f32.mrb[205].mxu1  ;;  %v6219_v11 = vpop.f32.mrb[205].mxu0 }
 0x293   : > { %v6108_v1 = vadd.f32 %v6107_v43, %v6106_v45  ;;  %v6220_v13 = vadd.f32 %v6219_v11, %v6218_v26  ;;  %v6109_v18 = vpop.f32.mrb[206].mxu1  ;;  %v6221_v51 = vpop.f32.mrb[206].mxu0 }
 0x294   : > { %v6110_v20 = vpop.f32.mrb[207].mxu1  ;;  %v6222_v22 = vpop.f32.mrb[207].mxu0 }
 0x295   : > { %v4013_v6 = vadd.f32 %v6108_v1, %v8035_v36  ;;  %v6111_v28 = vadd.f32 %v6110_v20, %v6109_v18  ;;  %v6223_v19 = vadd.f32 %v6222_v22, %v6221_v51 }
 0x297   : > { %v8165_v31 = vadd.f32 %v6220_v13, %v4013_v6  ;;  %v4016_v42 = vadd.f32 %v6111_v28, %v8038_v62 }
 0x299   : > { %v8168_v34 = vadd.f32 %v6223_v19, %v4016_v42  ;;  %v6112_v60 = vpop.f32.mrb[208].mxu1  ;;  %v6224_v16 = vpop.f32.mrb[208].mxu0 }
 0x29a   : > { %v6113_v29 = vpop.f32.mrb[209].mxu1  ;;  %v6225_v48 = vpop.f32.mrb[209].mxu0 }
 0x29b   : > { %v6114_v39 = vadd.f32 %v6113_v29, %v6112_v60  ;;  %v6226_v37 = vadd.f32 %v6225_v48, %v6224_v16  ;;  %v6115_v49 = vpop.f32.mrb[210].mxu1  ;;  %v6227_v52 = vpop.f32.mrb[210].mxu0 }
 0x29c   : > { %v6116_v53 = vpop.f32.mrb[211].mxu1  ;;  %v6228_v61 = vpop.f32.mrb[211].mxu0 }
 0x29d   : > { %v4021_v36 = vadd.f32 %v6114_v39, %v8045_v21  ;;  %v6117_v32 = vadd.f32 %v6116_v53, %v6115_v49  ;;  %v6229_v59 = vadd.f32 %v6228_v61, %v6227_v52 }
 0x29f   : > { %v8171_v54 = vadd.f32 %v6226_v37, %v4021_v36  ;;  %v4024_v62 = vadd.f32 %v6117_v32, %v8048_v50 }
 0x2a1   : > { %v8174_v40 = vadd.f32 %v6229_v59, %v4024_v62  ;;  %v6118_v9 = vpop.f32.mrb[212].mxu1  ;;  %v6230_v14 = vpop.f32.mrb[212].mxu0 }
 0x2a2   : > { %v6119_v45 = vpop.f32.mrb[213].mxu1  ;;  %v6231_v26 = vpop.f32.mrb[213].mxu0 }
 0x2a3   : > { %v6120_v43 = vadd.f32 %v6119_v45, %v6118_v9  ;;  %v6232_v11 = vadd.f32 %v6231_v26, %v6230_v14  ;;  %v6121_v1 = vpop.f32.mrb[214].mxu1  ;;  %v6233_v13 = vpop.f32.mrb[214].mxu0 }
 0x2a4   : > { %v6122_v18 = vpop.f32.mrb[215].mxu1  ;;  %v6234_v51 = vpop.f32.mrb[215].mxu0 }
 0x2a5   : > { %v4029_v21 = vadd.f32 %v6120_v43, %v8055_v10  ;;  %v6123_v20 = vadd.f32 %v6122_v18, %v6121_v1  ;;  %v6235_v22 = vadd.f32 %v6234_v51, %v6233_v13 }
 0x2a7   : > { %v8177_v6 = vadd.f32 %v6232_v11, %v4029_v21  ;;  %v4032_v50 = vadd.f32 %v6123_v20, %v8058_v46 }
 0x2a9   : > { %v8180_v28 = vadd.f32 %v6235_v22, %v4032_v50  ;;  %v6124_v19 = vpop.f32.mrb[216].mxu1  ;;  %v6236_v42 = vpop.f32.mrb[216].mxu0 }
 0x2aa   : > { %v6125_v60 = vpop.f32.mrb[217].mxu1  ;;  %v6237_v16 = vpop.f32.mrb[217].mxu0 }
 0x2ab   : > { %v6126_v29 = vadd.f32 %v6125_v60, %v6124_v19  ;;  %v6238_v48 = vadd.f32 %v6237_v16, %v6236_v42  ;;  %v6127_v39 = vpop.f32.mrb[218].mxu1  ;;  %v6239_v37 = vpop.f32.mrb[218].mxu0 }
 0x2ac   : > { %v6128_v49 = vpop.f32.mrb[219].mxu1  ;;  %v6240_v52 = vpop.f32.mrb[219].mxu0 }
 0x2ad   : > { %v4037_v10 = vadd.f32 %v6126_v29, %v8065_v0  ;;  %v6129_v53 = vadd.f32 %v6128_v49, %v6127_v39  ;;  %v6241_v61 = vadd.f32 %v6240_v52, %v6239_v37 }
 0x2af   : > { %v8183_v36 = vadd.f32 %v6238_v48, %v4037_v10  ;;  %v4040_v46 = vadd.f32 %v6129_v53, %v8068_v17 }
 0x2b1   : > { %v8186_v32 = vadd.f32 %v6241_v61, %v4040_v46  ;;  %v6130_v59 = vpop.f32.mrb[220].mxu1  ;;  %v6242_v62 = vpop.f32.mrb[220].mxu0  ;;  %v8204_v61 = vld [vmem:[%s8328_s3] ss:$0 sm:$0xff] }
 0x2b2   : > { %v6131_v9 = vpop.f32.mrb[221].mxu1  ;;  %v6243_v14 = vpop.f32.mrb[221].mxu0 }
 0x2b3   : > { %v6132_v45 = vadd.f32 %v6131_v9, %v6130_v59  ;;  %v6244_v26 = vadd.f32 %v6243_v14, %v6242_v62  ;;  %v6133_v43 = vpop.f32.mrb[222].mxu1  ;;  %v6245_v11 = vpop.f32.mrb[222].mxu0 }
 0x2b4   : > { %v6134_v1 = vpop.f32.mrb[223].mxu1  ;;  %v6246_v13 = vpop.f32.mrb[223].mxu0 }
 0x2b5   : > { %v4045_v0 = vadd.f32 %v6132_v45, %v8075_v8  ;;  %v6135_v18 = vadd.f32 %v6134_v1, %v6133_v43  ;;  %v6247_v51 = vadd.f32 %v6246_v13, %v6245_v11 }
 0x2b7   : > { %v8189_v21 = vadd.f32 %v6244_v26, %v4045_v0  ;;  %v4048_v17 = vadd.f32 %v6135_v18, %v8078_v58  ;;  %v8198_v58 = vld [vmem:[%s8327_s2] ss:$0 sm:$0xff] }
 0x2b9   : > { %v8192_v20 = vadd.f32 %v6247_v51, %v4048_v17  ;;  %v6264_v22 = vpop.f32.mrb[224].mxu1  ;;  %v6376_v50 = vpop.f32.mrb[224].mxu0 }
 0x2ba   : > { %v6265_v19 = vpop.f32.mrb[225].mxu1  ;;  %v6377_v42 = vpop.f32.mrb[225].mxu0 }
 0x2bb   : > { %v6266_v60 = vadd.f32 %v6265_v19, %v6264_v22  ;;  %v6378_v16 = vadd.f32 %v6377_v42, %v6376_v50  ;;  %v6267_v29 = vpop.f32.mrb[226].mxu1  ;;  %v6379_v48 = vpop.f32.mrb[226].mxu0 }
 0x2bc   : > { %v6268_v39 = vpop.f32.mrb[227].mxu1  ;;  %v6380_v37 = vpop.f32.mrb[227].mxu0 }
 0x2bd   : > { %v4247_v8 = vadd.f32 %v6266_v60, %v8085_v5  ;;  %v6269_v49 = vadd.f32 %v6268_v39, %v6267_v29  ;;  %v6381_v52 = vadd.f32 %v6380_v37, %v6379_v48 }
 0x2bf   : > { %v4408_v10 = vadd.f32 %v6378_v16, %v4247_v8  ;;  %v4250_v53 = vadd.f32 %v6269_v49, %v8088_v24 }
 0x2c1   : > { %v4541_v46 = vmul.f32 %v8198_v58, %v4408_v10  ;;  %v4411_v59 = vadd.f32 %v6381_v52, %v4250_v53  ;;  %v6270_v5 = vpop.f32.mrb[228].mxu1  ;;  %v6382_v62 = vpop.f32.mrb[228].mxu0 }
 0x2c2   : > { %v6271_v9 = vpop.f32.mrb[229].mxu1  ;;  %v6383_v14 = vpop.f32.mrb[229].mxu0 }
 0x2c3   : > { %v4580_v45 = vadd.f32 %v8204_v61, %v4541_v46  ;;  %v4542_v26 = vmul.f32 %v8198_v58, %v4411_v59  ;;  %v6272_v43 = vadd.f32 %v6271_v9, %v6270_v5  ;;  %v6384_v11 = vadd.f32 %v6383_v14, %v6382_v62  ;;  %v6273_v24 = vpop.f32.mrb[230].mxu1  ;;  %v6385_v1 = vpop.f32.mrb[230].mxu0 }
 0x2c4   : > { %v6274_v13 = vpop.f32.mrb[231].mxu1  ;;  %v6386_v0 = vpop.f32.mrb[231].mxu0 }
 0x2c5   : > { %v4581_v18 = vadd.f32 %v8204_v61, %v4542_v26  ;;  %v4255_v51 = vadd.f32 %v6272_v43, %v8095_v55  ;;  %v6275_v17 = vadd.f32 %v6274_v13, %v6273_v24  ;;  %v6387_v22 = vadd.f32 %v6386_v0, %v6385_v1 }
 0x2c6   : > { %v4612_v50 = vmax.f32 %v4580_v45, 0.0 }
 0x2c7   : > { %v4613_v19 = vmax.f32 %v4581_v18, 0.0  ;;  %v4416_v42 = vadd.f32 %v6384_v11, %v4255_v51  ;;  %v4258_v60 = vadd.f32 %v6275_v17, %v8098_v63 }
 0x2c9   : > { %v5372_v16 = vpack.c.bf16 %v4613_v19, %v4612_v50  ;;  %v4543_v29 = vmul.f32 %v8198_v58, %v4416_v42  ;;  %v4419_v48 = vadd.f32 %v6387_v22, %v4258_v60  ;;  %v6276_v39 = vpop.f32.mrb[232].mxu1  ;;  %v6388_v37 = vpop.f32.mrb[232].mxu0 }
 0x2ca   : > { %v6277_v55 = vpop.f32.mrb[233].mxu1  ;;  %v6389_v8 = vpop.f32.mrb[233].mxu0 }
 0x2cb   : > { %5373 = vst [vmem:[%s8216_s14] sm:$0xff] %v5372_v16   ;;  %v4582_v49 = vadd.f32 %v8204_v61, %v4543_v29  ;;  %v4544_v52 = vmul.f32 %v8198_v58, %v4419_v48  ;;  %v6278_v63 = vadd.f32 %v6277_v55, %v6276_v39  ;;  %v6390_v10 = vadd.f32 %v6389_v8, %v6388_v37  ;;  %v6279_v53 = vpop.f32.mrb[234].mxu1  ;;  %v6391_v46 = vpop.f32.mrb[234].mxu0 }
 0x2cc   : > { %v6280_v59 = vpop.f32.mrb[235].mxu1  ;;  %v6392_v5 = vpop.f32.mrb[235].mxu0 }
 0x2cd   : > { %v4583_v62 = vadd.f32 %v8204_v61, %v4544_v52  ;;  %v4263_v9 = vadd.f32 %v6278_v63, %v8105_v7  ;;  %v6281_v14 = vadd.f32 %v6280_v59, %v6279_v53  ;;  %v6393_v45 = vadd.f32 %v6392_v5, %v6391_v46 }
 0x2ce   : > { %v4614_v26 = vmax.f32 %v4582_v49, 0.0 }
 0x2cf   : > { %v4615_v43 = vmax.f32 %v4583_v62, 0.0  ;;  %v4424_v11 = vadd.f32 %v6390_v10, %v4263_v9  ;;  %v4266_v24 = vadd.f32 %v6281_v14, %v8108_v15 }
 0x2d1   : > { %v5377_v1 = vpack.c.bf16 %v4615_v43, %v4614_v26  ;;  %v4545_v13 = vmul.f32 %v8198_v58, %v4424_v11  ;;  %v4427_v0 = vadd.f32 %v6393_v45, %v4266_v24  ;;  %v6282_v18 = vpop.f32.mrb[236].mxu1  ;;  %v6394_v51 = vpop.f32.mrb[236].mxu0 }
 0x2d2   : > { %v6283_v17 = vpop.f32.mrb[237].mxu1  ;;  %v6395_v22 = vpop.f32.mrb[237].mxu0 }
 0x2d3   : > { %5449 = vst [vmem:[%s8216_s14 + $0x8] sm:$0xff] %v5377_v1   ;;  %v4584_v50 = vadd.f32 %v8204_v61, %v4545_v13  ;;  %v4546_v7 = vmul.f32 %v8198_v58, %v4427_v0  ;;  %v6284_v19 = vadd.f32 %v6283_v17, %v6282_v18  ;;  %v6396_v42 = vadd.f32 %v6395_v22, %v6394_v51  ;;  %v6285_v60 = vpop.f32.mrb[238].mxu1  ;;  %v6397_v16 = vpop.f32.mrb[238].mxu0 }
 0x2d4   : > { %v6286_v29 = vpop.f32.mrb[239].mxu1  ;;  %v6398_v48 = vpop.f32.mrb[239].mxu0 }
 0x2d5   : > { %v4585_v15 = vadd.f32 %v8204_v61, %v4546_v7  ;;  %v4271_v39 = vadd.f32 %v6284_v19, %v8115_v23  ;;  %v6287_v37 = vadd.f32 %v6286_v29, %v6285_v60  ;;  %v6399_v55 = vadd.f32 %v6398_v48, %v6397_v16 }
 0x2d6   : > { %v4616_v8 = vmax.f32 %v4584_v50, 0.0 }
 0x2d7   : > { %v4617_v49 = vmax.f32 %v4585_v15, 0.0  ;;  %v4432_v52 = vadd.f32 %v6396_v42, %v4271_v39  ;;  %v4274_v63 = vadd.f32 %v6287_v37, %v8118_v33 }
 0x2d9   : > { %v5382_v10 = vpack.c.bf16 %v4617_v49, %v4616_v8  ;;  %v4547_v53 = vmul.f32 %v8198_v58, %v4432_v52  ;;  %v4435_v46 = vadd.f32 %v6399_v55, %v4274_v63  ;;  %v6288_v59 = vpop.f32.mrb[240].mxu1  ;;  %v6400_v5 = vpop.f32.mrb[240].mxu0 }
 0x2da   : > { %v6289_v62 = vpop.f32.mrb[241].mxu1  ;;  %v6401_v9 = vpop.f32.mrb[241].mxu0 }
 0x2db   : > { %5450 = vst [vmem:[%s8216_s14 + $0x10] sm:$0xff] %v5382_v10   ;;  %v4586_v14 = vadd.f32 %v8204_v61, %v4547_v53  ;;  %v4548_v23 = vmul.f32 %v8198_v58, %v4435_v46  ;;  %v6290_v45 = vadd.f32 %v6289_v62, %v6288_v59  ;;  %v6402_v26 = vadd.f32 %v6401_v9, %v6400_v5  ;;  %v6291_v43 = vpop.f32.mrb[242].mxu1  ;;  %v6403_v11 = vpop.f32.mrb[242].mxu0 }
 0x2dc   : > { %v6292_v24 = vpop.f32.mrb[243].mxu1  ;;  %v6404_v1 = vpop.f32.mrb[243].mxu0 }
 0x2dd   : > { %v4587_v33 = vadd.f32 %v8204_v61, %v4548_v23  ;;  %v4279_v13 = vadd.f32 %v6290_v45, %v8123_v56  ;;  %v6293_v0 = vadd.f32 %v6292_v24, %v6291_v43  ;;  %v6405_v18 = vadd.f32 %v6404_v1, %v6403_v11 }
 0x2de   : > { %v4618_v51 = vmax.f32 %v4586_v14, 0.0 }
 0x2df   : > { %v4619_v17 = vmax.f32 %v4587_v33, 0.0  ;;  %v4440_v22 = vadd.f32 %v6402_v26, %v4279_v13  ;;  %v4282_v50 = vadd.f32 %v6293_v0, %v8126_v41 }
 0x2e1   : > { %v5387_v7 = vpack.c.bf16 %v4619_v17, %v4618_v51  ;;  %v4549_v19 = vmul.f32 %v8198_v58, %v4440_v22  ;;  %v4443_v42 = vadd.f32 %v6405_v18, %v4282_v50  ;;  %v6294_v60 = vpop.f32.mrb[244].mxu1  ;;  %v6406_v16 = vpop.f32.mrb[244].mxu0 }
 0x2e2   : > { %v6295_v29 = vpop.f32.mrb[245].mxu1  ;;  %v6407_v48 = vpop.f32.mrb[245].mxu0 }
 0x2e3   : > { %5451 = vst [vmem:[%s8216_s14 + $0x18] sm:$0xff] %v5387_v7   ;;  %v4588_v15 = vadd.f32 %v8204_v61, %v4549_v19  ;;  %v4550_v56 = vmul.f32 %v8198_v58, %v4443_v42  ;;  %v6296_v39 = vadd.f32 %v6295_v29, %v6294_v60  ;;  %v6408_v37 = vadd.f32 %v6407_v48, %v6406_v16  ;;  %v6297_v55 = vpop.f32.mrb[246].mxu1  ;;  %v6409_v8 = vpop.f32.mrb[246].mxu0 }
 0x2e4   : > { %v6298_v49 = vpop.f32.mrb[247].mxu1  ;;  %v6410_v52 = vpop.f32.mrb[247].mxu0 }
 0x2e5   : > { %v4589_v41 = vadd.f32 %v8204_v61, %v4550_v56  ;;  %v4287_v63 = vadd.f32 %v6296_v39, %v8129_v30  ;;  %v6299_v10 = vadd.f32 %v6298_v49, %v6297_v55  ;;  %v6411_v53 = vadd.f32 %v6410_v52, %v6409_v8 }
 0x2e6   : > { %v4620_v46 = vmax.f32 %v4588_v15, 0.0 }
 0x2e7   : > { %v4621_v59 = vmax.f32 %v4589_v41, 0.0  ;;  %v4448_v5 = vadd.f32 %v6408_v37, %v4287_v63  ;;  %v4290_v62 = vadd.f32 %v6299_v10, %v8132_v47 }
 0x2e9   : > { %v5392_v9 = vpack.c.bf16 %v4621_v59, %v4620_v46  ;;  %v4551_v14 = vmul.f32 %v8198_v58, %v4448_v5  ;;  %v4451_v23 = vadd.f32 %v6411_v53, %v4290_v62  ;;  %v6300_v45 = vpop.f32.mrb[248].mxu1  ;;  %v6412_v26 = vpop.f32.mrb[248].mxu0 }
 0x2ea   : > { %v6301_v43 = vpop.f32.mrb[249].mxu1  ;;  %v6413_v11 = vpop.f32.mrb[249].mxu0 }
 0x2eb   : > { %5452 = vst [vmem:[%s8216_s14 + $0x20] sm:$0xff] %v5392_v9   ;;  %v4590_v24 = vadd.f32 %v8204_v61, %v4551_v14  ;;  %v4552_v30 = vmul.f32 %v8198_v58, %v4451_v23  ;;  %v6302_v1 = vadd.f32 %v6301_v43, %v6300_v45  ;;  %v6414_v33 = vadd.f32 %v6413_v11, %v6412_v26  ;;  %v6303_v13 = vpop.f32.mrb[250].mxu1  ;;  %v6415_v0 = vpop.f32.mrb[250].mxu0 }
 0x2ec   : > { %v6304_v18 = vpop.f32.mrb[251].mxu1  ;;  %v6416_v51 = vpop.f32.mrb[251].mxu0 }
 0x2ed   : > { %v4591_v47 = vadd.f32 %v8204_v61, %v4552_v30  ;;  %v4295_v17 = vadd.f32 %v6302_v1, %v8135_v44  ;;  %v6305_v22 = vadd.f32 %v6304_v18, %v6303_v13  ;;  %v6417_v50 = vadd.f32 %v6416_v51, %v6415_v0 }
 0x2ee   : > { %v4622_v7 = vmax.f32 %v4590_v24, 0.0 }
 0x2ef   : > { %v4623_v19 = vmax.f32 %v4591_v47, 0.0  ;;  %v4456_v42 = vadd.f32 %v6414_v33, %v4295_v17  ;;  %v4298_v60 = vadd.f32 %v6305_v22, %v8138_v12 }
 0x2f1   : > { %v5397_v16 = vpack.c.bf16 %v4623_v19, %v4622_v7  ;;  %v4553_v29 = vmul.f32 %v8198_v58, %v4456_v42  ;;  %v4459_v48 = vadd.f32 %v6417_v50, %v4298_v60  ;;  %v6306_v15 = vpop.f32.mrb[252].mxu1  ;;  %v6418_v56 = vpop.f32.mrb[252].mxu0 }
 0x2f2   : > { %v6307_v39 = vpop.f32.mrb[253].mxu1  ;;  %v6419_v37 = vpop.f32.mrb[253].mxu0 }
 0x2f3   : > { %5453 = vst [vmem:[%s8216_s14 + $0x28] sm:$0xff] %v5397_v16   ;;  %v4592_v55 = vadd.f32 %v8204_v61, %v4553_v29  ;;  %v4554_v44 = vmul.f32 %v8198_v58, %v4459_v48  ;;  %v6308_v8 = vadd.f32 %v6307_v39, %v6306_v15  ;;  %v6420_v49 = vadd.f32 %v6419_v37, %v6418_v56  ;;  %v6309_v52 = vpop.f32.mrb[254].mxu1  ;;  %v6421_v41 = vpop.f32.mrb[254].mxu0 }
 0x2f4   : > { %v6310_v63 = vpop.f32.mrb[255].mxu1  ;;  %v6422_v10 = vpop.f32.mrb[255].mxu0 }
 0x2f5   : > { %v4593_v12 = vadd.f32 %v8204_v61, %v4554_v44  ;;  %v4303_v53 = vadd.f32 %v6308_v8, %v8141_v38  ;;  %v6311_v46 = vadd.f32 %v6310_v63, %v6309_v52  ;;  %v6423_v59 = vadd.f32 %v6422_v10, %v6421_v41 }
 0x2f6   : > { %v4624_v5 = vmax.f32 %v4592_v55, 0.0 }
 0x2f7   : > { %v4625_v62 = vmax.f32 %v4593_v12, 0.0  ;;  %v4464_v9 = vadd.f32 %v6420_v49, %v4303_v53  ;;  %v4306_v14 = vadd.f32 %v6311_v46, %v8144_v25 }
 0x2f9   : > { %v5402_v23 = vpack.c.bf16 %v4625_v62, %v4624_v5  ;;  %v4555_v45 = vmul.f32 %v8198_v58, %v4464_v9  ;;  %v4467_v26 = vadd.f32 %v6423_v59, %v4306_v14  ;;  %v6312_v43 = vpop.f32.mrb[0].mxu1  ;;  %v6424_v11 = vpop.f32.mrb[0].mxu0 }
 0x2fa   : > { %v6313_v24 = vpop.f32.mrb[1].mxu1  ;;  %v6425_v30 = vpop.f32.mrb[1].mxu0 }
 0x2fb   : > { %5454 = vst [vmem:[%s8216_s14 + $0x30] sm:$0xff] %v5402_v23   ;;  %v4594_v1 = vadd.f32 %v8204_v61, %v4555_v45  ;;  %v4556_v38 = vmul.f32 %v8198_v58, %v4467_v26  ;;  %v6314_v33 = vadd.f32 %v6313_v24, %v6312_v43  ;;  %v6426_v13 = vadd.f32 %v6425_v30, %v6424_v11  ;;  %v6315_v0 = vpop.f32.mrb[2].mxu1  ;;  %v6427_v18 = vpop.f32.mrb[2].mxu0 }
 0x2fc   : > { %v6316_v51 = vpop.f32.mrb[3].mxu1  ;;  %v6428_v47 = vpop.f32.mrb[3].mxu0 }
 0x2fd   : > { %v4595_v25 = vadd.f32 %v8204_v61, %v4556_v38  ;;  %v4311_v17 = vadd.f32 %v6314_v33, %v8147_v57  ;;  %v6317_v22 = vadd.f32 %v6316_v51, %v6315_v0  ;;  %v6429_v50 = vadd.f32 %v6428_v47, %v6427_v18 }
 0x2fe   : > { %v4626_v7 = vmax.f32 %v4594_v1, 0.0 }
 0x2ff   : > { %v4627_v19 = vmax.f32 %v4595_v25, 0.0  ;;  %v4472_v42 = vadd.f32 %v6426_v13, %v4311_v17  ;;  %v4314_v60 = vadd.f32 %v6317_v22, %v8150_v4 }
 0x301   : > { %v5407_v16 = vpack.c.bf16 %v4627_v19, %v4626_v7  ;;  %v4557_v29 = vmul.f32 %v8198_v58, %v4472_v42  ;;  %v4475_v48 = vadd.f32 %v6429_v50, %v4314_v60  ;;  %v6318_v15 = vpop.f32.mrb[4].mxu1  ;;  %v6430_v56 = vpop.f32.mrb[4].mxu0 }
 0x302   : > { %v6319_v39 = vpop.f32.mrb[5].mxu1  ;;  %v6431_v37 = vpop.f32.mrb[5].mxu0 }
 0x303   : > { %5455 = vst [vmem:[%s8216_s14 + $0x38] sm:$0xff] %v5407_v16   ;;  %v4596_v55 = vadd.f32 %v8204_v61, %v4557_v29  ;;  %v4558_v57 = vmul.f32 %v8198_v58, %v4475_v48  ;;  %v6320_v44 = vadd.f32 %v6319_v39, %v6318_v15  ;;  %v6432_v8 = vadd.f32 %v6431_v37, %v6430_v56  ;;  %v6321_v49 = vpop.f32.mrb[6].mxu1  ;;  %v6433_v52 = vpop.f32.mrb[6].mxu0 }
 0x304   : > { %v6322_v41 = vpop.f32.mrb[7].mxu1  ;;  %v6434_v63 = vpop.f32.mrb[7].mxu0 }
 0x305   : > { %v4597_v4 = vadd.f32 %v8204_v61, %v4558_v57  ;;  %v4319_v10 = vadd.f32 %v6320_v44, %v8153_v27  ;;  %v6323_v12 = vadd.f32 %v6322_v41, %v6321_v49  ;;  %v6435_v53 = vadd.f32 %v6434_v63, %v6433_v52 }
 0x306   : > { %v4628_v46 = vmax.f32 %v4596_v55, 0.0 }
 0x307   : > { %v4629_v59 = vmax.f32 %v4597_v4, 0.0  ;;  %v4480_v5 = vadd.f32 %v6432_v8, %v4319_v10  ;;  %v4322_v62 = vadd.f32 %v6323_v12, %v8156_v35 }
 0x309   : > { %v5412_v9 = vpack.c.bf16 %v4629_v59, %v4628_v46  ;;  %v4559_v14 = vmul.f32 %v8198_v58, %v4480_v5  ;;  %v4483_v23 = vadd.f32 %v6435_v53, %v4322_v62  ;;  %v6324_v45 = vpop.f32.mrb[8].mxu1  ;;  %v6436_v26 = vpop.f32.mrb[8].mxu0 }
 0x30a   : > { %v6325_v43 = vpop.f32.mrb[9].mxu1  ;;  %v6437_v11 = vpop.f32.mrb[9].mxu0 }
 0x30b   : > { %5456 = vst [vmem:[%s8216_s14 + $0x40] sm:$0xff] %v5412_v9   ;;  %v4598_v24 = vadd.f32 %v8204_v61, %v4559_v14  ;;  %v4560_v27 = vmul.f32 %v8198_v58, %v4483_v23  ;;  %v6326_v30 = vadd.f32 %v6325_v43, %v6324_v45  ;;  %v6438_v1 = vadd.f32 %v6437_v11, %v6436_v26  ;;  %v6327_v38 = vpop.f32.mrb[10].mxu1  ;;  %v6439_v33 = vpop.f32.mrb[10].mxu0 }
 0x30c   : > { %v6328_v13 = vpop.f32.mrb[11].mxu1  ;;  %v6440_v0 = vpop.f32.mrb[11].mxu0 }
 0x30d   : > { %v4599_v35 = vadd.f32 %v8204_v61, %v4560_v27  ;;  %v4327_v18 = vadd.f32 %v6326_v30, %v8159_v3  ;;  %v6329_v51 = vadd.f32 %v6328_v13, %v6327_v38  ;;  %v6441_v47 = vadd.f32 %v6440_v0, %v6439_v33 }
 0x30e   : > { %v4630_v25 = vmax.f32 %v4598_v24, 0.0 }
 0x30f   : > { %v4631_v17 = vmax.f32 %v4599_v35, 0.0  ;;  %v4488_v22 = vadd.f32 %v6438_v1, %v4327_v18  ;;  %v4330_v50 = vadd.f32 %v6329_v51, %v8162_v2 }
 0x311   : > { %v5417_v7 = vpack.c.bf16 %v4631_v17, %v4630_v25  ;;  %v4561_v19 = vmul.f32 %v8198_v58, %v4488_v22  ;;  %v4491_v42 = vadd.f32 %v6441_v47, %v4330_v50  ;;  %v6330_v60 = vpop.f32.mrb[12].mxu1  ;;  %v6442_v16 = vpop.f32.mrb[12].mxu0 }
 0x312   : > { %v6331_v29 = vpop.f32.mrb[13].mxu1  ;;  %v6443_v48 = vpop.f32.mrb[13].mxu0 }
 0x313   : > { %5457 = vst [vmem:[%s8216_s14 + $0x48] sm:$0xff] %v5417_v7   ;;  %v4600_v15 = vadd.f32 %v8204_v61, %v4561_v19  ;;  %v4562_v3 = vmul.f32 %v8198_v58, %v4491_v42  ;;  %v6332_v56 = vadd.f32 %v6331_v29, %v6330_v60  ;;  %v6444_v39 = vadd.f32 %v6443_v48, %v6442_v16  ;;  %v6333_v37 = vpop.f32.mrb[14].mxu1  ;;  %v6445_v55 = vpop.f32.mrb[14].mxu0 }
 0x314   : > { %v6334_v57 = vpop.f32.mrb[15].mxu1  ;;  %v6446_v44 = vpop.f32.mrb[15].mxu0 }
 0x315   : > { %v4601_v2 = vadd.f32 %v8204_v61, %v4562_v3  ;;  %v4335_v8 = vadd.f32 %v6332_v56, %v8165_v31  ;;  %v6335_v49 = vadd.f32 %v6334_v57, %v6333_v37  ;;  %v6447_v52 = vadd.f32 %v6446_v44, %v6445_v55 }
 0x316   : > { %v4632_v41 = vmax.f32 %v4600_v15, 0.0 }
 0x317   : > { %v4633_v63 = vmax.f32 %v4601_v2, 0.0  ;;  %v4496_v4 = vadd.f32 %v6444_v39, %v4335_v8  ;;  %v4338_v10 = vadd.f32 %v6335_v49, %v8168_v34 }
 0x319   : > { %v5422_v12 = vpack.c.bf16 %v4633_v63, %v4632_v41  ;;  %v4563_v53 = vmul.f32 %v8198_v58, %v4496_v4  ;;  %v4499_v46 = vadd.f32 %v6447_v52, %v4338_v10  ;;  %v6336_v59 = vpop.f32.mrb[16].mxu1  ;;  %v6448_v5 = vpop.f32.mrb[16].mxu0 }
 0x31a   : > { %v6337_v62 = vpop.f32.mrb[17].mxu1  ;;  %v6449_v9 = vpop.f32.mrb[17].mxu0 }
 0x31b   : > { %5458 = vst [vmem:[%s8216_s14 + $0x50] sm:$0xff] %v5422_v12   ;;  %v4602_v14 = vadd.f32 %v8204_v61, %v4563_v53  ;;  %v4564_v31 = vmul.f32 %v8198_v58, %v4499_v46  ;;  %v6338_v23 = vadd.f32 %v6337_v62, %v6336_v59  ;;  %v6450_v45 = vadd.f32 %v6449_v9, %v6448_v5  ;;  %v6339_v26 = vpop.f32.mrb[18].mxu1  ;;  %v6451_v43 = vpop.f32.mrb[18].mxu0 }
 0x31c   : > { %v6340_v11 = vpop.f32.mrb[19].mxu1  ;;  %v6452_v24 = vpop.f32.mrb[19].mxu0 }
 0x31d   : > { %v4603_v34 = vadd.f32 %v8204_v61, %v4564_v31  ;;  %v4343_v27 = vadd.f32 %v6338_v23, %v8171_v54  ;;  %v6341_v30 = vadd.f32 %v6340_v11, %v6339_v26  ;;  %v6453_v1 = vadd.f32 %v6452_v24, %v6451_v43 }
 0x31e   : > { %v4634_v38 = vmax.f32 %v4602_v14, 0.0 }
 0x31f   : > { %v4635_v33 = vmax.f32 %v4603_v34, 0.0  ;;  %v4504_v13 = vadd.f32 %v6450_v45, %v4343_v27  ;;  %v4346_v0 = vadd.f32 %v6341_v30, %v8174_v40 }
 0x321   : > { %v5427_v35 = vpack.c.bf16 %v4635_v33, %v4634_v38  ;;  %v4565_v18 = vmul.f32 %v8198_v58, %v4504_v13  ;;  %v4507_v51 = vadd.f32 %v6453_v1, %v4346_v0  ;;  %v6342_v47 = vpop.f32.mrb[20].mxu1  ;;  %v6454_v25 = vpop.f32.mrb[20].mxu0 }
 0x322   : > { %v6343_v17 = vpop.f32.mrb[21].mxu1  ;;  %v6455_v22 = vpop.f32.mrb[21].mxu0 }
 0x323   : > { %5459 = vst [vmem:[%s8216_s14 + $0x58] sm:$0xff] %v5427_v35   ;;  %v4604_v50 = vadd.f32 %v8204_v61, %v4565_v18  ;;  %v4566_v54 = vmul.f32 %v8198_v58, %v4507_v51  ;;  %v6344_v7 = vadd.f32 %v6343_v17, %v6342_v47  ;;  %v6456_v19 = vadd.f32 %v6455_v22, %v6454_v25  ;;  %v6345_v42 = vpop.f32.mrb[22].mxu1  ;;  %v6457_v60 = vpop.f32.mrb[22].mxu0 }
 0x324   : > { %v6346_v16 = vpop.f32.mrb[23].mxu1  ;;  %v6458_v29 = vpop.f32.mrb[23].mxu0 }
 0x325   : > { %v4605_v40 = vadd.f32 %v8204_v61, %v4566_v54  ;;  %v4351_v48 = vadd.f32 %v6344_v7, %v8177_v6  ;;  %v6347_v15 = vadd.f32 %v6346_v16, %v6345_v42  ;;  %v6459_v3 = vadd.f32 %v6458_v29, %v6457_v60 }
 0x326   : > { %v4636_v56 = vmax.f32 %v4604_v50, 0.0 }
 0x327   : > { %v4637_v39 = vmax.f32 %v4605_v40, 0.0  ;;  %v4512_v37 = vadd.f32 %v6456_v19, %v4351_v48  ;;  %v4354_v55 = vadd.f32 %v6347_v15, %v8180_v28 }
 0x329   : > { %v5432_v57 = vpack.c.bf16 %v4637_v39, %v4636_v56  ;;  %v4567_v44 = vmul.f32 %v8198_v58, %v4512_v37  ;;  %v4515_v2 = vadd.f32 %v6459_v3, %v4354_v55  ;;  %v6348_v8 = vpop.f32.mrb[24].mxu1  ;;  %v6460_v49 = vpop.f32.mrb[24].mxu0 }
 0x32a   : > { %v6349_v52 = vpop.f32.mrb[25].mxu1  ;;  %v6461_v41 = vpop.f32.mrb[25].mxu0 }
 0x32b   : > { %5460 = vst [vmem:[%s8216_s14 + $0x60] sm:$0xff] %v5432_v57   ;;  %v4606_v63 = vadd.f32 %v8204_v61, %v4567_v44  ;;  %v4568_v6 = vmul.f32 %v8198_v58, %v4515_v2  ;;  %v6350_v4 = vadd.f32 %v6349_v52, %v6348_v8  ;;  %v6462_v10 = vadd.f32 %v6461_v41, %v6460_v49  ;;  %v6351_v12 = vpop.f32.mrb[26].mxu1  ;;  %v6463_v53 = vpop.f32.mrb[26].mxu0 }
 0x32c   : > { %v6352_v46 = vpop.f32.mrb[27].mxu1  ;;  %v6464_v59 = vpop.f32.mrb[27].mxu0 }
 0x32d   : > { %v4607_v28 = vadd.f32 %v8204_v61, %v4568_v6  ;;  %v4359_v5 = vadd.f32 %v6350_v4, %v8183_v36  ;;  %v6353_v62 = vadd.f32 %v6352_v46, %v6351_v12  ;;  %v6465_v9 = vadd.f32 %v6464_v59, %v6463_v53 }
 0x32e   : > { %v4638_v14 = vmax.f32 %v4606_v63, 0.0 }
 0x32f   : > { %v4639_v31 = vmax.f32 %v4607_v28, 0.0  ;;  %v4520_v23 = vadd.f32 %v6462_v10, %v4359_v5  ;;  %v4362_v45 = vadd.f32 %v6353_v62, %v8186_v32 }
 0x331   : > { %v5437_v26 = vpack.c.bf16 %v4639_v31, %v4638_v14  ;;  %v4569_v43 = vmul.f32 %v8198_v58, %v4520_v23  ;;  %v4523_v11 = vadd.f32 %v6465_v9, %v4362_v45  ;;  %v6354_v24 = vpop.f32.mrb[28].mxu1  ;;  %v6466_v34 = vpop.f32.mrb[28].mxu0 }
 0x332   : > { %v6355_v27 = vpop.f32.mrb[29].mxu1  ;;  %v6467_v30 = vpop.f32.mrb[29].mxu0 }
 0x333   : > { %5461 = vst [vmem:[%s8216_s14 + $0x68] sm:$0xff] %v5437_v26   ;;  %v4608_v1 = vadd.f32 %v8204_v61, %v4569_v43  ;;  %v4570_v36 = vmul.f32 %v8198_v58, %v4523_v11  ;;  %v6356_v38 = vadd.f32 %v6355_v27, %v6354_v24  ;;  %v6468_v33 = vadd.f32 %v6467_v30, %v6466_v34  ;;  %v6357_v13 = vpop.f32.mrb[30].mxu1  ;;  %v6469_v0 = vpop.f32.mrb[30].mxu0 }
 0x334   : > { %v6358_v35 = vpop.f32.mrb[31].mxu1  ;;  %v6470_v32 = vpop.f32.mrb[31].mxu0 }
 0x335   : > { %v4609_v18 = vadd.f32 %v8204_v61, %v4570_v36  ;;  %v4367_v51 = vadd.f32 %v6356_v38, %v8189_v21  ;;  %v6359_v47 = vadd.f32 %v6358_v35, %v6357_v13  ;;  %v6471_v25 = vadd.f32 %v6470_v32, %v6469_v0 }
 0x336   : > { %v4640_v17 = vmax.f32 %v4608_v1, 0.0 }
 0x337   : > { %v4641_v22 = vmax.f32 %v4609_v18, 0.0  ;;  %v4528_v50 = vadd.f32 %v6468_v33, %v4367_v51  ;;  %v4370_v54 = vadd.f32 %v6359_v47, %v8192_v20 }
 0x339   : > { %v5442_v7 = vpack.c.bf16 %v4641_v22, %v4640_v17  ;;  %v4571_v19 = vmul.f32 %v8198_v58, %v4528_v50  ;;  %v4531_v42 = vadd.f32 %v6471_v25, %v4370_v54 }
 0x33b   : > { %5462 = vst [vmem:[%s8216_s14 + $0x70] sm:$0xff] %v5442_v7   ;;  %v4610_v60 = vadd.f32 %v8204_v61, %v4571_v19  ;;  %v4572_v16 = vmul.f32 %v8198_v58, %v4531_v42 }
 0x33d   : > { %v4611_v29 = vadd.f32 %v8204_v61, %v4572_v16  ;;  %v4642_v21 = vmax.f32 %v4610_v60, 0.0 }
 0x33f   : > { %v4643_v40 = vmax.f32 %v4611_v29, 0.0 }
 0x341   : > { %v5447_v48 = vpack.c.bf16 %v4643_v40, %v4642_v21 }
 0x343   : > { %5463 = vst [vmem:[%s8216_s14 + $0x78] sm:$0xff] %v5447_v48  }
 0x344 PF: > { %s14_s15 = sadd.s32 1, %s7079_s15  }
 0x345   : > { %p11_p4 = scmp.ge.s32.totalorder %s14_s15, 4  }
 0x347   :  { %13 = sbr.rel (!%p11_p4) target bundleno = 1 (0x1), region = 66 }

</bundles_post_ra>
